<compile_context>
chip_gen: v5e
topology: v5e:2x2
jax: 0.10.0
libtpu: 0.0.40
codegen_flags: <defaults>
</compile_context>

<pallas_src>
import functools

import jax
import jax.numpy as jnp
from jax.experimental import pallas as pl
from jax.experimental.pallas import tpu as pltpu

# ---------------- model hyper-parameters (small, consistent with the module) --
BATCH = 2
CHANNELS = 3
IMG = 16
PATCH = 4
GRID = IMG // PATCH                 # 4
NUM_PATCHES = GRID * GRID           # 16
SEQ = NUM_PATCHES + 1               # 17 tokens (cls + patches)
DIM = 32                            # transformer dim
HEADS = 2
DIM_HEAD = 24
INNER = HEADS * DIM_HEAD            # 48
MLP = 64
CONV_OUT = 512
PATCH_DIM = CHANNELS * PATCH * PATCH  # 48
N_TAPS = 9                          # 3x3 conv taps

LN_EPS = 1e-5
BN_EPS = 1e-5


# ---------------------------------------------------------------------------
# in-kernel helpers
# ---------------------------------------------------------------------------
def _gelu(x):
    # TODO(synk): PyTorch nn.GELU() defaults to the exact erf form; the tanh
    # approximation is used since erf lowering is not guaranteed in Mosaic.
    c = jnp.sqrt(2.0 / jnp.pi).astype(x.dtype)
    return 0.5 * x * (1.0 + jnp.tanh(c * (x + 0.044715 * x * x * x)))


# ---------------------------------------------------------------------------
# Kernel 1: fused trunk  (patch embed + cls/pos + transformer x2 + 1x1 conv)
# ---------------------------------------------------------------------------
def _trunk_kernel(
    xp_ref,                                    # (B, SEQ, PATCH_DIM) f32; row 0/batch is a dummy
    pe_ln1_g, pe_ln1_b, pe_w, pe_b, pe_ln2_g, pe_ln2_b,
    cls_ref, pos_ref,
    a0_ln_g, a0_ln_b, a0_wqkv, a0_wo, a0_bo,
    f0_ln_g, f0_ln_b, f0_w1, f0_b1, f0_w2, f0_b2,
    nrm_g, nrm_b,
    a1_ln_g, a1_ln_b, a1_wqkv,
    f1_ln_g, f1_ln_b, f1_w1, f1_b1, f1_w2, f1_b2,
    nl_g, nl_b,
    c1_w, c1_b,
    o_ref,                                     # (B, SEQ, CONV_OUT) f32
):
    def ln(x, g_ref, b_ref):
        mu = jnp.mean(x, axis=-1, keepdims=True)
        xc = x - mu
        var = jnp.mean(xc * xc, axis=-1, keepdims=True)
        return xc * jax.lax.rsqrt(var + LN_EPS) * g_ref[...] + b_ref[...]

    def mm(x, w_ref, b_ref=None):
        y = jnp.dot(x, w_ref[...], preferred_element_type=jnp.float32)
        if b_ref is not None:
            y = y + b_ref[...]
        return y

    scale = DIM_HEAD ** -0.5
    pos = pos_ref[...]                         # (SEQ, DIM)
    cls_tok = cls_ref[...]                     # (1, DIM)
    tok_is_cls = jax.lax.broadcasted_iota(jnp.int32, (SEQ, 1), 0) == 0

    def attn_heads(xin, ln_g, ln_b, wqkv_ref):
        """Pre-LN attention; returns the per-head outputs [(SEQ, DIM_HEAD)]."""
        hn = ln(xin, ln_g, ln_b)
        outs = []
        for h in range(HEADS):
            q = jnp.dot(hn, wqkv_ref[0 * HEADS + h], preferred_element_type=jnp.float32)
            k = jnp.dot(hn, wqkv_ref[1 * HEADS + h], preferred_element_type=jnp.float32)
            v = jnp.dot(hn, wqkv_ref[2 * HEADS + h], preferred_element_type=jnp.float32)
            s = jax.lax.dot_general(q, k, (((1,), (1,)), ((), ())),
                                    preferred_element_type=jnp.float32) * scale
            s = s - jnp.max(s, axis=-1, keepdims=True)
            p = jnp.exp(s)
            p = p * pl.reciprocal(jnp.sum(p, axis=-1, keepdims=True), approx=True)
            outs.append(jnp.dot(p, v, preferred_element_type=jnp.float32))
        return outs

    for b in range(BATCH):
        # --- to_patch_embedding: LN -> Linear -> LN (dummy row 0 is replaced) ---
        pe = ln(mm(ln(xp_ref[b], pe_ln1_g, pe_ln1_b), pe_w, pe_b),
                pe_ln2_g, pe_ln2_b)                                # (SEQ, DIM)
        # --- cls token + positional embedding (dropout p=0 -> identity) ---
        xb = jnp.where(tok_is_cls, cls_tok, pe) + pos              # (SEQ, DIM)

        # --- layer 0: x = attn(x) + x ; x = ff(x) + x ; x = norm(x) ---
        o = attn_heads(xb, a0_ln_g, a0_ln_b, a0_wqkv)
        proj = a0_bo[...]
        for h in range(HEADS):
            proj = proj + jnp.dot(o[h], a0_wo[h], preferred_element_type=jnp.float32)
        a = proj + xb
        hmid = _gelu(mm(ln(a, f0_ln_g, f0_ln_b), f0_w1, f0_b1))
        f = mm(hmid, f0_w2, f0_b2) + a
        xb = ln(f, nrm_g, nrm_b)

        # --- layer 1 (last): x = attn(x) ; x = ff(x) ; x = norm_last(x) ---
        o = attn_heads(xb, a1_ln_g, a1_ln_b, a1_wqkv)
        # LayerNorm(INNER) over the head concat + first FF linear, done per
        # head so the 48-wide concat is never materialized (stats are exact).
        mu = sum(jnp.sum(oh, axis=-1, keepdims=True) for oh in o) / INNER
        cen = [oh - mu for oh in o]
        var = sum(jnp.sum(ch * ch, axis=-1, keepdims=True) for ch in cen) / INNER
        inv = jax.lax.rsqrt(var + LN_EPS)
        hmid = f1_b1[...]
        for h in range(HEADS):
            nh = cen[h] * inv * f1_ln_g[h] + f1_ln_b[h]
            hmid = hmid + jnp.dot(nh, f1_w1[h], preferred_element_type=jnp.float32)
        hmid = _gelu(hmid)
        f = mm(hmid, f1_w2, f1_b2)                                 # (SEQ, INNER)
        xb = ln(f, nl_g, nl_b)                                     # norm_last

        # --- 1x1 conv (INNER -> 512) fused: lane-dense 512-wide HBM output ---
        yb = jnp.dot(xb.astype(jnp.bfloat16), c1_w[...],
                     preferred_element_type=jnp.float32) + c1_b[...]
        o_ref[b] = yb


_TRUNK_PARAM_KEYS = (
    'pe_ln1_g', 'pe_ln1_b', 'pe_w', 'pe_b', 'pe_ln2_g', 'pe_ln2_b',
    'cls', 'pos',
    'a0_ln_g', 'a0_ln_b', 'a0_wqkv', 'a0_wo', 'a0_bo',
    'f0_ln_g', 'f0_ln_b', 'f0_w1', 'f0_b1', 'f0_w2', 'f0_b2',
    'nrm_g', 'nrm_b',
    'a1_ln_g', 'a1_ln_b', 'a1_wqkv',
    'f1_ln_g', 'f1_ln_b', 'f1_w1', 'f1_b1', 'f1_w2', 'f1_b2',
    'nl_g', 'nl_b',
    'c1_w', 'c1_b',
)


def vit_trunk(xp_tok, IP):
    args = (xp_tok,) + tuple(IP[k] for k in _TRUNK_PARAM_KEYS)
    return pl.pallas_call(
        _trunk_kernel,
        out_shape=jax.ShapeDtypeStruct((BATCH, SEQ, CONV_OUT), jnp.float32),
    )(*args)


# ---------------------------------------------------------------------------
# Kernel 2: 3x3 conv (bias=False) + folded BatchNorm (+residual) + GELU
#           as a pipelined 9-tap accumulation, bf16 weights, f32 accumulation.
# ---------------------------------------------------------------------------
def _conv_tap_kernel(*refs, add_res, n_taps):
    if add_res:
        x_ref, w_ref, s_ref, t_ref, r_ref, o_ref, acc_ref = refs
    else:
        x_ref, w_ref, s_ref, t_ref, o_ref, acc_ref = refs
        r_ref = None
    tap = pl.program_id(1)

    @pl.when(tap == 0)
    def _():
        acc_ref[...] = jnp.zeros_like(acc_ref)

    acc_ref[...] += jnp.dot(x_ref[0], w_ref[0], preferred_element_type=jnp.float32)

    @pl.when(tap == n_taps - 1)
    def _():
        y = acc_ref[...] * s_ref[...] + t_ref[...]     # folded BatchNorm
        if add_res:
            y = y + r_ref[...]
        o_ref[...] = _gelu(y)


def conv3x3_bn_gelu(x_taps, w_taps, bn_scale, bn_shift, residual=None, n_split=1):
    """x_taps: (9, M, Cin) bf16 shifted slabs; w_taps: (9, Cin, Cout) bf16."""
    n_taps, M, cin = x_taps.shape
    cout = w_taps.shape[-1]
    assert cout % n_split == 0
    bn = cout // n_split
    add_res = residual is not None

    in_specs = [
        pl.BlockSpec((1, M, cin), lambda n, t: (t, 0, 0)),
        pl.BlockSpec((1, cin, bn), lambda n, t: (t, 0, n)),
        pl.BlockSpec((1, bn), lambda n, t: (0, n)),
        pl.BlockSpec((1, bn), lambda n, t: (0, n)),
    ]
    args = [x_taps, w_taps, bn_scale, bn_shift]
    if add_res:
        in_specs.append(pl.BlockSpec((M, bn), lambda n, t: (0, n)))
        args.append(residual)

    kern = functools.partial(_conv_tap_kernel, add_res=add_res, n_taps=n_taps)
    return pl.pallas_call(
        kern,
        grid=(n_split, n_taps),
        in_specs=in_specs,
        out_specs=pl.BlockSpec((M, bn), lambda n, t: (0, n)),
        out_shape=jax.ShapeDtypeStruct((M, cout), jnp.float32),
        scratch_shapes=[pltpu.VMEM((M, bn), jnp.float32)],
        compiler_params=pltpu.CompilerParams(
            dimension_semantics=("parallel", "arbitrary")),
    )(*args)


def _im2col_taps(z2d):
    """(B*G*G, C) -> (9, B*G*G, C) bf16: the 9 zero-padded shifted slabs of the
    3x3 neighbourhood, tap-major so the conv kernel streams one weight tap per
    grid step (keeps per-step VMEM ~1 MB and pipelines the weight DMA)."""
    B = z2d.shape[0] // (GRID * GRID)
    C = z2d.shape[1]
    z = z2d.astype(jnp.bfloat16).reshape(B, GRID, GRID, C)
    zp = jnp.pad(z, ((0, 0), (1, 1), (1, 1), (0, 0)))
    taps = jnp.stack([zp[:, dh:dh + GRID, dw:dw + GRID, :]
                      for dh in range(3) for dw in range(3)], axis=0)
    return taps.reshape(N_TAPS, B * GRID * GRID, C)


# ---------------------------------------------------------------------------
# full forward pass
# ---------------------------------------------------------------------------
def vit_forward(img, IP, n_split=1):
    B = img.shape[0]
    # rearrange b c (h p1) (w p2) -> b (h w) (p1 p2 c); prepend a dummy row per
    # batch that the trunk kernel overwrites with the cls token.
    x = img.reshape(B, CHANNELS, GRID, PATCH, GRID, PATCH)
    x = x.transpose(0, 2, 4, 3, 5, 1).reshape(B, NUM_PATCHES, PATCH_DIM)
    xp_tok = jnp.concatenate([jnp.zeros((B, 1, PATCH_DIM), x.dtype), x], axis=1)

    # fused: patch embed + cls/pos + transformer (2 layers) + 1x1 conv
    y_tok = vit_trunk(xp_tok, IP)                                   # (B, 17, 512)
    y2d = y_tok[:, 1:, :].reshape(B * NUM_PATCHES, CONV_OUT)        # drop cls

    # ResidualBlock(512, 512): two 3x3 convs as pipelined 9-tap accumulations
    h = conv3x3_bn_gelu(_im2col_taps(y2d), IP['rb_w1'], IP['rb_s1'], IP['rb_t1'],
                        n_split=n_split)
    out = conv3x3_bn_gelu(_im2col_taps(h), IP['rb_w2'], IP['rb_s2'], IP['rb_t2'],
                          residual=y2d, n_split=n_split)

    # (b h w) c -> b c h w to match the PyTorch module output
    return out.reshape(B, GRID, GRID, CONV_OUT).transpose(0, 3, 1, 2)


def _conv_n_split():
    """Split the conv output channels across TensorCores only on v7x (2 TCs)."""
    try:
        kind = jax.devices()[0].device_kind.lower()
    except Exception:
        return 1
    return 2 if ('v7' in kind or '7x' in kind) else 1


# ---------------------------------------------------------------------------
# deterministic synthetic parameters (module layout) + inference re-layout
# ---------------------------------------------------------------------------
def _normal(key, shape, scale=0.05):
    return scale * jax.random.normal(key, shape, dtype=jnp.float32)


def init_params(key):
    keys = iter(jax.random.split(key, 64))
    nk = lambda: next(keys)
    P = {}
    P['pe_ln1_g'] = jnp.ones((PATCH_DIM,), jnp.float32)
    P['pe_ln1_b'] = jnp.zeros((PATCH_DIM,), jnp.float32)
    P['pe_w'] = _normal(nk(), (PATCH_DIM, DIM))
    P['pe_b'] = _normal(nk(), (DIM,))
    P['pe_ln2_g'] = jnp.ones((DIM,), jnp.float32)
    P['pe_ln2_b'] = jnp.zeros((DIM,), jnp.float32)
    P['pos'] = _normal(nk(), (1, SEQ, DIM), 0.02)
    P['cls'] = _normal(nk(), (1, 1, DIM), 0.02)
    P['tr_norm_g'] = jnp.ones((DIM,), jnp.float32)
    P['tr_norm_b'] = jnp.zeros((DIM,), jnp.float32)
    P['tr_normlast_g'] = jnp.ones((INNER,), jnp.float32)
    P['tr_normlast_b'] = jnp.zeros((INNER,), jnp.float32)
    P['attn0'] = dict(
        ln_g=jnp.ones((DIM,), jnp.float32), ln_b=jnp.zeros((DIM,), jnp.float32),
        wqkv=_normal(nk(), (DIM, 3 * INNER)),
        wo=_normal(nk(), (INNER, DIM)), bo=_normal(nk(), (DIM,)))
    P['ff0'] = dict(
        ln_g=jnp.ones((DIM,), jnp.float32), ln_b=jnp.zeros((DIM,), jnp.float32),
        w1=_normal(nk(), (DIM, MLP)), b1=_normal(nk(), (MLP,)),
        w2=_normal(nk(), (MLP, DIM)), b2=_normal(nk(), (DIM,)))
    P['attn1'] = dict(
        ln_g=jnp.ones((DIM,), jnp.float32), ln_b=jnp.zeros((DIM,), jnp.float32),
        wqkv=_normal(nk(), (DIM, 3 * INNER)))
    P['ff1'] = dict(
        ln_g=jnp.ones((INNER,), jnp.float32), ln_b=jnp.zeros((INNER,), jnp.float32),
        w1=_normal(nk(), (INNER, MLP)), b1=_normal(nk(), (MLP,)),
        w2=_normal(nk(), (MLP, INNER)), b2=_normal(nk(), (INNER,)))
    P['c1_w'] = _normal(nk(), (INNER, CONV_OUT), 0.02)
    P['c1_b'] = _normal(nk(), (CONV_OUT,), 0.02)
    P['rb_w1'] = _normal(nk(), (3, 3, CONV_OUT, CONV_OUT), 0.02)
    P['rb_w2'] = _normal(nk(), (3, 3, CONV_OUT, CONV_OUT), 0.02)
    for i in (1, 2):
        P[f'rb_bn{i}_g'] = jnp.ones((CONV_OUT,), jnp.float32)
        P[f'rb_bn{i}_b'] = jnp.zeros((CONV_OUT,), jnp.float32)
        P[f'rb_bn{i}_mean'] = _normal(nk(), (CONV_OUT,), 0.02)
        P[f'rb_bn{i}_var'] = jnp.abs(_normal(nk(), (CONV_OUT,), 0.1)) + 1.0
    return P


def prepare_inference_params(P):
    """One-time (outside jit) parameter folding / re-layout for the kernels:
    per-head weight splits, BN folding, tap-major bf16 conv weights."""
    row = lambda v: v.reshape(1, -1)

    def split_qkv(w):   # (DIM, 3*INNER) -> (3*HEADS, DIM, DIM_HEAD), idx = part*HEADS + head
        w = w.reshape(DIM, 3, HEADS, DIM_HEAD)
        return jnp.transpose(w, (1, 2, 0, 3)).reshape(3 * HEADS, DIM, DIM_HEAD)

    a0, f0, a1, f1 = P['attn0'], P['ff0'], P['attn1'], P['ff1']
    IP = {
        'pe_ln1_g': row(P['pe_ln1_g']), 'pe_ln1_b': row(P['pe_ln1_b']),
        'pe_w': P['pe_w'], 'pe_b': row(P['pe_b']),
        'pe_ln2_g': row(P['pe_ln2_g']), 'pe_ln2_b': row(P['pe_ln2_b']),
        'cls': P['cls'].reshape(1, DIM), 'pos': P['pos'][0],
        'a0_ln_g': row(a0['ln_g']), 'a0_ln_b': row(a0['ln_b']),
        'a0_wqkv': split_qkv(a0['wqkv']),
        'a0_wo': a0['wo'].reshape(HEADS, DIM_HEAD, DIM), 'a0_bo': row(a0['bo']),
        'f0_ln_g': row(f0['ln_g']), 'f0_ln_b': row(f0['ln_b']),
        'f0_w1': f0['w1'], 'f0_b1': row(f0['b1']),
        'f0_w2': f0['w2'], 'f0_b2': row(f0['b2']),
        'nrm_g': row(P['tr_norm_g']), 'nrm_b': row(P['tr_norm_b']),
        'a1_ln_g': row(a1['ln_g']), 'a1_ln_b': row(a1['ln_b']),
        'a1_wqkv': split_qkv(a1['wqkv']),
        'f1_ln_g': f1['ln_g'].reshape(HEADS, 1, DIM_HEAD),
        'f1_ln_b': f1['ln_b'].reshape(HEADS, 1, DIM_HEAD),
        'f1_w1': f1['w1'].reshape(HEADS, DIM_HEAD, MLP), 'f1_b1': row(f1['b1']),
        'f1_w2': f1['w2'], 'f1_b2': row(f1['b2']),
        'nl_g': row(P['tr_normlast_g']), 'nl_b': row(P['tr_normlast_b']),
        'c1_w': P['c1_w'].astype(jnp.bfloat16), 'c1_b': row(P['c1_b']),
    }
    # TODO(synk): BatchNorm uses eval-mode running statistics (training-mode
    # batch statistics of a fresh module are not reproduced).
    for i in (1, 2):
        s = P[f'rb_bn{i}_g'] / jnp.sqrt(P[f'rb_bn{i}_var'] + BN_EPS)
        t = P[f'rb_bn{i}_b'] - P[f'rb_bn{i}_mean'] * s
        IP[f'rb_s{i}'] = row(s)
        IP[f'rb_t{i}'] = row(t)
        IP[f'rb_w{i}'] = P[f'rb_w{i}'].reshape(N_TAPS, CONV_OUT, CONV_OUT).astype(jnp.bfloat16)
    return IP


if __name__ == "__main__":
    key = jax.random.PRNGKey(0)
    pkey, ikey = jax.random.split(key)
    params = init_params(pkey)
    inf_params = prepare_inference_params(params)
    img = jax.random.normal(ikey, (BATCH, CHANNELS, IMG, IMG), dtype=jnp.float32)

    fwd = jax.jit(functools.partial(vit_forward, n_split=_conv_n_split()))
    out = fwd(img, inf_params)
    out = jax.block_until_ready(out)

    assert out.shape == (BATCH, CONV_OUT, GRID, GRID), out.shape
    assert bool(jnp.all(jnp.isfinite(out)))
    print("KERNEL_OK")
</pallas_src>

<mosaic_0001>
module attributes {stable_mosaic.version = 11 : i64} {
  func.func @_trunk_kernel(%arg0: memref<2x17x48xf32, #tpu.memory_space<vmem>>, %arg1: memref<1x48xf32, #tpu.memory_space<vmem>>, %arg2: memref<1x48xf32, #tpu.memory_space<vmem>>, %arg3: memref<48x32xf32, #tpu.memory_space<vmem>>, %arg4: memref<1x32xf32, #tpu.memory_space<vmem>>, %arg5: memref<1x32xf32, #tpu.memory_space<vmem>>, %arg6: memref<1x32xf32, #tpu.memory_space<vmem>>, %arg7: memref<1x32xf32, #tpu.memory_space<vmem>>, %arg8: memref<17x32xf32, #tpu.memory_space<vmem>>, %arg9: memref<1x32xf32, #tpu.memory_space<vmem>>, %arg10: memref<1x32xf32, #tpu.memory_space<vmem>>, %arg11: memref<6x32x24xf32, #tpu.memory_space<vmem>>, %arg12: memref<2x24x32xf32, #tpu.memory_space<vmem>>, %arg13: memref<1x32xf32, #tpu.memory_space<vmem>>, %arg14: memref<1x32xf32, #tpu.memory_space<vmem>>, %arg15: memref<1x32xf32, #tpu.memory_space<vmem>>, %arg16: memref<32x64xf32, #tpu.memory_space<vmem>>, %arg17: memref<1x64xf32, #tpu.memory_space<vmem>>, %arg18: memref<64x32xf32, #tpu.memory_space<vmem>>, %arg19: memref<1x32xf32, #tpu.memory_space<vmem>>, %arg20: memref<1x32xf32, #tpu.memory_space<vmem>>, %arg21: memref<1x32xf32, #tpu.memory_space<vmem>>, %arg22: memref<1x32xf32, #tpu.memory_space<vmem>>, %arg23: memref<1x32xf32, #tpu.memory_space<vmem>>, %arg24: memref<6x32x24xf32, #tpu.memory_space<vmem>>, %arg25: memref<2x1x24xf32, #tpu.memory_space<vmem>>, %arg26: memref<2x1x24xf32, #tpu.memory_space<vmem>>, %arg27: memref<2x24x64xf32, #tpu.memory_space<vmem>>, %arg28: memref<1x64xf32, #tpu.memory_space<vmem>>, %arg29: memref<64x48xf32, #tpu.memory_space<vmem>>, %arg30: memref<1x48xf32, #tpu.memory_space<vmem>>, %arg31: memref<1x48xf32, #tpu.memory_space<vmem>>, %arg32: memref<1x48xf32, #tpu.memory_space<vmem>>, %arg33: memref<48x512xbf16, #tpu.memory_space<vmem>>, %arg34: memref<1x512xf32, #tpu.memory_space<vmem>>, %arg35: memref<2x17x512xf32, #tpu.memory_space<vmem>>) attributes {dimension_semantics = [], scalar_prefetch = 0 : i64, scratch_operands = 0 : i64, tpu.core_type = #tpu.core_type<tc>} {
    %c0 = arith.constant 0 : index
    %c0_0 = arith.constant 0 : index
    %0 = vector.load %arg8[%c0, %c0_0] : memref<17x32xf32, #tpu.memory_space<vmem>>, vector<17x32xf32>
    %c0_1 = arith.constant 0 : index
    %c0_2 = arith.constant 0 : index
    %1 = vector.load %arg7[%c0_1, %c0_2] : memref<1x32xf32, #tpu.memory_space<vmem>>, vector<1x32xf32>
    %2 = tpu.iota {dimensions = array<i32: 0>} : vector<17x1xi32>
    %c0_i32 = arith.constant 0 : i32
    %3 = vector.broadcast %c0_i32 : i32 to vector<17x1xi32>
    %4 = arith.cmpi eq, %2, %3 : vector<17x1xi32>
    %c0_3 = arith.constant 0 : index
    %c0_4 = arith.constant 0 : index
    %c0_5 = arith.constant 0 : index
    %5 = vector.load %arg0[%c0_3, %c0_4, %c0_5] : memref<2x17x48xf32, #tpu.memory_space<vmem>>, vector<1x17x48xf32>
    %6 = vector.shape_cast %5 : vector<1x17x48xf32> to vector<17x48xf32>
    %cst = arith.constant dense<0.000000e+00> : vector<17xf32>
    %7 = vector.multi_reduction <add>, %6, %cst [1] : vector<17x48xf32> to vector<17xf32>
    %8 = vector.shape_cast %7 : vector<17xf32> to vector<17x1xf32>
    %cst_6 = arith.constant 4.800000e+01 : f32
    %9 = vector.broadcast %cst_6 : f32 to vector<17x1xf32>
    %10 = arith.divf %8, %9 : vector<17x1xf32>
    %11 = vector.broadcast %10 : vector<17x1xf32> to vector<17x48xf32>
    %12 = arith.subf %6, %11 : vector<17x48xf32>
    %13 = arith.mulf %12, %12 : vector<17x48xf32>
    %cst_7 = arith.constant dense<0.000000e+00> : vector<17xf32>
    %14 = vector.multi_reduction <add>, %13, %cst_7 [1] : vector<17x48xf32> to vector<17xf32>
    %15 = vector.shape_cast %14 : vector<17xf32> to vector<17x1xf32>
    %cst_8 = arith.constant 4.800000e+01 : f32
    %16 = vector.broadcast %cst_8 : f32 to vector<17x1xf32>
    %17 = arith.divf %15, %16 : vector<17x1xf32>
    %cst_9 = arith.constant 9.99999974E-6 : f32
    %18 = vector.broadcast %cst_9 : f32 to vector<17x1xf32>
    %19 = arith.addf %17, %18 : vector<17x1xf32>
    %20 = math.rsqrt %19 : vector<17x1xf32>
    %21 = vector.broadcast %20 : vector<17x1xf32> to vector<17x48xf32>
    %22 = arith.mulf %12, %21 : vector<17x48xf32>
    %c0_10 = arith.constant 0 : index
    %c0_11 = arith.constant 0 : index
    %23 = vector.load %arg1[%c0_10, %c0_11] : memref<1x48xf32, #tpu.memory_space<vmem>>, vector<1x48xf32>
    %24 = vector.broadcast %23 : vector<1x48xf32> to vector<17x48xf32>
    %25 = arith.mulf %22, %24 : vector<17x48xf32>
    %c0_12 = arith.constant 0 : index
    %c0_13 = arith.constant 0 : index
    %26 = vector.load %arg2[%c0_12, %c0_13] : memref<1x48xf32, #tpu.memory_space<vmem>>, vector<1x48xf32>
    %27 = vector.broadcast %26 : vector<1x48xf32> to vector<17x48xf32>
    %28 = arith.addf %25, %27 : vector<17x48xf32>
    %c0_14 = arith.constant 0 : index
    %c0_15 = arith.constant 0 : index
    %29 = vector.load %arg3[%c0_14, %c0_15] : memref<48x32xf32, #tpu.memory_space<vmem>>, vector<48x32xf32>
    %cst_16 = arith.constant dense<0.000000e+00> : vector<17x32xf32>
    %30 = tpu.matmul %28, %29, %cst_16 {dimension_numbers = #tpu.dot_dimension_numbers<[1], [0], [0], [1], [0, 0, 1, 1], [], []>} : vector<17x48xf32>, vector<48x32xf32>, vector<17x32xf32> -> vector<17x32xf32>
    %c0_17 = arith.constant 0 : index
    %c0_18 = arith.constant 0 : index
    %31 = vector.load %arg4[%c0_17, %c0_18] : memref<1x32xf32, #tpu.memory_space<vmem>>, vector<1x32xf32>
    %32 = vector.broadcast %31 : vector<1x32xf32> to vector<17x32xf32>
    %33 = arith.addf %30, %32 : vector<17x32xf32>
    %cst_19 = arith.constant dense<0.000000e+00> : vector<17xf32>
    %34 = vector.multi_reduction <add>, %33, %cst_19 [1] : vector<17x32xf32> to vector<17xf32>
    %35 = vector.shape_cast %34 : vector<17xf32> to vector<17x1xf32>
    %cst_20 = arith.constant 3.200000e+01 : f32
    %36 = vector.broadcast %cst_20 : f32 to vector<17x1xf32>
    %37 = arith.divf %35, %36 : vector<17x1xf32>
    %38 = vector.broadcast %37 : vector<17x1xf32> to vector<17x32xf32>
    %39 = arith.subf %33, %38 : vector<17x32xf32>
    %40 = arith.mulf %39, %39 : vector<17x32xf32>
    %cst_21 = arith.constant dense<0.000000e+00> : vector<17xf32>
    %41 = vector.multi_reduction <add>, %40, %cst_21 [1] : vector<17x32xf32> to vector<17xf32>
    %42 = vector.shape_cast %41 : vector<17xf32> to vector<17x1xf32>
    %cst_22 = arith.constant 3.200000e+01 : f32
    %43 = vector.broadcast %cst_22 : f32 to vector<17x1xf32>
    %44 = arith.divf %42, %43 : vector<17x1xf32>
    %cst_23 = arith.constant 9.99999974E-6 : f32
    %45 = vector.broadcast %cst_23 : f32 to vector<17x1xf32>
    %46 = arith.addf %44, %45 : vector<17x1xf32>
    %47 = math.rsqrt %46 : vector<17x1xf32>
    %48 = vector.broadcast %47 : vector<17x1xf32> to vector<17x32xf32>
    %49 = arith.mulf %39, %48 : vector<17x32xf32>
    %c0_24 = arith.constant 0 : index
    %c0_25 = arith.constant 0 : index
    %50 = vector.load %arg5[%c0_24, %c0_25] : memref<1x32xf32, #tpu.memory_space<vmem>>, vector<1x32xf32>
    %51 = vector.broadcast %50 : vector<1x32xf32> to vector<17x32xf32>
    %52 = arith.mulf %49, %51 : vector<17x32xf32>
    %c0_26 = arith.constant 0 : index
    %c0_27 = arith.constant 0 : index
    %53 = vector.load %arg6[%c0_26, %c0_27] : memref<1x32xf32, #tpu.memory_space<vmem>>, vector<1x32xf32>
    %54 = vector.broadcast %53 : vector<1x32xf32> to vector<17x32xf32>
    %55 = arith.addf %52, %54 : vector<17x32xf32>
    %56 = vector.shape_cast %4 : vector<17x1xi1> to vector<17x1xi1>
    %57 = vector.broadcast %56 : vector<17x1xi1> to vector<17x32xi1>
    %58 = vector.shape_cast %1 : vector<1x32xf32> to vector<1x32xf32>
    %59 = vector.broadcast %58 : vector<1x32xf32> to vector<17x32xf32>
    %60 = arith.select %57, %59, %55 : vector<17x32xi1>, vector<17x32xf32>
    %61 = arith.addf %60, %0 : vector<17x32xf32>
    %cst_28 = arith.constant dense<0.000000e+00> : vector<17xf32>
    %62 = vector.multi_reduction <add>, %61, %cst_28 [1] : vector<17x32xf32> to vector<17xf32>
    %63 = vector.shape_cast %62 : vector<17xf32> to vector<17x1xf32>
    %cst_29 = arith.constant 3.200000e+01 : f32
    %64 = vector.broadcast %cst_29 : f32 to vector<17x1xf32>
    %65 = arith.divf %63, %64 : vector<17x1xf32>
    %66 = vector.broadcast %65 : vector<17x1xf32> to vector<17x32xf32>
    %67 = arith.subf %61, %66 : vector<17x32xf32>
    %68 = arith.mulf %67, %67 : vector<17x32xf32>
    %cst_30 = arith.constant dense<0.000000e+00> : vector<17xf32>
    %69 = vector.multi_reduction <add>, %68, %cst_30 [1] : vector<17x32xf32> to vector<17xf32>
    %70 = vector.shape_cast %69 : vector<17xf32> to vector<17x1xf32>
    %cst_31 = arith.constant 3.200000e+01 : f32
    %71 = vector.broadcast %cst_31 : f32 to vector<17x1xf32>
    %72 = arith.divf %70, %71 : vector<17x1xf32>
    %cst_32 = arith.constant 9.99999974E-6 : f32
    %73 = vector.broadcast %cst_32 : f32 to vector<17x1xf32>
    %74 = arith.addf %72, %73 : vector<17x1xf32>
    %75 = math.rsqrt %74 : vector<17x1xf32>
    %76 = vector.broadcast %75 : vector<17x1xf32> to vector<17x32xf32>
    %77 = arith.mulf %67, %76 : vector<17x32xf32>
    %c0_33 = arith.constant 0 : index
    %c0_34 = arith.constant 0 : index
    %78 = vector.load %arg9[%c0_33, %c0_34] : memref<1x32xf32, #tpu.memory_space<vmem>>, vector<1x32xf32>
    %79 = vector.broadcast %78 : vector<1x32xf32> to vector<17x32xf32>
    %80 = arith.mulf %77, %79 : vector<17x32xf32>
    %c0_35 = arith.constant 0 : index
    %c0_36 = arith.constant 0 : index
    %81 = vector.load %arg10[%c0_35, %c0_36] : memref<1x32xf32, #tpu.memory_space<vmem>>, vector<1x32xf32>
    %82 = vector.broadcast %81 : vector<1x32xf32> to vector<17x32xf32>
    %83 = arith.addf %80, %82 : vector<17x32xf32>
    %c0_37 = arith.constant 0 : index
    %c0_38 = arith.constant 0 : index
    %c0_39 = arith.constant 0 : index
    %84 = vector.load %arg11[%c0_37, %c0_38, %c0_39] : memref<6x32x24xf32, #tpu.memory_space<vmem>>, vector<1x32x24xf32>
    %85 = vector.shape_cast %84 : vector<1x32x24xf32> to vector<32x24xf32>
    %cst_40 = arith.constant dense<0.000000e+00> : vector<17x24xf32>
    %86 = tpu.matmul %83, %85, %cst_40 {dimension_numbers = #tpu.dot_dimension_numbers<[1], [0], [0], [1], [0, 0, 1, 1], [], []>} : vector<17x32xf32>, vector<32x24xf32>, vector<17x24xf32> -> vector<17x24xf32>
    %c2 = arith.constant 2 : index
    %c0_41 = arith.constant 0 : index
    %c0_42 = arith.constant 0 : index
    %87 = vector.load %arg11[%c2, %c0_41, %c0_42] : memref<6x32x24xf32, #tpu.memory_space<vmem>>, vector<1x32x24xf32>
    %88 = vector.shape_cast %87 : vector<1x32x24xf32> to vector<32x24xf32>
    %cst_43 = arith.constant dense<0.000000e+00> : vector<17x24xf32>
    %89 = tpu.matmul %83, %88, %cst_43 {dimension_numbers = #tpu.dot_dimension_numbers<[1], [0], [0], [1], [0, 0, 1, 1], [], []>} : vector<17x32xf32>, vector<32x24xf32>, vector<17x24xf32> -> vector<17x24xf32>
    %c4 = arith.constant 4 : index
    %c0_44 = arith.constant 0 : index
    %c0_45 = arith.constant 0 : index
    %90 = vector.load %arg11[%c4, %c0_44, %c0_45] : memref<6x32x24xf32, #tpu.memory_space<vmem>>, vector<1x32x24xf32>
    %91 = vector.shape_cast %90 : vector<1x32x24xf32> to vector<32x24xf32>
    %cst_46 = arith.constant dense<0.000000e+00> : vector<17x24xf32>
    %92 = tpu.matmul %83, %91, %cst_46 {dimension_numbers = #tpu.dot_dimension_numbers<[1], [0], [0], [1], [0, 0, 1, 1], [], []>} : vector<17x32xf32>, vector<32x24xf32>, vector<17x24xf32> -> vector<17x24xf32>
    %cst_47 = arith.constant dense<0.000000e+00> : vector<17x17xf32>
    %93 = tpu.matmul %86, %89, %cst_47 {dimension_numbers = #tpu.dot_dimension_numbers<[1], [1], [0], [0], [0, 0, 1, 0], [], []>} : vector<17x24xf32>, vector<17x24xf32>, vector<17x17xf32> -> vector<17x17xf32>
    %cst_48 = arith.constant 0.204124153 : f32
    %94 = vector.broadcast %cst_48 : f32 to vector<17x17xf32>
    %95 = arith.mulf %93, %94 : vector<17x17xf32>
    %cst_49 = arith.constant dense<0xFF800000> : vector<17xf32>
    %96 = vector.multi_reduction <maximumf>, %95, %cst_49 [1] : vector<17x17xf32> to vector<17xf32>
    %97 = vector.shape_cast %96 : vector<17xf32> to vector<17x1xf32>
    %98 = vector.broadcast %97 : vector<17x1xf32> to vector<17x17xf32>
    %99 = arith.subf %95, %98 : vector<17x17xf32>
    %100 = math.exp %99 : vector<17x17xf32>
    %cst_50 = arith.constant dense<0.000000e+00> : vector<17xf32>
    %101 = vector.multi_reduction <add>, %100, %cst_50 [1] : vector<17x17xf32> to vector<17xf32>
    %102 = vector.shape_cast %101 : vector<17xf32> to vector<17x1xf32>
    %103 = tpu.reciprocal %102 {approx = true} : vector<17x1xf32> -> vector<17x1xf32>
    %104 = vector.broadcast %103 : vector<17x1xf32> to vector<17x17xf32>
    %105 = arith.mulf %100, %104 : vector<17x17xf32>
    %cst_51 = arith.constant dense<0.000000e+00> : vector<17x24xf32>
    %106 = tpu.matmul %105, %92, %cst_51 {dimension_numbers = #tpu.dot_dimension_numbers<[1], [0], [0], [1], [0, 0, 1, 1], [], []>} : vector<17x17xf32>, vector<17x24xf32>, vector<17x24xf32> -> vector<17x24xf32>
    %c1 = arith.constant 1 : index
    %c0_52 = arith.constant 0 : index
    %c0_53 = arith.constant 0 : index
    %107 = vector.load %arg11[%c1, %c0_52, %c0_53] : memref<6x32x24xf32, #tpu.memory_space<vmem>>, vector<1x32x24xf32>
    %108 = vector.shape_cast %107 : vector<1x32x24xf32> to vector<32x24xf32>
    %cst_54 = arith.constant dense<0.000000e+00> : vector<17x24xf32>
    %109 = tpu.matmul %83, %108, %cst_54 {dimension_numbers = #tpu.dot_dimension_numbers<[1], [0], [0], [1], [0, 0, 1, 1], [], []>} : vector<17x32xf32>, vector<32x24xf32>, vector<17x24xf32> -> vector<17x24xf32>
    %c3 = arith.constant 3 : index
    %c0_55 = arith.constant 0 : index
    %c0_56 = arith.constant 0 : index
    %110 = vector.load %arg11[%c3, %c0_55, %c0_56] : memref<6x32x24xf32, #tpu.memory_space<vmem>>, vector<1x32x24xf32>
    %111 = vector.shape_cast %110 : vector<1x32x24xf32> to vector<32x24xf32>
    %cst_57 = arith.constant dense<0.000000e+00> : vector<17x24xf32>
    %112 = tpu.matmul %83, %111, %cst_57 {dimension_numbers = #tpu.dot_dimension_numbers<[1], [0], [0], [1], [0, 0, 1, 1], [], []>} : vector<17x32xf32>, vector<32x24xf32>, vector<17x24xf32> -> vector<17x24xf32>
    %c5 = arith.constant 5 : index
    %c0_58 = arith.constant 0 : index
    %c0_59 = arith.constant 0 : index
    %113 = vector.load %arg11[%c5, %c0_58, %c0_59] : memref<6x32x24xf32, #tpu.memory_space<vmem>>, vector<1x32x24xf32>
    %114 = vector.shape_cast %113 : vector<1x32x24xf32> to vector<32x24xf32>
    %cst_60 = arith.constant dense<0.000000e+00> : vector<17x24xf32>
    %115 = tpu.matmul %83, %114, %cst_60 {dimension_numbers = #tpu.dot_dimension_numbers<[1], [0], [0], [1], [0, 0, 1, 1], [], []>} : vector<17x32xf32>, vector<32x24xf32>, vector<17x24xf32> -> vector<17x24xf32>
    %cst_61 = arith.constant dense<0.000000e+00> : vector<17x17xf32>
    %116 = tpu.matmul %109, %112, %cst_61 {dimension_numbers = #tpu.dot_dimension_numbers<[1], [1], [0], [0], [0, 0, 1, 0], [], []>} : vector<17x24xf32>, vector<17x24xf32>, vector<17x17xf32> -> vector<17x17xf32>
    %cst_62 = arith.constant 0.204124153 : f32
    %117 = vector.broadcast %cst_62 : f32 to vector<17x17xf32>
    %118 = arith.mulf %116, %117 : vector<17x17xf32>
    %cst_63 = arith.constant dense<0xFF800000> : vector<17xf32>
    %119 = vector.multi_reduction <maximumf>, %118, %cst_63 [1] : vector<17x17xf32> to vector<17xf32>
    %120 = vector.shape_cast %119 : vector<17xf32> to vector<17x1xf32>
    %121 = vector.broadcast %120 : vector<17x1xf32> to vector<17x17xf32>
    %122 = arith.subf %118, %121 : vector<17x17xf32>
    %123 = math.exp %122 : vector<17x17xf32>
    %cst_64 = arith.constant dense<0.000000e+00> : vector<17xf32>
    %124 = vector.multi_reduction <add>, %123, %cst_64 [1] : vector<17x17xf32> to vector<17xf32>
    %125 = vector.shape_cast %124 : vector<17xf32> to vector<17x1xf32>
    %126 = tpu.reciprocal %125 {approx = true} : vector<17x1xf32> -> vector<17x1xf32>
    %127 = vector.broadcast %126 : vector<17x1xf32> to vector<17x17xf32>
    %128 = arith.mulf %123, %127 : vector<17x17xf32>
    %cst_65 = arith.constant dense<0.000000e+00> : vector<17x24xf32>
    %129 = tpu.matmul %128, %115, %cst_65 {dimension_numbers = #tpu.dot_dimension_numbers<[1], [0], [0], [1], [0, 0, 1, 1], [], []>} : vector<17x17xf32>, vector<17x24xf32>, vector<17x24xf32> -> vector<17x24xf32>
    %c0_66 = arith.constant 0 : index
    %c0_67 = arith.constant 0 : index
    %130 = vector.load %arg13[%c0_66, %c0_67] : memref<1x32xf32, #tpu.memory_space<vmem>>, vector<1x32xf32>
    %c0_68 = arith.constant 0 : index
    %c0_69 = arith.constant 0 : index
    %c0_70 = arith.constant 0 : index
    %131 = vector.load %arg12[%c0_68, %c0_69, %c0_70] : memref<2x24x32xf32, #tpu.memory_space<vmem>>, vector<1x24x32xf32>
    %132 = vector.shape_cast %131 : vector<1x24x32xf32> to vector<24x32xf32>
    %cst_71 = arith.constant dense<0.000000e+00> : vector<17x32xf32>
    %133 = tpu.matmul %106, %132, %cst_71 {dimension_numbers = #tpu.dot_dimension_numbers<[1], [0], [0], [1], [0, 0, 1, 1], [], []>} : vector<17x24xf32>, vector<24x32xf32>, vector<17x32xf32> -> vector<17x32xf32>
    %134 = vector.broadcast %130 : vector<1x32xf32> to vector<17x32xf32>
    %135 = arith.addf %134, %133 : vector<17x32xf32>
    %c1_72 = arith.constant 1 : index
    %c0_73 = arith.constant 0 : index
    %c0_74 = arith.constant 0 : index
    %136 = vector.load %arg12[%c1_72, %c0_73, %c0_74] : memref<2x24x32xf32, #tpu.memory_space<vmem>>, vector<1x24x32xf32>
    %137 = vector.shape_cast %136 : vector<1x24x32xf32> to vector<24x32xf32>
    %cst_75 = arith.constant dense<0.000000e+00> : vector<17x32xf32>
    %138 = tpu.matmul %129, %137, %cst_75 {dimension_numbers = #tpu.dot_dimension_numbers<[1], [0], [0], [1], [0, 0, 1, 1], [], []>} : vector<17x24xf32>, vector<24x32xf32>, vector<17x32xf32> -> vector<17x32xf32>
    %139 = arith.addf %135, %138 : vector<17x32xf32>
    %140 = arith.addf %139, %61 : vector<17x32xf32>
    %cst_76 = arith.constant dense<0.000000e+00> : vector<17xf32>
    %141 = vector.multi_reduction <add>, %140, %cst_76 [1] : vector<17x32xf32> to vector<17xf32>
    %142 = vector.shape_cast %141 : vector<17xf32> to vector<17x1xf32>
    %cst_77 = arith.constant 3.200000e+01 : f32
    %143 = vector.broadcast %cst_77 : f32 to vector<17x1xf32>
    %144 = arith.divf %142, %143 : vector<17x1xf32>
    %145 = vector.broadcast %144 : vector<17x1xf32> to vector<17x32xf32>
    %146 = arith.subf %140, %145 : vector<17x32xf32>
    %147 = arith.mulf %146, %146 : vector<17x32xf32>
    %cst_78 = arith.constant dense<0.000000e+00> : vector<17xf32>
    %148 = vector.multi_reduction <add>, %147, %cst_78 [1] : vector<17x32xf32> to vector<17xf32>
    %149 = vector.shape_cast %148 : vector<17xf32> to vector<17x1xf32>
    %cst_79 = arith.constant 3.200000e+01 : f32
    %150 = vector.broadcast %cst_79 : f32 to vector<17x1xf32>
    %151 = arith.divf %149, %150 : vector<17x1xf32>
    %cst_80 = arith.constant 9.99999974E-6 : f32
    %152 = vector.broadcast %cst_80 : f32 to vector<17x1xf32>
    %153 = arith.addf %151, %152 : vector<17x1xf32>
    %154 = math.rsqrt %153 : vector<17x1xf32>
    %155 = vector.broadcast %154 : vector<17x1xf32> to vector<17x32xf32>
    %156 = arith.mulf %146, %155 : vector<17x32xf32>
    %c0_81 = arith.constant 0 : index
    %c0_82 = arith.constant 0 : index
    %157 = vector.load %arg14[%c0_81, %c0_82] : memref<1x32xf32, #tpu.memory_space<vmem>>, vector<1x32xf32>
    %158 = vector.broadcast %157 : vector<1x32xf32> to vector<17x32xf32>
    %159 = arith.mulf %156, %158 : vector<17x32xf32>
    %c0_83 = arith.constant 0 : index
    %c0_84 = arith.constant 0 : index
    %160 = vector.load %arg15[%c0_83, %c0_84] : memref<1x32xf32, #tpu.memory_space<vmem>>, vector<1x32xf32>
    %161 = vector.broadcast %160 : vector<1x32xf32> to vector<17x32xf32>
    %162 = arith.addf %159, %161 : vector<17x32xf32>
    %c0_85 = arith.constant 0 : index
    %c0_86 = arith.constant 0 : index
    %163 = vector.load %arg16[%c0_85, %c0_86] : memref<32x64xf32, #tpu.memory_space<vmem>>, vector<32x64xf32>
    %cst_87 = arith.constant dense<0.000000e+00> : vector<17x64xf32>
    %164 = tpu.matmul %162, %163, %cst_87 {dimension_numbers = #tpu.dot_dimension_numbers<[1], [0], [0], [1], [0, 0, 1, 1], [], []>} : vector<17x32xf32>, vector<32x64xf32>, vector<17x64xf32> -> vector<17x64xf32>
    %c0_88 = arith.constant 0 : index
    %c0_89 = arith.constant 0 : index
    %165 = vector.load %arg17[%c0_88, %c0_89] : memref<1x64xf32, #tpu.memory_space<vmem>>, vector<1x64xf32>
    %166 = vector.broadcast %165 : vector<1x64xf32> to vector<17x64xf32>
    %167 = arith.addf %164, %166 : vector<17x64xf32>
    %cst_90 = arith.constant 0.636619746 : f32
    %168 = math.sqrt %cst_90 : f32
    %cst_91 = arith.constant 5.000000e-01 : f32
    %169 = vector.broadcast %cst_91 : f32 to vector<17x64xf32>
    %170 = arith.mulf %169, %167 : vector<17x64xf32>
    %cst_92 = arith.constant 4.471500e-02 : f32
    %171 = vector.broadcast %cst_92 : f32 to vector<17x64xf32>
    %172 = arith.mulf %171, %167 : vector<17x64xf32>
    %173 = arith.mulf %172, %167 : vector<17x64xf32>
    %174 = arith.mulf %173, %167 : vector<17x64xf32>
    %175 = arith.addf %167, %174 : vector<17x64xf32>
    %176 = vector.broadcast %168 : f32 to vector<17x64xf32>
    %177 = arith.mulf %176, %175 : vector<17x64xf32>
    %178 = math.tanh %177 : vector<17x64xf32>
    %cst_93 = arith.constant 1.000000e+00 : f32
    %179 = vector.broadcast %cst_93 : f32 to vector<17x64xf32>
    %180 = arith.addf %179, %178 : vector<17x64xf32>
    %181 = arith.mulf %170, %180 : vector<17x64xf32>
    %c0_94 = arith.constant 0 : index
    %c0_95 = arith.constant 0 : index
    %182 = vector.load %arg18[%c0_94, %c0_95] : memref<64x32xf32, #tpu.memory_space<vmem>>, vector<64x32xf32>
    %cst_96 = arith.constant dense<0.000000e+00> : vector<17x32xf32>
    %183 = tpu.matmul %181, %182, %cst_96 {dimension_numbers = #tpu.dot_dimension_numbers<[1], [0], [0], [1], [0, 0, 1, 1], [], []>} : vector<17x64xf32>, vector<64x32xf32>, vector<17x32xf32> -> vector<17x32xf32>
    %c0_97 = arith.constant 0 : index
    %c0_98 = arith.constant 0 : index
    %184 = vector.load %arg19[%c0_97, %c0_98] : memref<1x32xf32, #tpu.memory_space<vmem>>, vector<1x32xf32>
    %185 = vector.broadcast %184 : vector<1x32xf32> to vector<17x32xf32>
    %186 = arith.addf %183, %185 : vector<17x32xf32>
    %187 = arith.addf %186, %140 : vector<17x32xf32>
    %cst_99 = arith.constant dense<0.000000e+00> : vector<17xf32>
    %188 = vector.multi_reduction <add>, %187, %cst_99 [1] : vector<17x32xf32> to vector<17xf32>
    %189 = vector.shape_cast %188 : vector<17xf32> to vector<17x1xf32>
    %cst_100 = arith.constant 3.200000e+01 : f32
    %190 = vector.broadcast %cst_100 : f32 to vector<17x1xf32>
    %191 = arith.divf %189, %190 : vector<17x1xf32>
    %192 = vector.broadcast %191 : vector<17x1xf32> to vector<17x32xf32>
    %193 = arith.subf %187, %192 : vector<17x32xf32>
    %194 = arith.mulf %193, %193 : vector<17x32xf32>
    %cst_101 = arith.constant dense<0.000000e+00> : vector<17xf32>
    %195 = vector.multi_reduction <add>, %194, %cst_101 [1] : vector<17x32xf32> to vector<17xf32>
    %196 = vector.shape_cast %195 : vector<17xf32> to vector<17x1xf32>
    %cst_102 = arith.constant 3.200000e+01 : f32
    %197 = vector.broadcast %cst_102 : f32 to vector<17x1xf32>
    %198 = arith.divf %196, %197 : vector<17x1xf32>
    %cst_103 = arith.constant 9.99999974E-6 : f32
    %199 = vector.broadcast %cst_103 : f32 to vector<17x1xf32>
    %200 = arith.addf %198, %199 : vector<17x1xf32>
    %201 = math.rsqrt %200 : vector<17x1xf32>
    %202 = vector.broadcast %201 : vector<17x1xf32> to vector<17x32xf32>
    %203 = arith.mulf %193, %202 : vector<17x32xf32>
    %c0_104 = arith.constant 0 : index
    %c0_105 = arith.constant 0 : index
    %204 = vector.load %arg20[%c0_104, %c0_105] : memref<1x32xf32, #tpu.memory_space<vmem>>, vector<1x32xf32>
    %205 = vector.broadcast %204 : vector<1x32xf32> to vector<17x32xf32>
    %206 = arith.mulf %203, %205 : vector<17x32xf32>
    %c0_106 = arith.constant 0 : index
    %c0_107 = arith.constant 0 : index
    %207 = vector.load %arg21[%c0_106, %c0_107] : memref<1x32xf32, #tpu.memory_space<vmem>>, vector<1x32xf32>
    %208 = vector.broadcast %207 : vector<1x32xf32> to vector<17x32xf32>
    %209 = arith.addf %206, %208 : vector<17x32xf32>
    %cst_108 = arith.constant dense<0.000000e+00> : vector<17xf32>
    %210 = vector.multi_reduction <add>, %209, %cst_108 [1] : vector<17x32xf32> to vector<17xf32>
    %211 = vector.shape_cast %210 : vector<17xf32> to vector<17x1xf32>
    %cst_109 = arith.constant 3.200000e+01 : f32
    %212 = vector.broadcast %cst_109 : f32 to vector<17x1xf32>
    %213 = arith.divf %211, %212 : vector<17x1xf32>
    %214 = vector.broadcast %213 : vector<17x1xf32> to vector<17x32xf32>
    %215 = arith.subf %209, %214 : vector<17x32xf32>
    %216 = arith.mulf %215, %215 : vector<17x32xf32>
    %cst_110 = arith.constant dense<0.000000e+00> : vector<17xf32>
    %217 = vector.multi_reduction <add>, %216, %cst_110 [1] : vector<17x32xf32> to vector<17xf32>
    %218 = vector.shape_cast %217 : vector<17xf32> to vector<17x1xf32>
    %cst_111 = arith.constant 3.200000e+01 : f32
    %219 = vector.broadcast %cst_111 : f32 to vector<17x1xf32>
    %220 = arith.divf %218, %219 : vector<17x1xf32>
    %cst_112 = arith.constant 9.99999974E-6 : f32
    %221 = vector.broadcast %cst_112 : f32 to vector<17x1xf32>
    %222 = arith.addf %220, %221 : vector<17x1xf32>
    %223 = math.rsqrt %222 : vector<17x1xf32>
    %224 = vector.broadcast %223 : vector<17x1xf32> to vector<17x32xf32>
    %225 = arith.mulf %215, %224 : vector<17x32xf32>
    %c0_113 = arith.constant 0 : index
    %c0_114 = arith.constant 0 : index
    %226 = vector.load %arg22[%c0_113, %c0_114] : memref<1x32xf32, #tpu.memory_space<vmem>>, vector<1x32xf32>
    %227 = vector.broadcast %226 : vector<1x32xf32> to vector<17x32xf32>
    %228 = arith.mulf %225, %227 : vector<17x32xf32>
    %c0_115 = arith.constant 0 : index
    %c0_116 = arith.constant 0 : index
    %229 = vector.load %arg23[%c0_115, %c0_116] : memref<1x32xf32, #tpu.memory_space<vmem>>, vector<1x32xf32>
    %230 = vector.broadcast %229 : vector<1x32xf32> to vector<17x32xf32>
    %231 = arith.addf %228, %230 : vector<17x32xf32>
    %c0_117 = arith.constant 0 : index
    %c0_118 = arith.constant 0 : index
    %c0_119 = arith.constant 0 : index
    %232 = vector.load %arg24[%c0_117, %c0_118, %c0_119] : memref<6x32x24xf32, #tpu.memory_space<vmem>>, vector<1x32x24xf32>
    %233 = vector.shape_cast %232 : vector<1x32x24xf32> to vector<32x24xf32>
    %cst_120 = arith.constant dense<0.000000e+00> : vector<17x24xf32>
    %234 = tpu.matmul %231, %233, %cst_120 {dimension_numbers = #tpu.dot_dimension_numbers<[1], [0], [0], [1], [0, 0, 1, 1], [], []>} : vector<17x32xf32>, vector<32x24xf32>, vector<17x24xf32> -> vector<17x24xf32>
    %c2_121 = arith.constant 2 : index
    %c0_122 = arith.constant 0 : index
    %c0_123 = arith.constant 0 : index
    %235 = vector.load %arg24[%c2_121, %c0_122, %c0_123] : memref<6x32x24xf32, #tpu.memory_space<vmem>>, vector<1x32x24xf32>
    %236 = vector.shape_cast %235 : vector<1x32x24xf32> to vector<32x24xf32>
    %cst_124 = arith.constant dense<0.000000e+00> : vector<17x24xf32>
    %237 = tpu.matmul %231, %236, %cst_124 {dimension_numbers = #tpu.dot_dimension_numbers<[1], [0], [0], [1], [0, 0, 1, 1], [], []>} : vector<17x32xf32>, vector<32x24xf32>, vector<17x24xf32> -> vector<17x24xf32>
    %c4_125 = arith.constant 4 : index
    %c0_126 = arith.constant 0 : index
    %c0_127 = arith.constant 0 : index
    %238 = vector.load %arg24[%c4_125, %c0_126, %c0_127] : memref<6x32x24xf32, #tpu.memory_space<vmem>>, vector<1x32x24xf32>
    %239 = vector.shape_cast %238 : vector<1x32x24xf32> to vector<32x24xf32>
    %cst_128 = arith.constant dense<0.000000e+00> : vector<17x24xf32>
    %240 = tpu.matmul %231, %239, %cst_128 {dimension_numbers = #tpu.dot_dimension_numbers<[1], [0], [0], [1], [0, 0, 1, 1], [], []>} : vector<17x32xf32>, vector<32x24xf32>, vector<17x24xf32> -> vector<17x24xf32>
    %cst_129 = arith.constant dense<0.000000e+00> : vector<17x17xf32>
    %241 = tpu.matmul %234, %237, %cst_129 {dimension_numbers = #tpu.dot_dimension_numbers<[1], [1], [0], [0], [0, 0, 1, 0], [], []>} : vector<17x24xf32>, vector<17x24xf32>, vector<17x17xf32> -> vector<17x17xf32>
    %cst_130 = arith.constant 0.204124153 : f32
    %242 = vector.broadcast %cst_130 : f32 to vector<17x17xf32>
    %243 = arith.mulf %241, %242 : vector<17x17xf32>
    %cst_131 = arith.constant dense<0xFF800000> : vector<17xf32>
    %244 = vector.multi_reduction <maximumf>, %243, %cst_131 [1] : vector<17x17xf32> to vector<17xf32>
    %245 = vector.shape_cast %244 : vector<17xf32> to vector<17x1xf32>
    %246 = vector.broadcast %245 : vector<17x1xf32> to vector<17x17xf32>
    %247 = arith.subf %243, %246 : vector<17x17xf32>
    %248 = math.exp %247 : vector<17x17xf32>
    %cst_132 = arith.constant dense<0.000000e+00> : vector<17xf32>
    %249 = vector.multi_reduction <add>, %248, %cst_132 [1] : vector<17x17xf32> to vector<17xf32>
    %250 = vector.shape_cast %249 : vector<17xf32> to vector<17x1xf32>
    %251 = tpu.reciprocal %250 {approx = true} : vector<17x1xf32> -> vector<17x1xf32>
    %252 = vector.broadcast %251 : vector<17x1xf32> to vector<17x17xf32>
    %253 = arith.mulf %248, %252 : vector<17x17xf32>
    %cst_133 = arith.constant dense<0.000000e+00> : vector<17x24xf32>
    %254 = tpu.matmul %253, %240, %cst_133 {dimension_numbers = #tpu.dot_dimension_numbers<[1], [0], [0], [1], [0, 0, 1, 1], [], []>} : vector<17x17xf32>, vector<17x24xf32>, vector<17x24xf32> -> vector<17x24xf32>
    %c1_134 = arith.constant 1 : index
    %c0_135 = arith.constant 0 : index
    %c0_136 = arith.constant 0 : index
    %255 = vector.load %arg24[%c1_134, %c0_135, %c0_136] : memref<6x32x24xf32, #tpu.memory_space<vmem>>, vector<1x32x24xf32>
    %256 = vector.shape_cast %255 : vector<1x32x24xf32> to vector<32x24xf32>
    %cst_137 = arith.constant dense<0.000000e+00> : vector<17x24xf32>
    %257 = tpu.matmul %231, %256, %cst_137 {dimension_numbers = #tpu.dot_dimension_numbers<[1], [0], [0], [1], [0, 0, 1, 1], [], []>} : vector<17x32xf32>, vector<32x24xf32>, vector<17x24xf32> -> vector<17x24xf32>
    %c3_138 = arith.constant 3 : index
    %c0_139 = arith.constant 0 : index
    %c0_140 = arith.constant 0 : index
    %258 = vector.load %arg24[%c3_138, %c0_139, %c0_140] : memref<6x32x24xf32, #tpu.memory_space<vmem>>, vector<1x32x24xf32>
    %259 = vector.shape_cast %258 : vector<1x32x24xf32> to vector<32x24xf32>
    %cst_141 = arith.constant dense<0.000000e+00> : vector<17x24xf32>
    %260 = tpu.matmul %231, %259, %cst_141 {dimension_numbers = #tpu.dot_dimension_numbers<[1], [0], [0], [1], [0, 0, 1, 1], [], []>} : vector<17x32xf32>, vector<32x24xf32>, vector<17x24xf32> -> vector<17x24xf32>
    %c5_142 = arith.constant 5 : index
    %c0_143 = arith.constant 0 : index
    %c0_144 = arith.constant 0 : index
    %261 = vector.load %arg24[%c5_142, %c0_143, %c0_144] : memref<6x32x24xf32, #tpu.memory_space<vmem>>, vector<1x32x24xf32>
    %262 = vector.shape_cast %261 : vector<1x32x24xf32> to vector<32x24xf32>
    %cst_145 = arith.constant dense<0.000000e+00> : vector<17x24xf32>
    %263 = tpu.matmul %231, %262, %cst_145 {dimension_numbers = #tpu.dot_dimension_numbers<[1], [0], [0], [1], [0, 0, 1, 1], [], []>} : vector<17x32xf32>, vector<32x24xf32>, vector<17x24xf32> -> vector<17x24xf32>
    %cst_146 = arith.constant dense<0.000000e+00> : vector<17x17xf32>
    %264 = tpu.matmul %257, %260, %cst_146 {dimension_numbers = #tpu.dot_dimension_numbers<[1], [1], [0], [0], [0, 0, 1, 0], [], []>} : vector<17x24xf32>, vector<17x24xf32>, vector<17x17xf32> -> vector<17x17xf32>
    %cst_147 = arith.constant 0.204124153 : f32
    %265 = vector.broadcast %cst_147 : f32 to vector<17x17xf32>
    %266 = arith.mulf %264, %265 : vector<17x17xf32>
    %cst_148 = arith.constant dense<0xFF800000> : vector<17xf32>
    %267 = vector.multi_reduction <maximumf>, %266, %cst_148 [1] : vector<17x17xf32> to vector<17xf32>
    %268 = vector.shape_cast %267 : vector<17xf32> to vector<17x1xf32>
    %269 = vector.broadcast %268 : vector<17x1xf32> to vector<17x17xf32>
    %270 = arith.subf %266, %269 : vector<17x17xf32>
    %271 = math.exp %270 : vector<17x17xf32>
    %cst_149 = arith.constant dense<0.000000e+00> : vector<17xf32>
    %272 = vector.multi_reduction <add>, %271, %cst_149 [1] : vector<17x17xf32> to vector<17xf32>
    %273 = vector.shape_cast %272 : vector<17xf32> to vector<17x1xf32>
    %274 = tpu.reciprocal %273 {approx = true} : vector<17x1xf32> -> vector<17x1xf32>
    %275 = vector.broadcast %274 : vector<17x1xf32> to vector<17x17xf32>
    %276 = arith.mulf %271, %275 : vector<17x17xf32>
    %cst_150 = arith.constant dense<0.000000e+00> : vector<17x24xf32>
    %277 = tpu.matmul %276, %263, %cst_150 {dimension_numbers = #tpu.dot_dimension_numbers<[1], [0], [0], [1], [0, 0, 1, 1], [], []>} : vector<17x17xf32>, vector<17x24xf32>, vector<17x24xf32> -> vector<17x24xf32>
    %cst_151 = arith.constant dense<0.000000e+00> : vector<17xf32>
    %278 = vector.multi_reduction <add>, %254, %cst_151 [1] : vector<17x24xf32> to vector<17xf32>
    %279 = vector.shape_cast %278 : vector<17xf32> to vector<17x1xf32>
    %cst_152 = arith.constant 0.000000e+00 : f32
    %280 = vector.broadcast %cst_152 : f32 to vector<17x1xf32>
    %281 = arith.addf %280, %279 : vector<17x1xf32>
    %cst_153 = arith.constant dense<0.000000e+00> : vector<17xf32>
    %282 = vector.multi_reduction <add>, %277, %cst_153 [1] : vector<17x24xf32> to vector<17xf32>
    %283 = vector.shape_cast %282 : vector<17xf32> to vector<17x1xf32>
    %284 = arith.addf %281, %283 : vector<17x1xf32>
    %cst_154 = arith.constant 4.800000e+01 : f32
    %285 = vector.broadcast %cst_154 : f32 to vector<17x1xf32>
    %286 = arith.divf %284, %285 : vector<17x1xf32>
    %287 = vector.broadcast %286 : vector<17x1xf32> to vector<17x24xf32>
    %288 = arith.subf %254, %287 : vector<17x24xf32>
    %289 = vector.broadcast %286 : vector<17x1xf32> to vector<17x24xf32>
    %290 = arith.subf %277, %289 : vector<17x24xf32>
    %291 = arith.mulf %288, %288 : vector<17x24xf32>
    %cst_155 = arith.constant dense<0.000000e+00> : vector<17xf32>
    %292 = vector.multi_reduction <add>, %291, %cst_155 [1] : vector<17x24xf32> to vector<17xf32>
    %293 = vector.shape_cast %292 : vector<17xf32> to vector<17x1xf32>
    %cst_156 = arith.constant 0.000000e+00 : f32
    %294 = vector.broadcast %cst_156 : f32 to vector<17x1xf32>
    %295 = arith.addf %294, %293 : vector<17x1xf32>
    %296 = arith.mulf %290, %290 : vector<17x24xf32>
    %cst_157 = arith.constant dense<0.000000e+00> : vector<17xf32>
    %297 = vector.multi_reduction <add>, %296, %cst_157 [1] : vector<17x24xf32> to vector<17xf32>
    %298 = vector.shape_cast %297 : vector<17xf32> to vector<17x1xf32>
    %299 = arith.addf %295, %298 : vector<17x1xf32>
    %cst_158 = arith.constant 4.800000e+01 : f32
    %300 = vector.broadcast %cst_158 : f32 to vector<17x1xf32>
    %301 = arith.divf %299, %300 : vector<17x1xf32>
    %cst_159 = arith.constant 9.99999974E-6 : f32
    %302 = vector.broadcast %cst_159 : f32 to vector<17x1xf32>
    %303 = arith.addf %301, %302 : vector<17x1xf32>
    %304 = math.rsqrt %303 : vector<17x1xf32>
    %c0_160 = arith.constant 0 : index
    %c0_161 = arith.constant 0 : index
    %305 = vector.load %arg28[%c0_160, %c0_161] : memref<1x64xf32, #tpu.memory_space<vmem>>, vector<1x64xf32>
    %306 = vector.broadcast %304 : vector<17x1xf32> to vector<17x24xf32>
    %307 = arith.mulf %288, %306 : vector<17x24xf32>
    %c0_162 = arith.constant 0 : index
    %c0_163 = arith.constant 0 : index
    %c0_164 = arith.constant 0 : index
    %308 = vector.load %arg25[%c0_162, %c0_163, %c0_164] : memref<2x1x24xf32, #tpu.memory_space<vmem>>, vector<1x1x24xf32>
    %309 = vector.shape_cast %308 : vector<1x1x24xf32> to vector<1x24xf32>
    %310 = vector.broadcast %309 : vector<1x24xf32> to vector<17x24xf32>
    %311 = arith.mulf %307, %310 : vector<17x24xf32>
    %c0_165 = arith.constant 0 : index
    %c0_166 = arith.constant 0 : index
    %c0_167 = arith.constant 0 : index
    %312 = vector.load %arg26[%c0_165, %c0_166, %c0_167] : memref<2x1x24xf32, #tpu.memory_space<vmem>>, vector<1x1x24xf32>
    %313 = vector.shape_cast %312 : vector<1x1x24xf32> to vector<1x24xf32>
    %314 = vector.broadcast %313 : vector<1x24xf32> to vector<17x24xf32>
    %315 = arith.addf %311, %314 : vector<17x24xf32>
    %c0_168 = arith.constant 0 : index
    %c0_169 = arith.constant 0 : index
    %c0_170 = arith.constant 0 : index
    %316 = vector.load %arg27[%c0_168, %c0_169, %c0_170] : memref<2x24x64xf32, #tpu.memory_space<vmem>>, vector<1x24x64xf32>
    %317 = vector.shape_cast %316 : vector<1x24x64xf32> to vector<24x64xf32>
    %cst_171 = arith.constant dense<0.000000e+00> : vector<17x64xf32>
    %318 = tpu.matmul %315, %317, %cst_171 {dimension_numbers = #tpu.dot_dimension_numbers<[1], [0], [0], [1], [0, 0, 1, 1], [], []>} : vector<17x24xf32>, vector<24x64xf32>, vector<17x64xf32> -> vector<17x64xf32>
    %319 = vector.broadcast %305 : vector<1x64xf32> to vector<17x64xf32>
    %320 = arith.addf %319, %318 : vector<17x64xf32>
    %321 = vector.broadcast %304 : vector<17x1xf32> to vector<17x24xf32>
    %322 = arith.mulf %290, %321 : vector<17x24xf32>
    %c1_172 = arith.constant 1 : index
    %c0_173 = arith.constant 0 : index
    %c0_174 = arith.constant 0 : index
    %323 = vector.load %arg25[%c1_172, %c0_173, %c0_174] : memref<2x1x24xf32, #tpu.memory_space<vmem>>, vector<1x1x24xf32>
    %324 = vector.shape_cast %323 : vector<1x1x24xf32> to vector<1x24xf32>
    %325 = vector.broadcast %324 : vector<1x24xf32> to vector<17x24xf32>
    %326 = arith.mulf %322, %325 : vector<17x24xf32>
    %c1_175 = arith.constant 1 : index
    %c0_176 = arith.constant 0 : index
    %c0_177 = arith.constant 0 : index
    %327 = vector.load %arg26[%c1_175, %c0_176, %c0_177] : memref<2x1x24xf32, #tpu.memory_space<vmem>>, vector<1x1x24xf32>
    %328 = vector.shape_cast %327 : vector<1x1x24xf32> to vector<1x24xf32>
    %329 = vector.broadcast %328 : vector<1x24xf32> to vector<17x24xf32>
    %330 = arith.addf %326, %329 : vector<17x24xf32>
    %c1_178 = arith.constant 1 : index
    %c0_179 = arith.constant 0 : index
    %c0_180 = arith.constant 0 : index
    %331 = vector.load %arg27[%c1_178, %c0_179, %c0_180] : memref<2x24x64xf32, #tpu.memory_space<vmem>>, vector<1x24x64xf32>
    %332 = vector.shape_cast %331 : vector<1x24x64xf32> to vector<24x64xf32>
    %cst_181 = arith.constant dense<0.000000e+00> : vector<17x64xf32>
    %333 = tpu.matmul %330, %332, %cst_181 {dimension_numbers = #tpu.dot_dimension_numbers<[1], [0], [0], [1], [0, 0, 1, 1], [], []>} : vector<17x24xf32>, vector<24x64xf32>, vector<17x64xf32> -> vector<17x64xf32>
    %334 = arith.addf %320, %333 : vector<17x64xf32>
    %cst_182 = arith.constant 0.636619746 : f32
    %335 = math.sqrt %cst_182 : f32
    %cst_183 = arith.constant 5.000000e-01 : f32
    %336 = vector.broadcast %cst_183 : f32 to vector<17x64xf32>
    %337 = arith.mulf %336, %334 : vector<17x64xf32>
    %cst_184 = arith.constant 4.471500e-02 : f32
    %338 = vector.broadcast %cst_184 : f32 to vector<17x64xf32>
    %339 = arith.mulf %338, %334 : vector<17x64xf32>
    %340 = arith.mulf %339, %334 : vector<17x64xf32>
    %341 = arith.mulf %340, %334 : vector<17x64xf32>
    %342 = arith.addf %334, %341 : vector<17x64xf32>
    %343 = vector.broadcast %335 : f32 to vector<17x64xf32>
    %344 = arith.mulf %343, %342 : vector<17x64xf32>
    %345 = math.tanh %344 : vector<17x64xf32>
    %cst_185 = arith.constant 1.000000e+00 : f32
    %346 = vector.broadcast %cst_185 : f32 to vector<17x64xf32>
    %347 = arith.addf %346, %345 : vector<17x64xf32>
    %348 = arith.mulf %337, %347 : vector<17x64xf32>
    %c0_186 = arith.constant 0 : index
    %c0_187 = arith.constant 0 : index
    %349 = vector.load %arg29[%c0_186, %c0_187] : memref<64x48xf32, #tpu.memory_space<vmem>>, vector<64x48xf32>
    %cst_188 = arith.constant dense<0.000000e+00> : vector<17x48xf32>
    %350 = tpu.matmul %348, %349, %cst_188 {dimension_numbers = #tpu.dot_dimension_numbers<[1], [0], [0], [1], [0, 0, 1, 1], [], []>} : vector<17x64xf32>, vector<64x48xf32>, vector<17x48xf32> -> vector<17x48xf32>
    %c0_189 = arith.constant 0 : index
    %c0_190 = arith.constant 0 : index
    %351 = vector.load %arg30[%c0_189, %c0_190] : memref<1x48xf32, #tpu.memory_space<vmem>>, vector<1x48xf32>
    %352 = vector.broadcast %351 : vector<1x48xf32> to vector<17x48xf32>
    %353 = arith.addf %350, %352 : vector<17x48xf32>
    %cst_191 = arith.constant dense<0.000000e+00> : vector<17xf32>
    %354 = vector.multi_reduction <add>, %353, %cst_191 [1] : vector<17x48xf32> to vector<17xf32>
    %355 = vector.shape_cast %354 : vector<17xf32> to vector<17x1xf32>
    %cst_192 = arith.constant 4.800000e+01 : f32
    %356 = vector.broadcast %cst_192 : f32 to vector<17x1xf32>
    %357 = arith.divf %355, %356 : vector<17x1xf32>
    %358 = vector.broadcast %357 : vector<17x1xf32> to vector<17x48xf32>
    %359 = arith.subf %353, %358 : vector<17x48xf32>
    %360 = arith.mulf %359, %359 : vector<17x48xf32>
    %cst_193 = arith.constant dense<0.000000e+00> : vector<17xf32>
    %361 = vector.multi_reduction <add>, %360, %cst_193 [1] : vector<17x48xf32> to vector<17xf32>
    %362 = vector.shape_cast %361 : vector<17xf32> to vector<17x1xf32>
    %cst_194 = arith.constant 4.800000e+01 : f32
    %363 = vector.broadcast %cst_194 : f32 to vector<17x1xf32>
    %364 = arith.divf %362, %363 : vector<17x1xf32>
    %cst_195 = arith.constant 9.99999974E-6 : f32
    %365 = vector.broadcast %cst_195 : f32 to vector<17x1xf32>
    %366 = arith.addf %364, %365 : vector<17x1xf32>
    %367 = math.rsqrt %366 : vector<17x1xf32>
    %368 = vector.broadcast %367 : vector<17x1xf32> to vector<17x48xf32>
    %369 = arith.mulf %359, %368 : vector<17x48xf32>
    %c0_196 = arith.constant 0 : index
    %c0_197 = arith.constant 0 : index
    %370 = vector.load %arg31[%c0_196, %c0_197] : memref<1x48xf32, #tpu.memory_space<vmem>>, vector<1x48xf32>
    %371 = vector.broadcast %370 : vector<1x48xf32> to vector<17x48xf32>
    %372 = arith.mulf %369, %371 : vector<17x48xf32>
    %c0_198 = arith.constant 0 : index
    %c0_199 = arith.constant 0 : index
    %373 = vector.load %arg32[%c0_198, %c0_199] : memref<1x48xf32, #tpu.memory_space<vmem>>, vector<1x48xf32>
    %374 = vector.broadcast %373 : vector<1x48xf32> to vector<17x48xf32>
    %375 = arith.addf %372, %374 : vector<17x48xf32>
    %376 = arith.truncf %375 : vector<17x48xf32> to vector<17x48xbf16>
    %c0_200 = arith.constant 0 : index
    %c0_201 = arith.constant 0 : index
    %377 = vector.load %arg33[%c0_200, %c0_201] : memref<48x512xbf16, #tpu.memory_space<vmem>>, vector<48x512xbf16>
    %cst_202 = arith.constant dense<0.000000e+00> : vector<17x512xf32>
    %378 = tpu.matmul %376, %377, %cst_202 {dimension_numbers = #tpu.dot_dimension_numbers<[1], [0], [0], [1], [0, 0, 1, 1], [], []>} : vector<17x48xbf16>, vector<48x512xbf16>, vector<17x512xf32> -> vector<17x512xf32>
    %c0_203 = arith.constant 0 : index
    %c0_204 = arith.constant 0 : index
    %379 = vector.load %arg34[%c0_203, %c0_204] : memref<1x512xf32, #tpu.memory_space<vmem>>, vector<1x512xf32>
    %380 = vector.broadcast %379 : vector<1x512xf32> to vector<17x512xf32>
    %381 = arith.addf %378, %380 : vector<17x512xf32>
    %c0_205 = arith.constant 0 : index
    %c0_206 = arith.constant 0 : index
    %c0_207 = arith.constant 0 : index
    %382 = vector.load %arg35[%c0_205, %c0_206, %c0_207] : memref<2x17x512xf32, #tpu.memory_space<vmem>>, vector<1x17x512xf32>
    %383 = vector.shape_cast %382 : vector<1x17x512xf32> to vector<17x512xf32>
    %384 = vector.shape_cast %381 : vector<17x512xf32> to vector<1x17x512xf32>
    tpu.vector_store %arg35[%c0_205, %c0_206, %c0_207], %384 {strides = array<i32>} : memref<2x17x512xf32, #tpu.memory_space<vmem>>, vector<1x17x512xf32>,
    %c1_208 = arith.constant 1 : index
    %c0_209 = arith.constant 0 : index
    %c0_210 = arith.constant 0 : index
    %385 = vector.load %arg0[%c1_208, %c0_209, %c0_210] : memref<2x17x48xf32, #tpu.memory_space<vmem>>, vector<1x17x48xf32>
    %386 = vector.shape_cast %385 : vector<1x17x48xf32> to vector<17x48xf32>
    %cst_211 = arith.constant dense<0.000000e+00> : vector<17xf32>
    %387 = vector.multi_reduction <add>, %386, %cst_211 [1] : vector<17x48xf32> to vector<17xf32>
    %388 = vector.shape_cast %387 : vector<17xf32> to vector<17x1xf32>
    %cst_212 = arith.constant 4.800000e+01 : f32
    %389 = vector.broadcast %cst_212 : f32 to vector<17x1xf32>
    %390 = arith.divf %388, %389 : vector<17x1xf32>
    %391 = vector.broadcast %390 : vector<17x1xf32> to vector<17x48xf32>
    %392 = arith.subf %386, %391 : vector<17x48xf32>
    %393 = arith.mulf %392, %392 : vector<17x48xf32>
    %cst_213 = arith.constant dense<0.000000e+00> : vector<17xf32>
    %394 = vector.multi_reduction <add>, %393, %cst_213 [1] : vector<17x48xf32> to vector<17xf32>
    %395 = vector.shape_cast %394 : vector<17xf32> to vector<17x1xf32>
    %cst_214 = arith.constant 4.800000e+01 : f32
    %396 = vector.broadcast %cst_214 : f32 to vector<17x1xf32>
    %397 = arith.divf %395, %396 : vector<17x1xf32>
    %cst_215 = arith.constant 9.99999974E-6 : f32
    %398 = vector.broadcast %cst_215 : f32 to vector<17x1xf32>
    %399 = arith.addf %397, %398 : vector<17x1xf32>
    %400 = math.rsqrt %399 : vector<17x1xf32>
    %401 = vector.broadcast %400 : vector<17x1xf32> to vector<17x48xf32>
    %402 = arith.mulf %392, %401 : vector<17x48xf32>
    %c0_216 = arith.constant 0 : index
    %c0_217 = arith.constant 0 : index
    %403 = vector.load %arg1[%c0_216, %c0_217] : memref<1x48xf32, #tpu.memory_space<vmem>>, vector<1x48xf32>
    %404 = vector.broadcast %403 : vector<1x48xf32> to vector<17x48xf32>
    %405 = arith.mulf %402, %404 : vector<17x48xf32>
    %c0_218 = arith.constant 0 : index
    %c0_219 = arith.constant 0 : index
    %406 = vector.load %arg2[%c0_218, %c0_219] : memref<1x48xf32, #tpu.memory_space<vmem>>, vector<1x48xf32>
    %407 = vector.broadcast %406 : vector<1x48xf32> to vector<17x48xf32>
    %408 = arith.addf %405, %407 : vector<17x48xf32>
    %c0_220 = arith.constant 0 : index
    %c0_221 = arith.constant 0 : index
    %409 = vector.load %arg3[%c0_220, %c0_221] : memref<48x32xf32, #tpu.memory_space<vmem>>, vector<48x32xf32>
    %cst_222 = arith.constant dense<0.000000e+00> : vector<17x32xf32>
    %410 = tpu.matmul %408, %409, %cst_222 {dimension_numbers = #tpu.dot_dimension_numbers<[1], [0], [0], [1], [0, 0, 1, 1], [], []>} : vector<17x48xf32>, vector<48x32xf32>, vector<17x32xf32> -> vector<17x32xf32>
    %c0_223 = arith.constant 0 : index
    %c0_224 = arith.constant 0 : index
    %411 = vector.load %arg4[%c0_223, %c0_224] : memref<1x32xf32, #tpu.memory_space<vmem>>, vector<1x32xf32>
    %412 = vector.broadcast %411 : vector<1x32xf32> to vector<17x32xf32>
    %413 = arith.addf %410, %412 : vector<17x32xf32>
    %cst_225 = arith.constant dense<0.000000e+00> : vector<17xf32>
    %414 = vector.multi_reduction <add>, %413, %cst_225 [1] : vector<17x32xf32> to vector<17xf32>
    %415 = vector.shape_cast %414 : vector<17xf32> to vector<17x1xf32>
    %cst_226 = arith.constant 3.200000e+01 : f32
    %416 = vector.broadcast %cst_226 : f32 to vector<17x1xf32>
    %417 = arith.divf %415, %416 : vector<17x1xf32>
    %418 = vector.broadcast %417 : vector<17x1xf32> to vector<17x32xf32>
    %419 = arith.subf %413, %418 : vector<17x32xf32>
    %420 = arith.mulf %419, %419 : vector<17x32xf32>
    %cst_227 = arith.constant dense<0.000000e+00> : vector<17xf32>
    %421 = vector.multi_reduction <add>, %420, %cst_227 [1] : vector<17x32xf32> to vector<17xf32>
    %422 = vector.shape_cast %421 : vector<17xf32> to vector<17x1xf32>
    %cst_228 = arith.constant 3.200000e+01 : f32
    %423 = vector.broadcast %cst_228 : f32 to vector<17x1xf32>
    %424 = arith.divf %422, %423 : vector<17x1xf32>
    %cst_229 = arith.constant 9.99999974E-6 : f32
    %425 = vector.broadcast %cst_229 : f32 to vector<17x1xf32>
    %426 = arith.addf %424, %425 : vector<17x1xf32>
    %427 = math.rsqrt %426 : vector<17x1xf32>
    %428 = vector.broadcast %427 : vector<17x1xf32> to vector<17x32xf32>
    %429 = arith.mulf %419, %428 : vector<17x32xf32>
    %c0_230 = arith.constant 0 : index
    %c0_231 = arith.constant 0 : index
    %430 = vector.load %arg5[%c0_230, %c0_231] : memref<1x32xf32, #tpu.memory_space<vmem>>, vector<1x32xf32>
    %431 = vector.broadcast %430 : vector<1x32xf32> to vector<17x32xf32>
    %432 = arith.mulf %429, %431 : vector<17x32xf32>
    %c0_232 = arith.constant 0 : index
    %c0_233 = arith.constant 0 : index
    %433 = vector.load %arg6[%c0_232, %c0_233] : memref<1x32xf32, #tpu.memory_space<vmem>>, vector<1x32xf32>
    %434 = vector.broadcast %433 : vector<1x32xf32> to vector<17x32xf32>
    %435 = arith.addf %432, %434 : vector<17x32xf32>
    %436 = vector.shape_cast %4 : vector<17x1xi1> to vector<17x1xi1>
    %437 = vector.broadcast %436 : vector<17x1xi1> to vector<17x32xi1>
    %438 = vector.shape_cast %1 : vector<1x32xf32> to vector<1x32xf32>
    %439 = vector.broadcast %438 : vector<1x32xf32> to vector<17x32xf32>
    %440 = arith.select %437, %439, %435 : vector<17x32xi1>, vector<17x32xf32>
    %441 = arith.addf %440, %0 : vector<17x32xf32>
    %cst_234 = arith.constant dense<0.000000e+00> : vector<17xf32>
    %442 = vector.multi_reduction <add>, %441, %cst_234 [1] : vector<17x32xf32> to vector<17xf32>
    %443 = vector.shape_cast %442 : vector<17xf32> to vector<17x1xf32>
    %cst_235 = arith.constant 3.200000e+01 : f32
    %444 = vector.broadcast %cst_235 : f32 to vector<17x1xf32>
    %445 = arith.divf %443, %444 : vector<17x1xf32>
    %446 = vector.broadcast %445 : vector<17x1xf32> to vector<17x32xf32>
    %447 = arith.subf %441, %446 : vector<17x32xf32>
    %448 = arith.mulf %447, %447 : vector<17x32xf32>
    %cst_236 = arith.constant dense<0.000000e+00> : vector<17xf32>
    %449 = vector.multi_reduction <add>, %448, %cst_236 [1] : vector<17x32xf32> to vector<17xf32>
    %450 = vector.shape_cast %449 : vector<17xf32> to vector<17x1xf32>
    %cst_237 = arith.constant 3.200000e+01 : f32
    %451 = vector.broadcast %cst_237 : f32 to vector<17x1xf32>
    %452 = arith.divf %450, %451 : vector<17x1xf32>
    %cst_238 = arith.constant 9.99999974E-6 : f32
    %453 = vector.broadcast %cst_238 : f32 to vector<17x1xf32>
    %454 = arith.addf %452, %453 : vector<17x1xf32>
    %455 = math.rsqrt %454 : vector<17x1xf32>
    %456 = vector.broadcast %455 : vector<17x1xf32> to vector<17x32xf32>
    %457 = arith.mulf %447, %456 : vector<17x32xf32>
    %c0_239 = arith.constant 0 : index
    %c0_240 = arith.constant 0 : index
    %458 = vector.load %arg9[%c0_239, %c0_240] : memref<1x32xf32, #tpu.memory_space<vmem>>, vector<1x32xf32>
    %459 = vector.broadcast %458 : vector<1x32xf32> to vector<17x32xf32>
    %460 = arith.mulf %457, %459 : vector<17x32xf32>
    %c0_241 = arith.constant 0 : index
    %c0_242 = arith.constant 0 : index
    %461 = vector.load %arg10[%c0_241, %c0_242] : memref<1x32xf32, #tpu.memory_space<vmem>>, vector<1x32xf32>
    %462 = vector.broadcast %461 : vector<1x32xf32> to vector<17x32xf32>
    %463 = arith.addf %460, %462 : vector<17x32xf32>
    %c0_243 = arith.constant 0 : index
    %c0_244 = arith.constant 0 : index
    %c0_245 = arith.constant 0 : index
    %464 = vector.load %arg11[%c0_243, %c0_244, %c0_245] : memref<6x32x24xf32, #tpu.memory_space<vmem>>, vector<1x32x24xf32>
    %465 = vector.shape_cast %464 : vector<1x32x24xf32> to vector<32x24xf32>
    %cst_246 = arith.constant dense<0.000000e+00> : vector<17x24xf32>
    %466 = tpu.matmul %463, %465, %cst_246 {dimension_numbers = #tpu.dot_dimension_numbers<[1], [0], [0], [1], [0, 0, 1, 1], [], []>} : vector<17x32xf32>, vector<32x24xf32>, vector<17x24xf32> -> vector<17x24xf32>
    %c2_247 = arith.constant 2 : index
    %c0_248 = arith.constant 0 : index
    %c0_249 = arith.constant 0 : index
    %467 = vector.load %arg11[%c2_247, %c0_248, %c0_249] : memref<6x32x24xf32, #tpu.memory_space<vmem>>, vector<1x32x24xf32>
    %468 = vector.shape_cast %467 : vector<1x32x24xf32> to vector<32x24xf32>
    %cst_250 = arith.constant dense<0.000000e+00> : vector<17x24xf32>
    %469 = tpu.matmul %463, %468, %cst_250 {dimension_numbers = #tpu.dot_dimension_numbers<[1], [0], [0], [1], [0, 0, 1, 1], [], []>} : vector<17x32xf32>, vector<32x24xf32>, vector<17x24xf32> -> vector<17x24xf32>
    %c4_251 = arith.constant 4 : index
    %c0_252 = arith.constant 0 : index
    %c0_253 = arith.constant 0 : index
    %470 = vector.load %arg11[%c4_251, %c0_252, %c0_253] : memref<6x32x24xf32, #tpu.memory_space<vmem>>, vector<1x32x24xf32>
    %471 = vector.shape_cast %470 : vector<1x32x24xf32> to vector<32x24xf32>
    %cst_254 = arith.constant dense<0.000000e+00> : vector<17x24xf32>
    %472 = tpu.matmul %463, %471, %cst_254 {dimension_numbers = #tpu.dot_dimension_numbers<[1], [0], [0], [1], [0, 0, 1, 1], [], []>} : vector<17x32xf32>, vector<32x24xf32>, vector<17x24xf32> -> vector<17x24xf32>
    %cst_255 = arith.constant dense<0.000000e+00> : vector<17x17xf32>
    %473 = tpu.matmul %466, %469, %cst_255 {dimension_numbers = #tpu.dot_dimension_numbers<[1], [1], [0], [0], [0, 0, 1, 0], [], []>} : vector<17x24xf32>, vector<17x24xf32>, vector<17x17xf32> -> vector<17x17xf32>
    %cst_256 = arith.constant 0.204124153 : f32
    %474 = vector.broadcast %cst_256 : f32 to vector<17x17xf32>
    %475 = arith.mulf %473, %474 : vector<17x17xf32>
    %cst_257 = arith.constant dense<0xFF800000> : vector<17xf32>
    %476 = vector.multi_reduction <maximumf>, %475, %cst_257 [1] : vector<17x17xf32> to vector<17xf32>
    %477 = vector.shape_cast %476 : vector<17xf32> to vector<17x1xf32>
    %478 = vector.broadcast %477 : vector<17x1xf32> to vector<17x17xf32>
    %479 = arith.subf %475, %478 : vector<17x17xf32>
    %480 = math.exp %479 : vector<17x17xf32>
    %cst_258 = arith.constant dense<0.000000e+00> : vector<17xf32>
    %481 = vector.multi_reduction <add>, %480, %cst_258 [1] : vector<17x17xf32> to vector<17xf32>
    %482 = vector.shape_cast %481 : vector<17xf32> to vector<17x1xf32>
    %483 = tpu.reciprocal %482 {approx = true} : vector<17x1xf32> -> vector<17x1xf32>
    %484 = vector.broadcast %483 : vector<17x1xf32> to vector<17x17xf32>
    %485 = arith.mulf %480, %484 : vector<17x17xf32>
    %cst_259 = arith.constant dense<0.000000e+00> : vector<17x24xf32>
    %486 = tpu.matmul %485, %472, %cst_259 {dimension_numbers = #tpu.dot_dimension_numbers<[1], [0], [0], [1], [0, 0, 1, 1], [], []>} : vector<17x17xf32>, vector<17x24xf32>, vector<17x24xf32> -> vector<17x24xf32>
    %c1_260 = arith.constant 1 : index
    %c0_261 = arith.constant 0 : index
    %c0_262 = arith.constant 0 : index
    %487 = vector.load %arg11[%c1_260, %c0_261, %c0_262] : memref<6x32x24xf32, #tpu.memory_space<vmem>>, vector<1x32x24xf32>
    %488 = vector.shape_cast %487 : vector<1x32x24xf32> to vector<32x24xf32>
    %cst_263 = arith.constant dense<0.000000e+00> : vector<17x24xf32>
    %489 = tpu.matmul %463, %488, %cst_263 {dimension_numbers = #tpu.dot_dimension_numbers<[1], [0], [0], [1], [0, 0, 1, 1], [], []>} : vector<17x32xf32>, vector<32x24xf32>, vector<17x24xf32> -> vector<17x24xf32>
    %c3_264 = arith.constant 3 : index
    %c0_265 = arith.constant 0 : index
    %c0_266 = arith.constant 0 : index
    %490 = vector.load %arg11[%c3_264, %c0_265, %c0_266] : memref<6x32x24xf32, #tpu.memory_space<vmem>>, vector<1x32x24xf32>
    %491 = vector.shape_cast %490 : vector<1x32x24xf32> to vector<32x24xf32>
    %cst_267 = arith.constant dense<0.000000e+00> : vector<17x24xf32>
    %492 = tpu.matmul %463, %491, %cst_267 {dimension_numbers = #tpu.dot_dimension_numbers<[1], [0], [0], [1], [0, 0, 1, 1], [], []>} : vector<17x32xf32>, vector<32x24xf32>, vector<17x24xf32> -> vector<17x24xf32>
    %c5_268 = arith.constant 5 : index
    %c0_269 = arith.constant 0 : index
    %c0_270 = arith.constant 0 : index
    %493 = vector.load %arg11[%c5_268, %c0_269, %c0_270] : memref<6x32x24xf32, #tpu.memory_space<vmem>>, vector<1x32x24xf32>
    %494 = vector.shape_cast %493 : vector<1x32x24xf32> to vector<32x24xf32>
    %cst_271 = arith.constant dense<0.000000e+00> : vector<17x24xf32>
    %495 = tpu.matmul %463, %494, %cst_271 {dimension_numbers = #tpu.dot_dimension_numbers<[1], [0], [0], [1], [0, 0, 1, 1], [], []>} : vector<17x32xf32>, vector<32x24xf32>, vector<17x24xf32> -> vector<17x24xf32>
    %cst_272 = arith.constant dense<0.000000e+00> : vector<17x17xf32>
    %496 = tpu.matmul %489, %492, %cst_272 {dimension_numbers = #tpu.dot_dimension_numbers<[1], [1], [0], [0], [0, 0, 1, 0], [], []>} : vector<17x24xf32>, vector<17x24xf32>, vector<17x17xf32> -> vector<17x17xf32>
    %cst_273 = arith.constant 0.204124153 : f32
    %497 = vector.broadcast %cst_273 : f32 to vector<17x17xf32>
    %498 = arith.mulf %496, %497 : vector<17x17xf32>
    %cst_274 = arith.constant dense<0xFF800000> : vector<17xf32>
    %499 = vector.multi_reduction <maximumf>, %498, %cst_274 [1] : vector<17x17xf32> to vector<17xf32>
    %500 = vector.shape_cast %499 : vector<17xf32> to vector<17x1xf32>
    %501 = vector.broadcast %500 : vector<17x1xf32> to vector<17x17xf32>
    %502 = arith.subf %498, %501 : vector<17x17xf32>
    %503 = math.exp %502 : vector<17x17xf32>
    %cst_275 = arith.constant dense<0.000000e+00> : vector<17xf32>
    %504 = vector.multi_reduction <add>, %503, %cst_275 [1] : vector<17x17xf32> to vector<17xf32>
    %505 = vector.shape_cast %504 : vector<17xf32> to vector<17x1xf32>
    %506 = tpu.reciprocal %505 {approx = true} : vector<17x1xf32> -> vector<17x1xf32>
    %507 = vector.broadcast %506 : vector<17x1xf32> to vector<17x17xf32>
    %508 = arith.mulf %503, %507 : vector<17x17xf32>
    %cst_276 = arith.constant dense<0.000000e+00> : vector<17x24xf32>
    %509 = tpu.matmul %508, %495, %cst_276 {dimension_numbers = #tpu.dot_dimension_numbers<[1], [0], [0], [1], [0, 0, 1, 1], [], []>} : vector<17x17xf32>, vector<17x24xf32>, vector<17x24xf32> -> vector<17x24xf32>
    %c0_277 = arith.constant 0 : index
    %c0_278 = arith.constant 0 : index
    %510 = vector.load %arg13[%c0_277, %c0_278] : memref<1x32xf32, #tpu.memory_space<vmem>>, vector<1x32xf32>
    %c0_279 = arith.constant 0 : index
    %c0_280 = arith.constant 0 : index
    %c0_281 = arith.constant 0 : index
    %511 = vector.load %arg12[%c0_279, %c0_280, %c0_281] : memref<2x24x32xf32, #tpu.memory_space<vmem>>, vector<1x24x32xf32>
    %512 = vector.shape_cast %511 : vector<1x24x32xf32> to vector<24x32xf32>
    %cst_282 = arith.constant dense<0.000000e+00> : vector<17x32xf32>
    %513 = tpu.matmul %486, %512, %cst_282 {dimension_numbers = #tpu.dot_dimension_numbers<[1], [0], [0], [1], [0, 0, 1, 1], [], []>} : vector<17x24xf32>, vector<24x32xf32>, vector<17x32xf32> -> vector<17x32xf32>
    %514 = vector.broadcast %510 : vector<1x32xf32> to vector<17x32xf32>
    %515 = arith.addf %514, %513 : vector<17x32xf32>
    %c1_283 = arith.constant 1 : index
    %c0_284 = arith.constant 0 : index
    %c0_285 = arith.constant 0 : index
    %516 = vector.load %arg12[%c1_283, %c0_284, %c0_285] : memref<2x24x32xf32, #tpu.memory_space<vmem>>, vector<1x24x32xf32>
    %517 = vector.shape_cast %516 : vector<1x24x32xf32> to vector<24x32xf32>
    %cst_286 = arith.constant dense<0.000000e+00> : vector<17x32xf32>
    %518 = tpu.matmul %509, %517, %cst_286 {dimension_numbers = #tpu.dot_dimension_numbers<[1], [0], [0], [1], [0, 0, 1, 1], [], []>} : vector<17x24xf32>, vector<24x32xf32>, vector<17x32xf32> -> vector<17x32xf32>
    %519 = arith.addf %515, %518 : vector<17x32xf32>
    %520 = arith.addf %519, %441 : vector<17x32xf32>
    %cst_287 = arith.constant dense<0.000000e+00> : vector<17xf32>
    %521 = vector.multi_reduction <add>, %520, %cst_287 [1] : vector<17x32xf32> to vector<17xf32>
    %522 = vector.shape_cast %521 : vector<17xf32> to vector<17x1xf32>
    %cst_288 = arith.constant 3.200000e+01 : f32
    %523 = vector.broadcast %cst_288 : f32 to vector<17x1xf32>
    %524 = arith.divf %522, %523 : vector<17x1xf32>
    %525 = vector.broadcast %524 : vector<17x1xf32> to vector<17x32xf32>
    %526 = arith.subf %520, %525 : vector<17x32xf32>
    %527 = arith.mulf %526, %526 : vector<17x32xf32>
    %cst_289 = arith.constant dense<0.000000e+00> : vector<17xf32>
    %528 = vector.multi_reduction <add>, %527, %cst_289 [1] : vector<17x32xf32> to vector<17xf32>
    %529 = vector.shape_cast %528 : vector<17xf32> to vector<17x1xf32>
    %cst_290 = arith.constant 3.200000e+01 : f32
    %530 = vector.broadcast %cst_290 : f32 to vector<17x1xf32>
    %531 = arith.divf %529, %530 : vector<17x1xf32>
    %cst_291 = arith.constant 9.99999974E-6 : f32
    %532 = vector.broadcast %cst_291 : f32 to vector<17x1xf32>
    %533 = arith.addf %531, %532 : vector<17x1xf32>
    %534 = math.rsqrt %533 : vector<17x1xf32>
    %535 = vector.broadcast %534 : vector<17x1xf32> to vector<17x32xf32>
    %536 = arith.mulf %526, %535 : vector<17x32xf32>
    %c0_292 = arith.constant 0 : index
    %c0_293 = arith.constant 0 : index
    %537 = vector.load %arg14[%c0_292, %c0_293] : memref<1x32xf32, #tpu.memory_space<vmem>>, vector<1x32xf32>
    %538 = vector.broadcast %537 : vector<1x32xf32> to vector<17x32xf32>
    %539 = arith.mulf %536, %538 : vector<17x32xf32>
    %c0_294 = arith.constant 0 : index
    %c0_295 = arith.constant 0 : index
    %540 = vector.load %arg15[%c0_294, %c0_295] : memref<1x32xf32, #tpu.memory_space<vmem>>, vector<1x32xf32>
    %541 = vector.broadcast %540 : vector<1x32xf32> to vector<17x32xf32>
    %542 = arith.addf %539, %541 : vector<17x32xf32>
    %c0_296 = arith.constant 0 : index
    %c0_297 = arith.constant 0 : index
    %543 = vector.load %arg16[%c0_296, %c0_297] : memref<32x64xf32, #tpu.memory_space<vmem>>, vector<32x64xf32>
    %cst_298 = arith.constant dense<0.000000e+00> : vector<17x64xf32>
    %544 = tpu.matmul %542, %543, %cst_298 {dimension_numbers = #tpu.dot_dimension_numbers<[1], [0], [0], [1], [0, 0, 1, 1], [], []>} : vector<17x32xf32>, vector<32x64xf32>, vector<17x64xf32> -> vector<17x64xf32>
    %c0_299 = arith.constant 0 : index
    %c0_300 = arith.constant 0 : index
    %545 = vector.load %arg17[%c0_299, %c0_300] : memref<1x64xf32, #tpu.memory_space<vmem>>, vector<1x64xf32>
    %546 = vector.broadcast %545 : vector<1x64xf32> to vector<17x64xf32>
    %547 = arith.addf %544, %546 : vector<17x64xf32>
    %cst_301 = arith.constant 0.636619746 : f32
    %548 = math.sqrt %cst_301 : f32
    %cst_302 = arith.constant 5.000000e-01 : f32
    %549 = vector.broadcast %cst_302 : f32 to vector<17x64xf32>
    %550 = arith.mulf %549, %547 : vector<17x64xf32>
    %cst_303 = arith.constant 4.471500e-02 : f32
    %551 = vector.broadcast %cst_303 : f32 to vector<17x64xf32>
    %552 = arith.mulf %551, %547 : vector<17x64xf32>
    %553 = arith.mulf %552, %547 : vector<17x64xf32>
    %554 = arith.mulf %553, %547 : vector<17x64xf32>
    %555 = arith.addf %547, %554 : vector<17x64xf32>
    %556 = vector.broadcast %548 : f32 to vector<17x64xf32>
    %557 = arith.mulf %556, %555 : vector<17x64xf32>
    %558 = math.tanh %557 : vector<17x64xf32>
    %cst_304 = arith.constant 1.000000e+00 : f32
    %559 = vector.broadcast %cst_304 : f32 to vector<17x64xf32>
    %560 = arith.addf %559, %558 : vector<17x64xf32>
    %561 = arith.mulf %550, %560 : vector<17x64xf32>
    %c0_305 = arith.constant 0 : index
    %c0_306 = arith.constant 0 : index
    %562 = vector.load %arg18[%c0_305, %c0_306] : memref<64x32xf32, #tpu.memory_space<vmem>>, vector<64x32xf32>
    %cst_307 = arith.constant dense<0.000000e+00> : vector<17x32xf32>
    %563 = tpu.matmul %561, %562, %cst_307 {dimension_numbers = #tpu.dot_dimension_numbers<[1], [0], [0], [1], [0, 0, 1, 1], [], []>} : vector<17x64xf32>, vector<64x32xf32>, vector<17x32xf32> -> vector<17x32xf32>
    %c0_308 = arith.constant 0 : index
    %c0_309 = arith.constant 0 : index
    %564 = vector.load %arg19[%c0_308, %c0_309] : memref<1x32xf32, #tpu.memory_space<vmem>>, vector<1x32xf32>
    %565 = vector.broadcast %564 : vector<1x32xf32> to vector<17x32xf32>
    %566 = arith.addf %563, %565 : vector<17x32xf32>
    %567 = arith.addf %566, %520 : vector<17x32xf32>
    %cst_310 = arith.constant dense<0.000000e+00> : vector<17xf32>
    %568 = vector.multi_reduction <add>, %567, %cst_310 [1] : vector<17x32xf32> to vector<17xf32>
    %569 = vector.shape_cast %568 : vector<17xf32> to vector<17x1xf32>
    %cst_311 = arith.constant 3.200000e+01 : f32
    %570 = vector.broadcast %cst_311 : f32 to vector<17x1xf32>
    %571 = arith.divf %569, %570 : vector<17x1xf32>
    %572 = vector.broadcast %571 : vector<17x1xf32> to vector<17x32xf32>
    %573 = arith.subf %567, %572 : vector<17x32xf32>
    %574 = arith.mulf %573, %573 : vector<17x32xf32>
    %cst_312 = arith.constant dense<0.000000e+00> : vector<17xf32>
    %575 = vector.multi_reduction <add>, %574, %cst_312 [1] : vector<17x32xf32> to vector<17xf32>
    %576 = vector.shape_cast %575 : vector<17xf32> to vector<17x1xf32>
    %cst_313 = arith.constant 3.200000e+01 : f32
    %577 = vector.broadcast %cst_313 : f32 to vector<17x1xf32>
    %578 = arith.divf %576, %577 : vector<17x1xf32>
    %cst_314 = arith.constant 9.99999974E-6 : f32
    %579 = vector.broadcast %cst_314 : f32 to vector<17x1xf32>
    %580 = arith.addf %578, %579 : vector<17x1xf32>
    %581 = math.rsqrt %580 : vector<17x1xf32>
    %582 = vector.broadcast %581 : vector<17x1xf32> to vector<17x32xf32>
    %583 = arith.mulf %573, %582 : vector<17x32xf32>
    %c0_315 = arith.constant 0 : index
    %c0_316 = arith.constant 0 : index
    %584 = vector.load %arg20[%c0_315, %c0_316] : memref<1x32xf32, #tpu.memory_space<vmem>>, vector<1x32xf32>
    %585 = vector.broadcast %584 : vector<1x32xf32> to vector<17x32xf32>
    %586 = arith.mulf %583, %585 : vector<17x32xf32>
    %c0_317 = arith.constant 0 : index
    %c0_318 = arith.constant 0 : index
    %587 = vector.load %arg21[%c0_317, %c0_318] : memref<1x32xf32, #tpu.memory_space<vmem>>, vector<1x32xf32>
    %588 = vector.broadcast %587 : vector<1x32xf32> to vector<17x32xf32>
    %589 = arith.addf %586, %588 : vector<17x32xf32>
    %cst_319 = arith.constant dense<0.000000e+00> : vector<17xf32>
    %590 = vector.multi_reduction <add>, %589, %cst_319 [1] : vector<17x32xf32> to vector<17xf32>
    %591 = vector.shape_cast %590 : vector<17xf32> to vector<17x1xf32>
    %cst_320 = arith.constant 3.200000e+01 : f32
    %592 = vector.broadcast %cst_320 : f32 to vector<17x1xf32>
    %593 = arith.divf %591, %592 : vector<17x1xf32>
    %594 = vector.broadcast %593 : vector<17x1xf32> to vector<17x32xf32>
    %595 = arith.subf %589, %594 : vector<17x32xf32>
    %596 = arith.mulf %595, %595 : vector<17x32xf32>
    %cst_321 = arith.constant dense<0.000000e+00> : vector<17xf32>
    %597 = vector.multi_reduction <add>, %596, %cst_321 [1] : vector<17x32xf32> to vector<17xf32>
    %598 = vector.shape_cast %597 : vector<17xf32> to vector<17x1xf32>
    %cst_322 = arith.constant 3.200000e+01 : f32
    %599 = vector.broadcast %cst_322 : f32 to vector<17x1xf32>
    %600 = arith.divf %598, %599 : vector<17x1xf32>
    %cst_323 = arith.constant 9.99999974E-6 : f32
    %601 = vector.broadcast %cst_323 : f32 to vector<17x1xf32>
    %602 = arith.addf %600, %601 : vector<17x1xf32>
    %603 = math.rsqrt %602 : vector<17x1xf32>
    %604 = vector.broadcast %603 : vector<17x1xf32> to vector<17x32xf32>
    %605 = arith.mulf %595, %604 : vector<17x32xf32>
    %c0_324 = arith.constant 0 : index
    %c0_325 = arith.constant 0 : index
    %606 = vector.load %arg22[%c0_324, %c0_325] : memref<1x32xf32, #tpu.memory_space<vmem>>, vector<1x32xf32>
    %607 = vector.broadcast %606 : vector<1x32xf32> to vector<17x32xf32>
    %608 = arith.mulf %605, %607 : vector<17x32xf32>
    %c0_326 = arith.constant 0 : index
    %c0_327 = arith.constant 0 : index
    %609 = vector.load %arg23[%c0_326, %c0_327] : memref<1x32xf32, #tpu.memory_space<vmem>>, vector<1x32xf32>
    %610 = vector.broadcast %609 : vector<1x32xf32> to vector<17x32xf32>
    %611 = arith.addf %608, %610 : vector<17x32xf32>
    %c0_328 = arith.constant 0 : index
    %c0_329 = arith.constant 0 : index
    %c0_330 = arith.constant 0 : index
    %612 = vector.load %arg24[%c0_328, %c0_329, %c0_330] : memref<6x32x24xf32, #tpu.memory_space<vmem>>, vector<1x32x24xf32>
    %613 = vector.shape_cast %612 : vector<1x32x24xf32> to vector<32x24xf32>
    %cst_331 = arith.constant dense<0.000000e+00> : vector<17x24xf32>
    %614 = tpu.matmul %611, %613, %cst_331 {dimension_numbers = #tpu.dot_dimension_numbers<[1], [0], [0], [1], [0, 0, 1, 1], [], []>} : vector<17x32xf32>, vector<32x24xf32>, vector<17x24xf32> -> vector<17x24xf32>
    %c2_332 = arith.constant 2 : index
    %c0_333 = arith.constant 0 : index
    %c0_334 = arith.constant 0 : index
    %615 = vector.load %arg24[%c2_332, %c0_333, %c0_334] : memref<6x32x24xf32, #tpu.memory_space<vmem>>, vector<1x32x24xf32>
    %616 = vector.shape_cast %615 : vector<1x32x24xf32> to vector<32x24xf32>
    %cst_335 = arith.constant dense<0.000000e+00> : vector<17x24xf32>
    %617 = tpu.matmul %611, %616, %cst_335 {dimension_numbers = #tpu.dot_dimension_numbers<[1], [0], [0], [1], [0, 0, 1, 1], [], []>} : vector<17x32xf32>, vector<32x24xf32>, vector<17x24xf32> -> vector<17x24xf32>
    %c4_336 = arith.constant 4 : index
    %c0_337 = arith.constant 0 : index
    %c0_338 = arith.constant 0 : index
    %618 = vector.load %arg24[%c4_336, %c0_337, %c0_338] : memref<6x32x24xf32, #tpu.memory_space<vmem>>, vector<1x32x24xf32>
    %619 = vector.shape_cast %618 : vector<1x32x24xf32> to vector<32x24xf32>
    %cst_339 = arith.constant dense<0.000000e+00> : vector<17x24xf32>
    %620 = tpu.matmul %611, %619, %cst_339 {dimension_numbers = #tpu.dot_dimension_numbers<[1], [0], [0], [1], [0, 0, 1, 1], [], []>} : vector<17x32xf32>, vector<32x24xf32>, vector<17x24xf32> -> vector<17x24xf32>
    %cst_340 = arith.constant dense<0.000000e+00> : vector<17x17xf32>
    %621 = tpu.matmul %614, %617, %cst_340 {dimension_numbers = #tpu.dot_dimension_numbers<[1], [1], [0], [0], [0, 0, 1, 0], [], []>} : vector<17x24xf32>, vector<17x24xf32>, vector<17x17xf32> -> vector<17x17xf32>
    %cst_341 = arith.constant 0.204124153 : f32
    %622 = vector.broadcast %cst_341 : f32 to vector<17x17xf32>
    %623 = arith.mulf %621, %622 : vector<17x17xf32>
    %cst_342 = arith.constant dense<0xFF800000> : vector<17xf32>
    %624 = vector.multi_reduction <maximumf>, %623, %cst_342 [1] : vector<17x17xf32> to vector<17xf32>
    %625 = vector.shape_cast %624 : vector<17xf32> to vector<17x1xf32>
    %626 = vector.broadcast %625 : vector<17x1xf32> to vector<17x17xf32>
    %627 = arith.subf %623, %626 : vector<17x17xf32>
    %628 = math.exp %627 : vector<17x17xf32>
    %cst_343 = arith.constant dense<0.000000e+00> : vector<17xf32>
    %629 = vector.multi_reduction <add>, %628, %cst_343 [1] : vector<17x17xf32> to vector<17xf32>
    %630 = vector.shape_cast %629 : vector<17xf32> to vector<17x1xf32>
    %631 = tpu.reciprocal %630 {approx = true} : vector<17x1xf32> -> vector<17x1xf32>
    %632 = vector.broadcast %631 : vector<17x1xf32> to vector<17x17xf32>
    %633 = arith.mulf %628, %632 : vector<17x17xf32>
    %cst_344 = arith.constant dense<0.000000e+00> : vector<17x24xf32>
    %634 = tpu.matmul %633, %620, %cst_344 {dimension_numbers = #tpu.dot_dimension_numbers<[1], [0], [0], [1], [0, 0, 1, 1], [], []>} : vector<17x17xf32>, vector<17x24xf32>, vector<17x24xf32> -> vector<17x24xf32>
    %c1_345 = arith.constant 1 : index
    %c0_346 = arith.constant 0 : index
    %c0_347 = arith.constant 0 : index
    %635 = vector.load %arg24[%c1_345, %c0_346, %c0_347] : memref<6x32x24xf32, #tpu.memory_space<vmem>>, vector<1x32x24xf32>
    %636 = vector.shape_cast %635 : vector<1x32x24xf32> to vector<32x24xf32>
    %cst_348 = arith.constant dense<0.000000e+00> : vector<17x24xf32>
    %637 = tpu.matmul %611, %636, %cst_348 {dimension_numbers = #tpu.dot_dimension_numbers<[1], [0], [0], [1], [0, 0, 1, 1], [], []>} : vector<17x32xf32>, vector<32x24xf32>, vector<17x24xf32> -> vector<17x24xf32>
    %c3_349 = arith.constant 3 : index
    %c0_350 = arith.constant 0 : index
    %c0_351 = arith.constant 0 : index
    %638 = vector.load %arg24[%c3_349, %c0_350, %c0_351] : memref<6x32x24xf32, #tpu.memory_space<vmem>>, vector<1x32x24xf32>
    %639 = vector.shape_cast %638 : vector<1x32x24xf32> to vector<32x24xf32>
    %cst_352 = arith.constant dense<0.000000e+00> : vector<17x24xf32>
    %640 = tpu.matmul %611, %639, %cst_352 {dimension_numbers = #tpu.dot_dimension_numbers<[1], [0], [0], [1], [0, 0, 1, 1], [], []>} : vector<17x32xf32>, vector<32x24xf32>, vector<17x24xf32> -> vector<17x24xf32>
    %c5_353 = arith.constant 5 : index
    %c0_354 = arith.constant 0 : index
    %c0_355 = arith.constant 0 : index
    %641 = vector.load %arg24[%c5_353, %c0_354, %c0_355] : memref<6x32x24xf32, #tpu.memory_space<vmem>>, vector<1x32x24xf32>
    %642 = vector.shape_cast %641 : vector<1x32x24xf32> to vector<32x24xf32>
    %cst_356 = arith.constant dense<0.000000e+00> : vector<17x24xf32>
    %643 = tpu.matmul %611, %642, %cst_356 {dimension_numbers = #tpu.dot_dimension_numbers<[1], [0], [0], [1], [0, 0, 1, 1], [], []>} : vector<17x32xf32>, vector<32x24xf32>, vector<17x24xf32> -> vector<17x24xf32>
    %cst_357 = arith.constant dense<0.000000e+00> : vector<17x17xf32>
    %644 = tpu.matmul %637, %640, %cst_357 {dimension_numbers = #tpu.dot_dimension_numbers<[1], [1], [0], [0], [0, 0, 1, 0], [], []>} : vector<17x24xf32>, vector<17x24xf32>, vector<17x17xf32> -> vector<17x17xf32>
    %cst_358 = arith.constant 0.204124153 : f32
    %645 = vector.broadcast %cst_358 : f32 to vector<17x17xf32>
    %646 = arith.mulf %644, %645 : vector<17x17xf32>
    %cst_359 = arith.constant dense<0xFF800000> : vector<17xf32>
    %647 = vector.multi_reduction <maximumf>, %646, %cst_359 [1] : vector<17x17xf32> to vector<17xf32>
    %648 = vector.shape_cast %647 : vector<17xf32> to vector<17x1xf32>
    %649 = vector.broadcast %648 : vector<17x1xf32> to vector<17x17xf32>
    %650 = arith.subf %646, %649 : vector<17x17xf32>
    %651 = math.exp %650 : vector<17x17xf32>
    %cst_360 = arith.constant dense<0.000000e+00> : vector<17xf32>
    %652 = vector.multi_reduction <add>, %651, %cst_360 [1] : vector<17x17xf32> to vector<17xf32>
    %653 = vector.shape_cast %652 : vector<17xf32> to vector<17x1xf32>
    %654 = tpu.reciprocal %653 {approx = true} : vector<17x1xf32> -> vector<17x1xf32>
    %655 = vector.broadcast %654 : vector<17x1xf32> to vector<17x17xf32>
    %656 = arith.mulf %651, %655 : vector<17x17xf32>
    %cst_361 = arith.constant dense<0.000000e+00> : vector<17x24xf32>
    %657 = tpu.matmul %656, %643, %cst_361 {dimension_numbers = #tpu.dot_dimension_numbers<[1], [0], [0], [1], [0, 0, 1, 1], [], []>} : vector<17x17xf32>, vector<17x24xf32>, vector<17x24xf32> -> vector<17x24xf32>
    %cst_362 = arith.constant dense<0.000000e+00> : vector<17xf32>
    %658 = vector.multi_reduction <add>, %634, %cst_362 [1] : vector<17x24xf32> to vector<17xf32>
    %659 = vector.shape_cast %658 : vector<17xf32> to vector<17x1xf32>
    %cst_363 = arith.constant 0.000000e+00 : f32
    %660 = vector.broadcast %cst_363 : f32 to vector<17x1xf32>
    %661 = arith.addf %660, %659 : vector<17x1xf32>
    %cst_364 = arith.constant dense<0.000000e+00> : vector<17xf32>
    %662 = vector.multi_reduction <add>, %657, %cst_364 [1] : vector<17x24xf32> to vector<17xf32>
    %663 = vector.shape_cast %662 : vector<17xf32> to vector<17x1xf32>
    %664 = arith.addf %661, %663 : vector<17x1xf32>
    %cst_365 = arith.constant 4.800000e+01 : f32
    %665 = vector.broadcast %cst_365 : f32 to vector<17x1xf32>
    %666 = arith.divf %664, %665 : vector<17x1xf32>
    %667 = vector.broadcast %666 : vector<17x1xf32> to vector<17x24xf32>
    %668 = arith.subf %634, %667 : vector<17x24xf32>
    %669 = vector.broadcast %666 : vector<17x1xf32> to vector<17x24xf32>
    %670 = arith.subf %657, %669 : vector<17x24xf32>
    %671 = arith.mulf %668, %668 : vector<17x24xf32>
    %cst_366 = arith.constant dense<0.000000e+00> : vector<17xf32>
    %672 = vector.multi_reduction <add>, %671, %cst_366 [1] : vector<17x24xf32> to vector<17xf32>
    %673 = vector.shape_cast %672 : vector<17xf32> to vector<17x1xf32>
    %cst_367 = arith.constant 0.000000e+00 : f32
    %674 = vector.broadcast %cst_367 : f32 to vector<17x1xf32>
    %675 = arith.addf %674, %673 : vector<17x1xf32>
    %676 = arith.mulf %670, %670 : vector<17x24xf32>
    %cst_368 = arith.constant dense<0.000000e+00> : vector<17xf32>
    %677 = vector.multi_reduction <add>, %676, %cst_368 [1] : vector<17x24xf32> to vector<17xf32>
    %678 = vector.shape_cast %677 : vector<17xf32> to vector<17x1xf32>
    %679 = arith.addf %675, %678 : vector<17x1xf32>
    %cst_369 = arith.constant 4.800000e+01 : f32
    %680 = vector.broadcast %cst_369 : f32 to vector<17x1xf32>
    %681 = arith.divf %679, %680 : vector<17x1xf32>
    %cst_370 = arith.constant 9.99999974E-6 : f32
    %682 = vector.broadcast %cst_370 : f32 to vector<17x1xf32>
    %683 = arith.addf %681, %682 : vector<17x1xf32>
    %684 = math.rsqrt %683 : vector<17x1xf32>
    %c0_371 = arith.constant 0 : index
    %c0_372 = arith.constant 0 : index
    %685 = vector.load %arg28[%c0_371, %c0_372] : memref<1x64xf32, #tpu.memory_space<vmem>>, vector<1x64xf32>
    %686 = vector.broadcast %684 : vector<17x1xf32> to vector<17x24xf32>
    %687 = arith.mulf %668, %686 : vector<17x24xf32>
    %c0_373 = arith.constant 0 : index
    %c0_374 = arith.constant 0 : index
    %c0_375 = arith.constant 0 : index
    %688 = vector.load %arg25[%c0_373, %c0_374, %c0_375] : memref<2x1x24xf32, #tpu.memory_space<vmem>>, vector<1x1x24xf32>
    %689 = vector.shape_cast %688 : vector<1x1x24xf32> to vector<1x24xf32>
    %690 = vector.broadcast %689 : vector<1x24xf32> to vector<17x24xf32>
    %691 = arith.mulf %687, %690 : vector<17x24xf32>
    %c0_376 = arith.constant 0 : index
    %c0_377 = arith.constant 0 : index
    %c0_378 = arith.constant 0 : index
    %692 = vector.load %arg26[%c0_376, %c0_377, %c0_378] : memref<2x1x24xf32, #tpu.memory_space<vmem>>, vector<1x1x24xf32>
    %693 = vector.shape_cast %692 : vector<1x1x24xf32> to vector<1x24xf32>
    %694 = vector.broadcast %693 : vector<1x24xf32> to vector<17x24xf32>
    %695 = arith.addf %691, %694 : vector<17x24xf32>
    %c0_379 = arith.constant 0 : index
    %c0_380 = arith.constant 0 : index
    %c0_381 = arith.constant 0 : index
    %696 = vector.load %arg27[%c0_379, %c0_380, %c0_381] : memref<2x24x64xf32, #tpu.memory_space<vmem>>, vector<1x24x64xf32>
    %697 = vector.shape_cast %696 : vector<1x24x64xf32> to vector<24x64xf32>
    %cst_382 = arith.constant dense<0.000000e+00> : vector<17x64xf32>
    %698 = tpu.matmul %695, %697, %cst_382 {dimension_numbers = #tpu.dot_dimension_numbers<[1], [0], [0], [1], [0, 0, 1, 1], [], []>} : vector<17x24xf32>, vector<24x64xf32>, vector<17x64xf32> -> vector<17x64xf32>
    %699 = vector.broadcast %685 : vector<1x64xf32> to vector<17x64xf32>
    %700 = arith.addf %699, %698 : vector<17x64xf32>
    %701 = vector.broadcast %684 : vector<17x1xf32> to vector<17x24xf32>
    %702 = arith.mulf %670, %701 : vector<17x24xf32>
    %c1_383 = arith.constant 1 : index
    %c0_384 = arith.constant 0 : index
    %c0_385 = arith.constant 0 : index
    %703 = vector.load %arg25[%c1_383, %c0_384, %c0_385] : memref<2x1x24xf32, #tpu.memory_space<vmem>>, vector<1x1x24xf32>
    %704 = vector.shape_cast %703 : vector<1x1x24xf32> to vector<1x24xf32>
    %705 = vector.broadcast %704 : vector<1x24xf32> to vector<17x24xf32>
    %706 = arith.mulf %702, %705 : vector<17x24xf32>
    %c1_386 = arith.constant 1 : index
    %c0_387 = arith.constant 0 : index
    %c0_388 = arith.constant 0 : index
    %707 = vector.load %arg26[%c1_386, %c0_387, %c0_388] : memref<2x1x24xf32, #tpu.memory_space<vmem>>, vector<1x1x24xf32>
    %708 = vector.shape_cast %707 : vector<1x1x24xf32> to vector<1x24xf32>
    %709 = vector.broadcast %708 : vector<1x24xf32> to vector<17x24xf32>
    %710 = arith.addf %706, %709 : vector<17x24xf32>
    %c1_389 = arith.constant 1 : index
    %c0_390 = arith.constant 0 : index
    %c0_391 = arith.constant 0 : index
    %711 = vector.load %arg27[%c1_389, %c0_390, %c0_391] : memref<2x24x64xf32, #tpu.memory_space<vmem>>, vector<1x24x64xf32>
    %712 = vector.shape_cast %711 : vector<1x24x64xf32> to vector<24x64xf32>
    %cst_392 = arith.constant dense<0.000000e+00> : vector<17x64xf32>
    %713 = tpu.matmul %710, %712, %cst_392 {dimension_numbers = #tpu.dot_dimension_numbers<[1], [0], [0], [1], [0, 0, 1, 1], [], []>} : vector<17x24xf32>, vector<24x64xf32>, vector<17x64xf32> -> vector<17x64xf32>
    %714 = arith.addf %700, %713 : vector<17x64xf32>
    %cst_393 = arith.constant 0.636619746 : f32
    %715 = math.sqrt %cst_393 : f32
    %cst_394 = arith.constant 5.000000e-01 : f32
    %716 = vector.broadcast %cst_394 : f32 to vector<17x64xf32>
    %717 = arith.mulf %716, %714 : vector<17x64xf32>
    %cst_395 = arith.constant 4.471500e-02 : f32
    %718 = vector.broadcast %cst_395 : f32 to vector<17x64xf32>
    %719 = arith.mulf %718, %714 : vector<17x64xf32>
    %720 = arith.mulf %719, %714 : vector<17x64xf32>
    %721 = arith.mulf %720, %714 : vector<17x64xf32>
    %722 = arith.addf %714, %721 : vector<17x64xf32>
    %723 = vector.broadcast %715 : f32 to vector<17x64xf32>
    %724 = arith.mulf %723, %722 : vector<17x64xf32>
    %725 = math.tanh %724 : vector<17x64xf32>
    %cst_396 = arith.constant 1.000000e+00 : f32
    %726 = vector.broadcast %cst_396 : f32 to vector<17x64xf32>
    %727 = arith.addf %726, %725 : vector<17x64xf32>
    %728 = arith.mulf %717, %727 : vector<17x64xf32>
    %c0_397 = arith.constant 0 : index
    %c0_398 = arith.constant 0 : index
    %729 = vector.load %arg29[%c0_397, %c0_398] : memref<64x48xf32, #tpu.memory_space<vmem>>, vector<64x48xf32>
    %cst_399 = arith.constant dense<0.000000e+00> : vector<17x48xf32>
    %730 = tpu.matmul %728, %729, %cst_399 {dimension_numbers = #tpu.dot_dimension_numbers<[1], [0], [0], [1], [0, 0, 1, 1], [], []>} : vector<17x64xf32>, vector<64x48xf32>, vector<17x48xf32> -> vector<17x48xf32>
    %c0_400 = arith.constant 0 : index
    %c0_401 = arith.constant 0 : index
    %731 = vector.load %arg30[%c0_400, %c0_401] : memref<1x48xf32, #tpu.memory_space<vmem>>, vector<1x48xf32>
    %732 = vector.broadcast %731 : vector<1x48xf32> to vector<17x48xf32>
    %733 = arith.addf %730, %732 : vector<17x48xf32>
    %cst_402 = arith.constant dense<0.000000e+00> : vector<17xf32>
    %734 = vector.multi_reduction <add>, %733, %cst_402 [1] : vector<17x48xf32> to vector<17xf32>
    %735 = vector.shape_cast %734 : vector<17xf32> to vector<17x1xf32>
    %cst_403 = arith.constant 4.800000e+01 : f32
    %736 = vector.broadcast %cst_403 : f32 to vector<17x1xf32>
    %737 = arith.divf %735, %736 : vector<17x1xf32>
    %738 = vector.broadcast %737 : vector<17x1xf32> to vector<17x48xf32>
    %739 = arith.subf %733, %738 : vector<17x48xf32>
    %740 = arith.mulf %739, %739 : vector<17x48xf32>
    %cst_404 = arith.constant dense<0.000000e+00> : vector<17xf32>
    %741 = vector.multi_reduction <add>, %740, %cst_404 [1] : vector<17x48xf32> to vector<17xf32>
    %742 = vector.shape_cast %741 : vector<17xf32> to vector<17x1xf32>
    %cst_405 = arith.constant 4.800000e+01 : f32
    %743 = vector.broadcast %cst_405 : f32 to vector<17x1xf32>
    %744 = arith.divf %742, %743 : vector<17x1xf32>
    %cst_406 = arith.constant 9.99999974E-6 : f32
    %745 = vector.broadcast %cst_406 : f32 to vector<17x1xf32>
    %746 = arith.addf %744, %745 : vector<17x1xf32>
    %747 = math.rsqrt %746 : vector<17x1xf32>
    %748 = vector.broadcast %747 : vector<17x1xf32> to vector<17x48xf32>
    %749 = arith.mulf %739, %748 : vector<17x48xf32>
    %c0_407 = arith.constant 0 : index
    %c0_408 = arith.constant 0 : index
    %750 = vector.load %arg31[%c0_407, %c0_408] : memref<1x48xf32, #tpu.memory_space<vmem>>, vector<1x48xf32>
    %751 = vector.broadcast %750 : vector<1x48xf32> to vector<17x48xf32>
    %752 = arith.mulf %749, %751 : vector<17x48xf32>
    %c0_409 = arith.constant 0 : index
    %c0_410 = arith.constant 0 : index
    %753 = vector.load %arg32[%c0_409, %c0_410] : memref<1x48xf32, #tpu.memory_space<vmem>>, vector<1x48xf32>
    %754 = vector.broadcast %753 : vector<1x48xf32> to vector<17x48xf32>
    %755 = arith.addf %752, %754 : vector<17x48xf32>
    %756 = arith.truncf %755 : vector<17x48xf32> to vector<17x48xbf16>
    %c0_411 = arith.constant 0 : index
    %c0_412 = arith.constant 0 : index
    %757 = vector.load %arg33[%c0_411, %c0_412] : memref<48x512xbf16, #tpu.memory_space<vmem>>, vector<48x512xbf16>
    %cst_413 = arith.constant dense<0.000000e+00> : vector<17x512xf32>
    %758 = tpu.matmul %756, %757, %cst_413 {dimension_numbers = #tpu.dot_dimension_numbers<[1], [0], [0], [1], [0, 0, 1, 1], [], []>} : vector<17x48xbf16>, vector<48x512xbf16>, vector<17x512xf32> -> vector<17x512xf32>
    %c0_414 = arith.constant 0 : index
    %c0_415 = arith.constant 0 : index
    %759 = vector.load %arg34[%c0_414, %c0_415] : memref<1x512xf32, #tpu.memory_space<vmem>>, vector<1x512xf32>
    %760 = vector.broadcast %759 : vector<1x512xf32> to vector<17x512xf32>
    %761 = arith.addf %758, %760 : vector<17x512xf32>
    %c1_416 = arith.constant 1 : index
    %c0_417 = arith.constant 0 : index
    %c0_418 = arith.constant 0 : index
    %762 = vector.load %arg35[%c1_416, %c0_417, %c0_418] : memref<2x17x512xf32, #tpu.memory_space<vmem>>, vector<1x17x512xf32>
    %763 = vector.shape_cast %762 : vector<1x17x512xf32> to vector<17x512xf32>
    %764 = vector.shape_cast %761 : vector<17x512xf32> to vector<1x17x512xf32>
    tpu.vector_store %arg35[%c1_416, %c0_417, %c0_418], %764 {strides = array<i32>} : memref<2x17x512xf32, #tpu.memory_space<vmem>>, vector<1x17x512xf32>,
    return
  }
}

module attributes {stable_mosaic.version = 11 : i64} {
  func.func @_conv_tap_kernel(%arg0: i32, %arg1: i32, %arg2: memref<1x32x512xbf16, #tpu.memory_space<vmem>>, %arg3: memref<1x512x512xbf16, #tpu.memory_space<vmem>>, %arg4: memref<1x512xf32, #tpu.memory_space<vmem>>, %arg5: memref<1x512xf32, #tpu.memory_space<vmem>>, %arg6: memref<32x512xf32, #tpu.memory_space<vmem>>, %arg7: memref<32x512xf32, #tpu.memory_space<vmem>>) attributes {dimension_semantics = [#tpu.dimension_semantics<parallel>, #tpu.dimension_semantics<arbitrary>], iteration_bounds = array<i64: 1, 9>, scalar_prefetch = 0 : i64, scratch_operands = 1 : i64, tpu.core_type = #tpu.core_type<tc>, window_params = [{transform_indices = @transform_0, window_bounds = array<i64: 1, 32, 512>}, {transform_indices = @transform_1, window_bounds = array<i64: 1, 512, 512>}, {transform_indices = @transform_2, window_bounds = array<i64: 1, 512>}, {transform_indices = @transform_3, window_bounds = array<i64: 1, 512>}, {transform_indices = @transform_4, window_bounds = array<i64: 32, 512>}]} {
    %c0_i32 = arith.constant 0 : i32
    %0 = arith.cmpi eq, %arg1, %c0_i32 : i32
    %1 = arith.extui %0 : i1 to i32
    %c0_i32_0 = arith.constant 0 : i32
    %2 = arith.cmpi ne, %1, %c0_i32_0 : i32
    scf.if %2 {
      %cst_11 = arith.constant 0.000000e+00 : f32
      %14 = vector.broadcast %cst_11 : f32 to vector<32x512xf32>
      %c0_12 = arith.constant 0 : index
      %c0_13 = arith.constant 0 : index
      %15 = vector.load %arg7[%c0_12, %c0_13] : memref<32x512xf32, #tpu.memory_space<vmem>>, vector<32x512xf32>
      tpu.vector_store %arg7[%c0_12, %c0_13], %14 {strides = array<i32>} : memref<32x512xf32, #tpu.memory_space<vmem>>, vector<32x512xf32>,
    } else {
    }
    %c0 = arith.constant 0 : index
    %c0_1 = arith.constant 0 : index
    %3 = vector.load %arg7[%c0, %c0_1] : memref<32x512xf32, #tpu.memory_space<vmem>>, vector<32x512xf32>
    %c0_2 = arith.constant 0 : index
    %c0_3 = arith.constant 0 : index
    %c0_4 = arith.constant 0 : index
    %4 = vector.load %arg2[%c0_2, %c0_3, %c0_4] : memref<1x32x512xbf16, #tpu.memory_space<vmem>>, vector<1x32x512xbf16>
    %5 = vector.shape_cast %4 : vector<1x32x512xbf16> to vector<32x512xbf16>
    %c0_5 = arith.constant 0 : index
    %c0_6 = arith.constant 0 : index
    %c0_7 = arith.constant 0 : index
    %6 = vector.load %arg3[%c0_5, %c0_6, %c0_7] : memref<1x512x512xbf16, #tpu.memory_space<vmem>>, vector<1x512x512xbf16>
    %7 = vector.shape_cast %6 : vector<1x512x512xbf16> to vector<512x512xbf16>
    %cst = arith.constant dense<0.000000e+00> : vector<32x512xf32>
    %8 = tpu.matmul %5, %7, %cst {dimension_numbers = #tpu.dot_dimension_numbers<[1], [0], [0], [1], [0, 0, 1, 1], [], []>} : vector<32x512xbf16>, vector<512x512xbf16>, vector<32x512xf32> -> vector<32x512xf32>
    %9 = arith.addf %3, %8 : vector<32x512xf32>
    %c0_8 = arith.constant 0 : index
    %c0_9 = arith.constant 0 : index
    %10 = vector.load %arg7[%c0_8, %c0_9] : memref<32x512xf32, #tpu.memory_space<vmem>>, vector<32x512xf32>
    tpu.vector_store %arg7[%c0_8, %c0_9], %9 {strides = array<i32>} : memref<32x512xf32, #tpu.memory_space<vmem>>, vector<32x512xf32>,
    %c8_i32 = arith.constant 8 : i32
    %11 = arith.cmpi eq, %arg1, %c8_i32 : i32
    %12 = arith.extui %11 : i1 to i32
    %c0_i32_10 = arith.constant 0 : i32
    %13 = arith.cmpi ne, %12, %c0_i32_10 : i32
    scf.if %13 {
      %c0_11 = arith.constant 0 : index
      %c0_12 = arith.constant 0 : index
      %14 = vector.load %arg7[%c0_11, %c0_12] : memref<32x512xf32, #tpu.memory_space<vmem>>, vector<32x512xf32>
      %c0_13 = arith.constant 0 : index
      %c0_14 = arith.constant 0 : index
      %15 = vector.load %arg4[%c0_13, %c0_14] : memref<1x512xf32, #tpu.memory_space<vmem>>, vector<1x512xf32>
      %16 = vector.broadcast %15 : vector<1x512xf32> to vector<32x512xf32>
      %17 = arith.mulf %14, %16 : vector<32x512xf32>
      %c0_15 = arith.constant 0 : index
      %c0_16 = arith.constant 0 : index
      %18 = vector.load %arg5[%c0_15, %c0_16] : memref<1x512xf32, #tpu.memory_space<vmem>>, vector<1x512xf32>
      %19 = vector.broadcast %18 : vector<1x512xf32> to vector<32x512xf32>
      %20 = arith.addf %17, %19 : vector<32x512xf32>
      %cst_17 = arith.constant 0.636619746 : f32
      %21 = math.sqrt %cst_17 : f32
      %cst_18 = arith.constant 5.000000e-01 : f32
      %22 = vector.broadcast %cst_18 : f32 to vector<32x512xf32>
      %23 = arith.mulf %22, %20 : vector<32x512xf32>
      %cst_19 = arith.constant 4.471500e-02 : f32
      %24 = vector.broadcast %cst_19 : f32 to vector<32x512xf32>
      %25 = arith.mulf %24, %20 : vector<32x512xf32>
      %26 = arith.mulf %25, %20 : vector<32x512xf32>
      %27 = arith.mulf %26, %20 : vector<32x512xf32>
      %28 = arith.addf %20, %27 : vector<32x512xf32>
      %29 = vector.broadcast %21 : f32 to vector<32x512xf32>
      %30 = arith.mulf %29, %28 : vector<32x512xf32>
      %31 = math.tanh %30 : vector<32x512xf32>
      %cst_20 = arith.constant 1.000000e+00 : f32
      %32 = vector.broadcast %cst_20 : f32 to vector<32x512xf32>
      %33 = arith.addf %32, %31 : vector<32x512xf32>
      %34 = arith.mulf %23, %33 : vector<32x512xf32>
      %c0_21 = arith.constant 0 : index
      %c0_22 = arith.constant 0 : index
      %35 = vector.load %arg6[%c0_21, %c0_22] : memref<32x512xf32, #tpu.memory_space<vmem>>, vector<32x512xf32>
      tpu.vector_store %arg6[%c0_21, %c0_22], %34 {strides = array<i32>} : memref<32x512xf32, #tpu.memory_space<vmem>>, vector<32x512xf32>,
    } else {
    }
    return
  }
  func.func @transform_0(%arg0: i32, %arg1: i32) -> (i32, i32, i32) {
    %c0_i32 = arith.constant 0 : i32
    %c0_i32_0 = arith.constant 0 : i32
    %c0_i32_1 = arith.constant 0 : i32
    return %arg1, %c0_i32, %c0_i32_0 : i32, i32, i32
  }
  func.func @transform_1(%arg0: i32, %arg1: i32) -> (i32, i32, i32) {
    %c0_i32 = arith.constant 0 : i32
    %c0_i32_0 = arith.constant 0 : i32
    return %arg1, %c0_i32, %arg0 : i32, i32, i32
  }
  func.func @transform_2(%arg0: i32, %arg1: i32) -> (i32, i32) {
    %c0_i32 = arith.constant 0 : i32
    %c0_i32_0 = arith.constant 0 : i32
    return %c0_i32, %arg0 : i32, i32
  }
  func.func @transform_3(%arg0: i32, %arg1: i32) -> (i32, i32) {
    %c0_i32 = arith.constant 0 : i32
    %c0_i32_0 = arith.constant 0 : i32
    return %c0_i32, %arg0 : i32, i32
  }
  func.func @transform_4(%arg0: i32, %arg1: i32) -> (i32, i32) {
    %c0_i32 = arith.constant 0 : i32
    %c0_i32_0 = arith.constant 0 : i32
    return %c0_i32, %arg0 : i32, i32
  }
}

module attributes {stable_mosaic.version = 11 : i64} {
  func.func @_conv_tap_kernel(%arg0: i32, %arg1: i32, %arg2: memref<1x32x512xbf16, #tpu.memory_space<vmem>>, %arg3: memref<1x512x512xbf16, #tpu.memory_space<vmem>>, %arg4: memref<1x512xf32, #tpu.memory_space<vmem>>, %arg5: memref<1x512xf32, #tpu.memory_space<vmem>>, %arg6: memref<32x512xf32, #tpu.memory_space<vmem>>, %arg7: memref<32x512xf32, #tpu.memory_space<vmem>>, %arg8: memref<32x512xf32, #tpu.memory_space<vmem>>) attributes {dimension_semantics = [#tpu.dimension_semantics<parallel>, #tpu.dimension_semantics<arbitrary>], iteration_bounds = array<i64: 1, 9>, scalar_prefetch = 0 : i64, scratch_operands = 1 : i64, tpu.core_type = #tpu.core_type<tc>, window_params = [{transform_indices = @transform_0, window_bounds = array<i64: 1, 32, 512>}, {transform_indices = @transform_1, window_bounds = array<i64: 1, 512, 512>}, {transform_indices = @transform_2, window_bounds = array<i64: 1, 512>}, {transform_indices = @transform_3, window_bounds = array<i64: 1, 512>}, {transform_indices = @transform_4, window_bounds = array<i64: 32, 512>}, {transform_indices = @transform_5, window_bounds = array<i64: 32, 512>}]} {
    %c0_i32 = arith.constant 0 : i32
    %0 = arith.cmpi eq, %arg1, %c0_i32 : i32
    %1 = arith.extui %0 : i1 to i32
    %c0_i32_0 = arith.constant 0 : i32
    %2 = arith.cmpi ne, %1, %c0_i32_0 : i32
    scf.if %2 {
      %cst_11 = arith.constant 0.000000e+00 : f32
      %14 = vector.broadcast %cst_11 : f32 to vector<32x512xf32>
      %c0_12 = arith.constant 0 : index
      %c0_13 = arith.constant 0 : index
      %15 = vector.load %arg8[%c0_12, %c0_13] : memref<32x512xf32, #tpu.memory_space<vmem>>, vector<32x512xf32>
      tpu.vector_store %arg8[%c0_12, %c0_13], %14 {strides = array<i32>} : memref<32x512xf32, #tpu.memory_space<vmem>>, vector<32x512xf32>,
    } else {
    }
    %c0 = arith.constant 0 : index
    %c0_1 = arith.constant 0 : index
    %3 = vector.load %arg8[%c0, %c0_1] : memref<32x512xf32, #tpu.memory_space<vmem>>, vector<32x512xf32>
    %c0_2 = arith.constant 0 : index
    %c0_3 = arith.constant 0 : index
    %c0_4 = arith.constant 0 : index
    %4 = vector.load %arg2[%c0_2, %c0_3, %c0_4] : memref<1x32x512xbf16, #tpu.memory_space<vmem>>, vector<1x32x512xbf16>
    %5 = vector.shape_cast %4 : vector<1x32x512xbf16> to vector<32x512xbf16>
    %c0_5 = arith.constant 0 : index
    %c0_6 = arith.constant 0 : index
    %c0_7 = arith.constant 0 : index
    %6 = vector.load %arg3[%c0_5, %c0_6, %c0_7] : memref<1x512x512xbf16, #tpu.memory_space<vmem>>, vector<1x512x512xbf16>
    %7 = vector.shape_cast %6 : vector<1x512x512xbf16> to vector<512x512xbf16>
    %cst = arith.constant dense<0.000000e+00> : vector<32x512xf32>
    %8 = tpu.matmul %5, %7, %cst {dimension_numbers = #tpu.dot_dimension_numbers<[1], [0], [0], [1], [0, 0, 1, 1], [], []>} : vector<32x512xbf16>, vector<512x512xbf16>, vector<32x512xf32> -> vector<32x512xf32>
    %9 = arith.addf %3, %8 : vector<32x512xf32>
    %c0_8 = arith.constant 0 : index
    %c0_9 = arith.constant 0 : index
    %10 = vector.load %arg8[%c0_8, %c0_9] : memref<32x512xf32, #tpu.memory_space<vmem>>, vector<32x512xf32>
    tpu.vector_store %arg8[%c0_8, %c0_9], %9 {strides = array<i32>} : memref<32x512xf32, #tpu.memory_space<vmem>>, vector<32x512xf32>,
    %c8_i32 = arith.constant 8 : i32
    %11 = arith.cmpi eq, %arg1, %c8_i32 : i32
    %12 = arith.extui %11 : i1 to i32
    %c0_i32_10 = arith.constant 0 : i32
    %13 = arith.cmpi ne, %12, %c0_i32_10 : i32
    scf.if %13 {
      %c0_11 = arith.constant 0 : index
      %c0_12 = arith.constant 0 : index
      %14 = vector.load %arg8[%c0_11, %c0_12] : memref<32x512xf32, #tpu.memory_space<vmem>>, vector<32x512xf32>
      %c0_13 = arith.constant 0 : index
      %c0_14 = arith.constant 0 : index
      %15 = vector.load %arg4[%c0_13, %c0_14] : memref<1x512xf32, #tpu.memory_space<vmem>>, vector<1x512xf32>
      %16 = vector.broadcast %15 : vector<1x512xf32> to vector<32x512xf32>
      %17 = arith.mulf %14, %16 : vector<32x512xf32>
      %c0_15 = arith.constant 0 : index
      %c0_16 = arith.constant 0 : index
      %18 = vector.load %arg5[%c0_15, %c0_16] : memref<1x512xf32, #tpu.memory_space<vmem>>, vector<1x512xf32>
      %19 = vector.broadcast %18 : vector<1x512xf32> to vector<32x512xf32>
      %20 = arith.addf %17, %19 : vector<32x512xf32>
      %c0_17 = arith.constant 0 : index
      %c0_18 = arith.constant 0 : index
      %21 = vector.load %arg6[%c0_17, %c0_18] : memref<32x512xf32, #tpu.memory_space<vmem>>, vector<32x512xf32>
      %22 = arith.addf %20, %21 : vector<32x512xf32>
      %cst_19 = arith.constant 0.636619746 : f32
      %23 = math.sqrt %cst_19 : f32
      %cst_20 = arith.constant 5.000000e-01 : f32
      %24 = vector.broadcast %cst_20 : f32 to vector<32x512xf32>
      %25 = arith.mulf %24, %22 : vector<32x512xf32>
      %cst_21 = arith.constant 4.471500e-02 : f32
      %26 = vector.broadcast %cst_21 : f32 to vector<32x512xf32>
      %27 = arith.mulf %26, %22 : vector<32x512xf32>
      %28 = arith.mulf %27, %22 : vector<32x512xf32>
      %29 = arith.mulf %28, %22 : vector<32x512xf32>
      %30 = arith.addf %22, %29 : vector<32x512xf32>
      %31 = vector.broadcast %23 : f32 to vector<32x512xf32>
      %32 = arith.mulf %31, %30 : vector<32x512xf32>
      %33 = math.tanh %32 : vector<32x512xf32>
      %cst_22 = arith.constant 1.000000e+00 : f32
      %34 = vector.broadcast %cst_22 : f32 to vector<32x512xf32>
      %35 = arith.addf %34, %33 : vector<32x512xf32>
      %36 = arith.mulf %25, %35 : vector<32x512xf32>
      %c0_23 = arith.constant 0 : index
      %c0_24 = arith.constant 0 : index
      %37 = vector.load %arg7[%c0_23, %c0_24] : memref<32x512xf32, #tpu.memory_space<vmem>>, vector<32x512xf32>
      tpu.vector_store %arg7[%c0_23, %c0_24], %36 {strides = array<i32>} : memref<32x512xf32, #tpu.memory_space<vmem>>, vector<32x512xf32>,
    } else {
    }
    return
  }
  func.func @transform_0(%arg0: i32, %arg1: i32) -> (i32, i32, i32) {
    %c0_i32 = arith.constant 0 : i32
    %c0_i32_0 = arith.constant 0 : i32
    %c0_i32_1 = arith.constant 0 : i32
    return %arg1, %c0_i32, %c0_i32_0 : i32, i32, i32
  }
  func.func @transform_1(%arg0: i32, %arg1: i32) -> (i32, i32, i32) {
    %c0_i32 = arith.constant 0 : i32
    %c0_i32_0 = arith.constant 0 : i32
    return %arg1, %c0_i32, %arg0 : i32, i32, i32
  }
  func.func @transform_2(%arg0: i32, %arg1: i32) -> (i32, i32) {
    %c0_i32 = arith.constant 0 : i32
    %c0_i32_0 = arith.constant 0 : i32
    return %c0_i32, %arg0 : i32, i32
  }
  func.func @transform_3(%arg0: i32, %arg1: i32) -> (i32, i32) {
    %c0_i32 = arith.constant 0 : i32
    %c0_i32_0 = arith.constant 0 : i32
    return %c0_i32, %arg0 : i32, i32
  }
  func.func @transform_4(%arg0: i32, %arg1: i32) -> (i32, i32) {
    %c0_i32 = arith.constant 0 : i32
    %c0_i32_0 = arith.constant 0 : i32
    return %c0_i32, %arg0 : i32, i32
  }
  func.func @transform_5(%arg0: i32, %arg1: i32) -> (i32, i32) {
    %c0_i32 = arith.constant 0 : i32
    %c0_i32_0 = arith.constant 0 : i32
    return %c0_i32, %arg0 : i32, i32
  }
}

</mosaic_0001>

<bundles_post_ra>
// kernel: vit_forward.5
= control target key start
LH: loop header
LB: loop body
LE: loop exit
PB: predicated region body
PF: predicated region fallthrough
CT: control target
= control target key end

     0   :  { %s2716_s18 = smov 0   ;;  %s2718_s19 = smov 0   ;;  %s3282_s0 = inlined_call_operand.vmem [shape: bf16[9,32,512], index: 0, kind: input, shape index: {}]   ;;  %s3283_s1 = inlined_call_operand.vmem [shape: bf16[9,512,512], index: 1, kind: input, shape index: {}]   ;;  %s3284_s2 = inlined_call_operand.vmem [shape: f32[1,512], index: 2, kind: input, shape index: {}]   ;;  %s3285_s3 = inlined_call_operand.vmem [shape: f32[1,512], index: 3, kind: input, shape index: {}]   ;;  %s3286_s4 = inlined_call_operand.vmem [shape: f32[32,512], index: 4, kind: input, shape index: {}]   ;;  %s3287_s5 = inlined_call_operand.vmem [shape: f32[32,512], index: 5, kind: output, shape index: {}]  }
   0x1   :  { %s2720_s20 = smov 0  }
   0x2 LB: > { %s24_s21 = sadd.s32 1, %s2679_s19  ;;  %p1911_p0 = scmp.ge.s32.totalorder %s2683_s20, 1  ;;  %s2683_s20 = sphi %s2720_s20, %s15_s20   ;;  %s2679_s19 = sphi %s2718_s19, %s3289_s19   ;;  %s2675_s18 = sphi %s2716_s18, %s3288_s18  }
   0x3   : > { %p25_p1 = scmp.ge.s32.totalorder %s24_s21, 9  ;;  %p247_p2 = scmp.lt.s32.totalorder %s2683_s20, 10 }
   0x5   : > { %s3291_s21 = smov (%p25_p1, %s24_s21), 0  ;;  %p248_p3 = pnand %p1911_p0, %p247_p2 }
   0x6   : > { %p297_p4 = scmp.lt.s32.totalorder (!%p248_p3), %s2675_s18, 8  ;;  %p1916_p5 = scmp.ne.s32.totalorder (!%p248_p3), %s2675_s18, 0 }
   0x7   : > { %251 = sbr.rel (%p248_p3) target bundleno = 396 (0x18c), region = 40 }
   0xc   : > { %s298_s22 = scalar_select %p297_p4, %s2675_s18, 8 }
   0xd   : > { %337 = sbr.rel (%p1916_p5) target bundleno = 35 (0x23), region = 44 }
   0xe   : > { %s2466_s23 = sshll.u32 %s298_s22, 6  ;;  %s2467_s24 = sshll.u32 %s298_s22, 10 }
   0xf   : > { %s2741_s27 = scalar_lea.vmem %s3282_s0, %s2466_s23  ;;  %s2746_s30 = scalar_lea.vmem %s3283_s1, %s2467_s24 }
  0x12   : > { %v2685_v0 = vmov 0.0  }
  0x13   : > { %338 = vst [vmem:[#allocation2 + $0x30] sm:$0xff] %v2685_v0 }
  0x14   : > { %339 = vst [vmem:[#allocation2] sm:$0xff] %v2685_v0 }
  0x15   : > { %340 = vst [vmem:[#allocation2 + $0x58] sm:$0xff] %v2685_v0 }
  0x16   : > { %341 = vst [vmem:[#allocation2 + $0x18] sm:$0xff] %v2685_v0 }
  0x17   : > { %342 = vst [vmem:[#allocation2 + $0x50] sm:$0xff] %v2685_v0 }
  0x18   : > { %343 = vst [vmem:[#allocation2 + $0x68] sm:$0xff] %v2685_v0 }
  0x19   : > { %344 = vst [vmem:[#allocation2 + $0x8] sm:$0xff] %v2685_v0 }
  0x1a   : > { %345 = vst [vmem:[#allocation2 + $0x48] sm:$0xff] %v2685_v0 }
  0x1b   : > { %346 = vst [vmem:[#allocation2 + $0x40] sm:$0xff] %v2685_v0 }
  0x1c   : > { %347 = vst [vmem:[#allocation2 + $0x20] sm:$0xff] %v2685_v0 }
  0x1d   : > { %348 = vst [vmem:[#allocation2 + $0x10] sm:$0xff] %v2685_v0 }
  0x1e   : > { %349 = vst [vmem:[#allocation2 + $0x38] sm:$0xff] %v2685_v0 }
  0x1f   : > { %350 = vst [vmem:[#allocation2 + $0x60] sm:$0xff] %v2685_v0 }
  0x20   : > { %351 = vst [vmem:[#allocation2 + $0x70] sm:$0xff] %v2685_v0 }
  0x21   : > { %352 = vst [vmem:[#allocation2 + $0x78] sm:$0xff] %v2685_v0 }
  0x22   : > { %353 = vst [vmem:[#allocation2 + $0x28] sm:$0xff] %v2685_v0 }
  0x23 PF: > { %v2063_v1 = vld [vmem:[%s2746_s30 + $0xe0] sm:$0xf]  ;;  %v2506_v2 = vld [vmem:[%s2746_s30 + $0xec] sm:$0xf0]  ;;  %p2461_p6 = scmp.ne.s32.totalorder %s2675_s18, 8 }
  0x24   : > { %v2191_v3 = vld [vmem:[%s2746_s30 + $0x1e0] sm:$0xf]  ;;  %v2064_v4 = vor.u32 %v2506_v2, %v2063_v1  ;;  %v2538_v5 = vld [vmem:[%s2746_s30 + $0x1ec] sm:$0xf0] }
  0x25   : > { %v2319_v6 = vld [vmem:[%s2746_s30 + $0x2e0] sm:$0xf]  ;;  %v2570_v7 = vld [vmem:[%s2746_s30 + $0x2ec] sm:$0xf0]  ;;  %v2192_v8 = vor.u32 %v2538_v5, %v2191_v3 }
  0x26   : > { %v2320_v9 = vor.u32 %v2570_v7, %v2319_v6  ;;  %v2447_v10 = vld [vmem:[%s2746_s30 + $0x3e0] sm:$0xf]  ;;  %v2602_v11 = vld [vmem:[%s2746_s30 + $0x3ec] sm:$0xf0]  ;;  %1186 = vmatpush.bf16.msra.mxu0 %v2064_v4 }
  0x27   : > { %v2047_v12 = vld [vmem:[%s2746_s30 + $0xc0] sm:$0xf]  ;;  %v2448_v13 = vor.u32 %v2602_v11, %v2447_v10  ;;  %v2502_v14 = vld [vmem:[%s2746_s30 + $0xcc] sm:$0xf0]  ;;  %1205 = vmatpush.bf16.msra.mxu1 %v2192_v8 }
  0x28   : > { %v2175_v15 = vld [vmem:[%s2746_s30 + $0x1c0] sm:$0xf]  ;;  %v2534_v16 = vld [vmem:[%s2746_s30 + $0x1cc] sm:$0xf0]  ;;  %1224 = vmatpush.bf16.msra.mxu2 %v2320_v9  ;;  %v2048_v17 = vor.u32 %v2502_v14, %v2047_v12 }
  0x29   : > { %v2176_v18 = vor.u32 %v2534_v16, %v2175_v15  ;;  %v2303_v19 = vld [vmem:[%s2746_s30 + $0x2c0] sm:$0xf]  ;;  %v2566_v20 = vld [vmem:[%s2746_s30 + $0x2cc] sm:$0xf0]  ;;  %1243 = vmatpush.bf16.msra.mxu3 %v2448_v13 }
  0x2a   : > { %v2431_v21 = vld [vmem:[%s2746_s30 + $0x3c0] sm:$0xf]  ;;  %v2304_v22 = vor.u32 %v2566_v20, %v2303_v19  ;;  %v2598_v23 = vld [vmem:[%s2746_s30 + $0x3cc] sm:$0xf0]  ;;  %1187 = vmatpush.bf16.msra.mxu0 %v2048_v17 }
  0x2b   : > { %v2031_v24 = vld [vmem:[%s2746_s30 + $0xa0] sm:$0xf]  ;;  %v2498_v25 = vld [vmem:[%s2746_s30 + $0xac] sm:$0xf0]  ;;  %v2432_v26 = vor.u32 %v2598_v23, %v2431_v21  ;;  %1206 = vmatpush.bf16.msra.mxu1 %v2176_v18 }
  0x2c   : > { %v2159_v27 = vld [vmem:[%s2746_s30 + $0x1a0] sm:$0xf]  ;;  %v2530_v28 = vld [vmem:[%s2746_s30 + $0x1ac] sm:$0xf0]  ;;  %v2032_v30 = vor.u32 %v2498_v25, %v2031_v24  ;;  %1225 = vmatpush.bf16.msra.mxu2 %v2304_v22 }
  0x2d   : > { %v2287_v29 = vld [vmem:[%s2746_s30 + $0x2a0] sm:$0xf]  ;;  %v2562_v31 = vld [vmem:[%s2746_s30 + $0x2ac] sm:$0xf0]  ;;  %v2160_v34 = vor.u32 %v2530_v28, %v2159_v27  ;;  %1244 = vmatpush.bf16.msra.mxu3 %v2432_v26 }
  0x2e   : > { %v2415_v32 = vld [vmem:[%s2746_s30 + $0x3a0] sm:$0xf]  ;;  %v2594_v33 = vld [vmem:[%s2746_s30 + $0x3ac] sm:$0xf0]  ;;  %v2288_v35 = vor.u32 %v2562_v31, %v2287_v29  ;;  %1188 = vmatpush.bf16.msra.mxu0 %v2032_v30  ;;  %v2468_v31 = vld [vmem:[%s2741_s27 + $0x4] sm:$0xf] }
  0x2f   : > { %v2015_v36 = vld [vmem:[%s2746_s30 + $0x80] sm:$0xf]  ;;  %v2494_v37 = vld [vmem:[%s2746_s30 + $0x8c] sm:$0xf0]  ;;  %v2416_v39 = vor.u32 %v2594_v33, %v2415_v32  ;;  %1207 = vmatpush.bf16.msra.mxu1 %v2160_v34  ;;  %v1921_v32 = vld [vmem:[%s2741_s27 + $0x10] sm:$0xf0] }
  0x30   : > { %v2143_v38 = vld [vmem:[%s2746_s30 + $0x180] sm:$0xf]  ;;  %v2526_v40 = vld [vmem:[%s2746_s30 + $0x18c] sm:$0xf0]  ;;  %v2016_v45 = vor.u32 %v2494_v37, %v2015_v36  ;;  %1226 = vmatpush.bf16.msra.mxu2 %v2288_v35  ;;  %v2568_v33 = vld [vmem:[%s2746_s30 + $0x2e4] sm:$0xf] }
  0x31   : > { %v2271_v41 = vld [vmem:[%s2746_s30 + $0x280] sm:$0xf]  ;;  %v2558_v42 = vld [vmem:[%s2746_s30 + $0x28c] sm:$0xf0]  ;;  %v2144_v46 = vor.u32 %v2526_v40, %v2143_v38  ;;  %1245 = vmatpush.bf16.msra.mxu3 %v2416_v39  ;;  %v2321_v34 = vld [vmem:[%s2746_s30 + $0x2f0] sm:$0xf0] }
  0x32   : > { %v2399_v43 = vld [vmem:[%s2746_s30 + $0x380] sm:$0xf]  ;;  %v2590_v44 = vld [vmem:[%s2746_s30 + $0x38c] sm:$0xf0]  ;;  %v2272_v47 = vor.u32 %v2558_v42, %v2271_v41  ;;  %1189 = vmatpush.bf16.msra.mxu0 %v2016_v45  ;;  %v1927_v36 = vld [vmem:[%s2741_s27 + $0x8] sm:$0xf]  ;;  %v2324_v45 = vor.u32 %v2568_v33, %v2321_v34 }
  0x33   : > { %v1999_v48 = vld [vmem:[%s2746_s30 + $0x60] sm:$0xf]  ;;  %v2490_v49 = vld [vmem:[%s2746_s30 + $0x6c] sm:$0xf0]  ;;  %v2400_v51 = vor.u32 %v2590_v44, %v2399_v43  ;;  %1208 = vmatpush.bf16.msra.mxu1 %v2144_v46  ;;  %v2536_v37 = vld [vmem:[%s2746_s30 + $0x1e4] sm:$0xf] }
  0x34   : > { %v2127_v50 = vld [vmem:[%s2746_s30 + $0x160] sm:$0xf]  ;;  %v2522_v52 = vld [vmem:[%s2746_s30 + $0x16c] sm:$0xf0]  ;;  %v2000_v57 = vor.u32 %v2490_v49, %v1999_v48  ;;  %1227 = vmatpush.bf16.msra.mxu2 %v2272_v47  ;;  %v2193_v38 = vld [vmem:[%s2746_s30 + $0x1f0] sm:$0xf0] }
  0x35   : > { %v2255_v53 = vld [vmem:[%s2746_s30 + $0x260] sm:$0xf]  ;;  %v2554_v54 = vld [vmem:[%s2746_s30 + $0x26c] sm:$0xf0]  ;;  %v2128_v58 = vor.u32 %v2522_v52, %v2127_v50  ;;  %1246 = vmatpush.bf16.msra.mxu3 %v2400_v51  ;;  %v2471_v41 = vld [vmem:[%s2741_s27 + $0x14] sm:$0xf0]  ;;  %v2196_v50 = vor.u32 %v2536_v37, %v2193_v38 }
  0x36   : > { %v2383_v55 = vld [vmem:[%s2746_s30 + $0x360] sm:$0xf]  ;;  %v2586_v56 = vld [vmem:[%s2746_s30 + $0x36c] sm:$0xf0]  ;;  %v2256_v59 = vor.u32 %v2554_v54, %v2255_v53  ;;  %1190 = vmatpush.bf16.msra.mxu0 %v2000_v57  ;;  %v2469_v42 = vld [vmem:[%s2741_s27 + $0xc] sm:$0xf]  ;;  %v2833_v54 = vor.u32 %v2468_v31, %v1921_v32 }
  0x37   : > { %v1983_v60 = vld [vmem:[%s2746_s30 + $0x40] sm:$0xf]  ;;  %v2486_v61 = vld [vmem:[%s2746_s30 + $0x4c] sm:$0xf0]  ;;  %v2384_v63 = vor.u32 %v2586_v56, %v2383_v55  ;;  %1209 = vmatpush.bf16.msra.mxu1 %v2128_v58  ;;  %v1929_v43 = vld [vmem:[%s2741_s27 + $0x18] sm:$0xf0]  ;;  %v2835_v55 = vor.u32 %v2471_v41, %v1927_v36 }
  0x38   : > { %v2111_v62 = vld [vmem:[%s2746_s30 + $0x140] sm:$0xf]  ;;  %v2518_v0 = vld [vmem:[%s2746_s30 + $0x14c] sm:$0xf0]  ;;  %v1984_v5 = vor.u32 %v2486_v61, %v1983_v60  ;;  %1228 = vmatpush.bf16.msra.mxu2 %v2256_v59  ;;  %v2504_v46 = vld [vmem:[%s2746_s30 + $0xe4] sm:$0xf]  ;;  %v2839_v58 = vor.u32 %v2469_v42, %v1929_v43 }
  0x39   : > { %v2239_v1 = vld [vmem:[%s2746_s30 + $0x240] sm:$0xf]  ;;  %v2550_v2 = vld [vmem:[%s2746_s30 + $0x24c] sm:$0xf0]  ;;  %v2112_v6 = vor.u32 %v2518_v0, %v2111_v62  ;;  %1247 = vmatpush.bf16.msra.mxu3 %v2384_v63  ;;  %v2065_v47 = vld [vmem:[%s2746_s30 + $0xf0] sm:$0xf0] }
  0x3a   : > { %v2367_v3 = vld [vmem:[%s2746_s30 + $0x340] sm:$0xf]  ;;  %v2582_v4 = vld [vmem:[%s2746_s30 + $0x34c] sm:$0xf0]  ;;  %v2240_v7 = vor.u32 %v2550_v2, %v2239_v1  ;;  %1191 = vmatpush.bf16.msra.mxu0 %v1984_v5  ;;  %v2600_v48 = vld [vmem:[%s2746_s30 + $0x3e4] sm:$0xf]  ;;  %v2068_v59 = vor.u32 %v2504_v46, %v2065_v47 }
  0x3b   : > { %v1967_v8 = vld [vmem:[%s2746_s30 + $0x20] sm:$0xf]  ;;  %v2482_v9 = vld [vmem:[%s2746_s30 + $0x2c] sm:$0xf0]  ;;  %v2368_v11 = vor.u32 %v2582_v4, %v2367_v3  ;;  %1210 = vmatpush.bf16.msra.mxu1 %v2112_v6  ;;  %v2449_v51 = vld [vmem:[%s2746_s30 + $0x3f0] sm:$0xf0] }
  0x3c   : > { %v2095_v10 = vld [vmem:[%s2746_s30 + $0x120] sm:$0xf]  ;;  %v2514_v12 = vld [vmem:[%s2746_s30 + $0x12c] sm:$0xf0]  ;;  %v1968_v18 = vor.u32 %v2482_v9, %v1967_v8  ;;  %1229 = vmatpush.bf16.msra.mxu2 %v2240_v7  ;;  %v2564_v52 = vld [vmem:[%s2746_s30 + $0x2c4] sm:$0xf]  ;;  %v2452_v60 = vor.u32 %v2600_v48, %v2449_v51 }
  0x3d   : > { %v2223_v13 = vld [vmem:[%s2746_s30 + $0x220] sm:$0xf]  ;;  %v2546_v14 = vld [vmem:[%s2746_s30 + $0x22c] sm:$0xf0]  ;;  %v2096_v22 = vor.u32 %v2514_v12, %v2095_v10  ;;  %1248 = vmatpush.bf16.msra.mxu3 %v2368_v11  ;;  %v2305_v53 = vld [vmem:[%s2746_s30 + $0x2d0] sm:$0xf0] }
  0x3e   : > { %v2351_v15 = vld [vmem:[%s2746_s30 + $0x320] sm:$0xf]  ;;  %v2578_v16 = vld [vmem:[%s2746_s30 + $0x32c] sm:$0xf0]  ;;  %v2224_v23 = vor.u32 %v2546_v14, %v2223_v13  ;;  %1192 = vmatpush.bf16.msra.mxu0 %v1968_v18  ;;  %v2532_v56 = vld [vmem:[%s2746_s30 + $0x1c4] sm:$0xf]  ;;  %v2308_v61 = vor.u32 %v2564_v52, %v2305_v53 }
  0x3f   : > { %v1951_v17 = vld [vmem:[%s2746_s30] sm:$0xf]  ;;  %v2478_v19 = vld [vmem:[%s2746_s30 + $0xc] sm:$0xf0]  ;;  %v2352_v27 = vor.u32 %v2578_v16, %v2351_v15  ;;  %1211 = vmatpush.bf16.msra.mxu1 %v2096_v22  ;;  %v2177_v57 = vld [vmem:[%s2746_s30 + $0x1d0] sm:$0xf0] }
  0x40   : > { %v2079_v20 = vld [vmem:[%s2746_s30 + $0x100] sm:$0xf]  ;;  %v2510_v21 = vld [vmem:[%s2746_s30 + $0x10c] sm:$0xf0]  ;;  %v1952_v35 = vor.u32 %v2478_v19, %v1951_v17  ;;  %1230 = vmatpush.bf16.msra.mxu2 %v2224_v23  ;;  %v2500_v62 = vld [vmem:[%s2746_s30 + $0xc4] sm:$0xf]  ;;  %v2180_v1 = vor.u32 %v2532_v56, %v2177_v57 }
  0x41   : > { %v2207_v24 = vld [vmem:[%s2746_s30 + $0x200] sm:$0xf]  ;;  %v2542_v25 = vld [vmem:[%s2746_s30 + $0x20c] sm:$0xf0]  ;;  %v2080_v39 = vor.u32 %v2510_v21, %v2079_v20  ;;  %1249 = vmatpush.bf16.msra.mxu3 %v2352_v27  ;;  %v2049_v63 = vld [vmem:[%s2746_s30 + $0xd0] sm:$0xf0] }
  0x42   : > { %v2335_v26 = vld [vmem:[%s2746_s30 + $0x300] sm:$0xf]  ;;  %v2574_v28 = vld [vmem:[%s2746_s30 + $0x30c] sm:$0xf0]  ;;  %v2208_v40 = vor.u32 %v2542_v25, %v2207_v24  ;;  %1193 = vmatpush.bf16.msra.mxu0 %v1952_v35  ;;  %v2596_v0 = vld [vmem:[%s2746_s30 + $0x3c4] sm:$0xf]  ;;  %v2052_v7 = vor.u32 %v2500_v62, %v2049_v63 }
  0x43   : > { %v1919_v29 = vld [vmem:[%s2741_s27] sm:$0xf]  ;;  %v2470_v30 = vld [vmem:[%s2741_s27 + $0xc] sm:$0xf0]  ;;  %v2336_v44 = vor.u32 %v2574_v28, %v2335_v26  ;;  %1212 = vmatpush.bf16.msra.mxu1 %v2080_v39  ;;  %v2433_v2 = vld [vmem:[%s2746_s30 + $0x3d0] sm:$0xf0] }
  0x44   : > { %v2828_v49 = vor.u32 %v2470_v30, %v1919_v29  ;;  %1231 = vmatpush.bf16.msra.mxu2 %v2208_v40  ;;  %v2560_v3 = vld [vmem:[%s2746_s30 + $0x2a4] sm:$0xf]  ;;  %v2289_v4 = vld [vmem:[%s2746_s30 + $0x2b0] sm:$0xf0]  ;;  %v2436_v8 = vor.u32 %v2596_v0, %v2433_v2  ;;  %v1935_v26 = vld [vmem:[%s2741_s27 + $0x20] sm:$0xf] }
  0x45   : > { %1250 = vmatpush.bf16.msra.mxu3 %v2336_v44  ;;  %v2528_v5 = vld [vmem:[%s2746_s30 + $0x1a4] sm:$0xf]  ;;  %v2161_v6 = vld [vmem:[%s2746_s30 + $0x1b0] sm:$0xf0]  ;;  %v2292_v9 = vor.u32 %v2560_v3, %v2289_v4  ;;  %v2474_v27 = vld [vmem:[%s2741_s27 + $0x2c] sm:$0xf0] }
  0x46   : > { %1194 = vmatmul.bf16.vlgmr.msra.gmra.mxu0 %v2828_v49  ;;  %1213 = vmatmul.bf16.vlgmr.msra.gmra.mxu1 %v2833_v54  ;;  %v2496_v10 = vld [vmem:[%s2746_s30 + $0xa4] sm:$0xf]  ;;  %v2033_v11 = vld [vmem:[%s2746_s30 + $0xb0] sm:$0xf0]  ;;  %v2164_v13 = vor.u32 %v2528_v5, %v2161_v6  ;;  %v1943_v33 = vld [vmem:[%s2741_s27 + $0x28] sm:$0xf] }
  0x47   : > { %1281 = vmatpush.bf16.msrb.mxu1 %v2196_v50  ;;  %1232 = vmatmul.bf16.vlgmr.msra.gmra.mxu2 %v2835_v55  ;;  %v2592_v12 = vld [vmem:[%s2746_s30 + $0x3a4] sm:$0xf]  ;;  %v2417_v14 = vld [vmem:[%s2746_s30 + $0x3b0] sm:$0xf0]  ;;  %v2036_v19 = vor.u32 %v2496_v10, %v2033_v11  ;;  %v2475_v37 = vld [vmem:[%s2741_s27 + $0x34] sm:$0xf0] }
  0x48   : > { %1300 = vmatpush.bf16.msrb.mxu2 %v2324_v45  ;;  %1251 = vmatmul.bf16.vlgmr.msra.gmra.mxu3 %v2839_v58  ;;  %v2556_v15 = vld [vmem:[%s2746_s30 + $0x284] sm:$0xf]  ;;  %v2273_v16 = vld [vmem:[%s2746_s30 + $0x290] sm:$0xf0]  ;;  %v2420_v23 = vor.u32 %v2592_v12, %v2417_v14  ;;  %v2473_v38 = vld [vmem:[%s2741_s27 + $0x2c] sm:$0xf]  ;;  %v2880_v45 = vor.u32 %v2474_v27, %v1935_v26  ;;  %v2887_v52 = vor.u32 %v2475_v37, %v1943_v33 }
  0x49   : > { %1262 = vmatpush.bf16.msrb.mxu0 %v2068_v59  ;;  %1319 = vmatpush.bf16.msrb.mxu3 %v2452_v60  ;;  %v2524_v17 = vld [vmem:[%s2746_s30 + $0x184] sm:$0xf]  ;;  %v2145_v18 = vld [vmem:[%s2746_s30 + $0x190] sm:$0xf0]  ;;  %v2276_v24 = vor.u32 %v2556_v15, %v2273_v16  ;;  %v1945_v39 = vld [vmem:[%s2741_s27 + $0x38] sm:$0xf0] }
  0x4a   : > { %v2492_v20 = vld [vmem:[%s2746_s30 + $0x84] sm:$0xf]  ;;  %v2017_v21 = vld [vmem:[%s2746_s30 + $0x90] sm:$0xf0]  ;;  %v2148_v28 = vor.u32 %v2524_v17, %v2145_v18  ;;  %v2891_v57 = vor.u32 %v2473_v38, %v1945_v39  ;;  %v2507_v33 = vld [vmem:[%s2746_s30 + $0xf4] sm:$0xf0] }
  0x4b   : > { %1282 = vmatpush.bf16.msrb.mxu1 %v2180_v1  ;;  %v2588_v22 = vld [vmem:[%s2746_s30 + $0x384] sm:$0xf]  ;;  %v2401_v25 = vld [vmem:[%s2746_s30 + $0x390] sm:$0xf0]  ;;  %v2020_v36 = vor.u32 %v2492_v20, %v2017_v21  ;;  %v2571_v20 = vld [vmem:[%s2746_s30 + $0x2f4] sm:$0xf0] }
  0x4c   : > { %1301 = vmatpush.bf16.msrb.mxu2 %v2308_v61  ;;  %v2472_v29 = vld [vmem:[%s2741_s27 + $0x24] sm:$0xf]  ;;  %v1937_v30 = vld [vmem:[%s2741_s27 + $0x30] sm:$0xf0]  ;;  %v2404_v40 = vor.u32 %v2588_v22, %v2401_v25  ;;  %v2311_v37 = vld [vmem:[%s2746_s30 + $0x2c8] sm:$0xf] }
  0x4d   : > { %1263 = vmatpush.bf16.msrb.mxu0 %v2052_v7  ;;  %1320 = vmatpush.bf16.msrb.mxu3 %v2436_v8  ;;  %v2552_v31 = vld [vmem:[%s2746_s30 + $0x264] sm:$0xf]  ;;  %v2257_v32 = vld [vmem:[%s2746_s30 + $0x270] sm:$0xf0]  ;;  %v2885_v51 = vor.u32 %v2472_v29, %v1937_v30  ;;  %v2567_v38 = vld [vmem:[%s2746_s30 + $0x2d4] sm:$0xf0] }
  0x4e   : > { %v2520_v34 = vld [vmem:[%s2746_s30 + $0x164] sm:$0xf]  ;;  %v2129_v35 = vld [vmem:[%s2746_s30 + $0x170] sm:$0xf0]  ;;  %v2260_v41 = vor.u32 %v2552_v31, %v2257_v32  ;;  %v2071_v32 = vld [vmem:[%s2746_s30 + $0xe8] sm:$0xf] }
  0x4f   : > { %1283 = vmatpush.bf16.msrb.mxu1 %v2164_v13  ;;  %v2488_v42 = vld [vmem:[%s2746_s30 + $0x64] sm:$0xf]  ;;  %v2001_v43 = vld [vmem:[%s2746_s30 + $0x70] sm:$0xf0]  ;;  %v2132_v46 = vor.u32 %v2520_v34, %v2129_v35  ;;  %v2455_v34 = vld [vmem:[%s2746_s30 + $0x3e8] sm:$0xf] }
  0x50   : > { %1302 = vmatpush.bf16.msrb.mxu2 %v2292_v9  ;;  %v2584_v44 = vld [vmem:[%s2746_s30 + $0x364] sm:$0xf]  ;;  %v2385_v47 = vld [vmem:[%s2746_s30 + $0x370] sm:$0xf0]  ;;  %v2004_v59 = vor.u32 %v2488_v42, %v2001_v43  ;;  %v2055_v42 = vld [vmem:[%s2746_s30 + $0xc8] sm:$0xf] }
  0x51   : > { %1264 = vmatpush.bf16.msrb.mxu0 %v2036_v19  ;;  %1321 = vmatpush.bf16.msrb.mxu3 %v2420_v23  ;;  %v2548_v48 = vld [vmem:[%s2746_s30 + $0x244] sm:$0xf]  ;;  %v2241_v50 = vld [vmem:[%s2746_s30 + $0x250] sm:$0xf0]  ;;  %v2388_v60 = vor.u32 %v2584_v44, %v2385_v47  ;;  %v2327_v19 = vld [vmem:[%s2746_s30 + $0x2e8] sm:$0xf] }
  0x52   : > { %v2516_v53 = vld [vmem:[%s2746_s30 + $0x144] sm:$0xf]  ;;  %v2113_v56 = vld [vmem:[%s2746_s30 + $0x150] sm:$0xf0]  ;;  %v2244_v61 = vor.u32 %v2548_v48, %v2241_v50  ;;  %v2199_v23 = vld [vmem:[%s2746_s30 + $0x1e8] sm:$0xf]  ;;  %v2328_v31 = vor.u32 %v2571_v20, %v2327_v19 }
  0x53   : > { %1284 = vmatpush.bf16.msrb.mxu1 %v2148_v28  ;;  %v2484_v62 = vld [vmem:[%s2746_s30 + $0x44] sm:$0xf]  ;;  %v1985_v63 = vld [vmem:[%s2746_s30 + $0x50] sm:$0xf0]  ;;  %v2116_v1 = vor.u32 %v2516_v53, %v2113_v56  ;;  %v2503_v43 = vld [vmem:[%s2746_s30 + $0xd4] sm:$0xf0] }
  0x54   : > { %1303 = vmatpush.bf16.msrb.mxu2 %v2276_v24  ;;  %v2580_v0 = vld [vmem:[%s2746_s30 + $0x344] sm:$0xf]  ;;  %v2369_v2 = vld [vmem:[%s2746_s30 + $0x350] sm:$0xf0]  ;;  %v1988_v7 = vor.u32 %v2484_v62, %v1985_v63  ;;  %v2539_v24 = vld [vmem:[%s2746_s30 + $0x1f4] sm:$0xf0] }
  0x55   : > { %1265 = vmatpush.bf16.msrb.mxu0 %v2020_v36  ;;  %1322 = vmatpush.bf16.msrb.mxu3 %v2404_v40  ;;  %v2544_v3 = vld [vmem:[%s2746_s30 + $0x224] sm:$0xf]  ;;  %v2225_v4 = vld [vmem:[%s2746_s30 + $0x230] sm:$0xf0]  ;;  %v2372_v9 = vor.u32 %v2580_v0, %v2369_v2  ;;  %v2200_v35 = vor.u32 %v2539_v24, %v2199_v23  ;;  %v2603_v36 = vld [vmem:[%s2746_s30 + $0x3f4] sm:$0xf0] }
  0x56   : > { %1199 = vmatmul.bf16.gmra.mxu0 %v2880_v45  ;;  %1218 = vmatmul.bf16.gmra.mxu1 %v2885_v51  ;;  %v2512_v5 = vld [vmem:[%s2746_s30 + $0x124] sm:$0xf]  ;;  %v2097_v6 = vld [vmem:[%s2746_s30 + $0x130] sm:$0xf0]  ;;  %v2228_v10 = vor.u32 %v2544_v3, %v2225_v4  ;;  %v2456_v44 = vor.u32 %v2603_v36, %v2455_v34  ;;  %v2183_v47 = vld [vmem:[%s2746_s30 + $0x1c8] sm:$0xf] }
  0x57   : > { %1285 = vmatpush.bf16.msrb.mxu1 %v2132_v46  ;;  %1237 = vmatmul.bf16.gmra.mxu2 %v2887_v52  ;;  %v2480_v8 = vld [vmem:[%s2746_s30 + $0x24] sm:$0xf]  ;;  %v1969_v11 = vld [vmem:[%s2746_s30 + $0x30] sm:$0xf0]  ;;  %v2100_v14 = vor.u32 %v2512_v5, %v2097_v6  ;;  %v2312_v46 = vor.u32 %v2567_v38, %v2311_v37  ;;  %v2535_v48 = vld [vmem:[%s2746_s30 + $0x1d4] sm:$0xf0] }
  0x58   : > { %1304 = vmatpush.bf16.msrb.mxu2 %v2260_v41  ;;  %1256 = vmatmul.bf16.gmra.mxu3 %v2891_v57  ;;  %v2576_v12 = vld [vmem:[%s2746_s30 + $0x324] sm:$0xf]  ;;  %v2353_v13 = vld [vmem:[%s2746_s30 + $0x330] sm:$0xf0]  ;;  %v1972_v21 = vor.u32 %v2480_v8, %v1969_v11  ;;  %v2072_v41 = vor.u32 %v2507_v33, %v2071_v32  ;;  %v2439_v50 = vld [vmem:[%s2746_s30 + $0x3c8] sm:$0xf] }
  0x59   : > { %1266 = vmatpush.bf16.msrb.mxu0 %v2004_v59  ;;  %1323 = vmatpush.bf16.msrb.mxu3 %v2388_v60  ;;  %v2540_v15 = vld [vmem:[%s2746_s30 + $0x204] sm:$0xf]  ;;  %v2209_v16 = vld [vmem:[%s2746_s30 + $0x210] sm:$0xf0]  ;;  %v2356_v25 = vor.u32 %v2576_v12, %v2353_v13  ;;  %v2599_v53 = vld [vmem:[%s2746_s30 + $0x3d4] sm:$0xf0]  ;;  %v2056_v60 = vor.u32 %v2503_v43, %v2055_v42 }
  0x5a   : > { %v2508_v17 = vld [vmem:[%s2746_s30 + $0x104] sm:$0xf]  ;;  %v2081_v18 = vld [vmem:[%s2746_s30 + $0x110] sm:$0xf0]  ;;  %v2212_v26 = vor.u32 %v2540_v15, %v2209_v16  ;;  %v2295_v56 = vld [vmem:[%s2746_s30 + $0x2a8] sm:$0xf]  ;;  %v2440_v0 = vor.u32 %v2599_v53, %v2439_v50 }
  0x5b   : > { %1286 = vmatpush.bf16.msrb.mxu1 %v2116_v1  ;;  %v2476_v22 = vld [vmem:[%s2746_s30 + $0x4] sm:$0xf]  ;;  %v1953_v27 = vld [vmem:[%s2746_s30 + $0x10] sm:$0xf0]  ;;  %v2084_v30 = vor.u32 %v2508_v17, %v2081_v18  ;;  %v2563_v59 = vld [vmem:[%s2746_s30 + $0x2b4] sm:$0xf0] }
  0x5c   : > { %1305 = vmatpush.bf16.msrb.mxu2 %v2244_v61  ;;  %v2572_v28 = vld [vmem:[%s2746_s30 + $0x304] sm:$0xf]  ;;  %v2337_v29 = vld [vmem:[%s2746_s30 + $0x310] sm:$0xf0]  ;;  %v1956_v39 = vor.u32 %v2476_v22, %v1953_v27  ;;  %v2184_v61 = vor.u32 %v2535_v48, %v2183_v47  ;;  %v2039_v62 = vld [vmem:[%s2746_s30 + $0xa8] sm:$0xf]  ;;  %v2296_v1 = vor.u32 %v2563_v59, %v2295_v56 }
  0x5d   : > { %1267 = vmatpush.bf16.msrb.mxu0 %v1988_v7  ;;  %1324 = vmatpush.bf16.msrb.mxu3 %v2372_v9  ;;  %v2340_v40 = vor.u32 %v2572_v28, %v2337_v29  ;;  %v2499_v63 = vld [vmem:[%s2746_s30 + $0xb4] sm:$0xf0]  ;;  %v2167_v2 = vld [vmem:[%s2746_s30 + $0x1a8] sm:$0xf] }
  0x5e   : > { %v2531_v3 = vld [vmem:[%s2746_s30 + $0x1b4] sm:$0xf0]  ;;  %v2423_v4 = vld [vmem:[%s2746_s30 + $0x3a8] sm:$0xf]  ;;  %v2040_v8 = vor.u32 %v2499_v63, %v2039_v62 }
  0x5f   : > { %1287 = vmatpush.bf16.msrb.mxu1 %v2100_v14  ;;  %v2595_v5 = vld [vmem:[%s2746_s30 + $0x3b4] sm:$0xf0]  ;;  %v2279_v6 = vld [vmem:[%s2746_s30 + $0x288] sm:$0xf]  ;;  %v2168_v9 = vor.u32 %v2531_v3, %v2167_v2 }
  0x60   : > { %1306 = vmatpush.bf16.msrb.mxu2 %v2228_v10  ;;  %v2559_v7 = vld [vmem:[%s2746_s30 + $0x294] sm:$0xf0]  ;;  %v2023_v10 = vld [vmem:[%s2746_s30 + $0x88] sm:$0xf]  ;;  %v2424_v12 = vor.u32 %v2595_v5, %v2423_v4 }
  0x61   : > { %1268 = vmatpush.bf16.msrb.mxu0 %v1972_v21  ;;  %1325 = vmatpush.bf16.msrb.mxu3 %v2356_v25  ;;  %v2495_v11 = vld [vmem:[%s2746_s30 + $0x94] sm:$0xf0]  ;;  %v2280_v13 = vor.u32 %v2559_v7, %v2279_v6  ;;  %v2151_v14 = vld [vmem:[%s2746_s30 + $0x188] sm:$0xf] }
  0x62   : > { %v2527_v15 = vld [vmem:[%s2746_s30 + $0x194] sm:$0xf0]  ;;  %v2407_v16 = vld [vmem:[%s2746_s30 + $0x388] sm:$0xf]  ;;  %v2024_v20 = vor.u32 %v2495_v11, %v2023_v10 }
  0x63   : > { %1288 = vmatpush.bf16.msrb.mxu1 %v2084_v30  ;;  %v2591_v17 = vld [vmem:[%s2746_s30 + $0x394] sm:$0xf0]  ;;  %v2263_v18 = vld [vmem:[%s2746_s30 + $0x268] sm:$0xf]  ;;  %v2152_v21 = vor.u32 %v2527_v15, %v2151_v14  ;;  %v2073_v14 = vld [vmem:[%s2746_s30 + $0xf8] sm:$0xf0] }
  0x64   : > { %1307 = vmatpush.bf16.msrb.mxu2 %v2212_v26  ;;  %v2555_v19 = vld [vmem:[%s2746_s30 + $0x274] sm:$0xf0]  ;;  %v2007_v22 = vld [vmem:[%s2746_s30 + $0x68] sm:$0xf]  ;;  %v2408_v24 = vor.u32 %v2591_v17, %v2407_v16  ;;  %v2537_v15 = vld [vmem:[%s2746_s30 + $0x1ec] sm:$0xf] }
  0x65   : > { %1269 = vmatpush.bf16.msrb.mxu0 %v1956_v39  ;;  %1326 = vmatpush.bf16.msrb.mxu3 %v2340_v40  ;;  %v2491_v23 = vld [vmem:[%s2746_s30 + $0x74] sm:$0xf0]  ;;  %v2264_v25 = vor.u32 %v2555_v19, %v2263_v18  ;;  %v2135_v26 = vld [vmem:[%s2746_s30 + $0x168] sm:$0xf]  ;;  %v2201_v16 = vld [vmem:[%s2746_s30 + $0x1f8] sm:$0xf0] }
  0x66   : > { %1289 = vmatmul.bf16.vlgmr.msrb.gmra.mxu1 %v2833_v54  ;;  %v2523_v27 = vld [vmem:[%s2746_s30 + $0x174] sm:$0xf0]  ;;  %v2391_v28 = vld [vmem:[%s2746_s30 + $0x368] sm:$0xf]  ;;  %v2008_v32 = vor.u32 %v2491_v23, %v2007_v22  ;;  %v2601_v17 = vld [vmem:[%s2746_s30 + $0x3ec] sm:$0xf] }
  0x67   : > { %1357 = vmatpush.bf16.msra.mxu1 %v2200_v35  ;;  %1308 = vmatmul.bf16.vlgmr.msrb.gmra.mxu2 %v2835_v55  ;;  %v2587_v29 = vld [vmem:[%s2746_s30 + $0x374] sm:$0xf0]  ;;  %v2247_v30 = vld [vmem:[%s2746_s30 + $0x248] sm:$0xf]  ;;  %v2136_v33 = vor.u32 %v2523_v27, %v2135_v26  ;;  %v2457_v18 = vld [vmem:[%s2746_s30 + $0x3f8] sm:$0xf0] }
  0x68   : > { %1376 = vmatpush.bf16.msra.mxu2 %v2328_v31  ;;  %1270 = vmatmul.bf16.vlgmr.msrb.gmra.mxu0 %v2828_v49  ;;  %v2551_v31 = vld [vmem:[%s2746_s30 + $0x254] sm:$0xf0]  ;;  %v1991_v34 = vld [vmem:[%s2746_s30 + $0x48] sm:$0xf]  ;;  %v2392_v36 = vor.u32 %v2587_v29, %v2391_v28  ;;  %v2313_v22 = vld [vmem:[%s2746_s30 + $0x2d8] sm:$0xf0]  ;;  %v2460_v26 = vor.u32 %v2601_v17, %v2457_v18 }
  0x69   : > { %1338 = vmatpush.bf16.msra.mxu0 %v2072_v41  ;;  %1395 = vmatpush.bf16.msra.mxu3 %v2456_v44  ;;  %v2487_v35 = vld [vmem:[%s2746_s30 + $0x54] sm:$0xf0]  ;;  %v2248_v37 = vor.u32 %v2551_v31, %v2247_v30  ;;  %v2119_v38 = vld [vmem:[%s2746_s30 + $0x148] sm:$0xf]  ;;  %v2501_v27 = vld [vmem:[%s2746_s30 + $0xcc] sm:$0xf] }
  0x6a   : > { %1327 = vmatmul.bf16.vlgmr.msrb.gmra.mxu3 %v2839_v58  ;;  %v2519_v39 = vld [vmem:[%s2746_s30 + $0x154] sm:$0xf0]  ;;  %v2375_v40 = vld [vmem:[%s2746_s30 + $0x348] sm:$0xf]  ;;  %v1992_v44 = vor.u32 %v2487_v35, %v1991_v34  ;;  %v2057_v28 = vld [vmem:[%s2746_s30 + $0xd8] sm:$0xf0] }
  0x6b   : > { %1358 = vmatpush.bf16.msra.mxu1 %v2184_v61  ;;  %v2583_v41 = vld [vmem:[%s2746_s30 + $0x354] sm:$0xf0]  ;;  %v2231_v42 = vld [vmem:[%s2746_s30 + $0x228] sm:$0xf]  ;;  %v2533_v30 = vld [vmem:[%s2746_s30 + $0x1cc] sm:$0xf] }
  0x6c   : > { %1377 = vmatpush.bf16.msra.mxu2 %v2312_v46  ;;  %v2547_v43 = vld [vmem:[%s2746_s30 + $0x234] sm:$0xf0]  ;;  %v2120_v46 = vor.u32 %v2519_v39, %v2119_v38  ;;  %v1975_v47 = vld [vmem:[%s2746_s30 + $0x28] sm:$0xf]  ;;  %v2376_v50 = vor.u32 %v2583_v41, %v2375_v40  ;;  %v2185_v31 = vld [vmem:[%s2746_s30 + $0x1d8] sm:$0xf0] }
  0x6d   : > { %1339 = vmatpush.bf16.msra.mxu0 %v2056_v60  ;;  %1396 = vmatpush.bf16.msra.mxu3 %v2440_v0  ;;  %v2483_v48 = vld [vmem:[%s2746_s30 + $0x34] sm:$0xf0]  ;;  %v2232_v53 = vor.u32 %v2547_v43, %v2231_v42  ;;  %v2103_v56 = vld [vmem:[%s2746_s30 + $0x128] sm:$0xf]  ;;  %v2569_v0 = vld [vmem:[%s2746_s30 + $0x2ec] sm:$0xf]  ;;  %v2188_v39 = vor.u32 %v2533_v30, %v2185_v31 }
  0x6e   : > { %v2515_v59 = vld [vmem:[%s2746_s30 + $0x134] sm:$0xf0]  ;;  %v2359_v60 = vld [vmem:[%s2746_s30 + $0x328] sm:$0xf]  ;;  %v1976_v2 = vor.u32 %v2483_v48, %v1975_v47  ;;  %v2441_v34 = vld [vmem:[%s2746_s30 + $0x3d8] sm:$0xf0] }
  0x6f   : > { %1359 = vmatpush.bf16.msra.mxu1 %v2168_v9  ;;  %v2579_v61 = vld [vmem:[%s2746_s30 + $0x334] sm:$0xf0]  ;;  %v2215_v62 = vld [vmem:[%s2746_s30 + $0x208] sm:$0xf]  ;;  %v2104_v3 = vor.u32 %v2515_v59, %v2103_v56  ;;  %v2561_v35 = vld [vmem:[%s2746_s30 + $0x2ac] sm:$0xf] }
  0x70   : > { %1378 = vmatpush.bf16.msra.mxu2 %v2296_v1  ;;  %v2543_v63 = vld [vmem:[%s2746_s30 + $0x214] sm:$0xf0]  ;;  %v2329_v1 = vld [vmem:[%s2746_s30 + $0x2f8] sm:$0xf0]  ;;  %v1959_v4 = vld [vmem:[%s2746_s30 + $0x8] sm:$0xf]  ;;  %v2360_v7 = vor.u32 %v2579_v61, %v2359_v60 }
  0x71   : > { %1340 = vmatpush.bf16.msra.mxu0 %v2040_v8  ;;  %1397 = vmatpush.bf16.msra.mxu3 %v2424_v12  ;;  %v2479_v5 = vld [vmem:[%s2746_s30 + $0x14] sm:$0xf0]  ;;  %v2087_v6 = vld [vmem:[%s2746_s30 + $0x108] sm:$0xf]  ;;  %v2216_v8 = vor.u32 %v2543_v63, %v2215_v62  ;;  %v2332_v12 = vor.u32 %v2569_v0, %v2329_v1  ;;  %v2041_v38 = vld [vmem:[%s2746_s30 + $0xb8] sm:$0xf0] }
  0x72   : > { %v2511_v9 = vld [vmem:[%s2746_s30 + $0x114] sm:$0xf0]  ;;  %v2343_v10 = vld [vmem:[%s2746_s30 + $0x308] sm:$0xf]  ;;  %v1960_v19 = vor.u32 %v2479_v5, %v1959_v4  ;;  %v2529_v41 = vld [vmem:[%s2746_s30 + $0x1ac] sm:$0xf] }
  0x73   : > { %1360 = vmatpush.bf16.msra.mxu1 %v2152_v21  ;;  %v2575_v11 = vld [vmem:[%s2746_s30 + $0x314] sm:$0xf0]  ;;  %v2565_v21 = vld [vmem:[%s2746_s30 + $0x2cc] sm:$0xf]  ;;  %v2169_v42 = vld [vmem:[%s2746_s30 + $0x1b8] sm:$0xf0] }
  0x74   : > { %1379 = vmatpush.bf16.msra.mxu2 %v2280_v13  ;;  %v2505_v13 = vld [vmem:[%s2746_s30 + $0xec] sm:$0xf]  ;;  %v2344_v23 = vor.u32 %v2575_v11, %v2343_v10  ;;  %v2316_v29 = vor.u32 %v2565_v21, %v2313_v22  ;;  %v2425_v47 = vld [vmem:[%s2746_s30 + $0x3b8] sm:$0xf0]  ;;  %v2172_v59 = vor.u32 %v2529_v41, %v2169_v42 }
  0x75   : > { %1341 = vmatpush.bf16.msra.mxu0 %v2024_v20  ;;  %1398 = vmatpush.bf16.msra.mxu3 %v2408_v24  ;;  %v2088_v20 = vor.u32 %v2511_v9, %v2087_v6  ;;  %v2076_v24 = vor.u32 %v2505_v13, %v2073_v14  ;;  %v2557_v48 = vld [vmem:[%s2746_s30 + $0x28c] sm:$0xf]  ;;  %v2025_v56 = vld [vmem:[%s2746_s30 + $0x98] sm:$0xf0] }
  0x76   : > { %1294 = vmatmul.bf16.gmra.mxu1 %v2885_v51  ;;  %v2525_v61 = vld [vmem:[%s2746_s30 + $0x18c] sm:$0xf]  ;;  %v2153_v62 = vld [vmem:[%s2746_s30 + $0x198] sm:$0xf0] }
  0x77   : > { %1361 = vmatpush.bf16.msra.mxu1 %v2136_v33  ;;  %1313 = vmatmul.bf16.gmra.mxu2 %v2887_v52  ;;  %v2597_v33 = vld [vmem:[%s2746_s30 + $0x3cc] sm:$0xf]  ;;  %v2265_v4 = vld [vmem:[%s2746_s30 + $0x278] sm:$0xf0] }
  0x78   : > { %1380 = vmatpush.bf16.msra.mxu2 %v2264_v25  ;;  %1275 = vmatmul.bf16.gmra.mxu0 %v2880_v45  ;;  %v2204_v25 = vor.u32 %v2537_v15, %v2201_v16  ;;  %v2444_v40 = vor.u32 %v2597_v33, %v2441_v34  ;;  %v2589_v1 = vld [vmem:[%s2746_s30 + $0x38c] sm:$0xf]  ;;  %v2009_v6 = vld [vmem:[%s2746_s30 + $0x78] sm:$0xf0] }
  0x79   : > { %1342 = vmatpush.bf16.msra.mxu0 %v2008_v32  ;;  %1399 = vmatpush.bf16.msra.mxu3 %v2392_v36  ;;  %v2060_v32 = vor.u32 %v2501_v27, %v2057_v28  ;;  %v2297_v36 = vld [vmem:[%s2746_s30 + $0x2b8] sm:$0xf0]  ;;  %v2489_v5 = vld [vmem:[%s2746_s30 + $0x6c] sm:$0xf] }
  0x7a   : > { %1332 = vmatmul.bf16.gmra.mxu3 %v2891_v57  ;;  %v2300_v43 = vor.u32 %v2561_v35, %v2297_v36  ;;  %v2521_v9 = vld [vmem:[%s2746_s30 + $0x16c] sm:$0xf]  ;;  %v2137_v10 = vld [vmem:[%s2746_s30 + $0x178] sm:$0xf0] }
  0x7b   : > { %1362 = vmatpush.bf16.msra.mxu1 %v2120_v46  ;;  %v2593_v46 = vld [vmem:[%s2746_s30 + $0x3ac] sm:$0xf]  ;;  %v2393_v14 = vld [vmem:[%s2746_s30 + $0x378] sm:$0xf0] }
  0x7c   : > { %1381 = vmatpush.bf16.msra.mxu2 %v2248_v37  ;;  %v2497_v37 = vld [vmem:[%s2746_s30 + $0xac] sm:$0xf]  ;;  %v2428_v60 = vor.u32 %v2593_v46, %v2425_v47  ;;  %v2249_v16 = vld [vmem:[%s2746_s30 + $0x258] sm:$0xf0] }
  0x7d   : > { %1343 = vmatpush.bf16.msra.mxu0 %v1992_v44  ;;  %1400 = vmatpush.bf16.msra.mxu3 %v2376_v50  ;;  %v2044_v44 = vor.u32 %v2497_v37, %v2041_v38  ;;  %v2281_v50 = vld [vmem:[%s2746_s30 + $0x298] sm:$0xf0]  ;;  %v2585_v13 = vld [vmem:[%s2746_s30 + $0x36c] sm:$0xf] }
  0x7e   : > { %v2284_v63 = vor.u32 %v2557_v48, %v2281_v50  ;;  %v2549_v15 = vld [vmem:[%s2746_s30 + $0x24c] sm:$0xf]  ;;  %v1993_v18 = vld [vmem:[%s2746_s30 + $0x58] sm:$0xf0] }
  0x7f   : > { %1363 = vmatpush.bf16.msra.mxu1 %v2104_v3  ;;  %v2553_v3 = vld [vmem:[%s2746_s30 + $0x26c] sm:$0xf]  ;;  %v2121_v22 = vld [vmem:[%s2746_s30 + $0x158] sm:$0xf0] }
  0x80   : > { %1382 = vmatpush.bf16.msra.mxu2 %v2232_v53  ;;  %v2493_v53 = vld [vmem:[%s2746_s30 + $0x8c] sm:$0xf]  ;;  %v2268_v11 = vor.u32 %v2553_v3, %v2265_v4  ;;  %v2233_v28 = vld [vmem:[%s2746_s30 + $0x238] sm:$0xf0] }
  0x81   : > { %1344 = vmatpush.bf16.msra.mxu0 %v1976_v2  ;;  %1401 = vmatpush.bf16.msra.mxu3 %v2360_v7  ;;  %v2028_v0 = vor.u32 %v2493_v53, %v2025_v56  ;;  %v2409_v2 = vld [vmem:[%s2746_s30 + $0x398] sm:$0xf0]  ;;  %v2156_v7 = vor.u32 %v2525_v61, %v2153_v62  ;;  %v2485_v17 = vld [vmem:[%s2746_s30 + $0x4c] sm:$0xf] }
  0x82   : > { %v2517_v21 = vld [vmem:[%s2746_s30 + $0x14c] sm:$0xf]  ;;  %v1977_v30 = vld [vmem:[%s2746_s30 + $0x38] sm:$0xf0] }
  0x83   : > { %1364 = vmatpush.bf16.msra.mxu1 %v2088_v20  ;;  %v2396_v20 = vor.u32 %v2585_v13, %v2393_v14  ;;  %v2545_v27 = vld [vmem:[%s2746_s30 + $0x22c] sm:$0xf]  ;;  %v2124_v31 = vor.u32 %v2517_v21, %v2121_v22  ;;  %v2105_v34 = vld [vmem:[%s2746_s30 + $0x138] sm:$0xf0]  ;;  %v362_v14 = vld [vmem:[#allocation2 + $0x40] sm:$0xff] }
  0x84   : > { %1383 = vmatpush.bf16.msra.mxu2 %v2216_v8  ;;  %v2412_v8 = vor.u32 %v2589_v1, %v2409_v2  ;;  %v2513_v33 = vld [vmem:[%s2746_s30 + $0x12c] sm:$0xf]  ;;  %v2236_v35 = vor.u32 %v2545_v27, %v2233_v28  ;;  %v2361_v38 = vld [vmem:[%s2746_s30 + $0x338] sm:$0xf0]  ;;  %v366_v22 = vld [vmem:[#allocation2 + $0x60] sm:$0xff] }
  0x85   : > { %1345 = vmatpush.bf16.msra.mxu0 %v1960_v19  ;;  %1402 = vmatpush.bf16.msra.mxu3 %v2344_v23  ;;  %v2140_v19 = vor.u32 %v2521_v9, %v2137_v10  ;;  %v2252_v23 = vor.u32 %v2549_v15, %v2249_v16  ;;  %v2577_v37 = vld [vmem:[%s2746_s30 + $0x32c] sm:$0xf]  ;;  %v1961_v42 = vld [vmem:[%s2746_s30 + $0x18] sm:$0xf0] }
  0x86   : > { %1365 = vmatmul.bf16.vlgmr.msra.gmra.mxu1 %v2833_v54  ;;  %v2477_v41 = vld [vmem:[%s2746_s30 + $0xc] sm:$0xf]  ;;  %v2089_v50 = vld [vmem:[%s2746_s30 + $0x118] sm:$0xf0] }
  0x87   : > { %1433 = vmatpush.bf16.msrb.mxu1 %v2204_v25  ;;  %1384 = vmatmul.bf16.vlgmr.msra.gmra.mxu2 %v2835_v55  ;;  %v2581_v25 = vld [vmem:[%s2746_s30 + $0x34c] sm:$0xf]  ;;  %v1964_v48 = vor.u32 %v2477_v41, %v1961_v42  ;;  %v2345_v56 = vld [vmem:[%s2746_s30 + $0x318] sm:$0xf0] }
  0x88   : > { %1452 = vmatpush.bf16.msrb.mxu2 %v2332_v12  ;;  %1346 = vmatmul.bf16.vlgmr.msra.gmra.mxu0 %v2828_v49  ;;  %v2012_v12 = vor.u32 %v2489_v5, %v2009_v6  ;;  %v2509_v46 = vld [vmem:[%s2746_s30 + $0x10c] sm:$0xf] }
  0x89   : > { %1414 = vmatpush.bf16.msrb.mxu0 %v2076_v24  ;;  %1471 = vmatpush.bf16.msrb.mxu3 %v2460_v26  ;;  %v1996_v24 = vor.u32 %v2485_v17, %v1993_v18  ;;  %v2377_v26 = vld [vmem:[%s2746_s30 + $0x358] sm:$0xf0]  ;;  %v2573_v53 = vld [vmem:[%s2746_s30 + $0x30c] sm:$0xf] }
  0x8a   : > { %1403 = vmatmul.bf16.vlgmr.msra.gmra.mxu3 %v2839_v58  ;;  %v359_v42 = vld [vmem:[#allocation2 + $0x68] sm:$0xff] }
  0x8b   : > { %1434 = vmatpush.bf16.msrb.mxu1 %v2188_v39  ;;  %v2541_v39 = vld [vmem:[%s2746_s30 + $0x20c] sm:$0xf] }
  0x8c   : > { %1453 = vmatpush.bf16.msrb.mxu2 %v2316_v29  ;;  %v2481_v29 = vld [vmem:[%s2746_s30 + $0x2c] sm:$0xf] }
  0x8d   : > { %1415 = vmatpush.bf16.msrb.mxu0 %v2060_v32  ;;  %1472 = vmatpush.bf16.msrb.mxu3 %v2444_v40  ;;  %v2380_v32 = vor.u32 %v2581_v25, %v2377_v26  ;;  %v1980_v36 = vor.u32 %v2481_v29, %v1977_v30  ;;  %v2217_v40 = vld [vmem:[%s2746_s30 + $0x218] sm:$0xf0] }
  0x8e   : > { %v2220_v47 = vor.u32 %v2541_v39, %v2217_v40 }
  0x8f   : > { %1435 = vmatpush.bf16.msrb.mxu1 %v2172_v59  ;;  %v2092_v59 = vor.u32 %v2509_v46, %v2089_v50 }
  0x90   : > { %1454 = vmatpush.bf16.msrb.mxu2 %v2300_v43  ;;  %v2108_v43 = vor.u32 %v2513_v33, %v2105_v34  ;;  %v355_v33 = vld [vmem:[#allocation2] sm:$0xff] }
  0x91   : > { %1416 = vmatpush.bf16.msrb.mxu0 %v2044_v44  ;;  %1473 = vmatpush.bf16.msrb.mxu3 %v2428_v60  ;;  %v2364_v44 = vor.u32 %v2577_v37, %v2361_v38  ;;  %v2348_v60 = vor.u32 %v2573_v53, %v2345_v56 }
  0x93   : > { %1436 = vmatpush.bf16.msrb.mxu1 %v2156_v7 }
  0x94   : > { %1455 = vmatpush.bf16.msrb.mxu2 %v2284_v63 }
  0x95   : > { %1417 = vmatpush.bf16.msrb.mxu0 %v2028_v0  ;;  %1474 = vmatpush.bf16.msrb.mxu3 %v2412_v8 }
  0x96   : > { %1370 = vmatmul.bf16.gmra.mxu1 %v2885_v51 }
  0x97   : > { %1437 = vmatpush.bf16.msrb.mxu1 %v2140_v19  ;;  %1389 = vmatmul.bf16.gmra.mxu2 %v2887_v52 }
  0x98   : > { %1456 = vmatpush.bf16.msrb.mxu2 %v2268_v11  ;;  %1351 = vmatmul.bf16.gmra.mxu0 %v2880_v45 }
  0x99   : > { %1418 = vmatpush.bf16.msrb.mxu0 %v2012_v12  ;;  %1475 = vmatpush.bf16.msrb.mxu3 %v2396_v20 }
  0x9a   : > { %1408 = vmatmul.bf16.gmra.mxu3 %v2891_v57 }
  0x9b   : > { %1438 = vmatpush.bf16.msrb.mxu1 %v2124_v31 }
  0x9c   : > { %1457 = vmatpush.bf16.msrb.mxu2 %v2252_v23 }
  0x9d   : > { %1419 = vmatpush.bf16.msrb.mxu0 %v1996_v24  ;;  %1476 = vmatpush.bf16.msrb.mxu3 %v2380_v32 }
  0x9f   : > { %1439 = vmatpush.bf16.msrb.mxu1 %v2108_v43 }
  0xa0   : > { %1458 = vmatpush.bf16.msrb.mxu2 %v2236_v35 }
  0xa1   : > { %1420 = vmatpush.bf16.msrb.mxu0 %v1980_v36  ;;  %1477 = vmatpush.bf16.msrb.mxu3 %v2364_v44 }
  0xa3   : > { %1440 = vmatpush.bf16.msrb.mxu1 %v2092_v59  ;;  %v363_v59 = vld [vmem:[#allocation2 + $0x20] sm:$0xff] }
  0xa4   : > { %1459 = vmatpush.bf16.msrb.mxu2 %v2220_v47 }
  0xa5   : > { %1421 = vmatpush.bf16.msrb.mxu0 %v1964_v48  ;;  %1478 = vmatpush.bf16.msrb.mxu3 %v2348_v60 }
  0xa6   : > { %1441 = vmatmul.bf16.vlgmr.msrb.gmra.mxu1 %v2833_v54  ;;  %v354_v54 = vld [vmem:[#allocation2 + $0x30] sm:$0xff] }
  0xa7   : > { %1460 = vmatmul.bf16.vlgmr.msrb.gmra.mxu2 %v2835_v55 }
  0xa8   : > { %1422 = vmatmul.bf16.vlgmr.msrb.gmra.mxu0 %v2828_v49 }
  0xaa   : > { %1479 = vmatmul.bf16.vlgmr.msrb.gmra.mxu3 %v2839_v58 }
  0xb6   : > { %1446 = vmatmul.bf16.gmra.mxu1 %v2885_v51 }
  0xb7   : > { %1465 = vmatmul.bf16.gmra.mxu2 %v2887_v52  ;;  %v358_v52 = vld [vmem:[#allocation2 + $0x50] sm:$0xff] }
  0xb8   : > { %1427 = vmatmul.bf16.gmra.mxu0 %v2880_v45 }
  0xba   : > { %1484 = vmatmul.bf16.gmra.mxu3 %v2891_v57 }
  0xc3   : > { %v1195_v61 = vpop.f32.mrf.mxu0  ;;  %v1214_v62 = vpop.f32.mrf.mxu1 }
  0xc4   : > { %v1215_v63 = vadd.f32 %v1214_v62, %v1195_v61 }
  0xca   : > { %v1233_v0 = vpop.f32.mrf.mxu2 }
  0xcb   : > { %v1234_v1 = vadd.f32 %v1233_v0, %v1215_v63  ;;  %v1252_v49 = vpop.f32.mrf.mxu3  ;;  %v1197_v2 = vpop.f32.mrf.mxu0 }
  0xcc   : > { %v1216_v3 = vpop.f32.mrf.mxu1 }
  0xcd   : > { %v1253_v55 = vadd.f32 %v1252_v49, %v1234_v1  ;;  %v1217_v58 = vadd.f32 %v1216_v3, %v1197_v2 }
  0xcf   : > { %v1490_v4 = vadd.f32 %v1253_v55, %v354_v54  ;;  %v367_v54 = vld [vmem:[#allocation2 + $0x70] sm:$0xff] }
  0xd1   : > { %1506 = vst [vmem:[#allocation2 + $0x30] sm:$0xff] %v1490_v4 }
  0xd2   : > { %v1235_v45 = vpop.f32.mrf.mxu2 }
  0xd3   : > { %v1236_v5 = vadd.f32 %v1235_v45, %v1217_v58  ;;  %v1254_v51 = vpop.f32.mrf.mxu3  ;;  %v1200_v6 = vpop.f32.mrf.mxu0 }
  0xd4   : > { %v1219_v7 = vpop.f32.mrf.mxu1 }
  0xd5   : > { %v1255_v57 = vadd.f32 %v1254_v51, %v1236_v5  ;;  %v1220_v9 = vadd.f32 %v1219_v7, %v1200_v6 }
  0xd7   : > { %v1494_v8 = vadd.f32 %v1255_v57, %v358_v52  ;;  %v356_v52 = vld [vmem:[#allocation2 + $0x58] sm:$0xff] }
  0xd9   : > { %1510 = vst [vmem:[#allocation2 + $0x50] sm:$0xff] %v1494_v8 }
  0xda   : > { %v1238_v10 = vpop.f32.mrf.mxu2 }
  0xdb   : > { %v1239_v11 = vadd.f32 %v1238_v10, %v1220_v9  ;;  %v1257_v12 = vpop.f32.mrf.mxu3  ;;  %v1202_v13 = vpop.f32.mrf.mxu0 }
  0xdc   : > { %v1221_v15 = vpop.f32.mrf.mxu1 }
  0xdd   : > { %v1258_v16 = vadd.f32 %v1257_v12, %v1239_v11  ;;  %v1222_v18 = vadd.f32 %v1221_v15, %v1202_v13 }
  0xdf   : > { %v1498_v17 = vadd.f32 %v1258_v16, %v362_v14  ;;  %v360_v14 = vld [vmem:[#allocation2 + $0x8] sm:$0xff] }
  0xe1   : > { %1514 = vst [vmem:[#allocation2 + $0x40] sm:$0xff] %v1498_v17 }
  0xe2   : > { %v1240_v19 = vpop.f32.mrf.mxu2 }
  0xe3   : > { %v1241_v20 = vadd.f32 %v1240_v19, %v1222_v18  ;;  %v1259_v21 = vpop.f32.mrf.mxu3 }
  0xe4   : > { %v1290_v24 = vpop.f32.mrf.mxu1 }
  0xe5   : > { %v1271_v23 = vpop.f32.mrf.mxu0  ;;  %v1260_v25 = vadd.f32 %v1259_v21, %v1241_v20 }
  0xe6   : > { %v1291_v27 = vadd.f32 %v1290_v24, %v1271_v23  ;;  %v364_v23 = vld [vmem:[#allocation2 + $0x10] sm:$0xff] }
  0xe7   : > { %v1502_v26 = vadd.f32 %v1260_v25, %v366_v22 }
  0xe9   : > { %1518 = vst [vmem:[#allocation2 + $0x60] sm:$0xff] %v1502_v26 }
  0xea   : > { %v1309_v28 = vpop.f32.mrf.mxu2 }
  0xeb   : > { %v1310_v30 = vadd.f32 %v1309_v28, %v1291_v27 }
  0xec   : > { %v1292_v32 = vpop.f32.mrf.mxu1 }
  0xed   : > { %v1328_v29 = vpop.f32.mrf.mxu3  ;;  %v1273_v31 = vpop.f32.mrf.mxu0 }
  0xee   : > { %v1329_v34 = vadd.f32 %v1328_v29, %v1310_v30  ;;  %v1293_v36 = vadd.f32 %v1292_v32, %v1273_v31  ;;  %v368_v32 = vld [vmem:[#allocation2 + $0x78] sm:$0xff] }
  0xf0   : > { %v1491_v35 = vadd.f32 %v1329_v34, %v355_v33 }
  0xf2   : > { %1507 = vst [vmem:[#allocation2] sm:$0xff] %v1491_v35  ;;  %v1311_v37 = vpop.f32.mrf.mxu2 }
  0xf3   : > { %v1312_v39 = vadd.f32 %v1311_v37, %v1293_v36 }
  0xf4   : > { %v1295_v41 = vpop.f32.mrf.mxu1 }
  0xf5   : > { %v1330_v38 = vpop.f32.mrf.mxu3  ;;  %v1276_v40 = vpop.f32.mrf.mxu0 }
  0xf6   : > { %v1331_v43 = vadd.f32 %v1330_v38, %v1312_v39  ;;  %v1296_v46 = vadd.f32 %v1295_v41, %v1276_v40  ;;  %v357_v41 = vld [vmem:[#allocation2 + $0x18] sm:$0xff] }
  0xf8   : > { %v1495_v44 = vadd.f32 %v1331_v43, %v359_v42 }
  0xfa   : > { %1511 = vst [vmem:[#allocation2 + $0x68] sm:$0xff] %v1495_v44  ;;  %v1314_v47 = vpop.f32.mrf.mxu2 }
  0xfb   : > { %v1315_v50 = vadd.f32 %v1314_v47, %v1296_v46 }
  0xfc   : > { %v1297_v56 = vpop.f32.mrf.mxu1 }
  0xfd   : > { %v1333_v48 = vpop.f32.mrf.mxu3  ;;  %v1278_v53 = vpop.f32.mrf.mxu0 }
  0xfe   : > { %v1334_v60 = vadd.f32 %v1333_v48, %v1315_v50  ;;  %v1298_v62 = vadd.f32 %v1297_v56, %v1278_v53  ;;  %v361_v50 = vld [vmem:[#allocation2 + $0x48] sm:$0xff] }
 0x100   : > { %v1499_v61 = vadd.f32 %v1334_v60, %v363_v59 }
 0x102   : > { %1515 = vst [vmem:[#allocation2 + $0x20] sm:$0xff] %v1499_v61  ;;  %v1316_v63 = vpop.f32.mrf.mxu2 }
 0x103   : > { %v1317_v1 = vadd.f32 %v1316_v63, %v1298_v62 }
 0x104   : > { %v1366_v2 = vpop.f32.mrf.mxu1 }
 0x105   : > { %v1335_v0 = vpop.f32.mrf.mxu3  ;;  %v1347_v49 = vpop.f32.mrf.mxu0 }
 0x106   : > { %v1336_v3 = vadd.f32 %v1335_v0, %v1317_v1  ;;  %v1367_v4 = vadd.f32 %v1366_v2, %v1347_v49  ;;  %v365_v1 = vld [vmem:[#allocation2 + $0x38] sm:$0xff] }
 0x108   : > { %v1503_v55 = vadd.f32 %v1336_v3, %v367_v54 }
 0x10a   : > { %1519 = vst [vmem:[#allocation2 + $0x70] sm:$0xff] %v1503_v55  ;;  %v1385_v58 = vpop.f32.mrf.mxu2 }
 0x10b   : > { %v1386_v5 = vadd.f32 %v1385_v58, %v1367_v4 }
 0x10c   : > { %v1368_v6 = vpop.f32.mrf.mxu1 }
 0x10d   : > { %v1404_v45 = vpop.f32.mrf.mxu3  ;;  %v1349_v51 = vpop.f32.mrf.mxu0 }
 0x10e   : > { %v1405_v7 = vadd.f32 %v1404_v45, %v1386_v5  ;;  %v1369_v8 = vadd.f32 %v1368_v6, %v1349_v51  ;;  %v369_v45 = vld [vmem:[#allocation2 + $0x28] sm:$0xff] }
 0x110   : > { %v1492_v57 = vadd.f32 %v1405_v7, %v356_v52 }
 0x112   : > { %1508 = vst [vmem:[#allocation2 + $0x58] sm:$0xff] %v1492_v57  ;;  %v1387_v9 = vpop.f32.mrf.mxu2 }
 0x113   : > { %v1388_v11 = vadd.f32 %v1387_v9, %v1369_v8 }
 0x114   : > { %v1371_v13 = vpop.f32.mrf.mxu1 }
 0x115   : > { %v1406_v10 = vpop.f32.mrf.mxu3  ;;  %v1352_v12 = vpop.f32.mrf.mxu0 }
 0x116   : > { %v1407_v15 = vadd.f32 %v1406_v10, %v1388_v11  ;;  %v1372_v17 = vadd.f32 %v1371_v13, %v1352_v12 }
 0x118   : > { %v1496_v16 = vadd.f32 %v1407_v15, %v360_v14 }
 0x11a   : > { %1512 = vst [vmem:[#allocation2 + $0x8] sm:$0xff] %v1496_v16  ;;  %v1390_v18 = vpop.f32.mrf.mxu2 }
 0x11b   : > { %v1391_v20 = vadd.f32 %v1390_v18, %v1372_v17 }
 0x11c   : > { %v1373_v22 = vpop.f32.mrf.mxu1 }
 0x11d   : > { %v1409_v19 = vpop.f32.mrf.mxu3  ;;  %v1354_v21 = vpop.f32.mrf.mxu0 }
 0x11e   : > { %v1410_v24 = vadd.f32 %v1409_v19, %v1391_v20  ;;  %v1374_v26 = vadd.f32 %v1373_v22, %v1354_v21 }
 0x120   : > { %v1500_v25 = vadd.f32 %v1410_v24, %v364_v23 }
 0x122   : > { %1516 = vst [vmem:[#allocation2 + $0x10] sm:$0xff] %v1500_v25  ;;  %v1392_v27 = vpop.f32.mrf.mxu2 }
 0x123   : > { %v1393_v29 = vadd.f32 %v1392_v27, %v1374_v26 }
 0x124   : > { %v1442_v31 = vpop.f32.mrf.mxu1 }
 0x125   : > { %v1411_v28 = vpop.f32.mrf.mxu3  ;;  %v1423_v30 = vpop.f32.mrf.mxu0 }
 0x126   : > { %v1412_v33 = vadd.f32 %v1411_v28, %v1393_v29  ;;  %v1443_v35 = vadd.f32 %v1442_v31, %v1423_v30 }
 0x128   : > { %v1504_v34 = vadd.f32 %v1412_v33, %v368_v32 }
 0x12a   : > { %1520 = vst [vmem:[#allocation2 + $0x78] sm:$0xff] %v1504_v34  ;;  %v1461_v36 = vpop.f32.mrf.mxu2 }
 0x12b   : > { %v1462_v38 = vadd.f32 %v1461_v36, %v1443_v35 }
 0x12c   : > { %v1444_v40 = vpop.f32.mrf.mxu1 }
 0x12d   : > { %v1480_v37 = vpop.f32.mrf.mxu3  ;;  %v1425_v39 = vpop.f32.mrf.mxu0 }
 0x12e   : > { %v1481_v42 = vadd.f32 %v1480_v37, %v1462_v38  ;;  %v1445_v44 = vadd.f32 %v1444_v40, %v1425_v39 }
 0x130   : > { %v1493_v43 = vadd.f32 %v1481_v42, %v357_v41 }
 0x132   : > { %1509 = vst [vmem:[#allocation2 + $0x18] sm:$0xff] %v1493_v43  ;;  %v1463_v46 = vpop.f32.mrf.mxu2 }
 0x133   : > { %v1464_v48 = vadd.f32 %v1463_v46, %v1445_v44 }
 0x134   : > { %v1447_v56 = vpop.f32.mrf.mxu1 }
 0x135   : > { %v1482_v47 = vpop.f32.mrf.mxu3  ;;  %v1428_v53 = vpop.f32.mrf.mxu0 }
 0x136   : > { %v1483_v59 = vadd.f32 %v1482_v47, %v1464_v48  ;;  %v1448_v61 = vadd.f32 %v1447_v56, %v1428_v53 }
 0x138   : > { %v1497_v60 = vadd.f32 %v1483_v59, %v361_v50 }
 0x13a   : > { %1513 = vst [vmem:[#allocation2 + $0x48] sm:$0xff] %v1497_v60  ;;  %v1466_v62 = vpop.f32.mrf.mxu2 }
 0x13b   : > { %v1467_v0 = vadd.f32 %v1466_v62, %v1448_v61 }
 0x13c   : > { %v1449_v54 = vpop.f32.mrf.mxu1 }
 0x13d   : > { %v1485_v63 = vpop.f32.mrf.mxu3  ;;  %v1430_v2 = vpop.f32.mrf.mxu0 }
 0x13e   : > { %v1486_v49 = vadd.f32 %v1485_v63, %v1467_v0  ;;  %v1450_v55 = vadd.f32 %v1449_v54, %v1430_v2 }
 0x140   : > { %v1501_v3 = vadd.f32 %v1486_v49, %v365_v1 }
 0x142   : > { %1517 = vst [vmem:[#allocation2 + $0x38] sm:$0xff] %v1501_v3  ;;  %v1468_v4 = vpop.f32.mrf.mxu2 }
 0x143   : > { %v1469_v58 = vadd.f32 %v1468_v4, %v1450_v55 }
 0x145   : > { %v1487_v5 = vpop.f32.mrf.mxu3 }
 0x146   : > { %v1488_v51 = vadd.f32 %v1487_v5, %v1469_v58  ;;  %1525 = sbr.rel (%p2461_p6) target bundleno = 396 (0x18c), region = 48 }
 0x148   : > { %v1505_v6 = vadd.f32 %v1488_v51, %v369_v45 }
 0x14a   : > { %1521 = vst [vmem:[#allocation2 + $0x28] sm:$0xff] %v1505_v6 }
 0x14b   : > { %v1526_v52 = vld [vmem:[#allocation2 + $0x30] sm:$0xff]  ;;  %v1542_v7 = vld [vmem:[%s3284_s2] sm:$0xf]  ;;  %v1528_v13 = vld [vmem:[#allocation2 + $0x58] sm:$0xff] }
 0x14c   : > { %v1568_v57 = vld [vmem:[%s3285_s3] sm:$0xf]  ;;  %v3076_v8 = vperm.slane %v1542_v7, 0  ;;  %v3080_v11 = vperm.slane %v1542_v7, 1  ;;  %v3084_v14 = vperm.slane %v1542_v7, 2  ;;  %v3088_v16 = vperm.slane %v1542_v7, 3 }
 0x14d   : > { %v3078_v9 = vperm.slane %v1568_v57, 0  ;;  %v1527_v10 = vld [vmem:[#allocation2] sm:$0xff]  ;;  %v3082_v12 = vperm.slane %v1568_v57, 1  ;;  %v3086_v15 = vperm.slane %v1568_v57, 2  ;;  %v1529_v20 = vld [vmem:[#allocation2 + $0x18] sm:$0xff]  ;;  %v3095_v21 = vperm.slane %v1568_v57, 3 }
 0x14e   : > { %v1552_v17 = vmul.f32 %v3076_v8, %v1526_v52  ;;  %v1594_v18 = vld [vmem:[%s3286_s4] sm:$0xff]  ;;  %v1553_v19 = vmul.f32 %v3080_v11, %v1527_v10  ;;  %v1530_v22 = vld [vmem:[#allocation2 + $0x50] sm:$0xff]  ;;  %v1595_v23 = vld [vmem:[%s3286_s4 + $0x8] sm:$0xff]  ;;  %v1554_v24 = vmul.f32 %v3084_v14, %v1528_v13  ;;  %v1555_v26 = vmul.f32 %v3088_v16, %v1529_v20 }
 0x14f   : > { %v1596_v25 = vld [vmem:[%s3286_s4 + $0x10] sm:$0xff]  ;;  %v1556_v27 = vmul.f32 %v3076_v8, %v1530_v22  ;;  %v1531_v28 = vld [vmem:[#allocation2 + $0x68] sm:$0xff]  ;;  %v1597_v31 = vld [vmem:[%s3286_s4 + $0x18] sm:$0xff] }
 0x150   : > { %v1578_v29 = vadd.f32 %v3078_v9, %v1552_v17  ;;  %v1579_v30 = vadd.f32 %v3082_v12, %v1553_v19  ;;  %v1598_v32 = vld [vmem:[%s3286_s4 + $0x20] sm:$0xff]  ;;  %v1557_v33 = vmul.f32 %v3080_v11, %v1531_v28  ;;  %v1532_v34 = vld [vmem:[#allocation2 + $0x8] sm:$0xff]  ;;  %v1580_v35 = vadd.f32 %v3086_v15, %v1554_v24  ;;  %v1600_v56 = vld [vmem:[%s3286_s4 + $0x30] sm:$0xff] }
 0x151   : > { %v1581_v36 = vadd.f32 %v3095_v21, %v1555_v26  ;;  %v1582_v37 = vadd.f32 %v3078_v9, %v1556_v27  ;;  %v1558_v38 = vmul.f32 %v3084_v14, %v1532_v34  ;;  %v1533_v39 = vld [vmem:[#allocation2 + $0x48] sm:$0xff]  ;;  %v1601_v57 = vld [vmem:[%s3286_s4 + $0x38] sm:$0xff]  ;;  %v1534_v28 = vld [vmem:[#allocation2 + $0x40] sm:$0xff] }
 0x152   : > { %v1610_v40 = vadd.f32 %v1594_v18, %v1578_v29  ;;  %v1611_v41 = vadd.f32 %v1595_v23, %v1579_v30  ;;  %v1583_v42 = vadd.f32 %v3082_v12, %v1557_v33  ;;  %v1612_v43 = vadd.f32 %v1596_v25, %v1580_v35  ;;  %v1599_v53 = vld [vmem:[%s3286_s4 + $0x28] sm:$0xff]  ;;  %v1535_v33 = vld [vmem:[#allocation2 + $0x20] sm:$0xff]  ;;  %v1536_v34 = vld [vmem:[#allocation2 + $0x10] sm:$0xff] }
 0x153   : > { %v1613_v44 = vadd.f32 %v1597_v31, %v1581_v36  ;;  %v1614_v46 = vadd.f32 %v1598_v32, %v1582_v37  ;;  %v1584_v47 = vadd.f32 %v3086_v15, %v1558_v38  ;;  %v1559_v59 = vmul.f32 %v3088_v16, %v1533_v39 }
 0x154   : > { %v1642_v48 = vmul.f32 0.044715, %v1610_v40  ;;  %v1643_v50 = vmul.f32 0.044715, %v1611_v41  ;;  %v3128_v60 = vmul.f32 0.5, %v1610_v40  ;;  %v3130_v0 = vmul.f32 0.5, %v1611_v41 }
 0x155   : > { %v1644_v61 = vmul.f32 0.044715, %v1612_v43  ;;  %v1645_v62 = vmul.f32 0.044715, %v1613_v44  ;;  %v1646_v49 = vmul.f32 0.044715, %v1614_v46  ;;  %v1615_v3 = vadd.f32 %v1599_v53, %v1583_v42 }
 0x156   : > { %v1658_v63 = vmul.f32 %v1642_v48, %v1610_v40  ;;  %v1659_v1 = vmul.f32 %v1643_v50, %v1611_v41  ;;  %v1616_v55 = vadd.f32 %v1600_v56, %v1584_v47  ;;  %v1585_v5 = vadd.f32 %v3095_v21, %v1559_v59  ;;  %v1602_v42 = vld [vmem:[%s3286_s4 + $0x40] sm:$0xff]  ;;  %v1603_v50 = vld [vmem:[%s3286_s4 + $0x48] sm:$0xff] }
 0x157   : > { %v1660_v2 = vmul.f32 %v1644_v61, %v1612_v43  ;;  %v1661_v54 = vmul.f32 %v1645_v62, %v1613_v44  ;;  %v1662_v45 = vmul.f32 %v1646_v49, %v1614_v46  ;;  %v3133_v51 = vmul.f32 0.5, %v1612_v43  ;;  %v1604_v61 = vld [vmem:[%s3286_s4 + $0x50] sm:$0xff]  ;;  %v1537_v49 = vld [vmem:[#allocation2 + $0x38] sm:$0xff] }
 0x158   : > { %v1674_v4 = vmul.f32 %v1658_v63, %v1610_v40  ;;  %v1675_v58 = vmul.f32 %v1659_v1, %v1611_v41  ;;  %v1647_v7 = vmul.f32 0.044715, %v1615_v3  ;;  %v3138_v17 = vmul.f32 0.5, %v1613_v44 }
 0x159   : > { %v1676_v6 = vmul.f32 %v1660_v2, %v1612_v43  ;;  %v1677_v52 = vmul.f32 %v1661_v54, %v1613_v44  ;;  %v1678_v18 = vmul.f32 %v1662_v45, %v1614_v46  ;;  %v1648_v23 = vmul.f32 0.044715, %v1616_v55 }
 0x15a   : > { %v1690_v10 = vadd.f32 %v1674_v4, %v1610_v40  ;;  %v1691_v13 = vadd.f32 %v1675_v58, %v1611_v41  ;;  %v1663_v22 = vmul.f32 %v1647_v7, %v1615_v3  ;;  %v1617_v27 = vadd.f32 %v1601_v57, %v1585_v5  ;;  %v1538_v5 = vld [vmem:[#allocation2 + $0x60] sm:$0xff] }
 0x15b   : > { %v1692_v19 = vadd.f32 %v1676_v6, %v1612_v43  ;;  %v1693_v20 = vadd.f32 %v1677_v52, %v1613_v44  ;;  %v1694_v26 = vadd.f32 %v1678_v18, %v1614_v46  ;;  %v1664_v32 = vmul.f32 %v1648_v23, %v1616_v55 }
 0x15c   : > { %v1706_v24 = vmul.f32 0.7978845, %v1690_v10  ;;  %v1707_v25 = vmul.f32 0.7978845, %v1691_v13  ;;  %v1679_v31 = vmul.f32 %v1663_v22, %v1615_v3  ;;  %v3140_v35 = vmul.f32 0.5, %v1614_v46 }
 0x15d   : > { %v1708_v29 = vmul.f32 0.7978845, %v1692_v19  ;;  %v1709_v30 = vmul.f32 0.7978845, %v1693_v20  ;;  %v1710_v36 = vmul.f32 0.7978845, %v1694_v26  ;;  %v1680_v39 = vmul.f32 %v1664_v32, %v1616_v55 }
 0x15e   : > { %2629 = vtanh.f32 %v1706_v24  ;;  %v1649_v37 = vmul.f32 0.044715, %v1617_v27  ;;  %v1695_v38 = vadd.f32 %v1679_v31, %v1615_v3  ;;  %v1560_v40 = vmul.f32 %v3076_v8, %v1534_v28 }
 0x15f   : > { %2631 = vtanh.f32 %v1707_v25  ;;  %v1561_v43 = vmul.f32 %v3080_v11, %v1535_v33  ;;  %v1562_v44 = vmul.f32 %v3084_v14, %v1536_v34  ;;  %v1696_v47 = vadd.f32 %v1680_v39, %v1616_v55 }
 0x160   : > { %2633 = vtanh.f32 %v1708_v29  ;;  %v1665_v41 = vmul.f32 %v1649_v37, %v1617_v27  ;;  %v1711_v46 = vmul.f32 0.7978845, %v1695_v38  ;;  %v1586_v48 = vadd.f32 %v3078_v9, %v1560_v40  ;;  %v1539_v37 = vld [vmem:[#allocation2 + $0x70] sm:$0xff] }
 0x161   : > { %2635 = vtanh.f32 %v1709_v30  ;;  %v1587_v56 = vadd.f32 %v3082_v12, %v1561_v43  ;;  %v1588_v59 = vadd.f32 %v3086_v15, %v1562_v44  ;;  %v1631_v62 = vmul.f32 0.5, %v1615_v3 }
 0x162   : > { %2637 = vtanh.f32 %v1710_v36  ;;  %v1681_v53 = vmul.f32 %v1665_v41, %v1617_v27  ;;  %v1712_v63 = vmul.f32 0.7978845, %v1696_v47  ;;  %v3157_v1 = vadd.f32 %v1602_v42, %v1586_v48  ;;  %v1606_v36 = vld [vmem:[%s3286_s4 + $0x60] sm:$0xff] }
 0x163   : > { %2639 = vtanh.f32 %v1711_v46  ;;  %v1632_v54 = vmul.f32 0.5, %v1616_v55  ;;  %v3159_v4 = vmul.f32 0.5, %v1617_v27  ;;  %v3161_v45 = vadd.f32 %v1603_v50, %v1587_v56  ;;  %v1540_v50 = vld [vmem:[#allocation2 + $0x78] sm:$0xff] }
 0x164   : > { %v2630_v2 = vpop.eup %2629  ;;  %v1697_v58 = vadd.f32 %v1681_v53, %v1617_v27  ;;  %2641 = vtanh.f32 %v1712_v63  ;;  %v1650_v7 = vmul.f32 0.044715, %v3157_v1  ;;  %v3164_v57 = vadd.f32 %v1604_v61, %v1588_v59 }
 0x165   : > { %v2632_v6 = vpop.eup %2631  ;;  %v1738_v52 = vadd.f32 1.0, %v2630_v2  ;;  %v1651_v18 = vmul.f32 0.044715, %v3161_v45  ;;  %v1563_v55 = vmul.f32 %v3088_v16, %v1537_v49  ;;  %v1564_v24 = vmul.f32 %v3076_v8, %v1538_v5  ;;  %v1605_v8 = vld [vmem:[%s3286_s4 + $0x58] sm:$0xff]  ;;  %v1607_v2 = vld [vmem:[%s3286_s4 + $0x68] sm:$0xff] }
 0x166   : > { %v2634_v3 = vpop.eup %2633  ;;  %v1739_v10 = vadd.f32 1.0, %v2632_v6  ;;  %v1713_v13 = vmul.f32 0.7978845, %v1697_v58  ;;  %v1666_v23 = vmul.f32 %v1650_v7, %v3157_v1  ;;  %v1652_v32 = vmul.f32 0.044715, %v3164_v57 }
 0x167   : > { %v2636_v19 = vpop.eup %2635  ;;  %v1754_v20 = vmul.f32 %v1738_v52, %v3128_v60  ;;  %v1740_v22 = vadd.f32 1.0, %v2634_v3  ;;  %v1667_v28 = vmul.f32 %v1651_v18, %v3161_v45  ;;  %v1590_v41 = vadd.f32 %v3078_v9, %v1564_v24  ;;  %v1608_v18 = vld [vmem:[%s3286_s4 + $0x70] sm:$0xff] }
 0x168   : > { %v2638_v25 = vpop.eup %2637  ;;  %v1755_v26 = vmul.f32 %v1739_v10, %v3130_v0  ;;  %v1741_v27 = vadd.f32 1.0, %v2636_v19  ;;  %2643 = vtanh.f32 %v1713_v13  ;;  %v1682_v31 = vmul.f32 %v1666_v23, %v3157_v1 }
 0x169   : > { %v2640_v29 = vpop.eup %2639  ;;  %1770 = vst [vmem:[%s3287_s5] sm:$0xff] %v1754_v20  ;;  %v1756_v30 = vmul.f32 %v1740_v22, %v3133_v51  ;;  %v1742_v60 = vadd.f32 1.0, %v2638_v25  ;;  %v1683_v34 = vmul.f32 %v1667_v28, %v3161_v45  ;;  %v1589_v51 = vadd.f32 %v3095_v21, %v1563_v55 }
 0x16a   : > { %1771 = vst [vmem:[%s3287_s5 + $0x8] sm:$0xff] %v1755_v26  ;;  %v1757_v0 = vmul.f32 %v1741_v27, %v3138_v17  ;;  %v1743_v33 = vadd.f32 1.0, %v2640_v29  ;;  %v2642_v38 = vpop.eup %2641  ;;  %v1698_v40 = vadd.f32 %v1682_v31, %v3157_v1  ;;  %v1668_v17 = vmul.f32 %v1652_v32, %v3164_v57 }
 0x16b   : > { %1772 = vst [vmem:[%s3287_s5 + $0x10] sm:$0xff] %v1756_v30  ;;  %v1758_v39 = vmul.f32 %v1742_v60, %v3140_v35  ;;  %v1744_v43 = vadd.f32 1.0, %v2642_v38  ;;  %v1699_v44 = vadd.f32 %v1683_v34, %v3161_v45  ;;  %v3202_v46 = vadd.f32 %v1605_v8, %v1589_v51 }
 0x16c   : > { %1773 = vst [vmem:[%s3287_s5 + $0x18] sm:$0xff] %v1757_v0  ;;  %v1759_v42 = vmul.f32 %v1743_v33, %v1631_v62  ;;  %v1714_v35 = vmul.f32 0.7978845, %v1698_v40  ;;  %v1684_v47 = vmul.f32 %v1668_v17, %v3164_v57  ;;  %v3208_v48 = vadd.f32 %v1606_v36, %v1590_v41  ;;  %v1541_v62 = vld [vmem:[#allocation2 + $0x28] sm:$0xff] }
 0x16d   : > { %1774 = vst [vmem:[%s3287_s5 + $0x20] sm:$0xff] %v1758_v39  ;;  %v1565_v9 = vmul.f32 %v3080_v11, %v1539_v37  ;;  %v1760_v56 = vmul.f32 %v1744_v43, %v1632_v54  ;;  %v1715_v59 = vmul.f32 0.7978845, %v1699_v44  ;;  %v1653_v61 = vmul.f32 0.044715, %v3202_v46 }
 0x16e   : > { %v2644_v53 = vpop.eup %2643  ;;  %1775 = vst [vmem:[%s3287_s5 + $0x28] sm:$0xff] %v1759_v42  ;;  %2645 = vtanh.f32 %v1714_v35  ;;  %v1700_v49 = vadd.f32 %v1684_v47, %v3164_v57  ;;  %v1654_v54 = vmul.f32 0.044715, %v3208_v48  ;;  %v1566_v52 = vmul.f32 %v3084_v14, %v1540_v50 }
 0x16f   : > { %v1745_v63 = vadd.f32 1.0, %v2644_v53  ;;  %1776 = vst [vmem:[%s3287_s5 + $0x30] sm:$0xff] %v1760_v56  ;;  %2647 = vtanh.f32 %v1715_v59  ;;  %v1669_v11 = vmul.f32 %v1653_v61, %v3202_v46  ;;  %v1591_v58 = vadd.f32 %v3082_v12, %v1565_v9  ;;  %v1609_v12 = vld [vmem:[%s3286_s4 + $0x78] sm:$0xff] }
 0x170   : > { %v1716_v6 = vmul.f32 0.7978845, %v1700_v49  ;;  %v1567_v7 = vmul.f32 %v3088_v16, %v1541_v62  ;;  %v1670_v10 = vmul.f32 %v1654_v54, %v3208_v48  ;;  %v1592_v14 = vadd.f32 %v3086_v15, %v1566_v52 }
 0x171   : > { %v1761_v5 = vmul.f32 %v1745_v63, %v3159_v4  ;;  %v1685_v3 = vmul.f32 %v1669_v11, %v3202_v46  ;;  %v1623_v13 = vadd.f32 %v1607_v2, %v1591_v58  ;;  %v1634_v4 = vmul.f32 0.5, %v3157_v1 }
 0x172   : > { %2649 = vtanh.f32 %v1716_v6  ;;  %v1593_v16 = vadd.f32 %v3095_v21, %v1567_v7  ;;  %v1686_v19 = vmul.f32 %v1670_v10, %v3208_v48  ;;  %v1635_v23 = vmul.f32 0.5, %v3161_v45 }
 0x173   : > { %1777 = vst [vmem:[%s3287_s5 + $0x38] sm:$0xff] %v1761_v5  ;;  %v1701_v55 = vadd.f32 %v1685_v3, %v3202_v46  ;;  %v1655_v20 = vmul.f32 0.044715, %v1623_v13  ;;  %v1624_v24 = vadd.f32 %v1608_v18, %v1592_v14  ;;  %v1636_v21 = vmul.f32 0.5, %v3164_v57 }
 0x174   : > { %v2646_v22 = vpop.eup %2645  ;;  %v1625_v25 = vadd.f32 %v1609_v12, %v1593_v16  ;;  %v1702_v29 = vadd.f32 %v1686_v19, %v3208_v48  ;;  %v1637_v39 = vmul.f32 0.5, %v3202_v46  ;;  %v1638_v43 = vmul.f32 0.5, %v3208_v48 }
 0x175   : > { %v2648_v26 = vpop.eup %2647  ;;  %v1746_v27 = vadd.f32 1.0, %v2646_v22  ;;  %v1717_v28 = vmul.f32 0.7978845, %v1701_v55  ;;  %v1671_v15 = vmul.f32 %v1655_v20, %v1623_v13  ;;  %v1656_v1 = vmul.f32 0.044715, %v1624_v24 }
 0x176   : > { %v1747_v30 = vadd.f32 1.0, %v2648_v26  ;;  %v1718_v31 = vmul.f32 0.7978845, %v1702_v29  ;;  %v1657_v45 = vmul.f32 0.044715, %v1625_v25  ;;  %v1639_v56 = vmul.f32 0.5, %v1623_v13 }
 0x177   : > { %v1762_v60 = vmul.f32 %v1746_v27, %v1634_v4  ;;  %2651 = vtanh.f32 %v1717_v28  ;;  %v1687_v32 = vmul.f32 %v1671_v15, %v1623_v13  ;;  %v1672_v33 = vmul.f32 %v1656_v1, %v1624_v24 }
 0x178   : > { %v2650_v8 = vpop.eup %2649  ;;  %v1763_v0 = vmul.f32 %v1747_v30, %v1635_v23  ;;  %2653 = vtanh.f32 %v1718_v31  ;;  %v1673_v36 = vmul.f32 %v1657_v45, %v1625_v25  ;;  %v1640_v61 = vmul.f32 0.5, %v1624_v24 }
 0x179   : > { %1778 = vst [vmem:[%s3287_s5 + $0x40] sm:$0xff] %v1762_v60  ;;  %v1748_v34 = vadd.f32 1.0, %v2650_v8  ;;  %v1703_v51 = vadd.f32 %v1687_v32, %v1623_v13  ;;  %v1688_v57 = vmul.f32 %v1672_v33, %v1624_v24  ;;  %v1641_v2 = vmul.f32 0.5, %v1625_v25 }
 0x17a   : > { %1779 = vst [vmem:[%s3287_s5 + $0x48] sm:$0xff] %v1763_v0  ;;  %v1689_v17 = vmul.f32 %v1673_v36, %v1625_v25 }
 0x17b   : > { %v1764_v37 = vmul.f32 %v1748_v34, %v1636_v21  ;;  %v1719_v38 = vmul.f32 0.7978845, %v1703_v51  ;;  %v1704_v40 = vadd.f32 %v1688_v57, %v1624_v24 }
 0x17c   : > { %v1705_v35 = vadd.f32 %v1689_v17, %v1625_v25 }
 0x17d   : > { %v2652_v41 = vpop.eup %2651  ;;  %1780 = vst [vmem:[%s3287_s5 + $0x50] sm:$0xff] %v1764_v37  ;;  %2655 = vtanh.f32 %v1719_v38  ;;  %v1720_v44 = vmul.f32 0.7978845, %v1704_v40 }
 0x17e   : > { %v1749_v42 = vadd.f32 1.0, %v2652_v41  ;;  %v2654_v47 = vpop.eup %2653  ;;  %v1721_v53 = vmul.f32 0.7978845, %v1705_v35 }
 0x17f   : > { %v1750_v50 = vadd.f32 1.0, %v2654_v47  ;;  %2657 = vtanh.f32 %v1720_v44 }
 0x180   : > { %v1765_v9 = vmul.f32 %v1749_v42, %v1637_v39  ;;  %2659 = vtanh.f32 %v1721_v53 }
 0x181   : > { %v1766_v46 = vmul.f32 %v1750_v50, %v1638_v43 }
 0x182   : > { %1781 = vst [vmem:[%s3287_s5 + $0x58] sm:$0xff] %v1765_v9 }
 0x183   : > { %v2656_v59 = vpop.eup %2655  ;;  %1782 = vst [vmem:[%s3287_s5 + $0x60] sm:$0xff] %v1766_v46 }
 0x184   : > { %v1751_v48 = vadd.f32 1.0, %v2656_v59 }
 0x185   : > { %v2658_v62 = vpop.eup %2657 }
 0x186   : > { %v1767_v63 = vmul.f32 %v1751_v48, %v1639_v56  ;;  %v1752_v49 = vadd.f32 1.0, %v2658_v62  ;;  %v2660_v11 = vpop.eup %2659 }
 0x187   : > { %v1753_v58 = vadd.f32 1.0, %v2660_v11 }
 0x188   : > { %1783 = vst [vmem:[%s3287_s5 + $0x68] sm:$0xff] %v1767_v63  ;;  %v1768_v54 = vmul.f32 %v1752_v49, %v1640_v61 }
 0x189   : > { %v1769_v5 = vmul.f32 %v1753_v58, %v1641_v2 }
 0x18a   : > { %1784 = vst [vmem:[%s3287_s5 + $0x70] sm:$0xff] %v1768_v54 }
 0x18b   : > { %1785 = vst [vmem:[%s3287_s5 + $0x78] sm:$0xff] %v1769_v5 }
 0x18c PF: > { %s15_s20 = sadd.s32 1, %s2683_s20   ;;  %s3288_s18 = smov %s2679_s19 }
 0x18d   : > { %p12_p7 = scmp.ge.s32.totalorder %s15_s20, 11   ;;  %s3289_s19 = smov %s3291_s21 }
 0x18f   :  { %14 = sbr.rel (!%p12_p7) target bundleno = 2 (0x2), region = 90 }

// kernel: vit_forward.4
= control target key start
LH: loop header
LB: loop body
LE: loop exit
PB: predicated region body
PF: predicated region fallthrough
CT: control target
= control target key end

     0   :  { %9 = vsyncpa [#allocation4], 0  ;;  %s3414_s0 = inlined_call_operand.vmem [shape: bf16[9,32,512], index: 0, kind: input, shape index: {}]   ;;  %s3415_s1 = inlined_call_operand.hbm [shape: bf16[9,512,512], index: 1, kind: input, shape index: {}]   ;;  %s3416_s2 = inlined_call_operand.hbm [shape: f32[1,512], index: 2, kind: input, shape index: {}]   ;;  %s3417_s3 = inlined_call_operand.hbm [shape: f32[1,512], index: 3, kind: input, shape index: {}]   ;;  %s3418_s4 = inlined_call_operand.vmem [shape: f32[32,512], index: 4, kind: output, shape index: {}]  }
   0x1   :  { %11 = vsyncpa [#allocation4 + $0x1], 0 }
   0x2   :  { %12 = vsyncpa [#allocation6], 0  ;;  %s2823_s15 = smov 0   ;;  %s2825_s16 = smov 0  }
   0x3   :  { %s2827_s17 = smov 0   ;;  %s2829_s18 = smov 0  }
   0x4   :  { %s2831_s19 = smov 0   ;;  %s2833_s20 = smov 0  }
   0x5 LB: > { %s1834_s21 = sadd.s32 4294967295, %s2791_s20   ;;  %s65_s22 = sadd.s32 1, %s2779_s17  ;;  %s2791_s20 = sphi %s2833_s20, %s18_s20   ;;  %s2787_s19 = sphi %s2831_s19, %s3428_s19   ;;  %s2783_s18 = sphi %s2829_s18, %s3427_s18   ;;  %s2779_s17 = sphi %s2827_s17, %s3426_s17   ;;  %s2775_s16 = sphi %s2825_s16, %s3425_s16   ;;  %s2771_s15 = sphi %s2823_s15, %s3424_s15  }
   0x6   : > { %p72_p0 = scmp.ne.s32.totalorder %s2779_s17, %s2775_s16  ;;  %p73_p1 = scmp.eq.s32.totalorder %s2791_s20, 0 }
   0x7   : > { %p78_p2 = scmp.ne.s32.totalorder %s2775_s16, %s2771_s15  ;;  %p2857_p3 = scmp.eq.s32.totalorder %s1834_s21, 0 }
   0x8   : > { %p2861_p4 = por %p73_p1, %p72_p0  ;;  %p1835_p5 = scmp.ge.s32.totalorder %s2791_s20, 1 }
   0x9   : > { %p2868_p6 = por %p2857_p3, %p78_p2  ;;  %p167_p7 = scmp.lt.s32.totalorder %s2791_s20, 10 }
   0xa   : > { %s181_s28 = sshll.u32 %s3416_s2, 4  ;;  %s2793_s30 = smov [#allocation5]   ;;  %s182_s28 = int_to_ptr.hbm [resolvable:$true] %s181_s28 }
   0xb   : > { %p2876_p8 = pnand %p1835_p5, %p167_p7  ;;  %s183_s5 = sshll.u32 %s2793_s30, 4  ;;  %s184_s5 = int_to_ptr.vmem [resolvable:$true] %s183_s5 }
   0xc   : > { %p2559_p10 = scmp.lt.s32.totalorder %s2791_s20, 9  ;;  %s195_s8 = sshll.u32 %s3417_s3, 4  ;;  %s196_s8 = int_to_ptr.hbm [resolvable:$true] %s195_s8 }
   0xd   : > { %p2546_p9 = pneg %p2876_p8  ;;  %s2794_s10 = smov [#allocation7]  }
   0xe   : > { %p2890_p12 = pnand %p2559_p10, %p2861_p4  ;;  %s197_s11 = sshll.u32 %s2794_s10, 4  ;;  %s198_s11 = int_to_ptr.vmem [resolvable:$true] %s197_s11 }
   0xf   : > { %p2547_p11 = pnand %p2546_p9, %p2857_p3  ;;  %s216_s12 = sand.u32 1, %s2779_s17  }
  0x10   : > { %s27_s13 = sadd.s32 1, %s2787_s19  ;;  %s1839_s14 = sshll.u32 %s216_s12, 10 }
  0x11   : > { %2549 = dma.hbm_to_vmem [thread:$0]  (!%p2547_p11), %s182_s28, 64, %s184_s5, [#allocation6]  }
  0x12   : > { %2552 = dma.hbm_to_vmem [thread:$0]  (!%p2547_p11), %s196_s8, 64, %s198_s11, [#allocation6]  }
  0x13   : > { %p28_p13 = scmp.ge.s32.totalorder %s27_s13, 9  ;;  %s2398_s15 = sshll.u32 %s2787_s19, 10 }
  0x14   : > { %s227_s26 = scalar_lea.hbm %s3415_s1, %s2398_s15  ;;  %s220_s27 = scalar_lea.vmem [#allocation3], %s1839_s14 }
  0x15   : > { %s3430_s13 = smov (%p28_p13, %s27_s13), 0  ;;  %s230_s28 = sshll.u32 %s220_s27, 4  ;;  %s231_s28 = int_to_ptr.vmem [resolvable:$true] %s230_s28 }
  0x16   : > { %s60_s30 = ssub.s32 %s2787_s19, %s3430_s13  ;;  %s228_s5 = sshll.u32 %s227_s26, 4  ;;  %s229_s5 = int_to_ptr.hbm [resolvable:$true] %s228_s5 }
  0x17   : > { %p63_p0 = scmp.eq.s32.totalorder %s60_s30, 0  ;;  %s217_s7 = scalar_lea.sflag [#allocation4], %s216_s12 }
  0x18   : > { %s2795_s8 = smov 256   ;;  %s2796_s10 = smov 16  }
  0x19   : > { %s2907_s6 = scalar_select %p63_p0, %s2779_s17, %s65_s22  }
  0x1a   : > { %2556 = dma.hbm_to_vmem [thread:$0]  (!%p2890_p12), %s229_s5, 16384, %s231_s28, %s217_s7, %s2795_s8, %s2795_s8, %s2796_s10  }
  0x1b   : > { %242 = sbr.rel (%p2876_p8) target bundleno = 415 (0x19f), region = 36  ;;  %s244_s11 = sand.u32 (!%p2876_p8), 1, %s2775_s16  }
  0x1c   : > { %s1843_s14 = sshll.u32 (!%p2876_p8), %s244_s11, 10  ;;  %s245_s15 = scalar_lea.sflag (!%p2876_p8), [#allocation4], %s244_s11 }
  0x1d   : > { %s2914_s21 = scalar_lea.vmem (!%p2876_p8), [#allocation3], %s1843_s14 }
  0x20   : > { %2762 = dma.done.wait (%p2868_p6), %s245_s15, 16384  }
  0x21   : > { %2764 = vsyncadd (%p2868_p6), %s245_s15, 4294950912 }
  0x22   : > { %2766 = dma.done.wait (%p2857_p3), [#allocation6], 128  }
  0x23   : > { %2768 = vsyncadd (%p2857_p3), [#allocation6], 4294967168  ;;  %p289_p1 = scmp.lt.s32.totalorder %s2783_s18, 8  ;;  %p1848_p2 = scmp.ne.s32.totalorder %s2783_s18, 0 }
  0x25   : > { %s290_s22 = scalar_select %p289_p1, %s2783_s18, 8 }
  0x26   : > { %306 = sbr.rel (%p1848_p2) target bundleno = 60 (0x3c), region = 52 }
  0x27   : > { %s2399_s29 = sshll.u32 %s290_s22, 6 }
  0x28   : > { %s2929_s24 = scalar_lea.vmem %s3414_s0, %s2399_s29 }
  0x2b   : > { %v2797_v0 = vmov 0.0  }
  0x2c   : > { %307 = vst [vmem:[#allocation2 + $0x30] sm:$0xff] %v2797_v0 }
  0x2d   : > { %308 = vst [vmem:[#allocation2] sm:$0xff] %v2797_v0 }
  0x2e   : > { %309 = vst [vmem:[#allocation2 + $0x58] sm:$0xff] %v2797_v0 }
  0x2f   : > { %310 = vst [vmem:[#allocation2 + $0x18] sm:$0xff] %v2797_v0 }
  0x30   : > { %311 = vst [vmem:[#allocation2 + $0x50] sm:$0xff] %v2797_v0 }
  0x31   : > { %312 = vst [vmem:[#allocation2 + $0x68] sm:$0xff] %v2797_v0 }
  0x32   : > { %313 = vst [vmem:[#allocation2 + $0x8] sm:$0xff] %v2797_v0 }
  0x33   : > { %314 = vst [vmem:[#allocation2 + $0x48] sm:$0xff] %v2797_v0 }
  0x34   : > { %315 = vst [vmem:[#allocation2 + $0x40] sm:$0xff] %v2797_v0 }
  0x35   : > { %316 = vst [vmem:[#allocation2 + $0x20] sm:$0xff] %v2797_v0 }
  0x36   : > { %317 = vst [vmem:[#allocation2 + $0x10] sm:$0xff] %v2797_v0 }
  0x37   : > { %318 = vst [vmem:[#allocation2 + $0x38] sm:$0xff] %v2797_v0 }
  0x38   : > { %319 = vst [vmem:[#allocation2 + $0x60] sm:$0xff] %v2797_v0 }
  0x39   : > { %320 = vst [vmem:[#allocation2 + $0x70] sm:$0xff] %v2797_v0 }
  0x3a   : > { %321 = vst [vmem:[#allocation2 + $0x78] sm:$0xff] %v2797_v0 }
  0x3b   : > { %322 = vst [vmem:[#allocation2 + $0x28] sm:$0xff] %v2797_v0 }
  0x3c PF: > { %v1995_v1 = vld [vmem:[%s2914_s21 + $0xe0] sm:$0xf]  ;;  %v2438_v2 = vld [vmem:[%s2914_s21 + $0xec] sm:$0xf0]  ;;  %p2393_p3 = scmp.ne.s32.totalorder %s2783_s18, 8 }
  0x3d   : > { %v2123_v3 = vld [vmem:[%s2914_s21 + $0x1e0] sm:$0xf]  ;;  %v1996_v4 = vor.u32 %v2438_v2, %v1995_v1  ;;  %v2470_v5 = vld [vmem:[%s2914_s21 + $0x1ec] sm:$0xf0] }
  0x3e   : > { %v2251_v6 = vld [vmem:[%s2914_s21 + $0x2e0] sm:$0xf]  ;;  %v2502_v7 = vld [vmem:[%s2914_s21 + $0x2ec] sm:$0xf0]  ;;  %v2124_v8 = vor.u32 %v2470_v5, %v2123_v3 }
  0x3f   : > { %v2252_v9 = vor.u32 %v2502_v7, %v2251_v6  ;;  %v2379_v10 = vld [vmem:[%s2914_s21 + $0x3e0] sm:$0xf]  ;;  %v2534_v11 = vld [vmem:[%s2914_s21 + $0x3ec] sm:$0xf0]  ;;  %1155 = vmatpush.bf16.msra.mxu0 %v1996_v4 }
  0x40   : > { %v1979_v12 = vld [vmem:[%s2914_s21 + $0xc0] sm:$0xf]  ;;  %v2380_v13 = vor.u32 %v2534_v11, %v2379_v10  ;;  %v2434_v14 = vld [vmem:[%s2914_s21 + $0xcc] sm:$0xf0]  ;;  %1174 = vmatpush.bf16.msra.mxu1 %v2124_v8 }
  0x41   : > { %v2107_v15 = vld [vmem:[%s2914_s21 + $0x1c0] sm:$0xf]  ;;  %v2466_v16 = vld [vmem:[%s2914_s21 + $0x1cc] sm:$0xf0]  ;;  %1193 = vmatpush.bf16.msra.mxu2 %v2252_v9  ;;  %v1980_v17 = vor.u32 %v2434_v14, %v1979_v12 }
  0x42   : > { %v2108_v18 = vor.u32 %v2466_v16, %v2107_v15  ;;  %v2235_v19 = vld [vmem:[%s2914_s21 + $0x2c0] sm:$0xf]  ;;  %v2498_v20 = vld [vmem:[%s2914_s21 + $0x2cc] sm:$0xf0]  ;;  %1212 = vmatpush.bf16.msra.mxu3 %v2380_v13 }
  0x43   : > { %v2363_v21 = vld [vmem:[%s2914_s21 + $0x3c0] sm:$0xf]  ;;  %v2236_v22 = vor.u32 %v2498_v20, %v2235_v19  ;;  %v2530_v23 = vld [vmem:[%s2914_s21 + $0x3cc] sm:$0xf0]  ;;  %1156 = vmatpush.bf16.msra.mxu0 %v1980_v17 }
  0x44   : > { %v1963_v24 = vld [vmem:[%s2914_s21 + $0xa0] sm:$0xf]  ;;  %v2430_v25 = vld [vmem:[%s2914_s21 + $0xac] sm:$0xf0]  ;;  %v2364_v26 = vor.u32 %v2530_v23, %v2363_v21  ;;  %1175 = vmatpush.bf16.msra.mxu1 %v2108_v18 }
  0x45   : > { %v2091_v27 = vld [vmem:[%s2914_s21 + $0x1a0] sm:$0xf]  ;;  %v2462_v28 = vld [vmem:[%s2914_s21 + $0x1ac] sm:$0xf0]  ;;  %v1964_v30 = vor.u32 %v2430_v25, %v1963_v24  ;;  %1194 = vmatpush.bf16.msra.mxu2 %v2236_v22 }
  0x46   : > { %v2219_v29 = vld [vmem:[%s2914_s21 + $0x2a0] sm:$0xf]  ;;  %v2494_v31 = vld [vmem:[%s2914_s21 + $0x2ac] sm:$0xf0]  ;;  %v2092_v34 = vor.u32 %v2462_v28, %v2091_v27  ;;  %1213 = vmatpush.bf16.msra.mxu3 %v2364_v26 }
  0x47   : > { %v2347_v32 = vld [vmem:[%s2914_s21 + $0x3a0] sm:$0xf]  ;;  %v2526_v33 = vld [vmem:[%s2914_s21 + $0x3ac] sm:$0xf0]  ;;  %v2220_v35 = vor.u32 %v2494_v31, %v2219_v29  ;;  %1157 = vmatpush.bf16.msra.mxu0 %v1964_v30  ;;  %v2400_v31 = vld [vmem:[%s2929_s24 + $0x4] sm:$0xf] }
  0x48   : > { %v1947_v36 = vld [vmem:[%s2914_s21 + $0x80] sm:$0xf]  ;;  %v2426_v37 = vld [vmem:[%s2914_s21 + $0x8c] sm:$0xf0]  ;;  %v2348_v39 = vor.u32 %v2526_v33, %v2347_v32  ;;  %1176 = vmatpush.bf16.msra.mxu1 %v2092_v34  ;;  %v1853_v32 = vld [vmem:[%s2929_s24 + $0x10] sm:$0xf0] }
  0x49   : > { %v2075_v38 = vld [vmem:[%s2914_s21 + $0x180] sm:$0xf]  ;;  %v2458_v40 = vld [vmem:[%s2914_s21 + $0x18c] sm:$0xf0]  ;;  %v1948_v45 = vor.u32 %v2426_v37, %v1947_v36  ;;  %1195 = vmatpush.bf16.msra.mxu2 %v2220_v35  ;;  %v2500_v33 = vld [vmem:[%s2914_s21 + $0x2e4] sm:$0xf] }
  0x4a   : > { %v2203_v41 = vld [vmem:[%s2914_s21 + $0x280] sm:$0xf]  ;;  %v2490_v42 = vld [vmem:[%s2914_s21 + $0x28c] sm:$0xf0]  ;;  %v2076_v46 = vor.u32 %v2458_v40, %v2075_v38  ;;  %1214 = vmatpush.bf16.msra.mxu3 %v2348_v39  ;;  %v2253_v34 = vld [vmem:[%s2914_s21 + $0x2f0] sm:$0xf0] }
  0x4b   : > { %v2331_v43 = vld [vmem:[%s2914_s21 + $0x380] sm:$0xf]  ;;  %v2522_v44 = vld [vmem:[%s2914_s21 + $0x38c] sm:$0xf0]  ;;  %v2204_v47 = vor.u32 %v2490_v42, %v2203_v41  ;;  %1158 = vmatpush.bf16.msra.mxu0 %v1948_v45  ;;  %v1859_v36 = vld [vmem:[%s2929_s24 + $0x8] sm:$0xf]  ;;  %v2256_v45 = vor.u32 %v2500_v33, %v2253_v34 }
  0x4c   : > { %v1931_v48 = vld [vmem:[%s2914_s21 + $0x60] sm:$0xf]  ;;  %v2422_v49 = vld [vmem:[%s2914_s21 + $0x6c] sm:$0xf0]  ;;  %v2332_v51 = vor.u32 %v2522_v44, %v2331_v43  ;;  %1177 = vmatpush.bf16.msra.mxu1 %v2076_v46  ;;  %v2468_v37 = vld [vmem:[%s2914_s21 + $0x1e4] sm:$0xf] }
  0x4d   : > { %v2059_v50 = vld [vmem:[%s2914_s21 + $0x160] sm:$0xf]  ;;  %v2454_v52 = vld [vmem:[%s2914_s21 + $0x16c] sm:$0xf0]  ;;  %v1932_v57 = vor.u32 %v2422_v49, %v1931_v48  ;;  %1196 = vmatpush.bf16.msra.mxu2 %v2204_v47  ;;  %v2125_v38 = vld [vmem:[%s2914_s21 + $0x1f0] sm:$0xf0] }
  0x4e   : > { %v2187_v53 = vld [vmem:[%s2914_s21 + $0x260] sm:$0xf]  ;;  %v2486_v54 = vld [vmem:[%s2914_s21 + $0x26c] sm:$0xf0]  ;;  %v2060_v58 = vor.u32 %v2454_v52, %v2059_v50  ;;  %1215 = vmatpush.bf16.msra.mxu3 %v2332_v51  ;;  %v2403_v41 = vld [vmem:[%s2929_s24 + $0x14] sm:$0xf0]  ;;  %v2128_v50 = vor.u32 %v2468_v37, %v2125_v38 }
  0x4f   : > { %v2315_v55 = vld [vmem:[%s2914_s21 + $0x360] sm:$0xf]  ;;  %v2518_v56 = vld [vmem:[%s2914_s21 + $0x36c] sm:$0xf0]  ;;  %v2188_v59 = vor.u32 %v2486_v54, %v2187_v53  ;;  %1159 = vmatpush.bf16.msra.mxu0 %v1932_v57  ;;  %v2401_v42 = vld [vmem:[%s2929_s24 + $0xc] sm:$0xf]  ;;  %v3016_v54 = vor.u32 %v2400_v31, %v1853_v32 }
  0x50   : > { %v1915_v60 = vld [vmem:[%s2914_s21 + $0x40] sm:$0xf]  ;;  %v2418_v61 = vld [vmem:[%s2914_s21 + $0x4c] sm:$0xf0]  ;;  %v2316_v63 = vor.u32 %v2518_v56, %v2315_v55  ;;  %1178 = vmatpush.bf16.msra.mxu1 %v2060_v58  ;;  %v1861_v43 = vld [vmem:[%s2929_s24 + $0x18] sm:$0xf0]  ;;  %v3018_v55 = vor.u32 %v2403_v41, %v1859_v36 }
  0x51   : > { %v2043_v62 = vld [vmem:[%s2914_s21 + $0x140] sm:$0xf]  ;;  %v2450_v0 = vld [vmem:[%s2914_s21 + $0x14c] sm:$0xf0]  ;;  %v1916_v5 = vor.u32 %v2418_v61, %v1915_v60  ;;  %1197 = vmatpush.bf16.msra.mxu2 %v2188_v59  ;;  %v2436_v46 = vld [vmem:[%s2914_s21 + $0xe4] sm:$0xf]  ;;  %v3022_v58 = vor.u32 %v2401_v42, %v1861_v43 }
  0x52   : > { %v2171_v1 = vld [vmem:[%s2914_s21 + $0x240] sm:$0xf]  ;;  %v2482_v2 = vld [vmem:[%s2914_s21 + $0x24c] sm:$0xf0]  ;;  %v2044_v6 = vor.u32 %v2450_v0, %v2043_v62  ;;  %1216 = vmatpush.bf16.msra.mxu3 %v2316_v63  ;;  %v1997_v47 = vld [vmem:[%s2914_s21 + $0xf0] sm:$0xf0] }
  0x53   : > { %v2299_v3 = vld [vmem:[%s2914_s21 + $0x340] sm:$0xf]  ;;  %v2514_v4 = vld [vmem:[%s2914_s21 + $0x34c] sm:$0xf0]  ;;  %v2172_v7 = vor.u32 %v2482_v2, %v2171_v1  ;;  %1160 = vmatpush.bf16.msra.mxu0 %v1916_v5  ;;  %v2532_v48 = vld [vmem:[%s2914_s21 + $0x3e4] sm:$0xf]  ;;  %v2000_v59 = vor.u32 %v2436_v46, %v1997_v47 }
  0x54   : > { %v1899_v8 = vld [vmem:[%s2914_s21 + $0x20] sm:$0xf]  ;;  %v2414_v9 = vld [vmem:[%s2914_s21 + $0x2c] sm:$0xf0]  ;;  %v2300_v11 = vor.u32 %v2514_v4, %v2299_v3  ;;  %1179 = vmatpush.bf16.msra.mxu1 %v2044_v6  ;;  %v2381_v51 = vld [vmem:[%s2914_s21 + $0x3f0] sm:$0xf0] }
  0x55   : > { %v2027_v10 = vld [vmem:[%s2914_s21 + $0x120] sm:$0xf]  ;;  %v2446_v12 = vld [vmem:[%s2914_s21 + $0x12c] sm:$0xf0]  ;;  %v1900_v18 = vor.u32 %v2414_v9, %v1899_v8  ;;  %1198 = vmatpush.bf16.msra.mxu2 %v2172_v7  ;;  %v2496_v52 = vld [vmem:[%s2914_s21 + $0x2c4] sm:$0xf]  ;;  %v2384_v60 = vor.u32 %v2532_v48, %v2381_v51 }
  0x56   : > { %v2155_v13 = vld [vmem:[%s2914_s21 + $0x220] sm:$0xf]  ;;  %v2478_v14 = vld [vmem:[%s2914_s21 + $0x22c] sm:$0xf0]  ;;  %v2028_v22 = vor.u32 %v2446_v12, %v2027_v10  ;;  %1217 = vmatpush.bf16.msra.mxu3 %v2300_v11  ;;  %v2237_v53 = vld [vmem:[%s2914_s21 + $0x2d0] sm:$0xf0] }
  0x57   : > { %v2283_v15 = vld [vmem:[%s2914_s21 + $0x320] sm:$0xf]  ;;  %v2510_v16 = vld [vmem:[%s2914_s21 + $0x32c] sm:$0xf0]  ;;  %v2156_v23 = vor.u32 %v2478_v14, %v2155_v13  ;;  %1161 = vmatpush.bf16.msra.mxu0 %v1900_v18  ;;  %v2464_v56 = vld [vmem:[%s2914_s21 + $0x1c4] sm:$0xf]  ;;  %v2240_v61 = vor.u32 %v2496_v52, %v2237_v53 }
  0x58   : > { %v1883_v17 = vld [vmem:[%s2914_s21] sm:$0xf]  ;;  %v2410_v19 = vld [vmem:[%s2914_s21 + $0xc] sm:$0xf0]  ;;  %v2284_v27 = vor.u32 %v2510_v16, %v2283_v15  ;;  %1180 = vmatpush.bf16.msra.mxu1 %v2028_v22  ;;  %v2109_v57 = vld [vmem:[%s2914_s21 + $0x1d0] sm:$0xf0] }
  0x59   : > { %v2011_v20 = vld [vmem:[%s2914_s21 + $0x100] sm:$0xf]  ;;  %v2442_v21 = vld [vmem:[%s2914_s21 + $0x10c] sm:$0xf0]  ;;  %v1884_v35 = vor.u32 %v2410_v19, %v1883_v17  ;;  %1199 = vmatpush.bf16.msra.mxu2 %v2156_v23  ;;  %v2432_v62 = vld [vmem:[%s2914_s21 + $0xc4] sm:$0xf]  ;;  %v2112_v1 = vor.u32 %v2464_v56, %v2109_v57 }
  0x5a   : > { %v2139_v24 = vld [vmem:[%s2914_s21 + $0x200] sm:$0xf]  ;;  %v2474_v25 = vld [vmem:[%s2914_s21 + $0x20c] sm:$0xf0]  ;;  %v2012_v39 = vor.u32 %v2442_v21, %v2011_v20  ;;  %1218 = vmatpush.bf16.msra.mxu3 %v2284_v27  ;;  %v1981_v63 = vld [vmem:[%s2914_s21 + $0xd0] sm:$0xf0] }
  0x5b   : > { %v2267_v26 = vld [vmem:[%s2914_s21 + $0x300] sm:$0xf]  ;;  %v2506_v28 = vld [vmem:[%s2914_s21 + $0x30c] sm:$0xf0]  ;;  %v2140_v40 = vor.u32 %v2474_v25, %v2139_v24  ;;  %1162 = vmatpush.bf16.msra.mxu0 %v1884_v35  ;;  %v2528_v0 = vld [vmem:[%s2914_s21 + $0x3c4] sm:$0xf]  ;;  %v1984_v7 = vor.u32 %v2432_v62, %v1981_v63 }
  0x5c   : > { %v1851_v29 = vld [vmem:[%s2929_s24] sm:$0xf]  ;;  %v2402_v30 = vld [vmem:[%s2929_s24 + $0xc] sm:$0xf0]  ;;  %v2268_v44 = vor.u32 %v2506_v28, %v2267_v26  ;;  %1181 = vmatpush.bf16.msra.mxu1 %v2012_v39  ;;  %v2365_v2 = vld [vmem:[%s2914_s21 + $0x3d0] sm:$0xf0] }
  0x5d   : > { %v3011_v49 = vor.u32 %v2402_v30, %v1851_v29  ;;  %1200 = vmatpush.bf16.msra.mxu2 %v2140_v40  ;;  %v2492_v3 = vld [vmem:[%s2914_s21 + $0x2a4] sm:$0xf]  ;;  %v2221_v4 = vld [vmem:[%s2914_s21 + $0x2b0] sm:$0xf0]  ;;  %v2368_v8 = vor.u32 %v2528_v0, %v2365_v2  ;;  %v1867_v26 = vld [vmem:[%s2929_s24 + $0x20] sm:$0xf] }
  0x5e   : > { %1219 = vmatpush.bf16.msra.mxu3 %v2268_v44  ;;  %v2460_v5 = vld [vmem:[%s2914_s21 + $0x1a4] sm:$0xf]  ;;  %v2093_v6 = vld [vmem:[%s2914_s21 + $0x1b0] sm:$0xf0]  ;;  %v2224_v9 = vor.u32 %v2492_v3, %v2221_v4  ;;  %v2406_v27 = vld [vmem:[%s2929_s24 + $0x2c] sm:$0xf0] }
  0x5f   : > { %1163 = vmatmul.bf16.vlgmr.msra.gmra.mxu0 %v3011_v49  ;;  %1182 = vmatmul.bf16.vlgmr.msra.gmra.mxu1 %v3016_v54  ;;  %v2428_v10 = vld [vmem:[%s2914_s21 + $0xa4] sm:$0xf]  ;;  %v1965_v11 = vld [vmem:[%s2914_s21 + $0xb0] sm:$0xf0]  ;;  %v2096_v13 = vor.u32 %v2460_v5, %v2093_v6  ;;  %v1875_v33 = vld [vmem:[%s2929_s24 + $0x28] sm:$0xf] }
  0x60   : > { %1250 = vmatpush.bf16.msrb.mxu1 %v2128_v50  ;;  %1201 = vmatmul.bf16.vlgmr.msra.gmra.mxu2 %v3018_v55  ;;  %v2524_v12 = vld [vmem:[%s2914_s21 + $0x3a4] sm:$0xf]  ;;  %v2349_v14 = vld [vmem:[%s2914_s21 + $0x3b0] sm:$0xf0]  ;;  %v1968_v19 = vor.u32 %v2428_v10, %v1965_v11  ;;  %v2407_v37 = vld [vmem:[%s2929_s24 + $0x34] sm:$0xf0] }
  0x61   : > { %1269 = vmatpush.bf16.msrb.mxu2 %v2256_v45  ;;  %1220 = vmatmul.bf16.vlgmr.msra.gmra.mxu3 %v3022_v58  ;;  %v2488_v15 = vld [vmem:[%s2914_s21 + $0x284] sm:$0xf]  ;;  %v2205_v16 = vld [vmem:[%s2914_s21 + $0x290] sm:$0xf0]  ;;  %v2352_v23 = vor.u32 %v2524_v12, %v2349_v14  ;;  %v2405_v38 = vld [vmem:[%s2929_s24 + $0x2c] sm:$0xf]  ;;  %v3063_v45 = vor.u32 %v2406_v27, %v1867_v26  ;;  %v3070_v52 = vor.u32 %v2407_v37, %v1875_v33 }
  0x62   : > { %1231 = vmatpush.bf16.msrb.mxu0 %v2000_v59  ;;  %1288 = vmatpush.bf16.msrb.mxu3 %v2384_v60  ;;  %v2456_v17 = vld [vmem:[%s2914_s21 + $0x184] sm:$0xf]  ;;  %v2077_v18 = vld [vmem:[%s2914_s21 + $0x190] sm:$0xf0]  ;;  %v2208_v24 = vor.u32 %v2488_v15, %v2205_v16  ;;  %v1877_v39 = vld [vmem:[%s2929_s24 + $0x38] sm:$0xf0] }
  0x63   : > { %v2424_v20 = vld [vmem:[%s2914_s21 + $0x84] sm:$0xf]  ;;  %v1949_v21 = vld [vmem:[%s2914_s21 + $0x90] sm:$0xf0]  ;;  %v2080_v28 = vor.u32 %v2456_v17, %v2077_v18  ;;  %v3074_v57 = vor.u32 %v2405_v38, %v1877_v39  ;;  %v2439_v33 = vld [vmem:[%s2914_s21 + $0xf4] sm:$0xf0] }
  0x64   : > { %1251 = vmatpush.bf16.msrb.mxu1 %v2112_v1  ;;  %v2520_v22 = vld [vmem:[%s2914_s21 + $0x384] sm:$0xf]  ;;  %v2333_v25 = vld [vmem:[%s2914_s21 + $0x390] sm:$0xf0]  ;;  %v1952_v36 = vor.u32 %v2424_v20, %v1949_v21  ;;  %v2503_v20 = vld [vmem:[%s2914_s21 + $0x2f4] sm:$0xf0] }
  0x65   : > { %1270 = vmatpush.bf16.msrb.mxu2 %v2240_v61  ;;  %v2404_v29 = vld [vmem:[%s2929_s24 + $0x24] sm:$0xf]  ;;  %v1869_v30 = vld [vmem:[%s2929_s24 + $0x30] sm:$0xf0]  ;;  %v2336_v40 = vor.u32 %v2520_v22, %v2333_v25  ;;  %v2243_v37 = vld [vmem:[%s2914_s21 + $0x2c8] sm:$0xf] }
  0x66   : > { %1232 = vmatpush.bf16.msrb.mxu0 %v1984_v7  ;;  %1289 = vmatpush.bf16.msrb.mxu3 %v2368_v8  ;;  %v2484_v31 = vld [vmem:[%s2914_s21 + $0x264] sm:$0xf]  ;;  %v2189_v32 = vld [vmem:[%s2914_s21 + $0x270] sm:$0xf0]  ;;  %v3068_v51 = vor.u32 %v2404_v29, %v1869_v30  ;;  %v2499_v38 = vld [vmem:[%s2914_s21 + $0x2d4] sm:$0xf0] }
  0x67   : > { %v2452_v34 = vld [vmem:[%s2914_s21 + $0x164] sm:$0xf]  ;;  %v2061_v35 = vld [vmem:[%s2914_s21 + $0x170] sm:$0xf0]  ;;  %v2192_v41 = vor.u32 %v2484_v31, %v2189_v32  ;;  %v2003_v32 = vld [vmem:[%s2914_s21 + $0xe8] sm:$0xf] }
  0x68   : > { %1252 = vmatpush.bf16.msrb.mxu1 %v2096_v13  ;;  %v2420_v42 = vld [vmem:[%s2914_s21 + $0x64] sm:$0xf]  ;;  %v1933_v43 = vld [vmem:[%s2914_s21 + $0x70] sm:$0xf0]  ;;  %v2064_v46 = vor.u32 %v2452_v34, %v2061_v35  ;;  %v2387_v34 = vld [vmem:[%s2914_s21 + $0x3e8] sm:$0xf] }
  0x69   : > { %1271 = vmatpush.bf16.msrb.mxu2 %v2224_v9  ;;  %v2516_v44 = vld [vmem:[%s2914_s21 + $0x364] sm:$0xf]  ;;  %v2317_v47 = vld [vmem:[%s2914_s21 + $0x370] sm:$0xf0]  ;;  %v1936_v59 = vor.u32 %v2420_v42, %v1933_v43  ;;  %v1987_v42 = vld [vmem:[%s2914_s21 + $0xc8] sm:$0xf] }
  0x6a   : > { %1233 = vmatpush.bf16.msrb.mxu0 %v1968_v19  ;;  %1290 = vmatpush.bf16.msrb.mxu3 %v2352_v23  ;;  %v2480_v48 = vld [vmem:[%s2914_s21 + $0x244] sm:$0xf]  ;;  %v2173_v50 = vld [vmem:[%s2914_s21 + $0x250] sm:$0xf0]  ;;  %v2320_v60 = vor.u32 %v2516_v44, %v2317_v47  ;;  %v2259_v19 = vld [vmem:[%s2914_s21 + $0x2e8] sm:$0xf] }
  0x6b   : > { %v2448_v53 = vld [vmem:[%s2914_s21 + $0x144] sm:$0xf]  ;;  %v2045_v56 = vld [vmem:[%s2914_s21 + $0x150] sm:$0xf0]  ;;  %v2176_v61 = vor.u32 %v2480_v48, %v2173_v50  ;;  %v2131_v23 = vld [vmem:[%s2914_s21 + $0x1e8] sm:$0xf]  ;;  %v2260_v31 = vor.u32 %v2503_v20, %v2259_v19 }
  0x6c   : > { %1253 = vmatpush.bf16.msrb.mxu1 %v2080_v28  ;;  %v2416_v62 = vld [vmem:[%s2914_s21 + $0x44] sm:$0xf]  ;;  %v1917_v63 = vld [vmem:[%s2914_s21 + $0x50] sm:$0xf0]  ;;  %v2048_v1 = vor.u32 %v2448_v53, %v2045_v56  ;;  %v2435_v43 = vld [vmem:[%s2914_s21 + $0xd4] sm:$0xf0] }
  0x6d   : > { %1272 = vmatpush.bf16.msrb.mxu2 %v2208_v24  ;;  %v2512_v0 = vld [vmem:[%s2914_s21 + $0x344] sm:$0xf]  ;;  %v2301_v2 = vld [vmem:[%s2914_s21 + $0x350] sm:$0xf0]  ;;  %v1920_v7 = vor.u32 %v2416_v62, %v1917_v63  ;;  %v2471_v24 = vld [vmem:[%s2914_s21 + $0x1f4] sm:$0xf0] }
  0x6e   : > { %1234 = vmatpush.bf16.msrb.mxu0 %v1952_v36  ;;  %1291 = vmatpush.bf16.msrb.mxu3 %v2336_v40  ;;  %v2476_v3 = vld [vmem:[%s2914_s21 + $0x224] sm:$0xf]  ;;  %v2157_v4 = vld [vmem:[%s2914_s21 + $0x230] sm:$0xf0]  ;;  %v2304_v9 = vor.u32 %v2512_v0, %v2301_v2  ;;  %v2132_v35 = vor.u32 %v2471_v24, %v2131_v23  ;;  %v2535_v36 = vld [vmem:[%s2914_s21 + $0x3f4] sm:$0xf0] }
  0x6f   : > { %1168 = vmatmul.bf16.gmra.mxu0 %v3063_v45  ;;  %1187 = vmatmul.bf16.gmra.mxu1 %v3068_v51  ;;  %v2444_v5 = vld [vmem:[%s2914_s21 + $0x124] sm:$0xf]  ;;  %v2029_v6 = vld [vmem:[%s2914_s21 + $0x130] sm:$0xf0]  ;;  %v2160_v10 = vor.u32 %v2476_v3, %v2157_v4  ;;  %v2388_v44 = vor.u32 %v2535_v36, %v2387_v34  ;;  %v2115_v47 = vld [vmem:[%s2914_s21 + $0x1c8] sm:$0xf] }
  0x70   : > { %1254 = vmatpush.bf16.msrb.mxu1 %v2064_v46  ;;  %1206 = vmatmul.bf16.gmra.mxu2 %v3070_v52  ;;  %v2412_v8 = vld [vmem:[%s2914_s21 + $0x24] sm:$0xf]  ;;  %v1901_v11 = vld [vmem:[%s2914_s21 + $0x30] sm:$0xf0]  ;;  %v2032_v14 = vor.u32 %v2444_v5, %v2029_v6  ;;  %v2244_v46 = vor.u32 %v2499_v38, %v2243_v37  ;;  %v2467_v48 = vld [vmem:[%s2914_s21 + $0x1d4] sm:$0xf0] }
  0x71   : > { %1273 = vmatpush.bf16.msrb.mxu2 %v2192_v41  ;;  %1225 = vmatmul.bf16.gmra.mxu3 %v3074_v57  ;;  %v2508_v12 = vld [vmem:[%s2914_s21 + $0x324] sm:$0xf]  ;;  %v2285_v13 = vld [vmem:[%s2914_s21 + $0x330] sm:$0xf0]  ;;  %v1904_v21 = vor.u32 %v2412_v8, %v1901_v11  ;;  %v2004_v41 = vor.u32 %v2439_v33, %v2003_v32  ;;  %v2371_v50 = vld [vmem:[%s2914_s21 + $0x3c8] sm:$0xf] }
  0x72   : > { %1235 = vmatpush.bf16.msrb.mxu0 %v1936_v59  ;;  %1292 = vmatpush.bf16.msrb.mxu3 %v2320_v60  ;;  %v2472_v15 = vld [vmem:[%s2914_s21 + $0x204] sm:$0xf]  ;;  %v2141_v16 = vld [vmem:[%s2914_s21 + $0x210] sm:$0xf0]  ;;  %v2288_v25 = vor.u32 %v2508_v12, %v2285_v13  ;;  %v2531_v53 = vld [vmem:[%s2914_s21 + $0x3d4] sm:$0xf0]  ;;  %v1988_v60 = vor.u32 %v2435_v43, %v1987_v42 }
  0x73   : > { %v2440_v17 = vld [vmem:[%s2914_s21 + $0x104] sm:$0xf]  ;;  %v2013_v18 = vld [vmem:[%s2914_s21 + $0x110] sm:$0xf0]  ;;  %v2144_v26 = vor.u32 %v2472_v15, %v2141_v16  ;;  %v2227_v56 = vld [vmem:[%s2914_s21 + $0x2a8] sm:$0xf]  ;;  %v2372_v0 = vor.u32 %v2531_v53, %v2371_v50 }
  0x74   : > { %1255 = vmatpush.bf16.msrb.mxu1 %v2048_v1  ;;  %v2408_v22 = vld [vmem:[%s2914_s21 + $0x4] sm:$0xf]  ;;  %v1885_v27 = vld [vmem:[%s2914_s21 + $0x10] sm:$0xf0]  ;;  %v2016_v30 = vor.u32 %v2440_v17, %v2013_v18  ;;  %v2495_v59 = vld [vmem:[%s2914_s21 + $0x2b4] sm:$0xf0] }
  0x75   : > { %1274 = vmatpush.bf16.msrb.mxu2 %v2176_v61  ;;  %v2504_v28 = vld [vmem:[%s2914_s21 + $0x304] sm:$0xf]  ;;  %v2269_v29 = vld [vmem:[%s2914_s21 + $0x310] sm:$0xf0]  ;;  %v1888_v39 = vor.u32 %v2408_v22, %v1885_v27  ;;  %v2116_v61 = vor.u32 %v2467_v48, %v2115_v47  ;;  %v1971_v62 = vld [vmem:[%s2914_s21 + $0xa8] sm:$0xf]  ;;  %v2228_v1 = vor.u32 %v2495_v59, %v2227_v56 }
  0x76   : > { %1236 = vmatpush.bf16.msrb.mxu0 %v1920_v7  ;;  %1293 = vmatpush.bf16.msrb.mxu3 %v2304_v9  ;;  %v2272_v40 = vor.u32 %v2504_v28, %v2269_v29  ;;  %v2431_v63 = vld [vmem:[%s2914_s21 + $0xb4] sm:$0xf0]  ;;  %v2099_v2 = vld [vmem:[%s2914_s21 + $0x1a8] sm:$0xf] }
  0x77   : > { %v2463_v3 = vld [vmem:[%s2914_s21 + $0x1b4] sm:$0xf0]  ;;  %v2355_v4 = vld [vmem:[%s2914_s21 + $0x3a8] sm:$0xf]  ;;  %v1972_v8 = vor.u32 %v2431_v63, %v1971_v62 }
  0x78   : > { %1256 = vmatpush.bf16.msrb.mxu1 %v2032_v14  ;;  %v2527_v5 = vld [vmem:[%s2914_s21 + $0x3b4] sm:$0xf0]  ;;  %v2211_v6 = vld [vmem:[%s2914_s21 + $0x288] sm:$0xf]  ;;  %v2100_v9 = vor.u32 %v2463_v3, %v2099_v2 }
  0x79   : > { %1275 = vmatpush.bf16.msrb.mxu2 %v2160_v10  ;;  %v2491_v7 = vld [vmem:[%s2914_s21 + $0x294] sm:$0xf0]  ;;  %v1955_v10 = vld [vmem:[%s2914_s21 + $0x88] sm:$0xf]  ;;  %v2356_v12 = vor.u32 %v2527_v5, %v2355_v4 }
  0x7a   : > { %1237 = vmatpush.bf16.msrb.mxu0 %v1904_v21  ;;  %1294 = vmatpush.bf16.msrb.mxu3 %v2288_v25  ;;  %v2427_v11 = vld [vmem:[%s2914_s21 + $0x94] sm:$0xf0]  ;;  %v2212_v13 = vor.u32 %v2491_v7, %v2211_v6  ;;  %v2083_v14 = vld [vmem:[%s2914_s21 + $0x188] sm:$0xf] }
  0x7b   : > { %v2459_v15 = vld [vmem:[%s2914_s21 + $0x194] sm:$0xf0]  ;;  %v2339_v16 = vld [vmem:[%s2914_s21 + $0x388] sm:$0xf]  ;;  %v1956_v20 = vor.u32 %v2427_v11, %v1955_v10 }
  0x7c   : > { %1257 = vmatpush.bf16.msrb.mxu1 %v2016_v30  ;;  %v2523_v17 = vld [vmem:[%s2914_s21 + $0x394] sm:$0xf0]  ;;  %v2195_v18 = vld [vmem:[%s2914_s21 + $0x268] sm:$0xf]  ;;  %v2084_v21 = vor.u32 %v2459_v15, %v2083_v14  ;;  %v2005_v14 = vld [vmem:[%s2914_s21 + $0xf8] sm:$0xf0] }
  0x7d   : > { %1276 = vmatpush.bf16.msrb.mxu2 %v2144_v26  ;;  %v2487_v19 = vld [vmem:[%s2914_s21 + $0x274] sm:$0xf0]  ;;  %v1939_v22 = vld [vmem:[%s2914_s21 + $0x68] sm:$0xf]  ;;  %v2340_v24 = vor.u32 %v2523_v17, %v2339_v16  ;;  %v2469_v15 = vld [vmem:[%s2914_s21 + $0x1ec] sm:$0xf] }
  0x7e   : > { %1238 = vmatpush.bf16.msrb.mxu0 %v1888_v39  ;;  %1295 = vmatpush.bf16.msrb.mxu3 %v2272_v40  ;;  %v2423_v23 = vld [vmem:[%s2914_s21 + $0x74] sm:$0xf0]  ;;  %v2196_v25 = vor.u32 %v2487_v19, %v2195_v18  ;;  %v2067_v26 = vld [vmem:[%s2914_s21 + $0x168] sm:$0xf]  ;;  %v2133_v16 = vld [vmem:[%s2914_s21 + $0x1f8] sm:$0xf0] }
  0x7f   : > { %1258 = vmatmul.bf16.vlgmr.msrb.gmra.mxu1 %v3016_v54  ;;  %v2455_v27 = vld [vmem:[%s2914_s21 + $0x174] sm:$0xf0]  ;;  %v2323_v28 = vld [vmem:[%s2914_s21 + $0x368] sm:$0xf]  ;;  %v1940_v32 = vor.u32 %v2423_v23, %v1939_v22  ;;  %v2533_v17 = vld [vmem:[%s2914_s21 + $0x3ec] sm:$0xf] }
  0x80   : > { %1326 = vmatpush.bf16.msra.mxu1 %v2132_v35  ;;  %1277 = vmatmul.bf16.vlgmr.msrb.gmra.mxu2 %v3018_v55  ;;  %v2519_v29 = vld [vmem:[%s2914_s21 + $0x374] sm:$0xf0]  ;;  %v2179_v30 = vld [vmem:[%s2914_s21 + $0x248] sm:$0xf]  ;;  %v2068_v33 = vor.u32 %v2455_v27, %v2067_v26  ;;  %v2389_v18 = vld [vmem:[%s2914_s21 + $0x3f8] sm:$0xf0] }
  0x81   : > { %1345 = vmatpush.bf16.msra.mxu2 %v2260_v31  ;;  %1239 = vmatmul.bf16.vlgmr.msrb.gmra.mxu0 %v3011_v49  ;;  %v2483_v31 = vld [vmem:[%s2914_s21 + $0x254] sm:$0xf0]  ;;  %v1923_v34 = vld [vmem:[%s2914_s21 + $0x48] sm:$0xf]  ;;  %v2324_v36 = vor.u32 %v2519_v29, %v2323_v28  ;;  %v2245_v22 = vld [vmem:[%s2914_s21 + $0x2d8] sm:$0xf0]  ;;  %v2392_v26 = vor.u32 %v2533_v17, %v2389_v18 }
  0x82   : > { %1307 = vmatpush.bf16.msra.mxu0 %v2004_v41  ;;  %1364 = vmatpush.bf16.msra.mxu3 %v2388_v44  ;;  %v2419_v35 = vld [vmem:[%s2914_s21 + $0x54] sm:$0xf0]  ;;  %v2180_v37 = vor.u32 %v2483_v31, %v2179_v30  ;;  %v2051_v38 = vld [vmem:[%s2914_s21 + $0x148] sm:$0xf]  ;;  %v2433_v27 = vld [vmem:[%s2914_s21 + $0xcc] sm:$0xf] }
  0x83   : > { %1296 = vmatmul.bf16.vlgmr.msrb.gmra.mxu3 %v3022_v58  ;;  %v2451_v39 = vld [vmem:[%s2914_s21 + $0x154] sm:$0xf0]  ;;  %v2307_v40 = vld [vmem:[%s2914_s21 + $0x348] sm:$0xf]  ;;  %v1924_v44 = vor.u32 %v2419_v35, %v1923_v34  ;;  %v1989_v28 = vld [vmem:[%s2914_s21 + $0xd8] sm:$0xf0] }
  0x84   : > { %1327 = vmatpush.bf16.msra.mxu1 %v2116_v61  ;;  %v2515_v41 = vld [vmem:[%s2914_s21 + $0x354] sm:$0xf0]  ;;  %v2163_v42 = vld [vmem:[%s2914_s21 + $0x228] sm:$0xf]  ;;  %v2465_v30 = vld [vmem:[%s2914_s21 + $0x1cc] sm:$0xf] }
  0x85   : > { %1346 = vmatpush.bf16.msra.mxu2 %v2244_v46  ;;  %v2479_v43 = vld [vmem:[%s2914_s21 + $0x234] sm:$0xf0]  ;;  %v2052_v46 = vor.u32 %v2451_v39, %v2051_v38  ;;  %v1907_v47 = vld [vmem:[%s2914_s21 + $0x28] sm:$0xf]  ;;  %v2308_v50 = vor.u32 %v2515_v41, %v2307_v40  ;;  %v2117_v31 = vld [vmem:[%s2914_s21 + $0x1d8] sm:$0xf0] }
  0x86   : > { %1308 = vmatpush.bf16.msra.mxu0 %v1988_v60  ;;  %1365 = vmatpush.bf16.msra.mxu3 %v2372_v0  ;;  %v2415_v48 = vld [vmem:[%s2914_s21 + $0x34] sm:$0xf0]  ;;  %v2164_v53 = vor.u32 %v2479_v43, %v2163_v42  ;;  %v2035_v56 = vld [vmem:[%s2914_s21 + $0x128] sm:$0xf]  ;;  %v2501_v0 = vld [vmem:[%s2914_s21 + $0x2ec] sm:$0xf]  ;;  %v2120_v39 = vor.u32 %v2465_v30, %v2117_v31 }
  0x87   : > { %v2447_v59 = vld [vmem:[%s2914_s21 + $0x134] sm:$0xf0]  ;;  %v2291_v60 = vld [vmem:[%s2914_s21 + $0x328] sm:$0xf]  ;;  %v1908_v2 = vor.u32 %v2415_v48, %v1907_v47  ;;  %v2373_v34 = vld [vmem:[%s2914_s21 + $0x3d8] sm:$0xf0] }
  0x88   : > { %1328 = vmatpush.bf16.msra.mxu1 %v2100_v9  ;;  %v2511_v61 = vld [vmem:[%s2914_s21 + $0x334] sm:$0xf0]  ;;  %v2147_v62 = vld [vmem:[%s2914_s21 + $0x208] sm:$0xf]  ;;  %v2036_v3 = vor.u32 %v2447_v59, %v2035_v56  ;;  %v2493_v35 = vld [vmem:[%s2914_s21 + $0x2ac] sm:$0xf] }
  0x89   : > { %1347 = vmatpush.bf16.msra.mxu2 %v2228_v1  ;;  %v2475_v63 = vld [vmem:[%s2914_s21 + $0x214] sm:$0xf0]  ;;  %v2261_v1 = vld [vmem:[%s2914_s21 + $0x2f8] sm:$0xf0]  ;;  %v1891_v4 = vld [vmem:[%s2914_s21 + $0x8] sm:$0xf]  ;;  %v2292_v7 = vor.u32 %v2511_v61, %v2291_v60 }
  0x8a   : > { %1309 = vmatpush.bf16.msra.mxu0 %v1972_v8  ;;  %1366 = vmatpush.bf16.msra.mxu3 %v2356_v12  ;;  %v2411_v5 = vld [vmem:[%s2914_s21 + $0x14] sm:$0xf0]  ;;  %v2019_v6 = vld [vmem:[%s2914_s21 + $0x108] sm:$0xf]  ;;  %v2148_v8 = vor.u32 %v2475_v63, %v2147_v62  ;;  %v2264_v12 = vor.u32 %v2501_v0, %v2261_v1  ;;  %v1973_v38 = vld [vmem:[%s2914_s21 + $0xb8] sm:$0xf0] }
  0x8b   : > { %v2443_v9 = vld [vmem:[%s2914_s21 + $0x114] sm:$0xf0]  ;;  %v2275_v10 = vld [vmem:[%s2914_s21 + $0x308] sm:$0xf]  ;;  %v1892_v19 = vor.u32 %v2411_v5, %v1891_v4  ;;  %v2461_v41 = vld [vmem:[%s2914_s21 + $0x1ac] sm:$0xf] }
  0x8c   : > { %1329 = vmatpush.bf16.msra.mxu1 %v2084_v21  ;;  %v2507_v11 = vld [vmem:[%s2914_s21 + $0x314] sm:$0xf0]  ;;  %v2497_v21 = vld [vmem:[%s2914_s21 + $0x2cc] sm:$0xf]  ;;  %v2101_v42 = vld [vmem:[%s2914_s21 + $0x1b8] sm:$0xf0] }
  0x8d   : > { %1348 = vmatpush.bf16.msra.mxu2 %v2212_v13  ;;  %v2437_v13 = vld [vmem:[%s2914_s21 + $0xec] sm:$0xf]  ;;  %v2276_v23 = vor.u32 %v2507_v11, %v2275_v10  ;;  %v2248_v29 = vor.u32 %v2497_v21, %v2245_v22  ;;  %v2357_v47 = vld [vmem:[%s2914_s21 + $0x3b8] sm:$0xf0]  ;;  %v2104_v59 = vor.u32 %v2461_v41, %v2101_v42 }
  0x8e   : > { %1310 = vmatpush.bf16.msra.mxu0 %v1956_v20  ;;  %1367 = vmatpush.bf16.msra.mxu3 %v2340_v24  ;;  %v2020_v20 = vor.u32 %v2443_v9, %v2019_v6  ;;  %v2008_v24 = vor.u32 %v2437_v13, %v2005_v14  ;;  %v2489_v48 = vld [vmem:[%s2914_s21 + $0x28c] sm:$0xf]  ;;  %v1957_v56 = vld [vmem:[%s2914_s21 + $0x98] sm:$0xf0] }
  0x8f   : > { %1263 = vmatmul.bf16.gmra.mxu1 %v3068_v51  ;;  %v2457_v61 = vld [vmem:[%s2914_s21 + $0x18c] sm:$0xf]  ;;  %v2085_v62 = vld [vmem:[%s2914_s21 + $0x198] sm:$0xf0] }
  0x90   : > { %1330 = vmatpush.bf16.msra.mxu1 %v2068_v33  ;;  %1282 = vmatmul.bf16.gmra.mxu2 %v3070_v52  ;;  %v2529_v33 = vld [vmem:[%s2914_s21 + $0x3cc] sm:$0xf]  ;;  %v2197_v4 = vld [vmem:[%s2914_s21 + $0x278] sm:$0xf0] }
  0x91   : > { %1349 = vmatpush.bf16.msra.mxu2 %v2196_v25  ;;  %1244 = vmatmul.bf16.gmra.mxu0 %v3063_v45  ;;  %v2136_v25 = vor.u32 %v2469_v15, %v2133_v16  ;;  %v2376_v40 = vor.u32 %v2529_v33, %v2373_v34  ;;  %v2521_v1 = vld [vmem:[%s2914_s21 + $0x38c] sm:$0xf]  ;;  %v1941_v6 = vld [vmem:[%s2914_s21 + $0x78] sm:$0xf0] }
  0x92   : > { %1311 = vmatpush.bf16.msra.mxu0 %v1940_v32  ;;  %1368 = vmatpush.bf16.msra.mxu3 %v2324_v36  ;;  %v1992_v32 = vor.u32 %v2433_v27, %v1989_v28  ;;  %v2229_v36 = vld [vmem:[%s2914_s21 + $0x2b8] sm:$0xf0]  ;;  %v2421_v5 = vld [vmem:[%s2914_s21 + $0x6c] sm:$0xf] }
  0x93   : > { %1301 = vmatmul.bf16.gmra.mxu3 %v3074_v57  ;;  %v2232_v43 = vor.u32 %v2493_v35, %v2229_v36  ;;  %v2453_v9 = vld [vmem:[%s2914_s21 + $0x16c] sm:$0xf]  ;;  %v2069_v10 = vld [vmem:[%s2914_s21 + $0x178] sm:$0xf0] }
  0x94   : > { %1331 = vmatpush.bf16.msra.mxu1 %v2052_v46  ;;  %v2525_v46 = vld [vmem:[%s2914_s21 + $0x3ac] sm:$0xf]  ;;  %v2325_v14 = vld [vmem:[%s2914_s21 + $0x378] sm:$0xf0] }
  0x95   : > { %1350 = vmatpush.bf16.msra.mxu2 %v2180_v37  ;;  %v2429_v37 = vld [vmem:[%s2914_s21 + $0xac] sm:$0xf]  ;;  %v2360_v60 = vor.u32 %v2525_v46, %v2357_v47  ;;  %v2181_v16 = vld [vmem:[%s2914_s21 + $0x258] sm:$0xf0] }
  0x96   : > { %1312 = vmatpush.bf16.msra.mxu0 %v1924_v44  ;;  %1369 = vmatpush.bf16.msra.mxu3 %v2308_v50  ;;  %v1976_v44 = vor.u32 %v2429_v37, %v1973_v38  ;;  %v2213_v50 = vld [vmem:[%s2914_s21 + $0x298] sm:$0xf0]  ;;  %v2517_v13 = vld [vmem:[%s2914_s21 + $0x36c] sm:$0xf] }
  0x97   : > { %v2216_v63 = vor.u32 %v2489_v48, %v2213_v50  ;;  %v2481_v15 = vld [vmem:[%s2914_s21 + $0x24c] sm:$0xf]  ;;  %v1925_v18 = vld [vmem:[%s2914_s21 + $0x58] sm:$0xf0] }
  0x98   : > { %1332 = vmatpush.bf16.msra.mxu1 %v2036_v3  ;;  %v2485_v3 = vld [vmem:[%s2914_s21 + $0x26c] sm:$0xf]  ;;  %v2053_v22 = vld [vmem:[%s2914_s21 + $0x158] sm:$0xf0] }
  0x99   : > { %1351 = vmatpush.bf16.msra.mxu2 %v2164_v53  ;;  %v2425_v53 = vld [vmem:[%s2914_s21 + $0x8c] sm:$0xf]  ;;  %v2200_v11 = vor.u32 %v2485_v3, %v2197_v4  ;;  %v2165_v28 = vld [vmem:[%s2914_s21 + $0x238] sm:$0xf0] }
  0x9a   : > { %1313 = vmatpush.bf16.msra.mxu0 %v1908_v2  ;;  %1370 = vmatpush.bf16.msra.mxu3 %v2292_v7  ;;  %v1960_v0 = vor.u32 %v2425_v53, %v1957_v56  ;;  %v2341_v2 = vld [vmem:[%s2914_s21 + $0x398] sm:$0xf0]  ;;  %v2088_v7 = vor.u32 %v2457_v61, %v2085_v62  ;;  %v2417_v17 = vld [vmem:[%s2914_s21 + $0x4c] sm:$0xf] }
  0x9b   : > { %v2449_v21 = vld [vmem:[%s2914_s21 + $0x14c] sm:$0xf]  ;;  %v1909_v30 = vld [vmem:[%s2914_s21 + $0x38] sm:$0xf0] }
  0x9c   : > { %1333 = vmatpush.bf16.msra.mxu1 %v2020_v20  ;;  %v2328_v20 = vor.u32 %v2517_v13, %v2325_v14  ;;  %v2477_v27 = vld [vmem:[%s2914_s21 + $0x22c] sm:$0xf]  ;;  %v2056_v31 = vor.u32 %v2449_v21, %v2053_v22  ;;  %v2037_v34 = vld [vmem:[%s2914_s21 + $0x138] sm:$0xf0]  ;;  %v331_v14 = vld [vmem:[#allocation2 + $0x40] sm:$0xff] }
  0x9d   : > { %1352 = vmatpush.bf16.msra.mxu2 %v2148_v8  ;;  %v2344_v8 = vor.u32 %v2521_v1, %v2341_v2  ;;  %v2445_v33 = vld [vmem:[%s2914_s21 + $0x12c] sm:$0xf]  ;;  %v2168_v35 = vor.u32 %v2477_v27, %v2165_v28  ;;  %v2293_v38 = vld [vmem:[%s2914_s21 + $0x338] sm:$0xf0]  ;;  %v335_v22 = vld [vmem:[#allocation2 + $0x60] sm:$0xff] }
  0x9e   : > { %1314 = vmatpush.bf16.msra.mxu0 %v1892_v19  ;;  %1371 = vmatpush.bf16.msra.mxu3 %v2276_v23  ;;  %v2072_v19 = vor.u32 %v2453_v9, %v2069_v10  ;;  %v2184_v23 = vor.u32 %v2481_v15, %v2181_v16  ;;  %v2509_v37 = vld [vmem:[%s2914_s21 + $0x32c] sm:$0xf]  ;;  %v1893_v42 = vld [vmem:[%s2914_s21 + $0x18] sm:$0xf0] }
  0x9f   : > { %1334 = vmatmul.bf16.vlgmr.msra.gmra.mxu1 %v3016_v54  ;;  %v2409_v41 = vld [vmem:[%s2914_s21 + $0xc] sm:$0xf]  ;;  %v2021_v50 = vld [vmem:[%s2914_s21 + $0x118] sm:$0xf0] }
  0xa0   : > { %1402 = vmatpush.bf16.msrb.mxu1 %v2136_v25  ;;  %1353 = vmatmul.bf16.vlgmr.msra.gmra.mxu2 %v3018_v55  ;;  %v2513_v25 = vld [vmem:[%s2914_s21 + $0x34c] sm:$0xf]  ;;  %v1896_v48 = vor.u32 %v2409_v41, %v1893_v42  ;;  %v2277_v56 = vld [vmem:[%s2914_s21 + $0x318] sm:$0xf0] }
  0xa1   : > { %1421 = vmatpush.bf16.msrb.mxu2 %v2264_v12  ;;  %1315 = vmatmul.bf16.vlgmr.msra.gmra.mxu0 %v3011_v49  ;;  %v1944_v12 = vor.u32 %v2421_v5, %v1941_v6  ;;  %v2441_v46 = vld [vmem:[%s2914_s21 + $0x10c] sm:$0xf] }
  0xa2   : > { %1383 = vmatpush.bf16.msrb.mxu0 %v2008_v24  ;;  %1440 = vmatpush.bf16.msrb.mxu3 %v2392_v26  ;;  %v1928_v24 = vor.u32 %v2417_v17, %v1925_v18  ;;  %v2309_v26 = vld [vmem:[%s2914_s21 + $0x358] sm:$0xf0]  ;;  %v2505_v53 = vld [vmem:[%s2914_s21 + $0x30c] sm:$0xf] }
  0xa3   : > { %1372 = vmatmul.bf16.vlgmr.msra.gmra.mxu3 %v3022_v58  ;;  %v328_v42 = vld [vmem:[#allocation2 + $0x68] sm:$0xff] }
  0xa4   : > { %1403 = vmatpush.bf16.msrb.mxu1 %v2120_v39  ;;  %v2473_v39 = vld [vmem:[%s2914_s21 + $0x20c] sm:$0xf] }
  0xa5   : > { %1422 = vmatpush.bf16.msrb.mxu2 %v2248_v29  ;;  %v2413_v29 = vld [vmem:[%s2914_s21 + $0x2c] sm:$0xf] }
  0xa6   : > { %1384 = vmatpush.bf16.msrb.mxu0 %v1992_v32  ;;  %1441 = vmatpush.bf16.msrb.mxu3 %v2376_v40  ;;  %v2312_v32 = vor.u32 %v2513_v25, %v2309_v26  ;;  %v1912_v36 = vor.u32 %v2413_v29, %v1909_v30  ;;  %v2149_v40 = vld [vmem:[%s2914_s21 + $0x218] sm:$0xf0] }
  0xa7   : > { %v2152_v47 = vor.u32 %v2473_v39, %v2149_v40 }
  0xa8   : > { %1404 = vmatpush.bf16.msrb.mxu1 %v2104_v59  ;;  %v2024_v59 = vor.u32 %v2441_v46, %v2021_v50 }
  0xa9   : > { %1423 = vmatpush.bf16.msrb.mxu2 %v2232_v43  ;;  %v2040_v43 = vor.u32 %v2445_v33, %v2037_v34  ;;  %v324_v33 = vld [vmem:[#allocation2] sm:$0xff] }
  0xaa   : > { %1385 = vmatpush.bf16.msrb.mxu0 %v1976_v44  ;;  %1442 = vmatpush.bf16.msrb.mxu3 %v2360_v60  ;;  %v2296_v44 = vor.u32 %v2509_v37, %v2293_v38  ;;  %v2280_v60 = vor.u32 %v2505_v53, %v2277_v56 }
  0xac   : > { %1405 = vmatpush.bf16.msrb.mxu1 %v2088_v7 }
  0xad   : > { %1424 = vmatpush.bf16.msrb.mxu2 %v2216_v63 }
  0xae   : > { %1386 = vmatpush.bf16.msrb.mxu0 %v1960_v0  ;;  %1443 = vmatpush.bf16.msrb.mxu3 %v2344_v8 }
  0xaf   : > { %1339 = vmatmul.bf16.gmra.mxu1 %v3068_v51 }
  0xb0   : > { %1406 = vmatpush.bf16.msrb.mxu1 %v2072_v19  ;;  %1358 = vmatmul.bf16.gmra.mxu2 %v3070_v52 }
  0xb1   : > { %1425 = vmatpush.bf16.msrb.mxu2 %v2200_v11  ;;  %1320 = vmatmul.bf16.gmra.mxu0 %v3063_v45 }
  0xb2   : > { %1387 = vmatpush.bf16.msrb.mxu0 %v1944_v12  ;;  %1444 = vmatpush.bf16.msrb.mxu3 %v2328_v20 }
  0xb3   : > { %1377 = vmatmul.bf16.gmra.mxu3 %v3074_v57 }
  0xb4   : > { %1407 = vmatpush.bf16.msrb.mxu1 %v2056_v31 }
  0xb5   : > { %1426 = vmatpush.bf16.msrb.mxu2 %v2184_v23 }
  0xb6   : > { %1388 = vmatpush.bf16.msrb.mxu0 %v1928_v24  ;;  %1445 = vmatpush.bf16.msrb.mxu3 %v2312_v32 }
  0xb8   : > { %1408 = vmatpush.bf16.msrb.mxu1 %v2040_v43 }
  0xb9   : > { %1427 = vmatpush.bf16.msrb.mxu2 %v2168_v35 }
  0xba   : > { %1389 = vmatpush.bf16.msrb.mxu0 %v1912_v36  ;;  %1446 = vmatpush.bf16.msrb.mxu3 %v2296_v44 }
  0xbc   : > { %1409 = vmatpush.bf16.msrb.mxu1 %v2024_v59  ;;  %v332_v59 = vld [vmem:[#allocation2 + $0x20] sm:$0xff] }
  0xbd   : > { %1428 = vmatpush.bf16.msrb.mxu2 %v2152_v47 }
  0xbe   : > { %1390 = vmatpush.bf16.msrb.mxu0 %v1896_v48  ;;  %1447 = vmatpush.bf16.msrb.mxu3 %v2280_v60 }
  0xbf   : > { %1410 = vmatmul.bf16.vlgmr.msrb.gmra.mxu1 %v3016_v54  ;;  %v323_v54 = vld [vmem:[#allocation2 + $0x30] sm:$0xff] }
  0xc0   : > { %1429 = vmatmul.bf16.vlgmr.msrb.gmra.mxu2 %v3018_v55 }
  0xc1   : > { %1391 = vmatmul.bf16.vlgmr.msrb.gmra.mxu0 %v3011_v49 }
  0xc3   : > { %1448 = vmatmul.bf16.vlgmr.msrb.gmra.mxu3 %v3022_v58 }
  0xcf   : > { %1415 = vmatmul.bf16.gmra.mxu1 %v3068_v51 }
  0xd0   : > { %1434 = vmatmul.bf16.gmra.mxu2 %v3070_v52  ;;  %v327_v52 = vld [vmem:[#allocation2 + $0x50] sm:$0xff] }
  0xd1   : > { %1396 = vmatmul.bf16.gmra.mxu0 %v3063_v45 }
  0xd3   : > { %1453 = vmatmul.bf16.gmra.mxu3 %v3074_v57 }
  0xdc   : > { %v1164_v61 = vpop.f32.mrf.mxu0  ;;  %v1183_v62 = vpop.f32.mrf.mxu1 }
  0xdd   : > { %v1184_v63 = vadd.f32 %v1183_v62, %v1164_v61 }
  0xe3   : > { %v1202_v0 = vpop.f32.mrf.mxu2 }
  0xe4   : > { %v1203_v1 = vadd.f32 %v1202_v0, %v1184_v63  ;;  %v1221_v49 = vpop.f32.mrf.mxu3  ;;  %v1166_v2 = vpop.f32.mrf.mxu0 }
  0xe5   : > { %v1185_v3 = vpop.f32.mrf.mxu1 }
  0xe6   : > { %v1222_v55 = vadd.f32 %v1221_v49, %v1203_v1  ;;  %v1186_v58 = vadd.f32 %v1185_v3, %v1166_v2 }
  0xe8   : > { %v1459_v4 = vadd.f32 %v1222_v55, %v323_v54  ;;  %v336_v54 = vld [vmem:[#allocation2 + $0x70] sm:$0xff] }
  0xea   : > { %1475 = vst [vmem:[#allocation2 + $0x30] sm:$0xff] %v1459_v4 }
  0xeb   : > { %v1204_v45 = vpop.f32.mrf.mxu2 }
  0xec   : > { %v1205_v5 = vadd.f32 %v1204_v45, %v1186_v58  ;;  %v1223_v51 = vpop.f32.mrf.mxu3  ;;  %v1169_v6 = vpop.f32.mrf.mxu0 }
  0xed   : > { %v1188_v7 = vpop.f32.mrf.mxu1 }
  0xee   : > { %v1224_v57 = vadd.f32 %v1223_v51, %v1205_v5  ;;  %v1189_v9 = vadd.f32 %v1188_v7, %v1169_v6 }
  0xf0   : > { %v1463_v8 = vadd.f32 %v1224_v57, %v327_v52  ;;  %v325_v52 = vld [vmem:[#allocation2 + $0x58] sm:$0xff] }
  0xf2   : > { %1479 = vst [vmem:[#allocation2 + $0x50] sm:$0xff] %v1463_v8 }
  0xf3   : > { %v1207_v10 = vpop.f32.mrf.mxu2 }
  0xf4   : > { %v1208_v11 = vadd.f32 %v1207_v10, %v1189_v9  ;;  %v1226_v12 = vpop.f32.mrf.mxu3  ;;  %v1171_v13 = vpop.f32.mrf.mxu0 }
  0xf5   : > { %v1190_v15 = vpop.f32.mrf.mxu1 }
  0xf6   : > { %v1227_v16 = vadd.f32 %v1226_v12, %v1208_v11  ;;  %v1191_v18 = vadd.f32 %v1190_v15, %v1171_v13 }
  0xf8   : > { %v1467_v17 = vadd.f32 %v1227_v16, %v331_v14  ;;  %v329_v14 = vld [vmem:[#allocation2 + $0x8] sm:$0xff] }
  0xfa   : > { %1483 = vst [vmem:[#allocation2 + $0x40] sm:$0xff] %v1467_v17 }
  0xfb   : > { %v1209_v19 = vpop.f32.mrf.mxu2 }
  0xfc   : > { %v1210_v20 = vadd.f32 %v1209_v19, %v1191_v18  ;;  %v1228_v21 = vpop.f32.mrf.mxu3 }
  0xfd   : > { %v1259_v24 = vpop.f32.mrf.mxu1 }
  0xfe   : > { %v1240_v23 = vpop.f32.mrf.mxu0  ;;  %v1229_v25 = vadd.f32 %v1228_v21, %v1210_v20 }
  0xff   : > { %v1260_v27 = vadd.f32 %v1259_v24, %v1240_v23  ;;  %v333_v23 = vld [vmem:[#allocation2 + $0x10] sm:$0xff] }
 0x100   : > { %v1471_v26 = vadd.f32 %v1229_v25, %v335_v22 }
 0x102   : > { %1487 = vst [vmem:[#allocation2 + $0x60] sm:$0xff] %v1471_v26 }
 0x103   : > { %v1278_v28 = vpop.f32.mrf.mxu2 }
 0x104   : > { %v1279_v30 = vadd.f32 %v1278_v28, %v1260_v27 }
 0x105   : > { %v1261_v32 = vpop.f32.mrf.mxu1 }
 0x106   : > { %v1297_v29 = vpop.f32.mrf.mxu3  ;;  %v1242_v31 = vpop.f32.mrf.mxu0 }
 0x107   : > { %v1298_v34 = vadd.f32 %v1297_v29, %v1279_v30  ;;  %v1262_v36 = vadd.f32 %v1261_v32, %v1242_v31  ;;  %v337_v32 = vld [vmem:[#allocation2 + $0x78] sm:$0xff] }
 0x109   : > { %v1460_v35 = vadd.f32 %v1298_v34, %v324_v33 }
 0x10b   : > { %1476 = vst [vmem:[#allocation2] sm:$0xff] %v1460_v35  ;;  %v1280_v37 = vpop.f32.mrf.mxu2 }
 0x10c   : > { %v1281_v39 = vadd.f32 %v1280_v37, %v1262_v36 }
 0x10d   : > { %v1264_v41 = vpop.f32.mrf.mxu1 }
 0x10e   : > { %v1299_v38 = vpop.f32.mrf.mxu3  ;;  %v1245_v40 = vpop.f32.mrf.mxu0 }
 0x10f   : > { %v1300_v43 = vadd.f32 %v1299_v38, %v1281_v39  ;;  %v1265_v46 = vadd.f32 %v1264_v41, %v1245_v40  ;;  %v326_v41 = vld [vmem:[#allocation2 + $0x18] sm:$0xff] }
 0x111   : > { %v1464_v44 = vadd.f32 %v1300_v43, %v328_v42 }
 0x113   : > { %1480 = vst [vmem:[#allocation2 + $0x68] sm:$0xff] %v1464_v44  ;;  %v1283_v47 = vpop.f32.mrf.mxu2 }
 0x114   : > { %v1284_v50 = vadd.f32 %v1283_v47, %v1265_v46 }
 0x115   : > { %v1266_v56 = vpop.f32.mrf.mxu1 }
 0x116   : > { %v1302_v48 = vpop.f32.mrf.mxu3  ;;  %v1247_v53 = vpop.f32.mrf.mxu0 }
 0x117   : > { %v1303_v60 = vadd.f32 %v1302_v48, %v1284_v50  ;;  %v1267_v62 = vadd.f32 %v1266_v56, %v1247_v53  ;;  %v330_v50 = vld [vmem:[#allocation2 + $0x48] sm:$0xff] }
 0x119   : > { %v1468_v61 = vadd.f32 %v1303_v60, %v332_v59 }
 0x11b   : > { %1484 = vst [vmem:[#allocation2 + $0x20] sm:$0xff] %v1468_v61  ;;  %v1285_v63 = vpop.f32.mrf.mxu2 }
 0x11c   : > { %v1286_v1 = vadd.f32 %v1285_v63, %v1267_v62 }
 0x11d   : > { %v1335_v2 = vpop.f32.mrf.mxu1 }
 0x11e   : > { %v1304_v0 = vpop.f32.mrf.mxu3  ;;  %v1316_v49 = vpop.f32.mrf.mxu0 }
 0x11f   : > { %v1305_v3 = vadd.f32 %v1304_v0, %v1286_v1  ;;  %v1336_v4 = vadd.f32 %v1335_v2, %v1316_v49  ;;  %v334_v1 = vld [vmem:[#allocation2 + $0x38] sm:$0xff] }
 0x121   : > { %v1472_v55 = vadd.f32 %v1305_v3, %v336_v54 }
 0x123   : > { %1488 = vst [vmem:[#allocation2 + $0x70] sm:$0xff] %v1472_v55  ;;  %v1354_v58 = vpop.f32.mrf.mxu2 }
 0x124   : > { %v1355_v5 = vadd.f32 %v1354_v58, %v1336_v4 }
 0x125   : > { %v1337_v6 = vpop.f32.mrf.mxu1 }
 0x126   : > { %v1373_v45 = vpop.f32.mrf.mxu3  ;;  %v1318_v51 = vpop.f32.mrf.mxu0 }
 0x127   : > { %v1374_v7 = vadd.f32 %v1373_v45, %v1355_v5  ;;  %v1338_v8 = vadd.f32 %v1337_v6, %v1318_v51  ;;  %v338_v45 = vld [vmem:[#allocation2 + $0x28] sm:$0xff] }
 0x129   : > { %v1461_v57 = vadd.f32 %v1374_v7, %v325_v52 }
 0x12b   : > { %1477 = vst [vmem:[#allocation2 + $0x58] sm:$0xff] %v1461_v57  ;;  %v1356_v9 = vpop.f32.mrf.mxu2 }
 0x12c   : > { %v1357_v11 = vadd.f32 %v1356_v9, %v1338_v8 }
 0x12d   : > { %v1340_v13 = vpop.f32.mrf.mxu1 }
 0x12e   : > { %v1375_v10 = vpop.f32.mrf.mxu3  ;;  %v1321_v12 = vpop.f32.mrf.mxu0 }
 0x12f   : > { %v1376_v15 = vadd.f32 %v1375_v10, %v1357_v11  ;;  %v1341_v17 = vadd.f32 %v1340_v13, %v1321_v12 }
 0x131   : > { %v1465_v16 = vadd.f32 %v1376_v15, %v329_v14 }
 0x133   : > { %1481 = vst [vmem:[#allocation2 + $0x8] sm:$0xff] %v1465_v16  ;;  %v1359_v18 = vpop.f32.mrf.mxu2 }
 0x134   : > { %v1360_v20 = vadd.f32 %v1359_v18, %v1341_v17 }
 0x135   : > { %v1342_v22 = vpop.f32.mrf.mxu1 }
 0x136   : > { %v1378_v19 = vpop.f32.mrf.mxu3  ;;  %v1323_v21 = vpop.f32.mrf.mxu0 }
 0x137   : > { %v1379_v24 = vadd.f32 %v1378_v19, %v1360_v20  ;;  %v1343_v26 = vadd.f32 %v1342_v22, %v1323_v21 }
 0x139   : > { %v1469_v25 = vadd.f32 %v1379_v24, %v333_v23 }
 0x13b   : > { %1485 = vst [vmem:[#allocation2 + $0x10] sm:$0xff] %v1469_v25  ;;  %v1361_v27 = vpop.f32.mrf.mxu2 }
 0x13c   : > { %v1362_v29 = vadd.f32 %v1361_v27, %v1343_v26 }
 0x13d   : > { %v1411_v31 = vpop.f32.mrf.mxu1 }
 0x13e   : > { %v1380_v28 = vpop.f32.mrf.mxu3  ;;  %v1392_v30 = vpop.f32.mrf.mxu0 }
 0x13f   : > { %v1381_v33 = vadd.f32 %v1380_v28, %v1362_v29  ;;  %v1412_v35 = vadd.f32 %v1411_v31, %v1392_v30 }
 0x141   : > { %v1473_v34 = vadd.f32 %v1381_v33, %v337_v32 }
 0x143   : > { %1489 = vst [vmem:[#allocation2 + $0x78] sm:$0xff] %v1473_v34  ;;  %v1430_v36 = vpop.f32.mrf.mxu2 }
 0x144   : > { %v1431_v38 = vadd.f32 %v1430_v36, %v1412_v35 }
 0x145   : > { %v1413_v40 = vpop.f32.mrf.mxu1 }
 0x146   : > { %v1449_v37 = vpop.f32.mrf.mxu3  ;;  %v1394_v39 = vpop.f32.mrf.mxu0 }
 0x147   : > { %v1450_v42 = vadd.f32 %v1449_v37, %v1431_v38  ;;  %v1414_v44 = vadd.f32 %v1413_v40, %v1394_v39 }
 0x149   : > { %v1462_v43 = vadd.f32 %v1450_v42, %v326_v41 }
 0x14b   : > { %1478 = vst [vmem:[#allocation2 + $0x18] sm:$0xff] %v1462_v43  ;;  %v1432_v46 = vpop.f32.mrf.mxu2 }
 0x14c   : > { %v1433_v48 = vadd.f32 %v1432_v46, %v1414_v44 }
 0x14d   : > { %v1416_v56 = vpop.f32.mrf.mxu1 }
 0x14e   : > { %v1451_v47 = vpop.f32.mrf.mxu3  ;;  %v1397_v53 = vpop.f32.mrf.mxu0 }
 0x14f   : > { %v1452_v59 = vadd.f32 %v1451_v47, %v1433_v48  ;;  %v1417_v61 = vadd.f32 %v1416_v56, %v1397_v53 }
 0x151   : > { %v1466_v60 = vadd.f32 %v1452_v59, %v330_v50 }
 0x153   : > { %1482 = vst [vmem:[#allocation2 + $0x48] sm:$0xff] %v1466_v60  ;;  %v1435_v62 = vpop.f32.mrf.mxu2 }
 0x154   : > { %v1436_v0 = vadd.f32 %v1435_v62, %v1417_v61 }
 0x155   : > { %v1418_v54 = vpop.f32.mrf.mxu1 }
 0x156   : > { %v1454_v63 = vpop.f32.mrf.mxu3  ;;  %v1399_v2 = vpop.f32.mrf.mxu0 }
 0x157   : > { %v1455_v49 = vadd.f32 %v1454_v63, %v1436_v0  ;;  %v1419_v55 = vadd.f32 %v1418_v54, %v1399_v2 }
 0x159   : > { %v1470_v3 = vadd.f32 %v1455_v49, %v334_v1 }
 0x15b   : > { %1486 = vst [vmem:[#allocation2 + $0x38] sm:$0xff] %v1470_v3  ;;  %v1437_v4 = vpop.f32.mrf.mxu2 }
 0x15c   : > { %v1438_v58 = vadd.f32 %v1437_v4, %v1419_v55 }
 0x15e   : > { %v1456_v5 = vpop.f32.mrf.mxu3 }
 0x15f   : > { %v1457_v51 = vadd.f32 %v1456_v5, %v1438_v58  ;;  %1494 = sbr.rel (%p2393_p3) target bundleno = 415 (0x19f), region = 56 }
 0x161   : > { %v1474_v6 = vadd.f32 %v1457_v51, %v338_v45 }
 0x163   : > { %1490 = vst [vmem:[#allocation2 + $0x28] sm:$0xff] %v1474_v6 }
 0x164   : > { %v1495_v52 = vld [vmem:[#allocation2 + $0x30] sm:$0xff]  ;;  %v1511_v7 = vld [vmem:[#allocation5] sm:$0xf]  ;;  %v1537_v57 = vld [vmem:[#allocation7] sm:$0xf] }
 0x165   : > { %v3253_v8 = vperm.slane %v1511_v7, 0  ;;  %v3255_v9 = vperm.slane %v1537_v57, 0  ;;  %v1496_v10 = vld [vmem:[#allocation2] sm:$0xff]  ;;  %v3257_v11 = vperm.slane %v1511_v7, 1  ;;  %v3259_v12 = vperm.slane %v1537_v57, 1  ;;  %v1497_v13 = vld [vmem:[#allocation2 + $0x58] sm:$0xff] }
 0x166   : > { %v3261_v14 = vperm.slane %v1511_v7, 2  ;;  %v3263_v15 = vperm.slane %v1537_v57, 2  ;;  %v1498_v16 = vld [vmem:[#allocation2 + $0x18] sm:$0xff]  ;;  %v3265_v17 = vperm.slane %v1511_v7, 3  ;;  %v3267_v18 = vperm.slane %v1537_v57, 3  ;;  %v1499_v19 = vld [vmem:[#allocation2 + $0x50] sm:$0xff] }
 0x167   : > { %v1521_v20 = vmul.f32 %v3253_v8, %v1495_v52  ;;  %v1522_v21 = vmul.f32 %v3257_v11, %v1496_v10  ;;  %v1525_v22 = vmul.f32 %v3253_v8, %v1499_v19  ;;  %v1500_v23 = vld [vmem:[#allocation2 + $0x68] sm:$0xff]  ;;  %v1503_v5 = vld [vmem:[#allocation2 + $0x40] sm:$0xff] }
 0x168   : > { %v1501_v24 = vld [vmem:[#allocation2 + $0x8] sm:$0xff]  ;;  %v1523_v25 = vmul.f32 %v3261_v14, %v1497_v13  ;;  %v1524_v26 = vmul.f32 %v3265_v17, %v1498_v16  ;;  %v1526_v27 = vmul.f32 %v3257_v11, %v1500_v23  ;;  %v1504_v57 = vld [vmem:[#allocation2 + $0x20] sm:$0xff]  ;;  %v1529_v23 = vmul.f32 %v3253_v8, %v1503_v5 }
 0x169   : > { %v1527_v28 = vmul.f32 %v3261_v14, %v1501_v24  ;;  %v1547_v29 = vadd.f32 %v3255_v9, %v1521_v20  ;;  %v1548_v30 = vadd.f32 %v3259_v12, %v1522_v21  ;;  %v1551_v31 = vadd.f32 %v3255_v9, %v1525_v22  ;;  %v1502_v32 = vld [vmem:[#allocation2 + $0x48] sm:$0xff]  ;;  %v1505_v20 = vld [vmem:[#allocation2 + $0x10] sm:$0xff] }
 0x16a   : > { %v1549_v33 = vadd.f32 %v3263_v15, %v1523_v25  ;;  %v1550_v34 = vadd.f32 %v3267_v18, %v1524_v26  ;;  %v3282_v35 = vadd.f32 %v3259_v12, %v1526_v27  ;;  %v1528_v41 = vmul.f32 %v3265_v17, %v1502_v32  ;;  %v1506_v27 = vld [vmem:[#allocation2 + $0x38] sm:$0xff] }
 0x16b   : > { %v1579_v36 = vmul.f32 0.044715, %v1547_v29  ;;  %v1580_v37 = vmul.f32 0.044715, %v1548_v30  ;;  %v1553_v40 = vadd.f32 %v3263_v15, %v1527_v28  ;;  %v3286_v42 = vmul.f32 0.5, %v1547_v29 }
 0x16c   : > { %v1581_v38 = vmul.f32 0.044715, %v1549_v33  ;;  %v1582_v39 = vmul.f32 0.044715, %v1550_v34  ;;  %v1583_v46 = vmul.f32 0.044715, %v1551_v31  ;;  %v1554_v3 = vadd.f32 %v3267_v18, %v1528_v41 }
 0x16d   : > { %v1595_v43 = vmul.f32 %v1579_v36, %v1547_v29  ;;  %v1596_v44 = vmul.f32 %v1580_v37, %v1548_v30  ;;  %v3288_v47 = vmul.f32 0.5, %v1548_v30  ;;  %v1584_v53 = vmul.f32 0.044715, %v3282_v35 }
 0x16e   : > { %v1597_v48 = vmul.f32 %v1581_v38, %v1549_v33  ;;  %v1598_v50 = vmul.f32 %v1582_v39, %v1550_v34  ;;  %v3291_v60 = vmul.f32 0.5, %v1549_v33  ;;  %v1599_v61 = vmul.f32 %v1583_v46, %v1551_v31 }
 0x16f   : > { %v1611_v56 = vmul.f32 %v1595_v43, %v1547_v29  ;;  %v1612_v59 = vmul.f32 %v1596_v44, %v1548_v30  ;;  %v1600_v0 = vmul.f32 %v1584_v53, %v3282_v35  ;;  %v1585_v1 = vmul.f32 0.044715, %v1553_v40 }
 0x170   : > { %v1613_v62 = vmul.f32 %v1597_v48, %v1549_v33  ;;  %v1614_v63 = vmul.f32 %v1598_v50, %v1550_v34  ;;  %v1615_v54 = vmul.f32 %v1599_v61, %v1551_v31  ;;  %v3296_v52 = vmul.f32 0.5, %v1550_v34 }
 0x171   : > { %v1627_v49 = vadd.f32 %v1611_v56, %v1547_v29  ;;  %v1628_v2 = vadd.f32 %v1612_v59, %v1548_v30  ;;  %v1616_v58 = vmul.f32 %v1600_v0, %v3282_v35  ;;  %v1601_v45 = vmul.f32 %v1585_v1, %v1553_v40 }
 0x172   : > { %v1629_v55 = vadd.f32 %v1613_v62, %v1549_v33  ;;  %v1630_v4 = vadd.f32 %v1614_v63, %v1550_v34  ;;  %v1631_v7 = vadd.f32 %v1615_v54, %v1551_v31  ;;  %v1586_v22 = vmul.f32 0.044715, %v1554_v3 }
 0x173   : > { %v1643_v51 = vmul.f32 0.7978845, %v1627_v49  ;;  %v1644_v6 = vmul.f32 0.7978845, %v1628_v2  ;;  %v1632_v16 = vadd.f32 %v1616_v58, %v3282_v35  ;;  %v1617_v19 = vmul.f32 %v1601_v45, %v1553_v40 }
 0x174   : > { %v1645_v10 = vmul.f32 0.7978845, %v1629_v55  ;;  %v1646_v13 = vmul.f32 0.7978845, %v1630_v4  ;;  %v1647_v21 = vmul.f32 0.7978845, %v1631_v7  ;;  %v1530_v26 = vmul.f32 %v3257_v11, %v1504_v57 }
 0x175   : > { %2615 = vtanh.f32 %v1643_v51  ;;  %v1648_v24 = vmul.f32 0.7978845, %v1632_v16  ;;  %v1633_v25 = vadd.f32 %v1617_v19, %v1553_v40  ;;  %v1602_v28 = vmul.f32 %v1586_v22, %v1554_v3  ;;  %v1507_v57 = vld [vmem:[#allocation2 + $0x60] sm:$0xff] }
 0x176   : > { %2617 = vtanh.f32 %v1644_v6  ;;  %v3302_v29 = vadd.f32 %v3255_v9, %v1529_v23  ;;  %v1531_v30 = vmul.f32 %v3261_v14, %v1505_v20  ;;  %v1567_v32 = vmul.f32 0.5, %v1551_v31 }
 0x177   : > { %2619 = vtanh.f32 %v1645_v10  ;;  %v1649_v33 = vmul.f32 0.7978845, %v1633_v25  ;;  %v3306_v34 = vadd.f32 %v3259_v12, %v1530_v26  ;;  %v1618_v36 = vmul.f32 %v1602_v28, %v1554_v3  ;;  %v1508_v10 = vld [vmem:[#allocation2 + $0x70] sm:$0xff]  ;;  %v1510_v25 = vld [vmem:[#allocation2 + $0x28] sm:$0xff] }
 0x178   : > { %2621 = vtanh.f32 %v1646_v13  ;;  %v1587_v37 = vmul.f32 0.044715, %v3302_v29  ;;  %v1532_v38 = vmul.f32 %v3265_v17, %v1506_v27  ;;  %v1568_v39 = vmul.f32 0.5, %v3282_v35 }
 0x179   : > { %2623 = vtanh.f32 %v1647_v21  ;;  %v1588_v41 = vmul.f32 0.044715, %v3306_v34  ;;  %v3313_v43 = vadd.f32 %v3263_v15, %v1531_v30  ;;  %v1569_v31 = vmul.f32 0.5, %v1553_v40 }
 0x17a   : > { %2625 = vtanh.f32 %v1648_v24  ;;  %v1634_v46 = vadd.f32 %v1618_v36, %v1554_v3  ;;  %v1603_v48 = vmul.f32 %v1587_v37, %v3302_v29  ;;  %v1570_v56 = vmul.f32 0.5, %v1554_v3  ;;  %v1509_v24 = vld [vmem:[#allocation2 + $0x78] sm:$0xff] }
 0x17b   : > { %v2616_v44 = vpop.eup %2615  ;;  %2627 = vtanh.f32 %v1649_v33  ;;  %v1604_v59 = vmul.f32 %v1588_v41, %v3306_v34  ;;  %v1589_v61 = vmul.f32 0.044715, %v3313_v43  ;;  %v3320_v1 = vadd.f32 %v3267_v18, %v1532_v38 }
 0x17c   : > { %v2618_v50 = vpop.eup %2617  ;;  %v1675_v53 = vadd.f32 1.0, %v2616_v44  ;;  %v1650_v63 = vmul.f32 0.7978845, %v1634_v46  ;;  %v1619_v0 = vmul.f32 %v1603_v48, %v3302_v29  ;;  %v1533_v27 = vmul.f32 %v3253_v8, %v1507_v57 }
 0x17d   : > { %v2620_v35 = vpop.eup %2619  ;;  %v1676_v62 = vadd.f32 1.0, %v2618_v50  ;;  %v1620_v54 = vmul.f32 %v1604_v59, %v3306_v34  ;;  %v1605_v3 = vmul.f32 %v1589_v61, %v3313_v43  ;;  %v1590_v20 = vmul.f32 0.044715, %v3320_v1 }
 0x17e   : > { %v2622_v40 = vpop.eup %2621  ;;  %v1691_v49 = vmul.f32 %v1675_v53, %v3286_v42  ;;  %v1677_v2 = vadd.f32 1.0, %v2620_v35  ;;  %2629 = vtanh.f32 %v1650_v63  ;;  %v1635_v45 = vadd.f32 %v1619_v0, %v3302_v29 }
 0x17f   : > { %v2624_v55 = vpop.eup %2623  ;;  %v1692_v4 = vmul.f32 %v1676_v62, %v3288_v47  ;;  %v1678_v58 = vadd.f32 1.0, %v2622_v40  ;;  %v1636_v6 = vadd.f32 %v1620_v54, %v3306_v34  ;;  %v1621_v7 = vmul.f32 %v1605_v3, %v3313_v43 }
 0x180   : > { %v2626_v5 = vpop.eup %2625  ;;  %1707 = vst [vmem:[%s3418_s4] sm:$0xff] %v1691_v49  ;;  %v1693_v51 = vmul.f32 %v1677_v2, %v3291_v60  ;;  %v1679_v42 = vadd.f32 1.0, %v2624_v55  ;;  %v1651_v19 = vmul.f32 0.7978845, %v1635_v45  ;;  %v1606_v26 = vmul.f32 %v1590_v20, %v3320_v1 }
 0x181   : > { %v2628_v13 = vpop.eup %2627  ;;  %1708 = vst [vmem:[%s3418_s4 + $0x8] sm:$0xff] %v1692_v4  ;;  %v1694_v47 = vmul.f32 %v1678_v58, %v3296_v52  ;;  %v1680_v16 = vadd.f32 1.0, %v2626_v5  ;;  %v1652_v22 = vmul.f32 0.7978845, %v1636_v6  ;;  %v1637_v23 = vadd.f32 %v1621_v7, %v3313_v43 }
 0x182   : > { %1709 = vst [vmem:[%s3418_s4 + $0x10] sm:$0xff] %v1693_v51  ;;  %v1695_v60 = vmul.f32 %v1679_v42, %v1567_v32  ;;  %v1681_v21 = vadd.f32 1.0, %v2628_v13  ;;  %2631 = vtanh.f32 %v1651_v19  ;;  %v1534_v32 = vmul.f32 %v3257_v11, %v1508_v10 }
 0x183   : > { %1710 = vst [vmem:[%s3418_s4 + $0x18] sm:$0xff] %v1694_v47  ;;  %v1696_v52 = vmul.f32 %v1680_v16, %v1568_v39  ;;  %2633 = vtanh.f32 %v1652_v22  ;;  %v1653_v30 = vmul.f32 0.7978845, %v1637_v23  ;;  %v1622_v36 = vmul.f32 %v1606_v26, %v3320_v1 }
 0x184   : > { %1711 = vst [vmem:[%s3418_s4 + $0x20] sm:$0xff] %v1695_v60  ;;  %v1697_v28 = vmul.f32 %v1681_v21, %v1569_v31  ;;  %v2630_v33 = vpop.eup %2629  ;;  %v1559_v37 = vadd.f32 %v3255_v9, %v1533_v27  ;;  %v1535_v8 = vmul.f32 %v3261_v14, %v1509_v24  ;;  %v1536_v38 = vmul.f32 %v3265_v17, %v1510_v25 }
 0x185   : > { %1712 = vst [vmem:[%s3418_s4 + $0x28] sm:$0xff] %v1696_v52  ;;  %v1682_v39 = vadd.f32 1.0, %v2630_v33  ;;  %2635 = vtanh.f32 %v1653_v30  ;;  %v1560_v11 = vadd.f32 %v3259_v12, %v1534_v32  ;;  %v1638_v41 = vadd.f32 %v1622_v36, %v3320_v1 }
 0x186   : > { %1713 = vst [vmem:[%s3418_s4 + $0x30] sm:$0xff] %v1697_v28  ;;  %v1591_v44 = vmul.f32 0.044715, %v1559_v37  ;;  %v1561_v31 = vadd.f32 %v3263_v15, %v1535_v8  ;;  %v1571_v9 = vmul.f32 0.5, %v3302_v29  ;;  %v1562_v14 = vadd.f32 %v3267_v18, %v1536_v38 }
 0x187   : > { %v1698_v46 = vmul.f32 %v1682_v39, %v1570_v56  ;;  %v1592_v48 = vmul.f32 0.044715, %v1560_v11  ;;  %v1572_v50 = vmul.f32 0.5, %v3306_v34  ;;  %v1654_v53 = vmul.f32 0.7978845, %v1638_v41 }
 0x188   : > { %v2632_v17 = vpop.eup %2631  ;;  %v1607_v59 = vmul.f32 %v1591_v44, %v1559_v37  ;;  %v1593_v61 = vmul.f32 0.044715, %v1561_v31  ;;  %v1573_v15 = vmul.f32 0.5, %v3313_v43  ;;  %v1594_v62 = vmul.f32 0.044715, %v1562_v14 }
 0x189   : > { %v2634_v35 = vpop.eup %2633  ;;  %1714 = vst [vmem:[%s3418_s4 + $0x38] sm:$0xff] %v1698_v46  ;;  %v1683_v12 = vadd.f32 1.0, %v2632_v17  ;;  %v1608_v56 = vmul.f32 %v1592_v48, %v1560_v11  ;;  %2637 = vtanh.f32 %v1654_v53  ;;  %v1574_v51 = vmul.f32 0.5, %v3320_v1 }
 0x18a   : > { %v1684_v29 = vadd.f32 1.0, %v2634_v35  ;;  %v1623_v63 = vmul.f32 %v1607_v59, %v1559_v37  ;;  %v1609_v18 = vmul.f32 %v1593_v61, %v1561_v31  ;;  %v1610_v49 = vmul.f32 %v1594_v62, %v1562_v14 }
 0x18b   : > { %v2636_v0 = vpop.eup %2635  ;;  %v1699_v40 = vmul.f32 %v1683_v12, %v1571_v9  ;;  %v1624_v34 = vmul.f32 %v1608_v56, %v1560_v11  ;;  %v1575_v1 = vmul.f32 0.5, %v1559_v37  ;;  %v1576_v19 = vmul.f32 0.5, %v1560_v11 }
 0x18c   : > { %v1700_v2 = vmul.f32 %v1684_v29, %v1572_v50  ;;  %v1685_v54 = vadd.f32 1.0, %v2636_v0  ;;  %v1639_v3 = vadd.f32 %v1623_v63, %v1559_v37  ;;  %v1625_v55 = vmul.f32 %v1609_v18, %v1561_v31 }
 0x18d   : > { %1715 = vst [vmem:[%s3418_s4 + $0x40] sm:$0xff] %v1699_v40  ;;  %v1640_v4 = vadd.f32 %v1624_v34, %v1560_v11  ;;  %v1626_v43 = vmul.f32 %v1610_v49, %v1562_v14  ;;  %v1577_v21 = vmul.f32 0.5, %v1561_v31  ;;  %v1578_v24 = vmul.f32 0.5, %v1562_v14 }
 0x18e   : > { %1716 = vst [vmem:[%s3418_s4 + $0x48] sm:$0xff] %v1700_v2  ;;  %v1701_v58 = vmul.f32 %v1685_v54, %v1573_v15  ;;  %v1655_v45 = vmul.f32 0.7978845, %v1639_v3  ;;  %v1641_v5 = vadd.f32 %v1625_v55, %v1561_v31 }
 0x18f   : > { %v1656_v42 = vmul.f32 0.7978845, %v1640_v4  ;;  %v1642_v6 = vadd.f32 %v1626_v43, %v1562_v14  ;;  %v2638_v7 = vpop.eup %2637 }
 0x190   : > { %1717 = vst [vmem:[%s3418_s4 + $0x50] sm:$0xff] %v1701_v58  ;;  %2639 = vtanh.f32 %v1655_v45  ;;  %v1657_v57 = vmul.f32 0.7978845, %v1641_v5  ;;  %v1686_v10 = vadd.f32 1.0, %v2638_v7 }
 0x191   : > { %2641 = vtanh.f32 %v1656_v42  ;;  %v1658_v13 = vmul.f32 0.7978845, %v1642_v6 }
 0x192   : > { %2643 = vtanh.f32 %v1657_v57  ;;  %v1702_v47 = vmul.f32 %v1686_v10, %v1574_v51 }
 0x193   : > { %2645 = vtanh.f32 %v1658_v13 }
 0x194   : > { %1718 = vst [vmem:[%s3418_s4 + $0x58] sm:$0xff] %v1702_v47 }
 0x196   : > { %v2640_v16 = vpop.eup %2639 }
 0x197   : > { %v2642_v20 = vpop.eup %2641  ;;  %v1687_v60 = vadd.f32 1.0, %v2640_v16 }
 0x198   : > { %v2644_v22 = vpop.eup %2643  ;;  %v1688_v23 = vadd.f32 1.0, %v2642_v20 }
 0x199   : > { %v2646_v25 = vpop.eup %2645  ;;  %v1703_v52 = vmul.f32 %v1687_v60, %v1575_v1  ;;  %v1689_v26 = vadd.f32 1.0, %v2644_v22 }
 0x19a   : > { %v1704_v27 = vmul.f32 %v1688_v23, %v1576_v19  ;;  %v1690_v28 = vadd.f32 1.0, %v2646_v25 }
 0x19b   : > { %1719 = vst [vmem:[%s3418_s4 + $0x60] sm:$0xff] %v1703_v52  ;;  %v1705_v30 = vmul.f32 %v1689_v26, %v1577_v21 }
 0x19c   : > { %1720 = vst [vmem:[%s3418_s4 + $0x68] sm:$0xff] %v1704_v27  ;;  %v1706_v32 = vmul.f32 %v1690_v28, %v1578_v24 }
 0x19d   : > { %1721 = vst [vmem:[%s3418_s4 + $0x70] sm:$0xff] %v1705_v30 }
 0x19e   : > { %1722 = vst [vmem:[%s3418_s4 + $0x78] sm:$0xff] %v1706_v32 }
 0x19f PF: > { %s18_s20 = sadd.s32 1, %s2791_s20   ;;  %s3424_s15 = smov %s2775_s16 }
 0x1a0   : > { %p15_p4 = scmp.ge.s32.totalorder %s18_s20, 11   ;;  %s3425_s16 = smov %s2779_s17 }
 0x1a1   : > { %s3426_s17 = smov %s2907_s6  ;;  %s3427_s18 = smov %s2787_s19 }
 0x1a2   : > { %s3428_s19 = smov %s3430_s13  ;;  %17 = sbr.rel (!%p15_p4) target bundleno = 5 (0x5), region = 97 }
 0x1a7   :  { %1745 = vsyncpa [#allocation4], 1 }
 0x1a8   :  { %1747 = vsyncpa [#allocation4 + $0x1], 1 }
 0x1a9   :  { %1748 = vsyncpa [#allocation6], 1 }

// kernel: vit_forward.3
= control target key start
LH: loop header
LB: loop body
LE: loop exit
PB: predicated region body
PF: predicated region fallthrough
CT: control target
= control target key end

     0   :  { %s6448_s6 = smov 1   ;;  %s6449_s10 = smov 2   ;;  %s7790_s0 = inlined_call_operand.smem [shape: u32[36], index: -1, kind: input, shape index: {}] }
   0x1   :  { %s6527_s5 = sld [smem:[%s7790_s0]]   ;;  %s6450_s14 = smov 3  }
   0x2   :  { %s6532_s9 = sld [smem:[%s7790_s0 + %s6448_s6]]   ;;  %s6451_s18 = smov 4  }
   0x3   :  { %s6537_s13 = sld [smem:[%s7790_s0 + %s6449_s10]]   ;;  %s6452_s22 = smov 5  }
   0x4   :  { %s6542_s17 = sld [smem:[%s7790_s0 + %s6450_s14]]   ;;  %s6453_s26 = smov 6  }
   0x5   :  { %s6547_s21 = sld [smem:[%s7790_s0 + %s6451_s18]]   ;;  %s6454_s30 = smov 7  }
   0x6   :  { %s6552_s25 = sld [smem:[%s7790_s0 + %s6452_s22]]   ;;  %s6455_s4 = smov 8  }
   0x7   :  { %7810 = sst [smem:[#allocation61_spill]] %s6527_s5  ;;  %s6456_s10 = smov 9  }
   0x8   :  { %s6557_s29 = sld [smem:[%s7790_s0 + %s6453_s26]]   ;;  %s6457_s15 = smov 10  }
   0x9   :  { %s6562_s3 = sld [smem:[%s7790_s0 + %s6454_s30]]   ;;  %s6458_s20 = smov 11  }
   0xa   :  { %7811 = sst [smem:[#allocation62_spill]] %s6542_s17  ;;  %s6459_s26 = smov 12  }
   0xb   :  { %7812 = sst [smem:[#allocation63_spill]] %s6547_s21  ;;  %s6460_s1 = smov 13  }
   0xc   :  { %s6567_s8 = sld [smem:[%s7790_s0 + %s6455_s4]]   ;;  %s6461_s7 = smov 14  }
   0xd   :  { %s6572_s14 = sld [smem:[%s7790_s0 + %s6456_s10]]   ;;  %s6463_s22 = smov 16  }
   0xe   :  { %7813 = sst [smem:[#allocation64_spill]] %s6557_s29  ;;  %s6464_s28 = smov 17  }
   0xf   :  { %s6577_s19 = sld [smem:[%s7790_s0 + %s6457_s15]]   ;;  %s6462_s15 = smov 15  }
  0x10   :  { %s6582_s24 = sld [smem:[%s7790_s0 + %s6458_s20]]  }
  0x11   :  { %s6587_s30 = sld [smem:[%s7790_s0 + %s6459_s26]]  }
  0x12   :  { %7814 = sst [smem:[#allocation65_spill]] %s6567_s8 }
  0x13   :  { %s6592_s6 = sld [smem:[%s7790_s0 + %s6460_s1]]  }
  0x14   :  { %s6597_s12 = sld [smem:[%s7790_s0 + %s6461_s7]]   ;;  %s6465_s7 = smov 18  }
  0x15   :  { %7815 = sst [smem:[#allocation66_spill]] %s6577_s19 }
  0x16   :  { %7816 = sst [smem:[#allocation67_spill]] %s6582_s24 }
  0x17   :  { %s6602_s20 = sld [smem:[%s7790_s0 + %s6462_s15]]   ;;  %s6466_s15 = smov 19  }
  0x18   :  { %s6607_s27 = sld [smem:[%s7790_s0 + %s6463_s22]]   ;;  %s6467_s22 = smov 20  }
  0x19   :  { %7817 = sst [smem:[#allocation68_spill]] %s6592_s6 }
  0x1a   :  { %s6612_s4 = sld [smem:[%s7790_s0 + %s6464_s28]]   ;;  %s6468_s28 = smov 21  }
  0x1b   :  { %s6617_s24 = sld [smem:[%s7790_s0 + %s6465_s7]]   ;;  %s6469_s7 = smov 22  }
  0x1c   :  { %s6622_s17 = sld [smem:[%s7790_s0 + %s6466_s15]]   ;;  %s6470_s15 = smov 23  }
  0x1d   :  { %7818 = sst [smem:[#allocation69_spill]] %s6602_s20 }
  0x1e   :  { %s6627_s5 = sld [smem:[%s7790_s0 + %s6467_s22]]   ;;  %s6471_s22 = smov 24  }
  0x1f   :  { %s6642_s20 = sld [smem:[%s7790_s0 + %s6470_s15]]   ;;  %s6474_s15 = smov 27  }
  0x20   :  { %7819 = sst [smem:[#allocation70_spill]] %s6612_s4 }
  0x21   :  { %7820 = sst [smem:[#allocation71_spill]] %s6617_s24 }
  0x22   :  { %s6632_s4 = sld [smem:[%s7790_s0 + %s6468_s28]]   ;;  %s6472_s28 = smov 25  }
  0x23   :  { %s6637_s24 = sld [smem:[%s7790_s0 + %s6469_s7]]   ;;  %s6473_s7 = smov 26  }
  0x24   :  { %7821 = sst [smem:[#allocation72_spill]] %s6627_s5 }
  0x25   :  { %s6647_s5 = sld [smem:[%s7790_s0 + %s6471_s22]]   ;;  %s6475_s22 = smov 28  }
  0x26   :  { %s6652_s6 = sld [smem:[%s7790_s0 + %s6472_s28]]   ;;  %s6476_s28 = smov 29  }
  0x27   :  { %s6662_s19 = sld [smem:[%s7790_s0 + %s6474_s15]]   ;;  %s6478_s15 = smov 31  }
  0x29   :  { %7822 = sst [smem:[#allocation73_spill]] %s6637_s24 }
  0x2a   :  { %s6657_s24 = sld [smem:[%s7790_s0 + %s6473_s7]]   ;;  %s6477_s7 = smov 30  }
  0x2b   :  { %7823 = sst [smem:[#allocation74_spill]] %s6647_s5 }
  0x2c   :  { %7824 = sst [smem:[#allocation75_spill]] %s6652_s6 }
  0x2d   :  { %7825 = sst [smem:[#allocation76_spill]] %s6662_s19 }
  0x2e   :  { %s6667_s5 = sld [smem:[%s7790_s0 + %s6475_s22]]   ;;  %s6479_s22 = smov 32  }
  0x2f   :  { %s6672_s6 = sld [smem:[%s7790_s0 + %s6476_s28]]   ;;  %s6480_s28 = smov 33  }
  0x30   :  { %s6677_s8 = sld [smem:[%s7790_s0 + %s6477_s7]]   ;;  %s6481_s7 = smov 34  }
  0x31   :  { %s6682_s19 = sld [smem:[%s7790_s0 + %s6478_s15]]   ;;  %s6482_s15 = smov 35  }
  0x32   :  { %s6687_s29 = sld [smem:[%s7790_s0 + %s6479_s22]]  }
  0x33   :  { %s6702_s21 = sld [smem:[%s7790_s0 + %s6482_s15]]  }
  0x35   :  { %7826 = sst [smem:[#allocation77_spill]] %s6672_s6 }
  0x36   :  { %7827 = sst [smem:[#allocation78_spill]] %s6677_s8 }
  0x37   :  { %s6692_s6 = sld [smem:[%s7790_s0 + %s6480_s28]]  }
  0x38   :  { %s6697_s8 = sld [smem:[%s7790_s0 + %s6481_s7]]  }
  0x39   :  { %76 = vsyncpa [#allocation3], 0 }
  0x3a   :  { %77 = vsyncpa [#allocation5], 0 }
  0x3b   :  { %78 = vsyncpa [#allocation8], 0 }
  0x3c   :  { %79 = vsyncpa [#allocation11], 0 }
  0x3d   :  { %80 = vsyncpa [#allocation14], 0 }
  0x3e   :  { %81 = vsyncpa [#allocation17], 0 }
  0x3f   :  { %82 = vsyncpa [#allocation20], 0 }
  0x40   :  { %83 = vsyncpa [#allocation23], 0 }
  0x41   :  { %84 = vsyncpa [#allocation26], 0 }
  0x42   :  { %85 = vsyncpa [#allocation29], 0 }
  0x43   :  { %86 = vsyncpa [#allocation32], 0 }
  0x44   :  { %87 = vsyncpa [#allocation35], 0 }
  0x45   :  { %88 = vsyncpa [#allocation38], 0 }
  0x46   :  { %89 = vsyncpa [#allocation41], 0  ;;  %s109_s22 = sshll.u32 %s6537_s13, 4  ;;  %s110_s22 = int_to_ptr.hbm [resolvable:$true] %s109_s22 }
  0x47   :  { %90 = vsyncpa [#allocation44], 0  ;;  %s6483_s0 = smov [#allocation4]   ;;  %s133_s26 = sshll.u32 %s6552_s25, 4  ;;  %s134_s26 = int_to_ptr.hbm [resolvable:$true] %s133_s26 }
  0x48   :  { %s111_s23 = sshll.u32 %s6483_s0, 4  ;;  %s5722_s28 = sshra.s32 %s110_s22, 4  ;;  %s112_s23 = int_to_ptr.vmem [resolvable:$true] %s111_s23  ;;  %s5723_s28 = int_to_ptr.hbm [resolvable:$true] %s5722_s28 }
  0x49   :  { %s5724_s1 = scalar_lea.hbm %s5723_s28, 1  ;;  %s5726_s2 = scalar_lea.hbm %s6537_s13, 1 }
  0x4a   :  { %p5725_p0 = scmp.ne.s32.totalorder %s5723_s28, %s5724_s1  ;;  %p5727_p1 = scmp.lt.s32.totalorder %s5723_s28, %s6537_s13 }
  0x4b   :  { %p5728_p2 = scmp.lt.s32.totalorder %s5726_s2, %s5724_s1 }
  0x4d   :  { %p5729_p3 = por %p5728_p2, %p5727_p1 }
  0x4f   :  { %p5730_p4 = pnand %p5729_p3, %p5725_p0 }
  0x51   :  { %5733 = shalt.err (!%p5730_p4)
}
  0x52   :  { %114 = dma.hbm_to_vmem [thread:$0]  %s110_s22, 16, %s112_s23, [#allocation5]  }
  0x53   :  { %s6484_s7 = smov [#allocation7]   ;;  %s155_s11 = sshll.u32 %s6562_s3, 4  ;;  %s156_s11 = int_to_ptr.hbm [resolvable:$true] %s155_s11 }
  0x54   :  { %s135_s10 = sshll.u32 %s6484_s7, 4  ;;  %s5746_s15 = sshra.s32 %s134_s26, 4  ;;  %s136_s10 = int_to_ptr.vmem [resolvable:$true] %s135_s10  ;;  %s5747_s15 = int_to_ptr.hbm [resolvable:$true] %s5746_s15 }
  0x55   :  { %s5748_s16 = scalar_lea.hbm %s5747_s15, 1  ;;  %s5750_s18 = scalar_lea.hbm %s6552_s25, 1 }
  0x56   :  { %p5749_p5 = scmp.ne.s32.totalorder %s5747_s15, %s5748_s16  ;;  %p5751_p6 = scmp.lt.s32.totalorder %s5747_s15, %s6552_s25 }
  0x57   :  { %p5752_p7 = scmp.lt.s32.totalorder %s5750_s18, %s5748_s16 }
  0x59   :  { %p5753_p8 = por %p5752_p7, %p5751_p6 }
  0x5b   :  { %p5754_p9 = pnand %p5753_p8, %p5749_p5 }
  0x5d   :  { %5757 = shalt.err (!%p5754_p9)
}
  0x5e   :  { %138 = dma.hbm_to_vmem [thread:$0]  %s134_s26, 16, %s136_s10, [#allocation8]  }
  0x5f   :  { %s179_s13 = sshll.u32 %s6572_s14, 4  ;;  %s6485_s22 = smov [#allocation10]   ;;  %s180_s13 = int_to_ptr.hbm [resolvable:$true] %s179_s13 }
  0x60   :  { %s157_s0 = sshll.u32 %s6485_s22, 4  ;;  %s5770_s23 = sshra.s32 %s156_s11, 4  ;;  %s158_s0 = int_to_ptr.vmem [resolvable:$true] %s157_s0  ;;  %s5771_s23 = int_to_ptr.hbm [resolvable:$true] %s5770_s23 }
  0x61   :  { %s5772_s28 = scalar_lea.hbm %s5771_s23, 1  ;;  %s5774_s1 = scalar_lea.hbm %s6562_s3, 1 }
  0x62   :  { %p5773_p10 = scmp.ne.s32.totalorder %s5771_s23, %s5772_s28  ;;  %p5775_p11 = scmp.lt.s32.totalorder %s5771_s23, %s6562_s3 }
  0x63   :  { %p5776_p12 = scmp.lt.s32.totalorder %s5774_s1, %s5772_s28 }
  0x65   :  { %p5777_p13 = por %p5776_p12, %p5775_p11 }
  0x67   :  { %p5778_p0 = pnand %p5777_p13, %p5773_p10 }
  0x69   :  { %5781 = shalt.err (!%p5778_p0)
}
  0x6a   :  { %160 = dma.hbm_to_vmem [thread:$0]  %s156_s11, 16, %s158_s0, [#allocation11]  }
  0x6b   :  { %s6486_s25 = smov [#allocation13]   ;;  %s5794_s2 = sshra.s32 %s180_s13, 4  ;;  %s5795_s2 = int_to_ptr.hbm [resolvable:$true] %s5794_s2 }
  0x6c   :  { %s181_s26 = sshll.u32 %s6486_s25, 4  ;;  %s5796_s7 = scalar_lea.hbm %s5795_s2, 1  ;;  %s182_s26 = int_to_ptr.vmem [resolvable:$true] %s181_s26 }
  0x6d   :  { %p5797_p1 = scmp.ne.s32.totalorder %s5795_s2, %s5796_s7  ;;  %s5798_s10 = scalar_lea.hbm %s6572_s14, 1 }
  0x6e   :  { %p5799_p2 = scmp.lt.s32.totalorder %s5795_s2, %s6572_s14  ;;  %p5800_p3 = scmp.lt.s32.totalorder %s5798_s10, %s5796_s7 }
  0x70   :  { %p5801_p4 = por %p5800_p3, %p5799_p2 }
  0x72   :  { %p5802_p5 = pnand %p5801_p4, %p5797_p1 }
  0x74   :  { %5805 = shalt.err (!%p5802_p5)
}
  0x75   :  { %184 = dma.hbm_to_vmem [thread:$0]  %s180_s13, 16, %s182_s26, [#allocation14]  }
  0x76   :  { %s202_s3 = sshll.u32 %s6587_s30, 4  ;;  %s6487_s11 = smov [#allocation16]   ;;  %s203_s3 = int_to_ptr.hbm [resolvable:$true] %s202_s3 }
  0x77   :  { %s204_s15 = sshll.u32 %s6487_s11, 4  ;;  %s227_s16 = sshll.u32 %s6597_s12, 4  ;;  %s205_s15 = int_to_ptr.vmem [resolvable:$true] %s204_s15  ;;  %s228_s16 = int_to_ptr.hbm [resolvable:$true] %s227_s16 }
  0x78   :  { %s5818_s18 = sshra.s32 %s203_s3, 4  ;;  %s5822_s14 = scalar_lea.hbm %s6587_s30, 48  ;;  %s5819_s18 = int_to_ptr.hbm [resolvable:$true] %s5818_s18 }
  0x79   :  { %s5820_s22 = scalar_lea.hbm %s5819_s18, 48  ;;  %p5823_p7 = scmp.lt.s32.totalorder %s5819_s18, %s6587_s30 }
  0x7a   :  { %p5821_p6 = scmp.ne.s32.totalorder %s5819_s18, %s5820_s22  ;;  %p5824_p8 = scmp.lt.s32.totalorder %s5822_s14, %s5820_s22 }
  0x7c   :  { %p5825_p9 = por %p5824_p8, %p5823_p7 }
  0x7e   :  { %p5826_p10 = pnand %p5825_p9, %p5821_p6 }
  0x80   :  { %5829 = shalt.err (!%p5826_p10)
}
  0x81   :  { %s6488_s13 = smov 128   ;;  %s6489_s0 = smov 8  }
  0x82   :  { %210 = dma.hbm_to_vmem [thread:$0]  %s203_s3, 768, %s205_s15, [#allocation17], %s6488_s13, %s6488_s13, %s6489_s0  }
  0x83   :  { %s6490_s23 = smov [#allocation19]   ;;  %s248_s1 = sshll.u32 %s6607_s27, 4  ;;  %s6724_s1 = int_to_ptr.hbm [resolvable:$true] %s248_s1 }
  0x84   :  { %s229_s28 = sshll.u32 %s6490_s23, 4  ;;  %s5842_s30 = sshra.s32 %s228_s16, 4  ;;  %s230_s28 = int_to_ptr.vmem [resolvable:$true] %s229_s28  ;;  %s5843_s30 = int_to_ptr.hbm [resolvable:$true] %s5842_s30 }
  0x85   :  { %s5844_s25 = scalar_lea.hbm %s5843_s30, 1  ;;  %s5846_s26 = scalar_lea.hbm %s6597_s12, 1 }
  0x86   :  { %p5845_p11 = scmp.ne.s32.totalorder %s5843_s30, %s5844_s25  ;;  %p5847_p12 = scmp.lt.s32.totalorder %s5843_s30, %s6597_s12 }
  0x87   :  { %p5848_p13 = scmp.lt.s32.totalorder %s5846_s26, %s5844_s25 }
  0x89   :  { %p5849_p0 = por %p5848_p13, %p5847_p12 }
  0x8b   :  { %p5850_p1 = pnand %p5849_p0, %p5845_p11 }
  0x8d   :  { %5853 = shalt.err (!%p5850_p1)
}
  0x8e   :  { %232 = dma.hbm_to_vmem [thread:$0]  %s228_s16, 16, %s230_s28, [#allocation20]  }
  0x8f   :  { %s275_s2 = sshll.u32 %s6622_s17, 4  ;;  %s6491_s7 = smov [#allocation22]   ;;  %s276_s2 = int_to_ptr.hbm [resolvable:$true] %s275_s2 }
  0x90   :  { %s250_s10 = sshll.u32 %s6491_s7, 4  ;;  %s5866_s3 = sshra.s32 %s6724_s1, 4  ;;  %s251_s10 = int_to_ptr.vmem [resolvable:$true] %s250_s10  ;;  %s5867_s3 = int_to_ptr.hbm [resolvable:$true] %s5866_s3 }
  0x91   :  { %s5868_s11 = scalar_lea.hbm %s5867_s3, 32  ;;  %s5870_s15 = scalar_lea.hbm %s6607_s27, 32 }
  0x92   :  { %p5869_p2 = scmp.ne.s32.totalorder %s5867_s3, %s5868_s11  ;;  %p5871_p3 = scmp.lt.s32.totalorder %s5867_s3, %s6607_s27 }
  0x93   :  { %p5872_p4 = scmp.lt.s32.totalorder %s5870_s15, %s5868_s11 }
  0x95   :  { %p5873_p5 = por %p5872_p4, %p5871_p3 }
  0x97   :  { %p5874_p6 = pnand %p5873_p5, %p5869_p2 }
  0x99   :  { %5877 = shalt.err (!%p5874_p6)
}
  0x9a   :  { %256 = dma.hbm_to_vmem [thread:$0]  %s6724_s1, 512, %s251_s10, [#allocation23], %s6488_s13, %s6488_s13, %s6489_s0  }
  0x9b   :  { %s6492_s12 = smov [#allocation25]   ;;  %s297_s18 = sshll.u32 %s6632_s4, 4  ;;  %s298_s18 = int_to_ptr.hbm [resolvable:$true] %s297_s18 }
  0x9c   :  { %s277_s16 = sshll.u32 %s6492_s12, 4  ;;  %s5890_s22 = sshra.s32 %s276_s2, 4  ;;  %s278_s16 = int_to_ptr.vmem [resolvable:$true] %s277_s16  ;;  %s5891_s22 = int_to_ptr.hbm [resolvable:$true] %s5890_s22 }
  0x9d   :  { %s5892_s27 = scalar_lea.hbm %s5891_s22, 1  ;;  %s5894_s14 = scalar_lea.hbm %s6622_s17, 1 }
  0x9e   :  { %p5893_p7 = scmp.ne.s32.totalorder %s5891_s22, %s5892_s27  ;;  %p5895_p8 = scmp.lt.s32.totalorder %s5891_s22, %s6622_s17 }
  0x9f   :  { %p5896_p9 = scmp.lt.s32.totalorder %s5894_s14, %s5892_s27 }
  0xa1   :  { %p5897_p10 = por %p5896_p9, %p5895_p8 }
  0xa3   :  { %p5898_p11 = pnand %p5897_p10, %p5893_p7 }
  0xa5   :  { %5901 = shalt.err (!%p5898_p11)
}
  0xa6   :  { %280 = dma.hbm_to_vmem [thread:$0]  %s276_s2, 16, %s278_s16, [#allocation26]  }
  0xa7   :  { %s319_s23 = sshll.u32 %s6642_s20, 4  ;;  %s6493_s28 = smov [#allocation28]   ;;  %s320_s23 = int_to_ptr.hbm [resolvable:$true] %s319_s23 }
  0xa8   :  { %s299_s1 = sshll.u32 %s6493_s28, 4  ;;  %s5914_s30 = sshra.s32 %s298_s18, 4  ;;  %s300_s1 = int_to_ptr.vmem [resolvable:$true] %s299_s1  ;;  %s5915_s30 = int_to_ptr.hbm [resolvable:$true] %s5914_s30 }
  0xa9   :  { %s5916_s25 = scalar_lea.hbm %s5915_s30, 1  ;;  %s5918_s26 = scalar_lea.hbm %s6632_s4, 1 }
  0xaa   :  { %p5917_p12 = scmp.ne.s32.totalorder %s5915_s30, %s5916_s25  ;;  %p5919_p13 = scmp.lt.s32.totalorder %s5915_s30, %s6632_s4 }
  0xab   :  { %p5920_p0 = scmp.lt.s32.totalorder %s5918_s26, %s5916_s25 }
  0xad   :  { %p5921_p1 = por %p5920_p0, %p5919_p13 }
  0xaf   :  { %p5922_p2 = pnand %p5921_p1, %p5917_p12 }
  0xb1   :  { %5925 = shalt.err (!%p5922_p2)
}
  0xb2   :  { %302 = dma.hbm_to_vmem [thread:$0]  %s298_s18, 16, %s300_s1, [#allocation29]  }
  0xb3   :  { %s6494_s17 = smov [#allocation31]   ;;  %s5938_s7 = sshra.s32 %s320_s23, 4  ;;  %s5939_s7 = int_to_ptr.hbm [resolvable:$true] %s5938_s7 }
  0xb4   :  { %s321_s2 = sshll.u32 %s6494_s17, 4  ;;  %s5940_s10 = scalar_lea.hbm %s5939_s7, 1  ;;  %s322_s2 = int_to_ptr.vmem [resolvable:$true] %s321_s2 }
  0xb5   :  { %p5941_p3 = scmp.ne.s32.totalorder %s5939_s7, %s5940_s10  ;;  %s5942_s3 = scalar_lea.hbm %s6642_s20, 1 }
  0xb6   :  { %p5943_p4 = scmp.lt.s32.totalorder %s5939_s7, %s6642_s20  ;;  %p5944_p5 = scmp.lt.s32.totalorder %s5942_s3, %s5940_s10 }
  0xb8   :  { %p5945_p6 = por %p5944_p5, %p5943_p4 }
  0xba   :  { %p5946_p7 = pnand %p5945_p6, %p5941_p3 }
  0xbc   :  { %5949 = shalt.err (!%p5946_p7)
}
  0xbd   :  { %324 = dma.hbm_to_vmem [thread:$0]  %s320_s23, 16, %s322_s2, [#allocation32]  }
  0xbe   :  { %s344_s4 = sshll.u32 %s6657_s24, 4  ;;  %s6495_s11 = smov [#allocation34]   ;;  %s345_s4 = int_to_ptr.hbm [resolvable:$true] %s344_s4 }
  0xbf   :  { %s346_s15 = sshll.u32 %s6495_s11, 4  ;;  %s371_s12 = sshll.u32 %s6667_s5, 4  ;;  %s347_s15 = int_to_ptr.vmem [resolvable:$true] %s346_s15  ;;  %s372_s12 = int_to_ptr.hbm [resolvable:$true] %s371_s12 }
  0xc0   :  { %s5962_s16 = sshra.s32 %s345_s4, 4  ;;  %s5966_s20 = scalar_lea.hbm %s6657_s24, 2  ;;  %s5963_s16 = int_to_ptr.hbm [resolvable:$true] %s5962_s16 }
  0xc1   :  { %s5964_s18 = scalar_lea.hbm %s5963_s16, 2  ;;  %p5967_p9 = scmp.lt.s32.totalorder %s5963_s16, %s6657_s24 }
  0xc2   :  { %p5965_p8 = scmp.ne.s32.totalorder %s5963_s16, %s5964_s18  ;;  %p5968_p10 = scmp.lt.s32.totalorder %s5966_s20, %s5964_s18 }
  0xc4   :  { %p5969_p11 = por %p5968_p10, %p5967_p9 }
  0xc6   :  { %p5970_p12 = pnand %p5969_p11, %p5965_p8 }
  0xc8   :  { %5973 = shalt.err (!%p5970_p12)
}
  0xc9   :  { %s6496_s22 = smov 16   ;;  %s6497_s27 = smov 1  }
  0xca   :  { %352 = dma.hbm_to_vmem [thread:$0]  %s345_s4, 32, %s347_s15, [#allocation35], %s6496_s22, %s6496_s22, %s6497_s27  }
  0xcb   :  { %s6498_s14 = smov [#allocation37]   ;;  %s395_s28 = sshll.u32 %s6682_s19, 4  ;;  %s396_s28 = int_to_ptr.hbm [resolvable:$true] %s395_s28 }
  0xcc   :  { %s373_s23 = sshll.u32 %s6498_s14, 4  ;;  %s5986_s24 = sshra.s32 %s372_s12, 4  ;;  %s374_s23 = int_to_ptr.vmem [resolvable:$true] %s373_s23  ;;  %s5987_s24 = int_to_ptr.hbm [resolvable:$true] %s5986_s24 }
  0xcd   :  { %s5988_s1 = scalar_lea.hbm %s5987_s24, 1  ;;  %s5990_s30 = scalar_lea.hbm %s6667_s5, 1 }
  0xce   :  { %p5989_p13 = scmp.ne.s32.totalorder %s5987_s24, %s5988_s1  ;;  %p5991_p0 = scmp.lt.s32.totalorder %s5987_s24, %s6667_s5 }
  0xcf   :  { %p5992_p1 = scmp.lt.s32.totalorder %s5990_s30, %s5988_s1 }
  0xd1   :  { %p5993_p2 = por %p5992_p1, %p5991_p0 }
  0xd3   :  { %p5994_p3 = pnand %p5993_p2, %p5989_p13 }
  0xd5   :  { %5997 = shalt.err (!%p5994_p3)
}
  0xd6   :  { %376 = dma.hbm_to_vmem [thread:$0]  %s372_s12, 16, %s374_s23, [#allocation38]  }
  0xd7   :  { %s416_s25 = sshll.u32 %s6692_s6, 4  ;;  %s6499_s26 = smov [#allocation40]   ;;  %s6755_s25 = int_to_ptr.hbm [resolvable:$true] %s416_s25 }
  0xd8   :  { %s397_s17 = sshll.u32 %s6499_s26, 4  ;;  %s6010_s2 = sshra.s32 %s396_s28, 4  ;;  %s398_s17 = int_to_ptr.vmem [resolvable:$true] %s397_s17  ;;  %s6011_s2 = int_to_ptr.hbm [resolvable:$true] %s6010_s2 }
  0xd9   :  { %s6012_s7 = scalar_lea.hbm %s6011_s2, 1  ;;  %s6014_s10 = scalar_lea.hbm %s6682_s19, 1 }
  0xda   :  { %p6013_p4 = scmp.ne.s32.totalorder %s6011_s2, %s6012_s7  ;;  %p6015_p5 = scmp.lt.s32.totalorder %s6011_s2, %s6682_s19 }
  0xdb   :  { %p6016_p6 = scmp.lt.s32.totalorder %s6014_s10, %s6012_s7 }
  0xdd   :  { %p6017_p7 = por %p6016_p6, %p6015_p5 }
  0xdf   :  { %p6018_p8 = pnand %p6017_p7, %p6013_p4 }
  0xe1   :  { %6021 = shalt.err (!%p6018_p8)
}
  0xe2   :  { %400 = dma.hbm_to_vmem [thread:$0]  %s396_s28, 16, %s398_s17, [#allocation41]  }
  0xe3   :  { %s6500_s5 = smov [#allocation43]   ;;  %s98_s4 = sshll.u32 %s6532_s9, 4  ;;  %s99_s4 = int_to_ptr.hbm [resolvable:$true] %s98_s4 }
  0xe4   :  { %s418_s3 = sshll.u32 %s6500_s5, 4  ;;  %s6034_s11 = sshra.s32 %s6755_s25, 4  ;;  %s419_s3 = int_to_ptr.vmem [resolvable:$true] %s418_s3  ;;  %s6035_s11 = int_to_ptr.hbm [resolvable:$true] %s6034_s11 }
  0xe5   :  { %s6036_s15 = scalar_lea.hbm %s6035_s11, 96  ;;  %s6038_s12 = scalar_lea.hbm %s6692_s6, 96 }
  0xe6   :  { %p6037_p9 = scmp.ne.s32.totalorder %s6035_s11, %s6036_s15  ;;  %p6039_p10 = scmp.lt.s32.totalorder %s6035_s11, %s6692_s6 }
  0xe7   :  { %p6040_p11 = scmp.lt.s32.totalorder %s6038_s12, %s6036_s15 }
  0xe9   :  { %p6041_p12 = por %p6040_p11, %p6039_p10 }
  0xeb   :  { %p6042_p13 = pnand %p6041_p12, %p6037_p9 }
  0xed   :  { %6045 = shalt.err (!%p6042_p13)
}
  0xee   :  { %s6501_s19 = smov 256   ;;  %s7828_s16 = sld [smem:[#allocation63_spill]] }
  0xef   :  { %424 = dma.hbm_to_vmem [thread:$0]  %s6755_s25, 1536, %s419_s3, [#allocation44], %s6501_s19, %s6501_s19, %s6496_s22  }
  0xf0   :  { %s6502_s18 = smov [#allocation2]   ;;  %s6058_s23 = sshra.s32 %s99_s4, 4  ;;  %s6059_s23 = int_to_ptr.hbm [resolvable:$true] %s6058_s23 }
  0xf1   :  { %s100_s20 = sshll.u32 %s6502_s18, 4  ;;  %s6060_s6 = scalar_lea.hbm %s6059_s23, 1  ;;  %s101_s20 = int_to_ptr.vmem [resolvable:$true] %s100_s20 }
  0xf2   :  { %p6061_p0 = scmp.ne.s32.totalorder %s6059_s23, %s6060_s6  ;;  %s6062_s28 = scalar_lea.hbm %s6532_s9, 1 }
  0xf3   :  { %p6063_p1 = scmp.lt.s32.totalorder %s6059_s23, %s6532_s9  ;;  %p6064_p2 = scmp.lt.s32.totalorder %s6062_s28, %s6060_s6 }
  0xf4   :  { %s122_s14 = sshll.u32 %s7828_s16, 4  ;;  %s123_s14 = int_to_ptr.hbm [resolvable:$true] %s122_s14 }
  0xf5   :  { %p6065_p3 = por %p6064_p2, %p6063_p1 }
  0xf7   :  { %p6066_p4 = pnand %p6065_p3, %p6061_p0 }
  0xf9   :  { %6069 = shalt.err (!%p6066_p4)
}
  0xfa   :  { %103 = dma.hbm_to_vmem [thread:$0]  %s99_s4, 16, %s101_s20, [#allocation3]  }
  0xfb   :  { %s7829_s24 = sld [smem:[#allocation64_spill]]  ;;  %s6503_s30 = smov [#allocation6]  }
  0xfc   :  { %s124_s25 = sshll.u32 %s6503_s30, 4  ;;  %s6082_s26 = sshra.s32 %s123_s14, 4  ;;  %s125_s25 = int_to_ptr.vmem [resolvable:$true] %s124_s25  ;;  %s6083_s26 = int_to_ptr.hbm [resolvable:$true] %s6082_s26 }
  0xfd   :  { %s6084_s17 = scalar_lea.hbm %s6083_s26, 1  ;;  %s6086_s2 = scalar_lea.hbm %s7828_s16, 1 }
  0xfe   :  { %p6085_p5 = scmp.ne.s32.totalorder %s6083_s26, %s6084_s17  ;;  %p6087_p6 = scmp.lt.s32.totalorder %s6083_s26, %s7828_s16 }
  0xff   :  { %p6088_p7 = scmp.lt.s32.totalorder %s6086_s2, %s6084_s17 }
 0x101   :  { %s144_s1 = sshll.u32 %s7829_s24, 4  ;;  %p6089_p8 = por %p6088_p7, %p6087_p6  ;;  %s145_s1 = int_to_ptr.hbm [resolvable:$true] %s144_s1 }
 0x103   :  { %p6090_p9 = pnand %p6089_p8, %p6085_p5 }
 0x105   :  { %6093 = shalt.err (!%p6090_p9)
}
 0x106   :  { %127 = dma.hbm_to_vmem [thread:$0]  %s123_s14, 16, %s125_s25, [#allocation5]  }
 0x107   :  { %s7830_s9 = sld [smem:[#allocation65_spill]]  ;;  %s6504_s7 = smov [#allocation9]  }
 0x108   :  { %s146_s10 = sshll.u32 %s6504_s7, 4  ;;  %s6106_s3 = sshra.s32 %s145_s1, 4  ;;  %s147_s10 = int_to_ptr.vmem [resolvable:$true] %s146_s10  ;;  %s6107_s3 = int_to_ptr.hbm [resolvable:$true] %s6106_s3 }
 0x109   :  { %s6108_s4 = scalar_lea.hbm %s6107_s3, 1  ;;  %s6110_s11 = scalar_lea.hbm %s7829_s24, 1 }
 0x10a   :  { %p6109_p10 = scmp.ne.s32.totalorder %s6107_s3, %s6108_s4  ;;  %p6111_p11 = scmp.lt.s32.totalorder %s6107_s3, %s7829_s24 }
 0x10b   :  { %p6112_p12 = scmp.lt.s32.totalorder %s6110_s11, %s6108_s4 }
 0x10d   :  { %s165_s5 = sshll.u32 %s7830_s9, 4  ;;  %p6113_p13 = por %p6112_p12, %p6111_p11  ;;  %s6772_s5 = int_to_ptr.hbm [resolvable:$true] %s165_s5 }
 0x10f   :  { %p6114_p0 = pnand %p6113_p13, %p6109_p10 }
 0x111   :  { %6117 = shalt.err (!%p6114_p0)
}
 0x112   :  { %149 = dma.hbm_to_vmem [thread:$0]  %s145_s1, 16, %s147_s10, [#allocation8]  }
 0x113   :  { %s7831_s15 = sld [smem:[#allocation66_spill]]  ;;  %s6505_s19 = smov [#allocation12]  }
 0x114   :  { %s167_s16 = sshll.u32 %s6505_s19, 4  ;;  %s6130_s18 = sshra.s32 %s6772_s5, 4  ;;  %s168_s16 = int_to_ptr.vmem [resolvable:$true] %s167_s16  ;;  %s6131_s18 = int_to_ptr.hbm [resolvable:$true] %s6130_s18 }
 0x115   :  { %s6132_s20 = scalar_lea.hbm %s6131_s18, 24  ;;  %s6134_s14 = scalar_lea.hbm %s7830_s9, 24 }
 0x116   :  { %p6133_p1 = scmp.ne.s32.totalorder %s6131_s18, %s6132_s20  ;;  %p6135_p2 = scmp.lt.s32.totalorder %s6131_s18, %s7830_s9 }
 0x117   :  { %p6136_p3 = scmp.lt.s32.totalorder %s6134_s14, %s6132_s20 }
 0x119   :  { %s190_s12 = sshll.u32 %s7831_s15, 4  ;;  %p6137_p4 = por %p6136_p3, %p6135_p2  ;;  %s191_s12 = int_to_ptr.hbm [resolvable:$true] %s190_s12 }
 0x11b   :  { %p6138_p5 = pnand %p6137_p4, %p6133_p1 }
 0x11d   :  { %6141 = shalt.err (!%p6138_p5)
}
 0x11e   :  { %s7832_s23 = sld [smem:[#allocation68_spill]]  ;;  %s6506_s6 = smov [#allocation15]  }
 0x11f   :  { %173 = dma.hbm_to_vmem [thread:$0]  %s6772_s5, 384, %s168_s16, [#allocation11], %s6488_s13, %s6488_s13, %s6489_s0  }
 0x120   :  { %s192_s28 = sshll.u32 %s6506_s6, 4  ;;  %s6154_s1 = sshra.s32 %s191_s12, 4  ;;  %s193_s28 = int_to_ptr.vmem [resolvable:$true] %s192_s28  ;;  %s6155_s1 = int_to_ptr.hbm [resolvable:$true] %s6154_s1 }
 0x121   :  { %s6156_s30 = scalar_lea.hbm %s6155_s1, 1  ;;  %s6158_s25 = scalar_lea.hbm %s7831_s15, 1 }
 0x122   :  { %p6157_p6 = scmp.ne.s32.totalorder %s6155_s1, %s6156_s30  ;;  %p6159_p7 = scmp.lt.s32.totalorder %s6155_s1, %s7831_s15 }
 0x123   :  { %p6160_p8 = scmp.lt.s32.totalorder %s6158_s25, %s6156_s30 }
 0x124   :  { %s216_s24 = sshll.u32 %s7832_s23, 4  ;;  %s217_s24 = int_to_ptr.hbm [resolvable:$true] %s216_s24 }
 0x125   :  { %p6161_p9 = por %p6160_p8, %p6159_p7 }
 0x127   :  { %p6162_p10 = pnand %p6161_p9, %p6157_p6 }
 0x129   :  { %6165 = shalt.err (!%p6162_p10)
}
 0x12a   :  { %195 = dma.hbm_to_vmem [thread:$0]  %s191_s12, 16, %s193_s28, [#allocation14]  }
 0x12b   :  { %s7833_s26 = sld [smem:[#allocation69_spill]]  ;;  %s6507_s2 = smov [#allocation18]  }
 0x12c   :  { %s218_s9 = sshll.u32 %s6507_s2, 4  ;;  %s6178_s7 = sshra.s32 %s217_s24, 4  ;;  %s219_s9 = int_to_ptr.vmem [resolvable:$true] %s218_s9  ;;  %s6179_s7 = int_to_ptr.hbm [resolvable:$true] %s6178_s7 }
 0x12d   :  { %s6180_s10 = scalar_lea.hbm %s6179_s7, 1  ;;  %s6182_s5 = scalar_lea.hbm %s7832_s23, 1 }
 0x12e   :  { %p6181_p11 = scmp.ne.s32.totalorder %s6179_s7, %s6180_s10  ;;  %p6183_p12 = scmp.lt.s32.totalorder %s6179_s7, %s7832_s23 }
 0x12f   :  { %p6184_p13 = scmp.lt.s32.totalorder %s6182_s5, %s6180_s10 }
 0x131   :  { %s238_s17 = sshll.u32 %s7833_s26, 4  ;;  %p6185_p0 = por %p6184_p13, %p6183_p12  ;;  %s239_s17 = int_to_ptr.hbm [resolvable:$true] %s238_s17 }
 0x133   :  { %p6186_p1 = pnand %p6185_p0, %p6181_p11 }
 0x135   :  { %6189 = shalt.err (!%p6186_p1)
}
 0x136   :  { %221 = dma.hbm_to_vmem [thread:$0]  %s217_s24, 16, %s219_s9, [#allocation17]  }
 0x137   :  { %s7834_s3 = sld [smem:[#allocation70_spill]]  ;;  %s6508_s4 = smov [#allocation21]  }
 0x138   :  { %s240_s11 = sshll.u32 %s6508_s4, 4  ;;  %s6202_s12 = sshra.s32 %s239_s17, 4  ;;  %s241_s11 = int_to_ptr.vmem [resolvable:$true] %s240_s11  ;;  %s6203_s12 = int_to_ptr.hbm [resolvable:$true] %s6202_s12 }
 0x139   :  { %s6204_s19 = scalar_lea.hbm %s6203_s12, 1  ;;  %s6206_s16 = scalar_lea.hbm %s7833_s26, 1 }
 0x13a   :  { %p6205_p2 = scmp.ne.s32.totalorder %s6203_s12, %s6204_s19  ;;  %p6207_p3 = scmp.lt.s32.totalorder %s6203_s12, %s7833_s26 }
 0x13b   :  { %p6208_p4 = scmp.lt.s32.totalorder %s6206_s16, %s6204_s19 }
 0x13d   :  { %s262_s15 = sshll.u32 %s7834_s3, 4  ;;  %p6209_p5 = por %p6208_p4, %p6207_p3  ;;  %s263_s15 = int_to_ptr.hbm [resolvable:$true] %s262_s15 }
 0x13f   :  { %p6210_p6 = pnand %p6209_p5, %p6205_p2 }
 0x141   :  { %6213 = shalt.err (!%p6210_p6)
}
 0x142   :  { %243 = dma.hbm_to_vmem [thread:$0]  %s239_s17, 16, %s241_s11, [#allocation20]  }
 0x143   :  { %s7835_s18 = sld [smem:[#allocation72_spill]]  ;;  %s6509_s14 = smov [#allocation24]  }
 0x144   :  { %s264_s23 = sshll.u32 %s6509_s14, 4  ;;  %s6226_s6 = sshra.s32 %s263_s15, 4  ;;  %s265_s23 = int_to_ptr.vmem [resolvable:$true] %s264_s23  ;;  %s6227_s6 = int_to_ptr.hbm [resolvable:$true] %s6226_s6 }
 0x145   :  { %s6228_s28 = scalar_lea.hbm %s6227_s6, 1  ;;  %s6230_s24 = scalar_lea.hbm %s7834_s3, 1 }
 0x146   :  { %p6229_p7 = scmp.ne.s32.totalorder %s6227_s6, %s6228_s28  ;;  %p6231_p8 = scmp.lt.s32.totalorder %s6227_s6, %s7834_s3 }
 0x147   :  { %p6232_p9 = scmp.lt.s32.totalorder %s6230_s24, %s6228_s28 }
 0x149   :  { %s286_s20 = sshll.u32 %s7835_s18, 4  ;;  %p6233_p10 = por %p6232_p9, %p6231_p8  ;;  %s287_s20 = int_to_ptr.hbm [resolvable:$true] %s286_s20 }
 0x14b   :  { %p6234_p11 = pnand %p6233_p10, %p6229_p7 }
 0x14d   :  { %6237 = shalt.err (!%p6234_p11)
}
 0x14e   :  { %267 = dma.hbm_to_vmem [thread:$0]  %s263_s15, 16, %s265_s23, [#allocation23]  }
 0x14f   :  { %s7836_s1 = sld [smem:[#allocation73_spill]]  ;;  %s6510_s30 = smov [#allocation27]  }
 0x150   :  { %s288_s25 = sshll.u32 %s6510_s30, 4  ;;  %s6250_s17 = sshra.s32 %s287_s20, 4  ;;  %s289_s25 = int_to_ptr.vmem [resolvable:$true] %s288_s25  ;;  %s6251_s17 = int_to_ptr.hbm [resolvable:$true] %s6250_s17 }
 0x151   :  { %s6252_s2 = scalar_lea.hbm %s6251_s17, 1  ;;  %s6254_s9 = scalar_lea.hbm %s7835_s18, 1 }
 0x152   :  { %p6253_p12 = scmp.ne.s32.totalorder %s6251_s17, %s6252_s2  ;;  %p6255_p13 = scmp.lt.s32.totalorder %s6251_s17, %s7835_s18 }
 0x153   :  { %p6256_p0 = scmp.lt.s32.totalorder %s6254_s9, %s6252_s2 }
 0x155   :  { %s308_s26 = sshll.u32 %s7836_s1, 4  ;;  %p6257_p1 = por %p6256_p0, %p6255_p13  ;;  %s309_s26 = int_to_ptr.hbm [resolvable:$true] %s308_s26 }
 0x157   :  { %p6258_p2 = pnand %p6257_p1, %p6253_p12 }
 0x159   :  { %6261 = shalt.err (!%p6258_p2)
}
 0x15a   :  { %291 = dma.hbm_to_vmem [thread:$0]  %s287_s20, 16, %s289_s25, [#allocation26]  }
 0x15b   :  { %s7837_s7 = sld [smem:[#allocation75_spill]]  ;;  %s6511_s5 = smov [#allocation30]  }
 0x15c   :  { %s310_s3 = sshll.u32 %s6511_s5, 4  ;;  %s6274_s4 = sshra.s32 %s309_s26, 4  ;;  %s311_s3 = int_to_ptr.vmem [resolvable:$true] %s310_s3  ;;  %s6275_s4 = int_to_ptr.hbm [resolvable:$true] %s6274_s4 }
 0x15d   :  { %s6276_s11 = scalar_lea.hbm %s6275_s4, 1  ;;  %s6278_s15 = scalar_lea.hbm %s7836_s1, 1 }
 0x15e   :  { %p6277_p3 = scmp.ne.s32.totalorder %s6275_s4, %s6276_s11  ;;  %p6279_p4 = scmp.lt.s32.totalorder %s6275_s4, %s7836_s1 }
 0x15f   :  { %p6280_p5 = scmp.lt.s32.totalorder %s6278_s15, %s6276_s11 }
 0x161   :  { %s331_s10 = sshll.u32 %s7837_s7, 4  ;;  %p6281_p6 = por %p6280_p5, %p6279_p4  ;;  %s6800_s10 = int_to_ptr.hbm [resolvable:$true] %s331_s10 }
 0x163   :  { %p6282_p7 = pnand %p6281_p6, %p6277_p3 }
 0x165   :  { %6285 = shalt.err (!%p6282_p7)
}
 0x166   :  { %313 = dma.hbm_to_vmem [thread:$0]  %s309_s26, 16, %s311_s3, [#allocation29]  }
 0x167   :  { %s7838_s12 = sld [smem:[#allocation76_spill]]  ;;  %s6512_s19 = smov [#allocation33]  }
 0x168   :  { %s333_s16 = sshll.u32 %s6512_s19, 4  ;;  %s6298_s20 = sshra.s32 %s6800_s10, 4  ;;  %s334_s16 = int_to_ptr.vmem [resolvable:$true] %s333_s16  ;;  %s6299_s20 = int_to_ptr.hbm [resolvable:$true] %s6298_s20 }
 0x169   :  { %s6300_s14 = scalar_lea.hbm %s6299_s20, 2  ;;  %s6302_s23 = scalar_lea.hbm %s7837_s7, 2 }
 0x16a   :  { %p6301_p8 = scmp.ne.s32.totalorder %s6299_s20, %s6300_s14  ;;  %p6303_p9 = scmp.lt.s32.totalorder %s6299_s20, %s7837_s7 }
 0x16b   :  { %p6304_p10 = scmp.lt.s32.totalorder %s6302_s23, %s6300_s14 }
 0x16d   :  { %s357_s18 = sshll.u32 %s7838_s12, 4  ;;  %p6305_p11 = por %p6304_p10, %p6303_p9  ;;  %s6805_s18 = int_to_ptr.hbm [resolvable:$true] %s357_s18 }
 0x16f   :  { %p6306_p12 = pnand %p6305_p11, %p6301_p8 }
 0x171   :  { %6309 = shalt.err (!%p6306_p12)
}
 0x172   :  { %s7839_s6 = sld [smem:[#allocation78_spill]]  ;;  %s6513_s24 = smov [#allocation36]  }
 0x173   :  { %339 = dma.hbm_to_vmem [thread:$0]  %s6800_s10, 32, %s334_s16, [#allocation32], %s6496_s22, %s6496_s22, %s6497_s27  }
 0x174   :  { %s359_s1 = sshll.u32 %s6513_s24, 4  ;;  %s6322_s30 = sshra.s32 %s6805_s18, 4  ;;  %s360_s1 = int_to_ptr.vmem [resolvable:$true] %s359_s1  ;;  %s6323_s30 = int_to_ptr.hbm [resolvable:$true] %s6322_s30 }
 0x175   :  { %s6324_s25 = scalar_lea.hbm %s6323_s30, 48  ;;  %s6326_s26 = scalar_lea.hbm %s7838_s12, 48 }
 0x176   :  { %p6325_p13 = scmp.ne.s32.totalorder %s6323_s30, %s6324_s25  ;;  %p6327_p0 = scmp.lt.s32.totalorder %s6323_s30, %s7838_s12 }
 0x177   :  { %p6328_p1 = scmp.lt.s32.totalorder %s6326_s26, %s6324_s25 }
 0x178   :  { %s384_s28 = sshll.u32 %s7839_s6, 4  ;;  %s385_s28 = int_to_ptr.hbm [resolvable:$true] %s384_s28 }
 0x179   :  { %p6329_p2 = por %p6328_p1, %p6327_p0 }
 0x17b   :  { %p6330_p3 = pnand %p6329_p2, %p6325_p13 }
 0x17d   :  { %6333 = shalt.err (!%p6330_p3)
}
 0x17e   :  { %365 = dma.hbm_to_vmem [thread:$0]  %s6805_s18, 768, %s360_s1, [#allocation35], %s6488_s13, %s6488_s13, %s6489_s0  }
 0x17f   :  { %s6514_s22 = smov [#allocation39]   ;;  %s406_s17 = sshll.u32 %s6687_s29, 4  ;;  %s407_s17 = int_to_ptr.hbm [resolvable:$true] %s406_s17 }
 0x180   :  { %s386_s27 = sshll.u32 %s6514_s22, 4  ;;  %s6346_s2 = sshra.s32 %s385_s28, 4  ;;  %s387_s27 = int_to_ptr.vmem [resolvable:$true] %s386_s27  ;;  %s6347_s2 = int_to_ptr.hbm [resolvable:$true] %s6346_s2 }
 0x181   :  { %s6348_s9 = scalar_lea.hbm %s6347_s2, 1  ;;  %s6350_s7 = scalar_lea.hbm %s7839_s6, 1 }
 0x182   :  { %p6349_p4 = scmp.ne.s32.totalorder %s6347_s2, %s6348_s9  ;;  %p6351_p5 = scmp.lt.s32.totalorder %s6347_s2, %s7839_s6 }
 0x183   :  { %p6352_p6 = scmp.lt.s32.totalorder %s6350_s7, %s6348_s9 }
 0x185   :  { %p6353_p7 = por %p6352_p6, %p6351_p5 }
 0x187   :  { %p6354_p8 = pnand %p6353_p7, %p6349_p4 }
 0x189   :  { %6357 = shalt.err (!%p6354_p8)
}
 0x18a   :  { %389 = dma.hbm_to_vmem [thread:$0]  %s385_s28, 16, %s387_s27, [#allocation38]  }
 0x18b   :  { %s430_s13 = sshll.u32 %s6697_s8, 4  ;;  %s6515_s0 = smov [#allocation42]   ;;  %s431_s13 = int_to_ptr.hbm [resolvable:$true] %s430_s13 }
 0x18c   :  { %s408_s10 = sshll.u32 %s6515_s0, 4  ;;  %s6370_s5 = sshra.s32 %s407_s17, 4  ;;  %s409_s10 = int_to_ptr.vmem [resolvable:$true] %s408_s10  ;;  %s6371_s5 = int_to_ptr.hbm [resolvable:$true] %s6370_s5 }
 0x18d   :  { %s6372_s3 = scalar_lea.hbm %s6371_s5, 1  ;;  %s6374_s4 = scalar_lea.hbm %s6687_s29, 1 }
 0x18e   :  { %p6373_p9 = scmp.ne.s32.totalorder %s6371_s5, %s6372_s3  ;;  %p6375_p10 = scmp.lt.s32.totalorder %s6371_s5, %s6687_s29 }
 0x18f   :  { %p6376_p11 = scmp.lt.s32.totalorder %s6374_s4, %s6372_s3 }
 0x191   :  { %p6377_p12 = por %p6376_p11, %p6375_p10 }
 0x193   :  { %p6378_p13 = pnand %p6377_p12, %p6373_p9 }
 0x195   :  { %6381 = shalt.err (!%p6378_p13)
}
 0x196   :  { %411 = dma.hbm_to_vmem [thread:$0]  %s407_s17, 16, %s409_s10, [#allocation41]  }
 0x197   :  { %s6516_s11 = smov [#allocation45]   ;;  %s6394_s12 = sshra.s32 %s431_s13, 4  ;;  %s6395_s12 = int_to_ptr.hbm [resolvable:$true] %s6394_s12 }
 0x198   :  { %s432_s15 = sshll.u32 %s6516_s11, 4  ;;  %s6396_s19 = scalar_lea.hbm %s6395_s12, 4  ;;  %s433_s15 = int_to_ptr.vmem [resolvable:$true] %s432_s15 }
 0x199   :  { %p6397_p0 = scmp.ne.s32.totalorder %s6395_s12, %s6396_s19  ;;  %s6398_s16 = scalar_lea.hbm %s6697_s8, 4 }
 0x19a   :  { %p6399_p1 = scmp.lt.s32.totalorder %s6395_s12, %s6697_s8  ;;  %p6400_p2 = scmp.lt.s32.totalorder %s6398_s16, %s6396_s19 }
 0x19c   :  { %p6401_p3 = por %p6400_p2, %p6399_p1 }
 0x19e   :  { %p6402_p4 = pnand %p6401_p3, %p6397_p0 }
 0x1a0   :  { %6405 = shalt.err (!%p6402_p4)
}
 0x1a1   :  { %435 = dma.hbm_to_vmem [thread:$0]  %s431_s13, 64, %s433_s15, [#allocation44]  }
 0x1a2   :  { %6418 = dma.done.wait [#allocation3], 16  }
 0x1a3   :  { %6419 = vsyncadd [#allocation3], 4294967280 }
 0x1a4   :  { %6420 = dma.done.wait [#allocation5], 32  }
 0x1a5   :  { %6421 = vsyncadd [#allocation5], 4294967264 }
 0x1a6   :  { %6422 = dma.done.wait [#allocation8], 32  }
 0x1a7   :  { %6423 = vsyncadd [#allocation8], 4294967264 }
 0x1a8   :  { %6424 = dma.done.wait [#allocation11], 400  }
 0x1a9   :  { %6425 = vsyncadd [#allocation11], 4294966896 }
 0x1aa   :  { %6426 = dma.done.wait [#allocation14], 32  }
 0x1ab   :  { %6427 = vsyncadd [#allocation14], 4294967264 }
 0x1ac   :  { %6428 = dma.done.wait [#allocation17], 784  }
 0x1ad   :  { %6429 = vsyncadd [#allocation17], 4294966512 }
 0x1ae   :  { %6430 = dma.done.wait [#allocation20], 32  }
 0x1af   :  { %6431 = vsyncadd [#allocation20], 4294967264 }
 0x1b0   :  { %6432 = dma.done.wait [#allocation23], 528  }
 0x1b1   :  { %6433 = vsyncadd [#allocation23], 4294966768 }
 0x1b2   :  { %6434 = dma.done.wait [#allocation26], 32  }
 0x1b3   :  { %6435 = vsyncadd [#allocation26], 4294967264 }
 0x1b4   :  { %6436 = dma.done.wait [#allocation29], 32  }
 0x1b5   :  { %6437 = vsyncadd [#allocation29], 4294967264 }
 0x1b6   :  { %6438 = dma.done.wait [#allocation32], 48  }
 0x1b7   :  { %6439 = vsyncadd [#allocation32], 4294967248 }
 0x1b8   :  { %6440 = dma.done.wait [#allocation35], 800  }
 0x1b9   :  { %6441 = vsyncadd [#allocation35], 4294966496 }
 0x1ba   :  { %6442 = dma.done.wait [#allocation38], 32  }
 0x1bb   :  { %6443 = vsyncadd [#allocation38], 4294967264 }
 0x1bc   :  { %6444 = dma.done.wait [#allocation41], 32  }
 0x1bd   :  { %6445 = vsyncadd [#allocation41], 4294967264 }
 0x1be   :  { %6446 = dma.done.wait [#allocation44], 1600  }
 0x1bf   :  { %6447 = vsyncadd [#allocation44], 4294965696  ;;  %s7840_s29 = sld [smem:[#allocation61_spill]]  ;;  %vm567_vm0 = vcmask 392192   ;;  %vm7809_vm1 = vcmask 385024   ;;  %v6517_v6 = vmov 48.0  }
 0x1c0   :  { %5498 = vrcp.f32 %v6517_v6  ;;  %s7841_s8 = sld [smem:[#allocation62_spill]]  ;;  %v5449_v51 = vld [vmem:[#allocation2] ss:$0 sm:$0xff]  ;;  %v5450_v55 = vld [vmem:[#allocation4] ss:$0 sm:$0xff]  ;;  %vm701_vm12 = vcmask 261120  }
 0x1c1   :  { %vm708_vm13 = vcmask 253952   ;;  %s7842_s18 = sld [smem:[#allocation67_spill]] }
 0x1c2   :  { %s7843_s20 = sld [smem:[#allocation71_spill]] }
 0x1c3   :  { %s7844_s14 = sld [smem:[#allocation74_spill]] }
 0x1c4   :  { %s7845_s23 = sld [smem:[#allocation77_spill]] }
 0x1c5   :  { %v564_v0 = vld [vmem:[%s7840_s29] sm:$0xff]  ;;  %v565_v1 = vld [vmem:[%s7840_s29 + $0x8] sm:$0xff]  ;;  %v566_v2 = vld [vmem:[%s7840_s29 + $0x10] sm:$0x1] }
 0x1c6   :  { %v568_v3 = vsel %vm567_vm0, %v564_v0, 0.0  ;;  %v575_v4 = vsel %vm7809_vm1, %v566_v2, 0.0  ;;  %v571_v5 = vsel %vm567_vm0, %v565_v1, 0.0  ;;  %v5499_v7 = vpop.eup %5498  ;;  %v661_v28 = vld [vmem:[%s7841_s8 + $0x28] sm:$0xff]  ;;  %v660_v29 = vld [vmem:[%s7841_s8 + $0x20] sm:$0xff]  ;;  %v659_v30 = vld [vmem:[%s7841_s8 + $0x18] sm:$0xff] }
 0x1c7   :  { %569 = vadd.xlane.f32.xlu0 %v568_v3  ;;  %576 = vadd.xlane.f32.xlu1 %v575_v4  ;;  %v579_v8 = vmul.f32 48.0, %v5499_v7  ;;  %vm583_vm2 = vweird.f32 %v5499_v7  ;;  %v658_v31 = vld [vmem:[%s7841_s8 + $0x10] sm:$0xff]  ;;  %v657_v32 = vld [vmem:[%s7841_s8 + $0x8] sm:$0xff]  ;;  %v656_v33 = vld [vmem:[%s7841_s8] sm:$0xff] }
 0x1c8   :  { %685 = vmatpush.msra.mxu0 %v661_v28 }
 0x1c9   :  { %v580_v9 = vsub.f32 1.0, %v579_v8 }
 0x1ca   :  { %686 = vmatpush.msra.mxu0 %v660_v29 }
 0x1cb   :  { %v581_v10 = vmul.f32 %v5499_v7, %v580_v9 }
 0x1cc   :  { %687 = vmatpush.msra.mxu0 %v659_v30 }
 0x1cd   :  { %v582_v11 = vadd.f32 %v5499_v7, %v581_v10 }
 0x1ce   :  { %688 = vmatpush.msra.mxu0 %v658_v31 }
 0x1cf   :  { %572 = vadd.xlane.f32.xlu0 %v571_v5  ;;  %v6836_v12 = vsel %vm583_vm2, %v5499_v7, %v582_v11  ;;  %v5451_v11 = vld [vmem:[#allocation6] ss:$0 sm:$0xff] }
 0x1d0   :  { %689 = vmatpush.msra.mxu0 %v657_v32 }
 0x1d2   :  { %690 = vmatpush.msra.mxu0 %v656_v33 }
 0x23a   :  { %v570_v13 = vpop.xlane.xlu0 %569  ;;  %v577_v17 = vpop.xlane.xlu1 %576 }
 0x23b   :  { %v585_v14 = vmul.f32 %v6836_v12, %v570_v13  ;;  %v587_v21 = vmul.f32 %v6836_v12, %v577_v17 }
 0x23d   :  { %v588_v15 = vsub.f32 %v564_v0, %v585_v14  ;;  %v6842_v23 = vsub.f32 %v566_v2, %v587_v21 }
 0x23f   :  { %v591_v16 = vmul.f32 %v588_v15, %v588_v15  ;;  %v593_v26 = vmul.f32 %v6842_v23, %v6842_v23 }
 0x241   :  { %v594_v18 = vsel %vm567_vm0, %v591_v16, 0.0  ;;  %v600_v27 = vsel %vm7809_vm1, %v593_v26, 0.0 }
 0x242   :  { %595 = vadd.xlane.f32.xlu1 %v594_v18  ;;  %v573_v19 = vpop.xlane.xlu0 %572 }
 0x243   :  { %v586_v20 = vmul.f32 %v6836_v12, %v573_v19 }
 0x245   :  { %v589_v22 = vsub.f32 %v565_v1, %v586_v20 }
 0x247   :  { %v592_v24 = vmul.f32 %v589_v22, %v589_v22 }
 0x249   :  { %v597_v25 = vsel %vm567_vm0, %v592_v24, 0.0 }
 0x24a   :  { %598 = vadd.xlane.f32.xlu2 %v597_v25 }
 0x252   :  { %601 = vadd.xlane.f32.xlu2 %v600_v27 }
 0x2b5   :  { %v596_v34 = vpop.xlane.xlu1 %595 }
 0x2b6   :  { %v603_v35 = vmul.f32 %v596_v34, %v6836_v12 }
 0x2b8   :  { %v606_v36 = vadd.f32 1e-05, %v603_v35 }
 0x2ba   :  { %5500 = vrsqrt.f32 %v606_v36  ;;  %vm615_vm4 = vweird.f32 %v606_v36 }
 0x2bd   :  { %v599_v37 = vpop.xlane.xlu2 %598 }
 0x2be   :  { %v604_v38 = vmul.f32 %v599_v37, %v6836_v12 }
 0x2c0   :  { %v5501_v39 = vpop.eup %5500  ;;  %v607_v40 = vadd.f32 1e-05, %v604_v38 }
 0x2c1   :  { %v610_v41 = vmul.f32 %v5501_v39, %v606_v36  ;;  %vm616_vm3 = vweird.f32 %v5501_v39 }
 0x2c2   :  { %5502 = vrsqrt.f32 %v607_v40  ;;  %vm617_vm5 = vmor %vm615_vm4, %vm616_vm3  ;;  %vm625_vm7 = vweird.f32 %v607_v40 }
 0x2c3   :  { %v611_v42 = vmul.f32 %v5501_v39, %v610_v41 }
 0x2c5   :  { %v612_v43 = vmul.f32 0.5, %v611_v42  ;;  %v602_v44 = vpop.xlane.xlu2 %601 }
 0x2c6   :  { %v605_v45 = vmul.f32 %v602_v44, %v6836_v12 }
 0x2c7   :  { %v613_v46 = vsub.f32 1.5, %v612_v43 }
 0x2c8   :  { %v5503_v47 = vpop.eup %5502  ;;  %v608_v48 = vadd.f32 1e-05, %v605_v45 }
 0x2c9   :  { %v614_v49 = vmul.f32 %v5501_v39, %v613_v46  ;;  %v620_v50 = vmul.f32 %v5503_v47, %v607_v40  ;;  %vm626_vm6 = vweird.f32 %v5503_v47 }
 0x2ca   :  { %5504 = vrsqrt.f32 %v608_v48  ;;  %vm627_vm8 = vmor %vm625_vm7, %vm626_vm6  ;;  %vm635_vm10 = vweird.f32 %v608_v48 }
 0x2cb   :  { %v621_v52 = vmul.f32 %v5503_v47, %v620_v50  ;;  %v618_v53 = vsel %vm617_vm5, %v5501_v39, %v614_v49 }
 0x2cc   :  { %v639_v54 = vmul.f32 %v618_v53, %v588_v15 }
 0x2cd   :  { %v622_v56 = vmul.f32 0.5, %v621_v52 }
 0x2ce   :  { %v646_v57 = vmul.f32 %v5449_v51, %v639_v54 }
 0x2cf   :  { %v623_v58 = vsub.f32 1.5, %v622_v56 }
 0x2d0   :  { %v5505_v59 = vpop.eup %5504  ;;  %v653_v60 = vadd.f32 %v5450_v55, %v646_v57  ;;  %v557_v57 = vlaneseq }
 0x2d1   :  { %v624_v61 = vmul.f32 %v5503_v47, %v623_v58  ;;  %v630_v62 = vmul.f32 %v5505_v59, %v608_v48  ;;  %vm636_vm9 = vweird.f32 %v5505_v59 }
 0x2d2   :  { %4947 = vmatmul.msk.f32.vlgmr.msra.gmra.mxu0 %vm567_vm0, %v653_v60  ;;  %vm637_vm11 = vmor %vm635_vm10, %vm636_vm9 }
 0x2d3   :  { %v631_v63 = vmul.f32 %v5505_v59, %v630_v62  ;;  %v628_v0 = vsel %vm627_vm8, %v5503_v47, %v624_v61  ;;  %v5452_v62 = vld [vmem:[#allocation7] ss:$0 sm:$0xff] }
 0x2d4   :  { %v640_v1 = vmul.f32 %v628_v0, %v589_v22  ;;  %v6518_v22 = vmov 32.0  }
 0x2d5   :  { %v632_v2 = vmul.f32 0.5, %v631_v63  ;;  %5506 = vrcp.f32 %v6518_v22 }
 0x2d6   :  { %v647_v3 = vmul.f32 %v5449_v51, %v640_v1  ;;  %v6879_v1 = vshrl.u32 %v557_v57, 7  ;;  %v4962_v57 = vld [vmem:[%s7842_s18 + $0x90] sm:$0xff] }
 0x2d7   :  { %v633_v4 = vsub.f32 1.5, %v632_v2 }
 0x2d8   :  { %v654_v5 = vadd.f32 %v5450_v55, %v647_v3  ;;  %v5453_v3 = vld [vmem:[#allocation9] ss:$0 sm:$0xff]  ;;  %vm561_vm5 = vcmp.eq.s32.totalorder %v6879_v1, 0  ;;  %v5720_v1 = vld [vmem:[#allocation12 + $0x8] sm:$0xff] }
 0x2d9   :  { %v634_v6 = vmul.f32 %v5505_v59, %v633_v4 }
 0x2da   :  { %4948 = vmatmul.msk.f32.gmra.mxu0 %vm567_vm0, %v654_v5 }
 0x2db   :  { %v638_v7 = vsel %vm637_vm11, %v5505_v59, %v634_v6  ;;  %v5454_v6 = vld [vmem:[#allocation10] ss:$0 sm:$0xff] }
 0x2dc   :  { %v641_v8 = vmul.f32 %v638_v7, %v6842_v23  ;;  %v5507_v23 = vpop.eup %5506 }
 0x2dd   :  { %v713_v24 = vmul.f32 32.0, %v5507_v23  ;;  %vm717_vm14 = vweird.f32 %v5507_v23 }
 0x2de   :  { %v648_v9 = vmul.f32 %v5449_v51, %v641_v8 }
 0x2df   :  { %v714_v25 = vsub.f32 1.0, %v713_v24 }
 0x2e0   :  { %v655_v10 = vadd.f32 %v5450_v55, %v648_v9  ;;  %v553_v9 = vld [vmem:[#allocation12] sm:$0xff] }
 0x2e1   :  { %v715_v26 = vmul.f32 %v5507_v23, %v714_v25 }
 0x2e2   :  { %4949 = vmatmul.msk.f32.gmra.mxu0 %vm567_vm0, %v655_v10 }
 0x2e3   :  { %v716_v27 = vadd.f32 %v5507_v23, %v715_v26 }
 0x2e5   :  { %v6864_v28 = vsel %vm717_vm14, %v5507_v23, %v716_v27  ;;  %v554_v23 = vld [vmem:[#allocation12 + $0x8] sm:$0xff] }
 0x34f   :  { %v692_v13 = vpop.f32.mrf.mxu0 }
 0x350   :  { %v693_v14 = vadd.f32 %v5451_v11, %v692_v13 }
 0x352   :  { %v702_v15 = vsel %vm701_vm12, %v693_v14, 0.0 }
 0x353   :  { %703 = vadd.xlane.f32.xlu0 %v702_v15 }
 0x357   :  { %v695_v16 = vpop.f32.mrf.mxu0 }
 0x358   :  { %v696_v17 = vadd.f32 %v5451_v11, %v695_v16 }
 0x35a   :  { %v705_v18 = vsel %vm701_vm12, %v696_v17, 0.0 }
 0x35b   :  { %706 = vadd.xlane.f32.xlu1 %v705_v18 }
 0x35f   :  { %v698_v19 = vpop.f32.mrf.mxu0 }
 0x360   :  { %v699_v20 = vadd.f32 %v5451_v11, %v698_v19 }
 0x362   :  { %v709_v21 = vsel %vm708_vm13, %v699_v20, 0.0 }
 0x363   :  { %710 = vadd.xlane.f32.xlu2 %v709_v21 }
 0x3c6   :  { %v704_v29 = vpop.xlane.xlu0 %703 }
 0x3c7   :  { %v719_v30 = vmul.f32 %v6864_v28, %v704_v29 }
 0x3c9   :  { %v722_v31 = vsub.f32 %v693_v14, %v719_v30 }
 0x3cb   :  { %v725_v32 = vmul.f32 %v722_v31, %v722_v31 }
 0x3cd   :  { %v728_v33 = vsel %vm701_vm12, %v725_v32, 0.0  ;;  %v555_v32 = vld [vmem:[#allocation12 + $0x10] sm:$0x1] }
 0x3ce   :  { %v707_v34 = vpop.xlane.xlu1 %706  ;;  %729 = vadd.xlane.f32.xlu0 %v728_v33 }
 0x3cf   :  { %v720_v35 = vmul.f32 %v6864_v28, %v707_v34 }
 0x3d1   :  { %v723_v36 = vsub.f32 %v696_v17, %v720_v35 }
 0x3d3   :  { %v726_v37 = vmul.f32 %v723_v36, %v723_v36 }
 0x3d5   :  { %v731_v38 = vsel %vm701_vm12, %v726_v37, 0.0 }
 0x3d6   :  { %732 = vadd.xlane.f32.xlu1 %v731_v38  ;;  %v711_v39 = vpop.xlane.xlu2 %710 }
 0x3d7   :  { %v721_v40 = vmul.f32 %v6864_v28, %v711_v39 }
 0x3d9   :  { %v6871_v41 = vsub.f32 %v699_v20, %v721_v40 }
 0x3db   :  { %v727_v42 = vmul.f32 %v6871_v41, %v6871_v41 }
 0x3dd   :  { %v734_v43 = vsel %vm708_vm13, %v727_v42, 0.0 }
 0x3de   :  { %735 = vadd.xlane.f32.xlu2 %v734_v43 }
 0x441   :  { %v730_v44 = vpop.xlane.xlu0 %729 }
 0x442   :  { %v737_v45 = vmul.f32 %v730_v44, %v6864_v28 }
 0x444   :  { %v740_v46 = vadd.f32 1e-05, %v737_v45 }
 0x446   :  { %5508 = vrsqrt.f32 %v740_v46  ;;  %vm749_vm2 = vweird.f32 %v740_v46 }
 0x449   :  { %v733_v47 = vpop.xlane.xlu1 %732 }
 0x44a   :  { %v738_v48 = vmul.f32 %v733_v47, %v6864_v28 }
 0x44c   :  { %v5509_v49 = vpop.eup %5508  ;;  %v741_v50 = vadd.f32 1e-05, %v738_v48 }
 0x44d   :  { %v744_v51 = vmul.f32 %v5509_v49, %v740_v46  ;;  %vm750_vm15 = vweird.f32 %v5509_v49 }
 0x44e   :  { %5510 = vrsqrt.f32 %v741_v50  ;;  %vm751_vm3 = vmor %vm749_vm2, %vm750_vm15  ;;  %vm759_vm6 = vweird.f32 %v741_v50 }
 0x44f   :  { %v745_v52 = vmul.f32 %v5509_v49, %v744_v51  ;;  %v888_v51 = vld [vmem:[%s7842_s18 + $0x18] sm:$0xff] }
 0x450   :  { %910 = vmatpush.msra.mxu1 %v888_v51 }
 0x451   :  { %v746_v53 = vmul.f32 0.5, %v745_v52  ;;  %v736_v54 = vpop.xlane.xlu2 %735  ;;  %v4956_v52 = vld [vmem:[%s7842_s18 + $0x58] sm:$0xff] }
 0x452   :  { %v739_v55 = vmul.f32 %v736_v54, %v6864_v28  ;;  %941 = vmatpush.msra.mxu2 %v4956_v52  ;;  %v4987_v54 = vld [vmem:[%s7842_s18 + $0x78] sm:$0xff] }
 0x453   :  { %v747_v56 = vsub.f32 1.5, %v746_v53  ;;  %v4963_v53 = vld [vmem:[%s7842_s18 + $0x98] sm:$0xff]  ;;  %1156 = vmatpush.msrb.mxu0 %v4987_v54 }
 0x454   :  { %v5511_v58 = vpop.eup %5510  ;;  %v742_v59 = vadd.f32 1e-05, %v739_v55  ;;  %972 = vmatpush.msra.mxu3 %v4963_v53  ;;  %v887_v55 = vld [vmem:[%s7842_s18 + $0x10] sm:$0xff] }
 0x455   :  { %v748_v60 = vmul.f32 %v5509_v49, %v747_v56  ;;  %v754_v61 = vmul.f32 %v5511_v58, %v741_v50  ;;  %vm760_vm4 = vweird.f32 %v5511_v58  ;;  %v4955_v56 = vld [vmem:[%s7842_s18 + $0x50] sm:$0xff]  ;;  %911 = vmatpush.msra.mxu1 %v887_v55 }
 0x456   :  { %5512 = vrsqrt.f32 %v742_v59  ;;  %vm761_vm7 = vmor %vm759_vm6, %vm760_vm4  ;;  %vm769_vm9 = vweird.f32 %v742_v59  ;;  %942 = vmatpush.msra.mxu2 %v4955_v56  ;;  %973 = vmatpush.msra.mxu3 %v4962_v57 }
 0x457   :  { %v752_v63 = vsel %vm751_vm3, %v5509_v49, %v748_v60  ;;  %v755_v0 = vmul.f32 %v5511_v58, %v754_v61  ;;  %v4954_v60 = vld [vmem:[%s7842_s18 + $0x48] sm:$0xff] }
 0x458   :  { %v773_v2 = vmul.f32 %v752_v63, %v722_v31  ;;  %v4961_v61 = vld [vmem:[%s7842_s18 + $0x88] sm:$0xff]  ;;  %943 = vmatpush.msra.mxu2 %v4954_v60  ;;  %v885_v63 = vld [vmem:[%s7842_s18] sm:$0xff] }
 0x459   :  { %v756_v4 = vmul.f32 0.5, %v755_v0  ;;  %974 = vmatpush.msra.mxu3 %v4961_v61  ;;  %v4953_v0 = vld [vmem:[%s7842_s18 + $0x40] sm:$0xff] }
 0x45a   :  { %v780_v5 = vmul.f32 %v5452_v62, %v773_v2  ;;  %v4960_v2 = vld [vmem:[%s7842_s18 + $0x80] sm:$0xff]  ;;  %944 = vmatpush.msra.mxu2 %v4953_v0  ;;  %v4994_v0 = vld [vmem:[%s7842_s18 + $0xb8] sm:$0xff] }
 0x45b   :  { %v757_v7 = vsub.f32 1.5, %v756_v4  ;;  %975 = vmatpush.msra.mxu3 %v4960_v2  ;;  %v4993_v2 = vld [vmem:[%s7842_s18 + $0xb0] sm:$0xff] }
 0x45c   :  { %v5513_v8 = vpop.eup %5512  ;;  %v787_v10 = vadd.f32 %v5453_v3, %v780_v5 }
 0x45d   :  { %v758_v11 = vmul.f32 %v5511_v58, %v757_v7  ;;  %v764_v13 = vmul.f32 %v5513_v8, %v742_v59  ;;  %vm770_vm8 = vweird.f32 %v5513_v8  ;;  %v886_v59 = vld [vmem:[%s7842_s18 + $0x8] sm:$0xff] }
 0x45e   :  { %v799_v14 = vsel %vm561_vm5, %v5454_v6, %v787_v10  ;;  %vm771_vm10 = vmor %vm769_vm9, %vm770_vm8  ;;  %912 = vmatpush.msra.mxu1 %v886_v59  ;;  %vm986_vm9 = vcmask 195584  }
 0x45f   :  { %v762_v15 = vsel %vm761_vm7, %v5511_v58, %v758_v11  ;;  %v765_v16 = vmul.f32 %v5513_v8, %v764_v13  ;;  %v6884_v17 = vadd.f32 %v799_v14, %v553_v9  ;;  %v4986_v58 = vld [vmem:[%s7842_s18 + $0x70] sm:$0xff]  ;;  %v4980_v14 = vld [vmem:[%s7842_s18 + $0x38] sm:$0xff] }
 0x460   :  { %v774_v18 = vmul.f32 %v762_v15, %v723_v36  ;;  %1157 = vmatpush.msrb.mxu0 %v4986_v58  ;;  %913 = vmatpush.msra.mxu1 %v885_v63  ;;  %v4979_v15 = vld [vmem:[%s7842_s18 + $0x30] sm:$0xff] }
 0x461   :  { %v766_v19 = vmul.f32 0.5, %v765_v16  ;;  %v805_v20 = vsel %vm701_vm12, %v6884_v17, 0.0  ;;  %1125 = vmatpush.msrb.mxu3 %v4980_v14 }
 0x462   :  { %806 = vadd.xlane.f32.xlu0 %v805_v20  ;;  %v781_v21 = vmul.f32 %v5452_v62, %v774_v18  ;;  %v4978_v20 = vld [vmem:[%s7842_s18 + $0x28] sm:$0xff] }
 0x463   :  { %v767_v22 = vsub.f32 1.5, %v766_v19  ;;  %1126 = vmatpush.msrb.mxu3 %v4979_v15 }
 0x464   :  { %v788_v24 = vadd.f32 %v5453_v3, %v781_v21 }
 0x465   :  { %v768_v25 = vmul.f32 %v5513_v8, %v767_v22  ;;  %1127 = vmatpush.msrb.mxu3 %v4978_v20 }
 0x466   :  { %v6888_v26 = vadd.f32 %v788_v24, %v554_v23  ;;  %v4977_v24 = vld [vmem:[%s7842_s18 + $0x20] sm:$0xff] }
 0x467   :  { %v772_v27 = vsel %vm771_vm10, %v5513_v8, %v768_v25  ;;  %1128 = vmatpush.msrb.mxu3 %v4977_v24  ;;  %vm1078_vm10 = vcmask 1040384  }
 0x468   :  { %v775_v29 = vmul.f32 %v772_v27, %v6871_v41  ;;  %v808_v30 = vsel %vm701_vm12, %v6888_v26, 0.0 }
 0x469   :  { %809 = vadd.xlane.f32.xlu1 %v808_v30 }
 0x46a   :  { %v782_v31 = vmul.f32 %v5452_v62, %v775_v29  ;;  %v4985_v62 = vld [vmem:[%s7842_s18 + $0x68] sm:$0xff]  ;;  %v5455_v29 = vld [vmem:[#allocation13] ss:$0 sm:$0xff] }
 0x46b   :  { %1158 = vmatpush.msrb.mxu0 %v4985_v62 }
 0x46c   :  { %v789_v33 = vadd.f32 %v5453_v3, %v782_v31  ;;  %v4984_v3 = vld [vmem:[%s7842_s18 + $0x60] sm:$0xff] }
 0x46d   :  { %1159 = vmatpush.msrb.mxu0 %v4984_v3  ;;  %v4992_v3 = vld [vmem:[%s7842_s18 + $0xa8] sm:$0xff] }
 0x46e   :  { %v6893_v34 = vadd.f32 %v789_v33, %v555_v32  ;;  %v5456_v32 = vld [vmem:[#allocation15] ss:$0 sm:$0xff] }
 0x470   :  { %v811_v35 = vsel %vm708_vm13, %v6893_v34, 0.0 }
 0x471   :  { %812 = vadd.xlane.f32.xlu2 %v811_v35 }
 0x4d5   :  { %v807_v36 = vpop.xlane.xlu0 %806 }
 0x4d6   :  { %v814_v37 = vmul.f32 %v807_v36, %v6864_v28 }
 0x4d8   :  { %v6899_v38 = vsub.f32 %v6884_v17, %v814_v37 }
 0x4da   :  { %v820_v39 = vmul.f32 %v6899_v38, %v6899_v38 }
 0x4dc   :  { %v810_v40 = vpop.xlane.xlu1 %809  ;;  %v823_v41 = vsel %vm701_vm12, %v820_v39, 0.0 }
 0x4dd   :  { %v815_v42 = vmul.f32 %v810_v40, %v6864_v28  ;;  %824 = vadd.xlane.f32.xlu0 %v823_v41 }
 0x4df   :  { %v6906_v43 = vsub.f32 %v6888_v26, %v815_v42 }
 0x4e1   :  { %v821_v44 = vmul.f32 %v6906_v43, %v6906_v43 }
 0x4e3   :  { %v826_v45 = vsel %vm701_vm12, %v821_v44, 0.0 }
 0x4e4   :  { %v813_v46 = vpop.xlane.xlu2 %812  ;;  %827 = vadd.xlane.f32.xlu1 %v826_v45 }
 0x4e5   :  { %v816_v47 = vmul.f32 %v813_v46, %v6864_v28 }
 0x4e7   :  { %v6913_v48 = vsub.f32 %v6893_v34, %v816_v47 }
 0x4e9   :  { %v822_v49 = vmul.f32 %v6913_v48, %v6913_v48 }
 0x4eb   :  { %v829_v50 = vsel %vm708_vm13, %v822_v49, 0.0 }
 0x4ec   :  { %830 = vadd.xlane.f32.xlu2 %v829_v50 }
 0x550   :  { %v825_v4 = vpop.xlane.xlu0 %824 }
 0x551   :  { %v832_v5 = vmul.f32 %v825_v4, %v6864_v28  ;;  %v4991_v4 = vld [vmem:[%s7842_s18 + $0xa0] sm:$0xff] }
 0x553   :  { %v835_v6 = vadd.f32 1e-05, %v832_v5 }
 0x555   :  { %5514 = vrsqrt.f32 %v835_v6  ;;  %vm844_vm14 = vweird.f32 %v835_v6 }
 0x557   :  { %v828_v7 = vpop.xlane.xlu1 %827 }
 0x558   :  { %v833_v8 = vmul.f32 %v828_v7, %v6864_v28 }
 0x55a   :  { %v836_v9 = vadd.f32 1e-05, %v833_v8 }
 0x55b   :  { %v5515_v10 = vpop.eup %5514 }
 0x55c   :  { %v839_v11 = vmul.f32 %v5515_v10, %v835_v6  ;;  %5516 = vrsqrt.f32 %v836_v9  ;;  %vm845_vm11 = vweird.f32 %v5515_v10  ;;  %vm854_vm3 = vweird.f32 %v836_v9 }
 0x55d   :  { %vm846_vm15 = vmor %vm844_vm14, %vm845_vm11  ;;  %vm1034_vm11 = vcmask 138240   ;;  %vm1041_vm14 = vcmask 131072  }
 0x55e   :  { %v840_v13 = vmul.f32 %v5515_v10, %v839_v11 }
 0x55f   :  { %v831_v16 = vpop.xlane.xlu2 %830 }
 0x560   :  { %v841_v18 = vmul.f32 0.5, %v840_v13  ;;  %v834_v19 = vmul.f32 %v831_v16, %v6864_v28 }
 0x562   :  { %v5517_v21 = vpop.eup %5516  ;;  %v842_v22 = vsub.f32 1.5, %v841_v18  ;;  %v837_v23 = vadd.f32 1e-05, %v834_v19 }
 0x563   :  { %v849_v25 = vmul.f32 %v5517_v21, %v836_v9  ;;  %vm855_vm2 = vweird.f32 %v5517_v21 }
 0x564   :  { %v843_v27 = vmul.f32 %v5515_v10, %v842_v22  ;;  %5518 = vrsqrt.f32 %v837_v23  ;;  %vm856_vm4 = vmor %vm854_vm3, %vm855_vm2  ;;  %vm864_vm7 = vweird.f32 %v837_v23 }
 0x565   :  { %v850_v30 = vmul.f32 %v5517_v21, %v849_v25 }
 0x566   :  { %v847_v31 = vsel %vm846_vm15, %v5515_v10, %v843_v27 }
 0x567   :  { %v868_v33 = vmul.f32 %v847_v31, %v6899_v38  ;;  %v851_v35 = vmul.f32 0.5, %v850_v30 }
 0x569   :  { %v875_v36 = vmul.f32 %v5455_v29, %v868_v33  ;;  %v852_v37 = vsub.f32 1.5, %v851_v35 }
 0x56a   :  { %v5519_v39 = vpop.eup %5518 }
 0x56b   :  { %v6942_v40 = vadd.f32 %v5456_v32, %v875_v36  ;;  %v853_v41 = vmul.f32 %v5517_v21, %v852_v37  ;;  %v859_v42 = vmul.f32 %v5519_v39, %v837_v23  ;;  %vm865_vm6 = vweird.f32 %v5519_v39 }
 0x56c   :  { %vm866_vm8 = vmor %vm864_vm7, %vm865_vm6 }
 0x56d   :  { %v857_v44 = vsel %vm856_vm4, %v5517_v21, %v853_v41  ;;  %v860_v45 = vmul.f32 %v5519_v39, %v859_v42  ;;  %4950 = vmatmul.msk.f32.vlgmr.msra.gmra.mxu1 %vm701_vm12, %v6942_v40  ;;  %4957 = vmatmul.msk.f32.vlgmr.msra.gmra.mxu2 %vm701_vm12, %v6942_v40 }
 0x56e   :  { %v869_v38 = vmul.f32 %v857_v44, %v6906_v43  ;;  %4964 = vmatmul.msk.f32.vlgmr.msra.gmra.mxu3 %vm701_vm12, %v6942_v40  ;;  %4988 = vmatmul.msk.f32.vlgmr.msrb.gmra.mxu0 %vm701_vm12, %v6942_v40 }
 0x56f   :  { %v861_v46 = vmul.f32 0.5, %v860_v45 }
 0x570   :  { %v876_v47 = vmul.f32 %v5455_v29, %v869_v38 }
 0x571   :  { %v862_v49 = vsub.f32 1.5, %v861_v46 }
 0x572   :  { %v883_v50 = vadd.f32 %v5456_v32, %v876_v47  ;;  %v1322_v47 = vld [vmem:[#allocation16 + $0x10] sm:$0xff] }
 0x573   :  { %v863_v51 = vmul.f32 %v5519_v39, %v862_v49  ;;  %v1321_v49 = vld [vmem:[#allocation16 + $0x8] sm:$0xff]  ;;  %1345 = vmatpush.msra.mxu0 %v1322_v47 }
 0x575   :  { %v867_v52 = vsel %vm866_vm8, %v5519_v39, %v863_v51  ;;  %4951 = vmatmul.msk.f32.gmra.mxu1 %vm701_vm12, %v883_v50  ;;  %4958 = vmatmul.msk.f32.gmra.mxu2 %vm701_vm12, %v883_v50 }
 0x576   :  { %v870_v43 = vmul.f32 %v867_v52, %v6913_v48  ;;  %4965 = vmatmul.msk.f32.gmra.mxu3 %vm701_vm12, %v883_v50  ;;  %4989 = vmatmul.msk.f32.gmra.mxu0 %vm701_vm12, %v883_v50 }
 0x577   :  { %1346 = vmatpush.msra.mxu0 %v1321_v49 }
 0x578   :  { %v877_v53 = vmul.f32 %v5455_v29, %v870_v43 }
 0x57a   :  { %v884_v54 = vadd.f32 %v5456_v32, %v877_v53 }
 0x57d   :  { %4952 = vmatmul.msk.f32.gmra.mxu1 %vm701_vm12, %v884_v54  ;;  %4959 = vmatmul.msk.f32.gmra.mxu2 %vm701_vm12, %v884_v54 }
 0x57e   :  { %4966 = vmatmul.msk.f32.gmra.mxu3 %vm701_vm12, %v884_v54  ;;  %4990 = vmatmul.msk.f32.gmra.mxu0 %vm701_vm12, %v884_v54 }
 0x586   :  { %4981 = vmatmul.msk.f32.vlgmr.msrb.gmra.mxu3 %vm701_vm12, %v6942_v40 }
 0x58e   :  { %4982 = vmatmul.msk.f32.gmra.mxu3 %vm701_vm12, %v883_v50 }
 0x596   :  { %4983 = vmatmul.msk.f32.gmra.mxu3 %vm701_vm12, %v884_v54 }
 0x5ea   :  { %v915_v63 = vpop.f32.mrf.mxu1 }
 0x5eb   :  { %v1161_v56 = vpop.f32.mrf.mxu0 }
 0x5f0   :  { %v946_v48 = vpop.f32.mrf.mxu2 }
 0x5f1   :  { %v977_v55 = vpop.f32.mrf.mxu3 }
 0x5f2   :  { %v918_v5 = vpop.f32.mrf.mxu1 }
 0x5f3   :  { %v1164_v59 = vpop.f32.mrf.mxu0 }
 0x5f8   :  { %v949_v57 = vpop.f32.mrf.mxu2 }
 0x5f9   :  { %v980_v58 = vpop.f32.mrf.mxu3 }
 0x5fa   :  { %v921_v6 = vpop.f32.mrf.mxu1 }
 0x5fb   :  { %v1167_v62 = vpop.f32.mrf.mxu0 }
 0x600   :  { %v952_v60 = vpop.f32.mrf.mxu2 }
 0x601   :  { %v983_v61 = vpop.f32.mrf.mxu3  ;;  %4967 = vmatpush.xpose.msk.msrb.mxu1 %vm986_vm9, %v952_v60 }
 0x602   :  { %4973 = vmatpush.msk.msrb.mxu2 %vm1078_vm10, %v983_v61 }
 0x604   :  { %1096 = vmatpush.msrb.mxu2 %v980_v58 }
 0x605   :  { %4968 = vmatpush.xpose.msk.msrb.mxu1 %vm986_vm9, %v949_v57 }
 0x606   :  { %1097 = vmatpush.msrb.mxu2 %v977_v55 }
 0x608   :  { %4998 = vmatpush.xpose.msk.msra.mxu2 %vm986_vm9, %v1167_v62 }
 0x609   :  { %4969 = vmatpush.xpose.msk.msrb.mxu1 %vm986_vm9, %v946_v48  ;;  %v1130_v52 = vpop.f32.mrf.mxu3 }
 0x60c   :  { %4999 = vmatpush.xpose.msk.msra.mxu2 %vm986_vm9, %v1164_v59  ;;  %4970 = vmatmul.msk.f32.vlgmr.msrb.gmra.mxu1 %vm986_vm9, %v915_v63 }
 0x60d   :  { %1187 = vmatpush.msra.mxu1 %v4994_v0 }
 0x60f   :  { %1188 = vmatpush.msra.mxu1 %v4993_v2 }
 0x610   :  { %5000 = vmatpush.xpose.msk.msra.mxu2 %vm986_vm9, %v1161_v56 }
 0x611   :  { %1189 = vmatpush.msra.mxu1 %v4992_v3  ;;  %v1133_v43 = vpop.f32.mrf.mxu3 }
 0x613   :  { %1190 = vmatpush.msra.mxu1 %v4991_v4 }
 0x614   :  { %4971 = vmatmul.msk.f32.gmra.mxu1 %vm986_vm9, %v918_v5 }
 0x619   :  { %v1136_v53 = vpop.f32.mrf.mxu3 }
 0x61c   :  { %4972 = vmatmul.msk.f32.gmra.mxu1 %vm986_vm9, %v921_v6 }
 0x624   :  { %4995 = vmatmul.msk.f32.vlgmr.msra.gmra.mxu1 %vm701_vm12, %v6942_v40 }
 0x62c   :  { %4996 = vmatmul.msk.f32.gmra.mxu1 %vm701_vm12, %v883_v50 }
 0x634   :  { %4997 = vmatmul.msk.f32.gmra.mxu1 %vm701_vm12, %v884_v54  ;;  %v1320_v54 = vld [vmem:[#allocation16] sm:$0xff] }
 0x635   :  { %1347 = vmatpush.msra.mxu0 %v1320_v54 }
 0x689   :  { %v1022_v7 = vpop.f32.mrf.mxu1 }
 0x68a   :  { %v1031_v8 = vmul.f32 0.20412415, %v1022_v7 }
 0x68c   :  { %v1035_v9 = vsel %vm1034_vm11, %v1031_v8, -inf }
 0x68d   :  { %1036 = vmax.xlane.f32.xlu0 %v1035_v9 }
 0x691   :  { %v1025_v10 = vpop.f32.mrf.mxu1 }
 0x692   :  { %v1032_v11 = vmul.f32 0.20412415, %v1025_v10 }
 0x694   :  { %v1038_v13 = vsel %vm1034_vm11, %v1032_v11, -inf }
 0x695   :  { %1039 = vmax.xlane.f32.xlu1 %v1038_v13 }
 0x699   :  { %v1028_v14 = vpop.f32.mrf.mxu1 }
 0x69a   :  { %v1033_v15 = vmul.f32 0.20412415, %v1028_v14 }
 0x69c   :  { %v1042_v16 = vsel %vm1041_vm14, %v1033_v15, -inf }
 0x69d   :  { %1043 = vmax.xlane.f32.xlu2 %v1042_v16 }
 0x6a1   :  { %v1192_v18 = vpop.f32.mrf.mxu1 }
 0x6a9   :  { %v1195_v19 = vpop.f32.mrf.mxu1 }
 0x6b1   :  { %v1198_v20 = vpop.f32.mrf.mxu1 }
 0x6b2   :  { %5004 = vmatpush.msk.msra.mxu3 %vm1078_vm10, %v1198_v20  ;;  %v1367_v20 = vld [vmem:[#allocation16 + $0x28] sm:$0xff] }
 0x6b3   :  { %1390 = vmatpush.msrb.mxu1 %v1367_v20 }
 0x6b4   :  { %1307 = vmatpush.msra.mxu3 %v1195_v19 }
 0x6b6   :  { %1308 = vmatpush.msra.mxu3 %v1192_v18 }
 0x700   :  { %v1037_v21 = vpop.xlane.xlu0 %1036 }
 0x701   :  { %v1045_v22 = vsub.f32 %v1031_v8, %v1037_v21  ;;  %v1366_v21 = vld [vmem:[#allocation16 + $0x20] sm:$0xff] }
 0x702   :  { %1391 = vmatpush.msrb.mxu1 %v1366_v21 }
 0x703   :  { %v1048_v23 = vmul.f32 1.442695, %v1045_v22 }
 0x705   :  { %5520 = vpow2.f32 %v1048_v23 }
 0x708   :  { %v1040_v24 = vpop.xlane.xlu1 %1039 }
 0x709   :  { %v1046_v25 = vsub.f32 %v1032_v11, %v1040_v24 }
 0x70b   :  { %v5521_v27 = vpop.eup %5520  ;;  %v1050_v29 = vmul.f32 1.442695, %v1046_v25 }
 0x70c   :  { %v1054_v30 = vsel %vm1034_vm11, %v5521_v27, 0.0 }
 0x70d   :  { %5522 = vpow2.f32 %v1050_v29  ;;  %1055 = vadd.xlane.f32.xlu0 %v1054_v30 }
 0x710   :  { %v1044_v31 = vpop.xlane.xlu2 %1043 }
 0x711   :  { %v1047_v32 = vsub.f32 %v1033_v15, %v1044_v31 }
 0x713   :  { %v5523_v33 = vpop.eup %5522  ;;  %v1052_v35 = vmul.f32 1.442695, %v1047_v32 }
 0x714   :  { %v1057_v36 = vsel %vm1034_vm11, %v5523_v33, 0.0 }
 0x715   :  { %5524 = vpow2.f32 %v1052_v35  ;;  %1058 = vadd.xlane.f32.xlu1 %v1057_v36 }
 0x71b   :  { %v5525_v37 = vpop.eup %5524 }
 0x71c   :  { %v1060_v39 = vsel %vm1041_vm14, %v5525_v37, 0.0 }
 0x71d   :  { %1061 = vadd.xlane.f32.xlu2 %v1060_v39 }
 0x780   :  { %v1056_v40 = vpop.xlane.xlu0 %1055 }
 0x781   :  { %5526 = vrcp.f32 %v1056_v40  ;;  %v5457_v40 = vld [vmem:[#allocation18] ss:$0 sm:$0xff] }
 0x787   :  { %v5527_v41 = vpop.eup %5526 }
 0x788   :  { %v1059_v42 = vpop.xlane.xlu1 %1058  ;;  %v1066_v44 = vmul.f32 %v5527_v41, %v5521_v27 }
 0x789   :  { %5528 = vrcp.f32 %v1059_v42 }
 0x78a   :  { %4974 = vmatmul.msk.f32.vlgmr.msrb.gmra.mxu2 %vm1034_vm11, %v1066_v44 }
 0x78f   :  { %v5529_v45 = vpop.eup %5528 }
 0x790   :  { %v1062_v38 = vpop.xlane.xlu2 %1061  ;;  %v1067_v46 = vmul.f32 %v5529_v45, %v5523_v33  ;;  %v1365_v33 = vld [vmem:[#allocation16 + $0x18] sm:$0xff] }
 0x791   :  { %5530 = vrcp.f32 %v1062_v38  ;;  %1392 = vmatpush.msrb.mxu1 %v1365_v33 }
 0x792   :  { %4975 = vmatmul.msk.f32.gmra.mxu2 %vm1034_vm11, %v1067_v46 }
 0x797   :  { %v5531_v50 = vpop.eup %5530 }
 0x798   :  { %v1068_v51 = vmul.f32 %v5531_v50, %v5525_v37 }
 0x79a   :  { %4976 = vmatmul.msk.f32.gmra.mxu2 %vm1034_vm11, %v1068_v51 }
 0x7a2   :  { %5001 = vmatmul.msk.f32.vlgmr.msra.gmra.mxu2 %vm986_vm9, %v1130_v52 }
 0x7aa   :  { %5002 = vmatmul.msk.f32.gmra.mxu2 %vm986_vm9, %v1133_v43 }
 0x7b2   :  { %5003 = vmatmul.msk.f32.gmra.mxu2 %vm986_vm9, %v1136_v53 }
 0x80d   :  { %v1099_v48 = vpop.f32.mrf.mxu2 }
 0x80e   :  { %5008 = vmatmul.msk.f32.vlgmr.msra.gmra.mxu0 %vm986_vm9, %v1099_v48 }
 0x815   :  { %v1102_v55 = vpop.f32.mrf.mxu2 }
 0x816   :  { %5009 = vmatmul.msk.f32.gmra.mxu0 %vm986_vm9, %v1102_v55 }
 0x81d   :  { %v1105_v56 = vpop.f32.mrf.mxu2 }
 0x81e   :  { %5010 = vmatmul.msk.f32.gmra.mxu0 %vm986_vm9, %v1105_v56 }
 0x825   :  { %v1236_v57 = vpop.f32.mrf.mxu2 }
 0x826   :  { %v1245_v58 = vmul.f32 0.20412415, %v1236_v57 }
 0x828   :  { %v1248_v59 = vsel %vm1034_vm11, %v1245_v58, -inf }
 0x829   :  { %1249 = vmax.xlane.f32.xlu0 %v1248_v59 }
 0x82d   :  { %v1239_v60 = vpop.f32.mrf.mxu2 }
 0x82e   :  { %v1246_v61 = vmul.f32 0.20412415, %v1239_v60 }
 0x830   :  { %v1251_v62 = vsel %vm1034_vm11, %v1246_v61, -inf }
 0x831   :  { %1252 = vmax.xlane.f32.xlu1 %v1251_v62 }
 0x835   :  { %v1242_v63 = vpop.f32.mrf.mxu2 }
 0x836   :  { %v1247_v0 = vmul.f32 0.20412415, %v1242_v63 }
 0x838   :  { %v1254_v2 = vsel %vm1041_vm14, %v1247_v0, -inf }
 0x839   :  { %1255 = vmax.xlane.f32.xlu2 %v1254_v2 }
 0x88b   :  { %v1349_v39 = vpop.f32.mrf.mxu0 }
 0x88c   :  { %v1361_v41 = vadd.f32 %v5457_v40, %v1349_v39 }
 0x893   :  { %v1352_v45 = vpop.f32.mrf.mxu0 }
 0x894   :  { %v1362_v47 = vadd.f32 %v5457_v40, %v1352_v45 }
 0x89b   :  { %v1355_v52 = vpop.f32.mrf.mxu0 }
 0x89c   :  { %v1250_v3 = vpop.xlane.xlu0 %1249  ;;  %v1363_v53 = vadd.f32 %v5457_v40, %v1355_v52 }
 0x89d   :  { %v1257_v4 = vsub.f32 %v1245_v58, %v1250_v3 }
 0x89f   :  { %v1260_v5 = vmul.f32 1.442695, %v1257_v4 }
 0x8a1   :  { %5532 = vpow2.f32 %v1260_v5 }
 0x8a4   :  { %v1253_v6 = vpop.xlane.xlu1 %1252 }
 0x8a5   :  { %v1258_v7 = vsub.f32 %v1246_v61, %v1253_v6  ;;  %v1492_v6 = vld [vmem:[#allocation22 + $0x18] sm:$0xff] }
 0x8a6   :  { %1518 = vmatpush.msrb.mxu2 %v1492_v6 }
 0x8a7   :  { %v5533_v8 = vpop.eup %5532  ;;  %v1262_v9 = vmul.f32 1.442695, %v1258_v7  ;;  %v1491_v7 = vld [vmem:[#allocation22 + $0x10] sm:$0xff] }
 0x8a8   :  { %v1266_v10 = vsel %vm1034_vm11, %v5533_v8, 0.0  ;;  %1519 = vmatpush.msrb.mxu2 %v1491_v7 }
 0x8a9   :  { %5534 = vpow2.f32 %v1262_v9  ;;  %1267 = vadd.xlane.f32.xlu0 %v1266_v10  ;;  %v1489_v9 = vld [vmem:[#allocation22] sm:$0xff] }
 0x8ac   :  { %v1256_v11 = vpop.xlane.xlu2 %1255 }
 0x8ad   :  { %v1259_v13 = vsub.f32 %v1247_v0, %v1256_v11 }
 0x8af   :  { %v5535_v14 = vpop.eup %5534  ;;  %v1264_v15 = vmul.f32 1.442695, %v1259_v13 }
 0x8b0   :  { %v1269_v16 = vsel %vm1034_vm11, %v5535_v14, 0.0 }
 0x8b1   :  { %5536 = vpow2.f32 %v1264_v15  ;;  %1270 = vadd.xlane.f32.xlu1 %v1269_v16 }
 0x8b7   :  { %v5537_v18 = vpop.eup %5536 }
 0x8b8   :  { %v1272_v19 = vsel %vm1041_vm14, %v5537_v18, 0.0 }
 0x8b9   :  { %1273 = vadd.xlane.f32.xlu2 %v1272_v19 }
 0x91c   :  { %v1268_v22 = vpop.xlane.xlu0 %1267 }
 0x91d   :  { %5538 = vrcp.f32 %v1268_v22 }
 0x923   :  { %v5539_v23 = vpop.eup %5538 }
 0x924   :  { %v1278_v24 = vmul.f32 %v5539_v23, %v5533_v8  ;;  %v1271_v25 = vpop.xlane.xlu1 %1270  ;;  %v1490_v8 = vld [vmem:[#allocation22 + $0x8] sm:$0xff] }
 0x925   :  { %5540 = vrcp.f32 %v1271_v25  ;;  %1520 = vmatpush.msrb.mxu2 %v1490_v8 }
 0x926   :  { %5005 = vmatmul.msk.f32.vlgmr.msra.gmra.mxu3 %vm1034_vm11, %v1278_v24 }
 0x927   :  { %1521 = vmatpush.msrb.mxu2 %v1489_v9 }
 0x92b   :  { %v5541_v27 = vpop.eup %5540 }
 0x92c   :  { %v1274_v29 = vpop.xlane.xlu2 %1273  ;;  %v1279_v30 = vmul.f32 %v5541_v27, %v5535_v14 }
 0x92d   :  { %5542 = vrcp.f32 %v1274_v29 }
 0x92e   :  { %5006 = vmatmul.msk.f32.gmra.mxu3 %vm1034_vm11, %v1279_v30 }
 0x933   :  { %v5543_v31 = vpop.eup %5542 }
 0x934   :  { %v1280_v32 = vmul.f32 %v5543_v31, %v5537_v18  ;;  %v5458_v31 = vld [vmem:[#allocation19] ss:$0 sm:$0xff] }
 0x936   :  { %5007 = vmatmul.msk.f32.gmra.mxu3 %vm1034_vm11, %v1280_v32 }
 0x9a9   :  { %v1310_v35 = vpop.f32.mrf.mxu3 }
 0x9aa   :  { %5011 = vmatmul.msk.f32.vlgmr.msrb.gmra.mxu1 %vm986_vm9, %v1310_v35 }
 0x9b1   :  { %v1313_v36 = vpop.f32.mrf.mxu3 }
 0x9b2   :  { %5012 = vmatmul.msk.f32.gmra.mxu1 %vm986_vm9, %v1313_v36  ;;  %v5459_v36 = vld [vmem:[#allocation21] ss:$0 sm:$0xff] }
 0x9b9   :  { %v1316_v37 = vpop.f32.mrf.mxu3 }
 0x9ba   :  { %5013 = vmatmul.msk.f32.gmra.mxu1 %vm986_vm9, %v1316_v37 }
 0xa27   :  { %v1394_v42 = vpop.f32.mrf.mxu1 }
 0xa28   :  { %v1403_v44 = vadd.f32 %v1394_v42, %v1361_v41 }
 0xa2a   :  { %v7013_v38 = vadd.f32 %v1403_v44, %v6884_v17 }
 0xa2c   :  { %v1409_v46 = vsel %vm701_vm12, %v7013_v38, 0.0 }
 0xa2d   :  { %1410 = vadd.xlane.f32.xlu0 %v1409_v46 }
 0xa2f   :  { %v1397_v49 = vpop.f32.mrf.mxu1 }
 0xa30   :  { %v1404_v50 = vadd.f32 %v1397_v49, %v1362_v47 }
 0xa32   :  { %v7018_v51 = vadd.f32 %v1404_v50, %v6888_v26 }
 0xa34   :  { %v1412_v43 = vsel %vm701_vm12, %v7018_v51, 0.0 }
 0xa35   :  { %1413 = vadd.xlane.f32.xlu1 %v1412_v43 }
 0xa37   :  { %v1400_v54 = vpop.f32.mrf.mxu1 }
 0xa38   :  { %v1405_v48 = vadd.f32 %v1400_v54, %v1363_v53 }
 0xa3a   :  { %v7023_v17 = vadd.f32 %v1405_v48, %v6893_v34 }
 0xa3c   :  { %v1415_v55 = vsel %vm708_vm13, %v7023_v17, 0.0 }
 0xa3d   :  { %1416 = vadd.xlane.f32.xlu2 %v1415_v55 }
 0xaa0   :  { %v1411_v56 = vpop.xlane.xlu0 %1410 }
 0xaa1   :  { %v1418_v57 = vmul.f32 %v1411_v56, %v6864_v28 }
 0xaa3   :  { %v1421_v26 = vsub.f32 %v7013_v38, %v1418_v57 }
 0xaa5   :  { %v1424_v58 = vmul.f32 %v1421_v26, %v1421_v26 }
 0xaa7   :  { %v1427_v59 = vsel %vm701_vm12, %v1424_v58, 0.0  ;;  %v1565_v58 = vld [vmem:[%s7843_s20 + $0x30] sm:$0xff] }
 0xaa8   :  { %1428 = vadd.xlane.f32.xlu0 %v1427_v59  ;;  %v1414_v60 = vpop.xlane.xlu1 %1413  ;;  %v1564_v59 = vld [vmem:[%s7843_s20 + $0x28] sm:$0xff] }
 0xaa9   :  { %v1419_v61 = vmul.f32 %v1414_v60, %v6864_v28  ;;  %v1563_v60 = vld [vmem:[%s7843_s20 + $0x20] sm:$0xff] }
 0xaab   :  { %v1422_v62 = vsub.f32 %v7018_v51, %v1419_v61  ;;  %v1562_v61 = vld [vmem:[%s7843_s20 + $0x18] sm:$0xff] }
 0xaad   :  { %v1425_v34 = vmul.f32 %v1422_v62, %v1422_v62 }
 0xaaf   :  { %v1430_v63 = vsel %vm701_vm12, %v1425_v34, 0.0  ;;  %v1560_v34 = vld [vmem:[%s7843_s20 + $0x8] sm:$0xff] }
 0xab0   :  { %1431 = vadd.xlane.f32.xlu1 %v1430_v63  ;;  %v1417_v0 = vpop.xlane.xlu2 %1416  ;;  %v1559_v63 = vld [vmem:[%s7843_s20] sm:$0xff] }
 0xab1   :  { %v1420_v2 = vmul.f32 %v1417_v0, %v6864_v28  ;;  %v5460_v0 = vld [vmem:[#allocation24] ss:$0 sm:$0xff] }
 0xab3   :  { %v7035_v3 = vsub.f32 %v7023_v17, %v1420_v2 }
 0xab5   :  { %v1426_v4 = vmul.f32 %v7035_v3, %v7035_v3 }
 0xab7   :  { %v1433_v5 = vsel %vm708_vm13, %v1426_v4, 0.0 }
 0xab8   :  { %1434 = vadd.xlane.f32.xlu2 %v1433_v5 }
 0xb1b   :  { %v1429_v10 = vpop.xlane.xlu0 %1428 }
 0xb1c   :  { %v1436_v11 = vmul.f32 %v1429_v10, %v6864_v28 }
 0xb1e   :  { %v1439_v13 = vadd.f32 1e-05, %v1436_v11 }
 0xb20   :  { %5544 = vrsqrt.f32 %v1439_v13  ;;  %vm1448_vm2 = vweird.f32 %v1439_v13 }
 0xb23   :  { %v1432_v14 = vpop.xlane.xlu1 %1431 }
 0xb24   :  { %v1437_v15 = vmul.f32 %v1432_v14, %v6864_v28 }
 0xb26   :  { %v5545_v16 = vpop.eup %5544  ;;  %v1440_v18 = vadd.f32 1e-05, %v1437_v15 }
 0xb27   :  { %v1443_v19 = vmul.f32 %v5545_v16, %v1439_v13  ;;  %vm1449_vm15 = vweird.f32 %v5545_v16 }
 0xb28   :  { %5546 = vrsqrt.f32 %v1440_v18  ;;  %vm1450_vm3 = vmor %vm1448_vm2, %vm1449_vm15  ;;  %vm1458_vm6 = vweird.f32 %v1440_v18 }
 0xb29   :  { %v1444_v20 = vmul.f32 %v5545_v16, %v1443_v19 }
 0xb2b   :  { %v1445_v21 = vmul.f32 0.5, %v1444_v20  ;;  %v1435_v22 = vpop.xlane.xlu2 %1434 }
 0xb2c   :  { %v1438_v23 = vmul.f32 %v1435_v22, %v6864_v28 }
 0xb2d   :  { %v1446_v24 = vsub.f32 1.5, %v1445_v21 }
 0xb2e   :  { %v5547_v25 = vpop.eup %5546  ;;  %v1441_v27 = vadd.f32 1e-05, %v1438_v23 }
 0xb2f   :  { %v1447_v29 = vmul.f32 %v5545_v16, %v1446_v24  ;;  %v1453_v30 = vmul.f32 %v5547_v25, %v1440_v18  ;;  %vm1459_vm4 = vweird.f32 %v5547_v25 }
 0xb30   :  { %5548 = vrsqrt.f32 %v1441_v27  ;;  %vm1460_vm7 = vmor %vm1458_vm6, %vm1459_vm4  ;;  %vm1468_vm15 = vweird.f32 %v1441_v27 }
 0xb31   :  { %v1451_v32 = vsel %vm1450_vm3, %v5545_v16, %v1447_v29  ;;  %v1454_v33 = vmul.f32 %v5547_v25, %v1453_v30  ;;  %vm1571_vm3 = vcmask 523264  }
 0xb32   :  { %v1472_v35 = vmul.f32 %v1451_v32, %v1421_v26  ;;  %v1566_v26 = vld [vmem:[%s7843_s20 + $0x38] sm:$0xff] }
 0xb33   :  { %v1455_v37 = vmul.f32 0.5, %v1454_v33  ;;  %1589 = vmatpush.msrb.mxu3 %v1566_v26 }
 0xb34   :  { %v1479_v39 = vmul.f32 %v5458_v31, %v1472_v35 }
 0xb35   :  { %v1456_v40 = vsub.f32 1.5, %v1455_v37  ;;  %1590 = vmatpush.msrb.mxu3 %v1565_v58 }
 0xb36   :  { %v5549_v41 = vpop.eup %5548  ;;  %v1486_v42 = vadd.f32 %v5459_v36, %v1479_v39 }
 0xb37   :  { %v1457_v44 = vmul.f32 %v5547_v25, %v1456_v40  ;;  %v1463_v45 = vmul.f32 %v5549_v41, %v1441_v27  ;;  %vm1469_vm8 = vweird.f32 %v5549_v41  ;;  %1591 = vmatpush.msrb.mxu3 %v1564_v59 }
 0xb38   :  { %5014 = vmatmul.msk.f32.vlgmr.msrb.gmra.mxu2 %vm701_vm12, %v1486_v42  ;;  %vm1470_vm2 = vmor %vm1468_vm15, %vm1469_vm8 }
 0xb39   :  { %v1461_v46 = vsel %vm1460_vm7, %v5547_v25, %v1457_v44  ;;  %v1464_v47 = vmul.f32 %v5549_v41, %v1463_v45  ;;  %1592 = vmatpush.msrb.mxu3 %v1563_v60 }
 0xb3a   :  { %v1473_v49 = vmul.f32 %v1461_v46, %v1422_v62  ;;  %v1561_v62 = vld [vmem:[%s7843_s20 + $0x10] sm:$0xff] }
 0xb3b   :  { %v1465_v50 = vmul.f32 0.5, %v1464_v47  ;;  %1593 = vmatpush.msrb.mxu3 %v1562_v61 }
 0xb3c   :  { %v1480_v52 = vmul.f32 %v5458_v31, %v1473_v49 }
 0xb3d   :  { %v1466_v43 = vsub.f32 1.5, %v1465_v50  ;;  %1594 = vmatpush.msrb.mxu3 %v1561_v62 }
 0xb3e   :  { %v1487_v53 = vadd.f32 %v5459_v36, %v1480_v52 }
 0xb3f   :  { %v1467_v54 = vmul.f32 %v5549_v41, %v1466_v43  ;;  %1595 = vmatpush.msrb.mxu3 %v1560_v34 }
 0xb40   :  { %5015 = vmatmul.msk.f32.gmra.mxu2 %vm701_vm12, %v1487_v53 }
 0xb41   :  { %v1471_v48 = vsel %vm1470_vm2, %v5549_v41, %v1467_v54  ;;  %1596 = vmatpush.msrb.mxu3 %v1559_v63  ;;  %v5461_v41 = vld [vmem:[#allocation25] ss:$0 sm:$0xff] }
 0xb42   :  { %v1474_v55 = vmul.f32 %v1471_v48, %v7035_v3 }
 0xb44   :  { %v1481_v56 = vmul.f32 %v5458_v31, %v1474_v55 }
 0xb46   :  { %v1488_v57 = vadd.f32 %v5459_v36, %v1481_v56 }
 0xb48   :  { %5016 = vmatmul.msk.f32.gmra.mxu2 %vm701_vm12, %v1488_v57 }
 0xbbb   :  { %v1523_v2 = vpop.f32.mrf.mxu2 }
 0xbbc   :  { %v1524_v3 = vadd.f32 %v5460_v0, %v1523_v2 }
 0xbbe   :  { %v1535_v4 = vmul.f32 0.044715, %v1524_v3  ;;  %v1532_v22 = vmul.f32 0.5, %v1524_v3 }
 0xbc0   :  { %v1538_v5 = vmul.f32 %v1535_v4, %v1524_v3 }
 0xbc2   :  { %v1541_v6 = vmul.f32 %v1538_v5, %v1524_v3 }
 0xbc3   :  { %v1526_v7 = vpop.f32.mrf.mxu2 }
 0xbc4   :  { %v1544_v8 = vadd.f32 %v1541_v6, %v1524_v3  ;;  %v1527_v9 = vadd.f32 %v5460_v0, %v1526_v7 }
 0xbc6   :  { %v1547_v10 = vmul.f32 0.7978845, %v1544_v8  ;;  %v1536_v11 = vmul.f32 0.044715, %v1527_v9  ;;  %v1533_v32 = vmul.f32 0.5, %v1527_v9 }
 0xbc8   :  { %5550 = vtanh.f32 %v1547_v10  ;;  %v1539_v13 = vmul.f32 %v1536_v11, %v1527_v9 }
 0xbca   :  { %v1542_v14 = vmul.f32 %v1539_v13, %v1527_v9 }
 0xbcb   :  { %v1529_v15 = vpop.f32.mrf.mxu2 }
 0xbcc   :  { %v1530_v16 = vadd.f32 %v5460_v0, %v1529_v15  ;;  %v1545_v18 = vadd.f32 %v1542_v14, %v1527_v9 }
 0xbce   :  { %v5551_v19 = vpop.eup %5550  ;;  %v1537_v20 = vmul.f32 0.044715, %v1530_v16  ;;  %v1548_v21 = vmul.f32 0.7978845, %v1545_v18  ;;  %v1534_v37 = vmul.f32 0.5, %v1530_v16 }
 0xbcf   :  { %v1553_v23 = vadd.f32 1.0, %v5551_v19 }
 0xbd0   :  { %5552 = vtanh.f32 %v1548_v21  ;;  %v1540_v24 = vmul.f32 %v1537_v20, %v1530_v16  ;;  %v5462_v21 = vld [vmem:[#allocation27] ss:$0 sm:$0xff] }
 0xbd1   :  { %v1556_v25 = vmul.f32 %v1553_v23, %v1532_v22 }
 0xbd2   :  { %v1543_v27 = vmul.f32 %v1540_v24, %v1530_v16 }
 0xbd3   :  { %5017 = vmatmul.msk.f32.vlgmr.msrb.gmra.mxu3 %vm1571_vm3, %v1556_v25  ;;  %v5463_v25 = vld [vmem:[#allocation28] ss:$0 sm:$0xff] }
 0xbd4   :  { %v1546_v29 = vadd.f32 %v1543_v27, %v1530_v16 }
 0xbd6   :  { %v5553_v30 = vpop.eup %5552  ;;  %v1549_v31 = vmul.f32 0.7978845, %v1546_v29 }
 0xbd7   :  { %v1554_v33 = vadd.f32 1.0, %v5553_v30 }
 0xbd8   :  { %5554 = vtanh.f32 %v1549_v31 }
 0xbd9   :  { %v1557_v35 = vmul.f32 %v1554_v33, %v1533_v32 }
 0xbdb   :  { %5018 = vmatmul.msk.f32.gmra.mxu3 %vm1571_vm3, %v1557_v35 }
 0xbde   :  { %v5555_v36 = vpop.eup %5554 }
 0xbdf   :  { %v1555_v39 = vadd.f32 1.0, %v5555_v36 }
 0xbe1   :  { %v1558_v40 = vmul.f32 %v1555_v39, %v1534_v37 }
 0xbe3   :  { %5019 = vmatmul.msk.f32.gmra.mxu3 %vm1571_vm3, %v1558_v40 }
 0xc56   :  { %v1598_v42 = vpop.f32.mrf.mxu3 }
 0xc57   :  { %v1599_v44 = vadd.f32 %v5461_v41, %v1598_v42 }
 0xc59   :  { %v1607_v45 = vadd.f32 %v1599_v44, %v7013_v38 }
 0xc5b   :  { %v1610_v46 = vsel %vm701_vm12, %v1607_v45, 0.0 }
 0xc5c   :  { %1611 = vadd.xlane.f32.xlu0 %v1610_v46 }
 0xc5e   :  { %v1601_v47 = vpop.f32.mrf.mxu3 }
 0xc5f   :  { %v1602_v49 = vadd.f32 %v5461_v41, %v1601_v47 }
 0xc61   :  { %v1608_v50 = vadd.f32 %v1602_v49, %v7018_v51 }
 0xc63   :  { %v1613_v52 = vsel %vm701_vm12, %v1608_v50, 0.0 }
 0xc64   :  { %1614 = vadd.xlane.f32.xlu1 %v1613_v52 }
 0xc66   :  { %v1604_v43 = vpop.f32.mrf.mxu3 }
 0xc67   :  { %v1605_v53 = vadd.f32 %v5461_v41, %v1604_v43 }
 0xc69   :  { %v1609_v54 = vadd.f32 %v1605_v53, %v7023_v17 }
 0xc6b   :  { %v1616_v48 = vsel %vm708_vm13, %v1609_v54, 0.0 }
 0xc6c   :  { %1617 = vadd.xlane.f32.xlu2 %v1616_v48 }
 0xccf   :  { %v1612_v55 = vpop.xlane.xlu0 %1611 }
 0xcd0   :  { %v1619_v38 = vmul.f32 %v1612_v55, %v6864_v28 }
 0xcd2   :  { %v1622_v56 = vsub.f32 %v1607_v45, %v1619_v38 }
 0xcd4   :  { %v1625_v57 = vmul.f32 %v1622_v56, %v1622_v56 }
 0xcd6   :  { %v1628_v26 = vsel %vm701_vm12, %v1625_v57, 0.0 }
 0xcd7   :  { %v1615_v58 = vpop.xlane.xlu1 %1614  ;;  %1629 = vadd.xlane.f32.xlu0 %v1628_v26 }
 0xcd8   :  { %v1620_v51 = vmul.f32 %v1615_v58, %v6864_v28 }
 0xcda   :  { %v1623_v59 = vsub.f32 %v1608_v50, %v1620_v51 }
 0xcdc   :  { %v1626_v60 = vmul.f32 %v1623_v59, %v1623_v59 }
 0xcde   :  { %v1631_v61 = vsel %vm701_vm12, %v1626_v60, 0.0 }
 0xcdf   :  { %1632 = vadd.xlane.f32.xlu1 %v1631_v61  ;;  %v1618_v17 = vpop.xlane.xlu2 %1617 }
 0xce0   :  { %v1621_v62 = vmul.f32 %v1618_v17, %v6864_v28 }
 0xce2   :  { %v1624_v34 = vsub.f32 %v1609_v54, %v1621_v62 }
 0xce4   :  { %v1627_v63 = vmul.f32 %v1624_v34, %v1624_v34 }
 0xce6   :  { %v1634_v0 = vsel %vm708_vm13, %v1627_v63, 0.0  ;;  %v5026_v63 = vld [vmem:[%s7844_s14 + $0x58] sm:$0xff] }
 0xce7   :  { %1635 = vadd.xlane.f32.xlu2 %v1634_v0  ;;  %v1773_v0 = vld [vmem:[%s7844_s14 + $0x18] sm:$0xff]  ;;  %1826 = vmatpush.msra.mxu1 %v5026_v63 }
 0xce8   :  { %1795 = vmatpush.msrb.mxu0 %v1773_v0 }
 0xd4a   :  { %v1630_v2 = vpop.xlane.xlu0 %1629 }
 0xd4b   :  { %v1637_v3 = vmul.f32 %v1630_v2, %v6864_v28  ;;  %v5033_v2 = vld [vmem:[%s7844_s14 + $0x98] sm:$0xff] }
 0xd4c   :  { %1857 = vmatpush.msra.mxu2 %v5033_v2 }
 0xd4d   :  { %v1640_v4 = vadd.f32 1e-05, %v1637_v3  ;;  %v1772_v3 = vld [vmem:[%s7844_s14 + $0x10] sm:$0xff] }
 0xd4e   :  { %1796 = vmatpush.msrb.mxu0 %v1772_v3 }
 0xd4f   :  { %5556 = vrsqrt.f32 %v1640_v4  ;;  %vm1649_vm6 = vweird.f32 %v1640_v4 }
 0xd52   :  { %v1633_v5 = vpop.xlane.xlu1 %1632 }
 0xd53   :  { %v1638_v6 = vmul.f32 %v1633_v5, %v6864_v28  ;;  %v5032_v5 = vld [vmem:[%s7844_s14 + $0x90] sm:$0xff] }
 0xd54   :  { %1858 = vmatpush.msra.mxu2 %v5032_v5 }
 0xd55   :  { %v5557_v7 = vpop.eup %5556  ;;  %v1641_v8 = vadd.f32 1e-05, %v1638_v6  ;;  %v1771_v6 = vld [vmem:[%s7844_s14 + $0x8] sm:$0xff] }
 0xd56   :  { %v1644_v9 = vmul.f32 %v5557_v7, %v1640_v4  ;;  %vm1650_vm4 = vweird.f32 %v5557_v7  ;;  %v5025_v4 = vld [vmem:[%s7844_s14 + $0x50] sm:$0xff]  ;;  %1797 = vmatpush.msrb.mxu0 %v1771_v6 }
 0xd57   :  { %5558 = vrsqrt.f32 %v1641_v8  ;;  %vm1651_vm7 = vmor %vm1649_vm6, %vm1650_vm4  ;;  %vm1659_vm15 = vweird.f32 %v1641_v8  ;;  %1827 = vmatpush.msra.mxu1 %v5025_v4 }
 0xd58   :  { %v1645_v10 = vmul.f32 %v5557_v7, %v1644_v9  ;;  %v1770_v9 = vld [vmem:[%s7844_s14] sm:$0xff] }
 0xd59   :  { %1798 = vmatpush.msrb.mxu0 %v1770_v9  ;;  %v5062_v9 = vld [vmem:[%s7844_s14 + $0xa8] sm:$0xff] }
 0xd5a   :  { %v1646_v11 = vmul.f32 0.5, %v1645_v10  ;;  %v1636_v13 = vpop.xlane.xlu2 %1635  ;;  %v5023_v10 = vld [vmem:[%s7844_s14 + $0x40] sm:$0xff] }
 0xd5b   :  { %v1639_v14 = vmul.f32 %v1636_v13, %v6864_v28 }
 0xd5c   :  { %v1647_v15 = vsub.f32 1.5, %v1646_v11  ;;  %v5030_v11 = vld [vmem:[%s7844_s14 + $0x80] sm:$0xff] }
 0xd5d   :  { %v5559_v16 = vpop.eup %5558  ;;  %v1642_v18 = vadd.f32 1e-05, %v1639_v14 }
 0xd5e   :  { %v1648_v19 = vmul.f32 %v5557_v7, %v1647_v15  ;;  %v1654_v20 = vmul.f32 %v5559_v16, %v1641_v8  ;;  %vm1660_vm8 = vweird.f32 %v5559_v16  ;;  %v5031_v8 = vld [vmem:[%s7844_s14 + $0x88] sm:$0xff] }
 0xd5f   :  { %5560 = vrsqrt.f32 %v1642_v18  ;;  %vm1661_vm2 = vmor %vm1659_vm15, %vm1660_vm8  ;;  %vm1669_vm6 = vweird.f32 %v1642_v18  ;;  %1859 = vmatpush.msra.mxu2 %v5031_v8  ;;  %v5063_v8 = vld [vmem:[%s7844_s14 + $0xb0] sm:$0xff] }
 0xd60   :  { %v1655_v22 = vmul.f32 %v5559_v16, %v1654_v20  ;;  %v1652_v23 = vsel %vm1651_vm7, %v5557_v7, %v1648_v19  ;;  %v5024_v7 = vld [vmem:[%s7844_s14 + $0x48] sm:$0xff] }
 0xd61   :  { %v1673_v24 = vmul.f32 %v1652_v23, %v1622_v56  ;;  %1828 = vmatpush.msra.mxu1 %v5024_v7  ;;  %1860 = vmatpush.msra.mxu2 %v5030_v11  ;;  %v5050_v23 = vld [vmem:[%s7844_s14 + $0x38] sm:$0xff] }
 0xd62   :  { %v1656_v27 = vmul.f32 0.5, %v1655_v22  ;;  %v5064_v7 = vld [vmem:[%s7844_s14 + $0xb8] sm:$0xff] }
 0xd63   :  { %v1680_v29 = vmul.f32 %v5462_v21, %v1673_v24  ;;  %1829 = vmatpush.msra.mxu1 %v5023_v10  ;;  %v5057_v24 = vld [vmem:[%s7844_s14 + $0x78] sm:$0xff]  ;;  %v5061_v10 = vld [vmem:[%s7844_s14 + $0xa0] sm:$0xff] }
 0xd64   :  { %v1657_v30 = vsub.f32 1.5, %v1656_v27  ;;  %2037 = vmatpush.msrb.mxu2 %v5057_v24  ;;  %v5056_v27 = vld [vmem:[%s7844_s14 + $0x70] sm:$0xff] }
 0xd65   :  { %v5561_v31 = vpop.eup %5560  ;;  %v1687_v32 = vadd.f32 %v5463_v25, %v1680_v29  ;;  %2006 = vmatpush.msrb.mxu1 %v5050_v23 }
 0xd66   :  { %v1658_v33 = vmul.f32 %v5559_v16, %v1657_v30  ;;  %v1664_v35 = vmul.f32 %v5561_v31, %v1642_v18  ;;  %vm1670_vm4 = vweird.f32 %v5561_v31  ;;  %2038 = vmatpush.msrb.mxu2 %v5056_v27 }
 0xd67   :  { %v1690_v36 = vsel %vm701_vm12, %v1687_v32, 0.0  ;;  %vm1671_vm7 = vmor %vm1669_vm6, %vm1670_vm4 }
 0xd68   :  { %v1665_v37 = vmul.f32 %v5561_v31, %v1664_v35  ;;  %1691 = vadd.xlane.f32.xlu0 %v1690_v36  ;;  %v1662_v39 = vsel %vm1661_vm2, %v5559_v16, %v1658_v33  ;;  %v5047_v36 = vld [vmem:[%s7844_s14 + $0x20] sm:$0xff] }
 0xd69   :  { %v1674_v40 = vmul.f32 %v1662_v39, %v1623_v59 }
 0xd6a   :  { %v1666_v41 = vmul.f32 0.5, %v1665_v37  ;;  %v5054_v37 = vld [vmem:[%s7844_s14 + $0x60] sm:$0xff] }
 0xd6b   :  { %v1681_v42 = vmul.f32 %v5462_v21, %v1674_v40 }
 0xd6c   :  { %v1667_v44 = vsub.f32 1.5, %v1666_v41 }
 0xd6d   :  { %v1688_v45 = vadd.f32 %v5463_v25, %v1681_v42 }
 0xd6e   :  { %v1668_v46 = vmul.f32 %v5561_v31, %v1667_v44  ;;  %v5464_v44 = vld [vmem:[#allocation30] ss:$0 sm:$0xff] }
 0xd6f   :  { %v1693_v47 = vsel %vm701_vm12, %v1688_v45, 0.0 }
 0xd70   :  { %1694 = vadd.xlane.f32.xlu1 %v1693_v47  ;;  %v1672_v49 = vsel %vm1671_vm7, %v5561_v31, %v1668_v46  ;;  %v5048_v31 = vld [vmem:[%s7844_s14 + $0x28] sm:$0xff] }
 0xd71   :  { %v1675_v50 = vmul.f32 %v1672_v49, %v1624_v34  ;;  %v5465_v47 = vld [vmem:[#allocation31] ss:$0 sm:$0xff] }
 0xd73   :  { %v1682_v52 = vmul.f32 %v5462_v21, %v1675_v50 }
 0xd75   :  { %v1689_v43 = vadd.f32 %v5463_v25, %v1682_v52  ;;  %v5049_v25 = vld [vmem:[%s7844_s14 + $0x30] sm:$0xff] }
 0xd76   :  { %2007 = vmatpush.msrb.mxu1 %v5049_v25 }
 0xd77   :  { %v1696_v53 = vsel %vm708_vm13, %v1689_v43, 0.0 }
 0xd78   :  { %1697 = vadd.xlane.f32.xlu2 %v1696_v53  ;;  %2008 = vmatpush.msrb.mxu1 %v5048_v31 }
 0xd7a   :  { %2009 = vmatpush.msrb.mxu1 %v5047_v36 }
 0xddb   :  { %v1692_v54 = vpop.xlane.xlu0 %1691 }
 0xddc   :  { %v1699_v48 = vmul.f32 %v1692_v54, %v6864_v28 }
 0xdde   :  { %v7077_v55 = vsub.f32 %v1687_v32, %v1699_v48  ;;  %v5055_v32 = vld [vmem:[%s7844_s14 + $0x68] sm:$0xff] }
 0xddf   :  { %2039 = vmatpush.msrb.mxu2 %v5055_v32 }
 0xde0   :  { %v1705_v38 = vmul.f32 %v7077_v55, %v7077_v55 }
 0xde1   :  { %2040 = vmatpush.msrb.mxu2 %v5054_v37 }
 0xde2   :  { %v1708_v56 = vsel %vm701_vm12, %v1705_v38, 0.0 }
 0xde3   :  { %v1695_v57 = vpop.xlane.xlu1 %1694  ;;  %1709 = vadd.xlane.f32.xlu0 %v1708_v56 }
 0xde4   :  { %v1700_v26 = vmul.f32 %v1695_v57, %v6864_v28 }
 0xde6   :  { %v7083_v58 = vsub.f32 %v1688_v45, %v1700_v26 }
 0xde8   :  { %v1706_v51 = vmul.f32 %v7083_v58, %v7083_v58 }
 0xdea   :  { %v1711_v59 = vsel %vm701_vm12, %v1706_v51, 0.0 }
 0xdeb   :  { %1712 = vadd.xlane.f32.xlu1 %v1711_v59  ;;  %v1698_v60 = vpop.xlane.xlu2 %1697 }
 0xdec   :  { %v1701_v61 = vmul.f32 %v1698_v60, %v6864_v28 }
 0xdee   :  { %v7089_v17 = vsub.f32 %v1689_v43, %v1701_v61 }
 0xdf0   :  { %v1707_v62 = vmul.f32 %v7089_v17, %v7089_v17 }
 0xdf2   :  { %v1714_v34 = vsel %vm708_vm13, %v1707_v62, 0.0 }
 0xdf3   :  { %1715 = vadd.xlane.f32.xlu2 %v1714_v34 }
 0xe56   :  { %v1710_v13 = vpop.xlane.xlu0 %1709 }
 0xe57   :  { %v1717_v14 = vmul.f32 %v1710_v13, %v6864_v28 }
 0xe59   :  { %v1720_v15 = vadd.f32 1e-05, %v1717_v14 }
 0xe5b   :  { %5562 = vrsqrt.f32 %v1720_v15  ;;  %vm1729_vm15 = vweird.f32 %v1720_v15 }
 0xe5e   :  { %v1713_v16 = vpop.xlane.xlu1 %1712 }
 0xe5f   :  { %v1718_v18 = vmul.f32 %v1713_v16, %v6864_v28 }
 0xe61   :  { %v5563_v19 = vpop.eup %5562  ;;  %v1721_v20 = vadd.f32 1e-05, %v1718_v18 }
 0xe62   :  { %v1724_v21 = vmul.f32 %v5563_v19, %v1720_v15  ;;  %vm1730_vm8 = vweird.f32 %v5563_v19 }
 0xe63   :  { %5564 = vrsqrt.f32 %v1721_v20  ;;  %vm1731_vm2 = vmor %vm1729_vm15, %vm1730_vm8  ;;  %vm1739_vm6 = vweird.f32 %v1721_v20 }
 0xe64   :  { %v1725_v22 = vmul.f32 %v5563_v19, %v1724_v21 }
 0xe66   :  { %v1726_v29 = vmul.f32 0.5, %v1725_v22  ;;  %v1716_v30 = vpop.xlane.xlu2 %1715 }
 0xe67   :  { %v1719_v33 = vmul.f32 %v1716_v30, %v6864_v28 }
 0xe68   :  { %v1727_v35 = vsub.f32 1.5, %v1726_v29 }
 0xe69   :  { %v5565_v39 = vpop.eup %5564  ;;  %v1722_v40 = vadd.f32 1e-05, %v1719_v33 }
 0xe6a   :  { %v1728_v41 = vmul.f32 %v5563_v19, %v1727_v35  ;;  %v1734_v42 = vmul.f32 %v5565_v39, %v1721_v20  ;;  %vm1740_vm4 = vweird.f32 %v5565_v39 }
 0xe6b   :  { %5566 = vrsqrt.f32 %v1722_v40  ;;  %vm1741_vm7 = vmor %vm1739_vm6, %vm1740_vm4  ;;  %vm1749_vm15 = vweird.f32 %v1722_v40  ;;  %vm2206_vm4 = vcmask 188416  }
 0xe6c   :  { %v1732_v45 = vsel %vm1731_vm2, %v5563_v19, %v1728_v41  ;;  %v1735_v46 = vmul.f32 %v5565_v39, %v1734_v42 }
 0xe6d   :  { %v1753_v49 = vmul.f32 %v1732_v45, %v7077_v55 }
 0xe6e   :  { %v1736_v50 = vmul.f32 0.5, %v1735_v46 }
 0xe6f   :  { %v1760_v52 = vmul.f32 %v5464_v44, %v1753_v49 }
 0xe70   :  { %v1737_v43 = vsub.f32 1.5, %v1736_v50 }
 0xe71   :  { %v5567_v53 = vpop.eup %5566  ;;  %v7118_v54 = vadd.f32 %v5465_v47, %v1760_v52 }
 0xe72   :  { %v1738_v48 = vmul.f32 %v5565_v39, %v1737_v43  ;;  %v1744_v38 = vmul.f32 %v5567_v53, %v1722_v40  ;;  %vm1750_vm8 = vweird.f32 %v5567_v53 }
 0xe73   :  { %5020 = vmatmul.msk.f32.vlgmr.msrb.gmra.mxu0 %vm701_vm12, %v7118_v54  ;;  %5027 = vmatmul.msk.f32.vlgmr.msra.gmra.mxu1 %vm701_vm12, %v7118_v54  ;;  %vm1751_vm2 = vmor %vm1749_vm15, %vm1750_vm8 }
 0xe74   :  { %v1742_v56 = vsel %vm1741_vm7, %v5565_v39, %v1738_v48  ;;  %v1745_v57 = vmul.f32 %v5567_v53, %v1744_v38  ;;  %5034 = vmatmul.msk.f32.vlgmr.msra.gmra.mxu2 %vm701_vm12, %v7118_v54 }
 0xe75   :  { %v1754_v55 = vmul.f32 %v1742_v56, %v7083_v58 }
 0xe76   :  { %v1746_v26 = vmul.f32 0.5, %v1745_v57 }
 0xe77   :  { %v1761_v51 = vmul.f32 %v5464_v44, %v1754_v55 }
 0xe78   :  { %v1747_v59 = vsub.f32 1.5, %v1746_v26 }
 0xe79   :  { %v1768_v60 = vadd.f32 %v5465_v47, %v1761_v51 }
 0xe7a   :  { %v1748_v61 = vmul.f32 %v5567_v53, %v1747_v59 }
 0xe7b   :  { %5021 = vmatmul.msk.f32.gmra.mxu0 %vm701_vm12, %v1768_v60  ;;  %5028 = vmatmul.msk.f32.gmra.mxu1 %vm701_vm12, %v1768_v60 }
 0xe7c   :  { %v1752_v62 = vsel %vm1751_vm2, %v5567_v53, %v1748_v61  ;;  %5035 = vmatmul.msk.f32.gmra.mxu2 %vm701_vm12, %v1768_v60 }
 0xe7d   :  { %v1755_v34 = vmul.f32 %v1752_v62, %v7089_v17 }
 0xe7f   :  { %v1762_v63 = vmul.f32 %v5464_v44, %v1755_v34 }
 0xe81   :  { %v1769_v0 = vadd.f32 %v5465_v47, %v1762_v63 }
 0xe83   :  { %5022 = vmatmul.msk.f32.gmra.mxu0 %vm701_vm12, %v1769_v0  ;;  %5029 = vmatmul.msk.f32.gmra.mxu1 %vm701_vm12, %v1769_v0 }
 0xe84   :  { %5036 = vmatmul.msk.f32.gmra.mxu2 %vm701_vm12, %v1769_v0 }
 0xe8b   :  { %5051 = vmatmul.msk.f32.vlgmr.msrb.gmra.mxu1 %vm701_vm12, %v7118_v54 }
 0xe8c   :  { %5058 = vmatmul.msk.f32.vlgmr.msrb.gmra.mxu2 %vm701_vm12, %v7118_v54 }
 0xe93   :  { %5052 = vmatmul.msk.f32.gmra.mxu1 %vm701_vm12, %v1768_v60 }
 0xe94   :  { %5059 = vmatmul.msk.f32.gmra.mxu2 %vm701_vm12, %v1768_v60 }
 0xe9b   :  { %5053 = vmatmul.msk.f32.gmra.mxu1 %vm701_vm12, %v1769_v0 }
 0xe9c   :  { %5060 = vmatmul.msk.f32.gmra.mxu2 %vm701_vm12, %v1769_v0 }
 0xef0   :  { %v1831_v58 = vpop.f32.mrf.mxu1  ;;  %v1800_v5 = vpop.f32.mrf.mxu0 }
 0xef7   :  { %v1862_v17 = vpop.f32.mrf.mxu2 }
 0xef8   :  { %v1834_v2 = vpop.f32.mrf.mxu1  ;;  %v1803_v13 = vpop.f32.mrf.mxu0 }
 0xeff   :  { %v1865_v3 = vpop.f32.mrf.mxu2 }
 0xf00   :  { %v1837_v4 = vpop.f32.mrf.mxu1  ;;  %v1806_v15 = vpop.f32.mrf.mxu0 }
 0xf01   :  { %5037 = vmatpush.xpose.msk.msra.mxu3 %vm986_vm9, %v1837_v4 }
 0xf05   :  { %5038 = vmatpush.xpose.msk.msra.mxu3 %vm986_vm9, %v1834_v2 }
 0xf07   :  { %v1868_v6 = vpop.f32.mrf.mxu2 }
 0xf08   :  { %5043 = vmatpush.msk.msra.mxu0 %vm1078_vm10, %v1868_v6  ;;  %v2011_v26 = vpop.f32.mrf.mxu1 }
 0xf09   :  { %5039 = vmatpush.xpose.msk.msra.mxu3 %vm986_vm9, %v1831_v58 }
 0xf0a   :  { %1977 = vmatpush.msra.mxu0 %v1865_v3 }
 0xf0c   :  { %1978 = vmatpush.msra.mxu0 %v1862_v17  ;;  %5040 = vmatmul.msk.f32.vlgmr.msra.gmra.mxu3 %vm986_vm9, %v1800_v5 }
 0xf0d   :  { %2068 = vmatpush.msrb.mxu3 %v5064_v7 }
 0xf0f   :  { %2069 = vmatpush.msrb.mxu3 %v5063_v8  ;;  %v2042_v11 = vpop.f32.mrf.mxu2 }
 0xf10   :  { %v2014_v51 = vpop.f32.mrf.mxu1 }
 0xf11   :  { %2070 = vmatpush.msrb.mxu3 %v5062_v9 }
 0xf13   :  { %2071 = vmatpush.msrb.mxu3 %v5061_v10 }
 0xf14   :  { %5041 = vmatmul.msk.f32.gmra.mxu3 %vm986_vm9, %v1803_v13 }
 0xf17   :  { %v2045_v14 = vpop.f32.mrf.mxu2 }
 0xf18   :  { %v2017_v59 = vpop.f32.mrf.mxu1 }
 0xf1c   :  { %5042 = vmatmul.msk.f32.gmra.mxu3 %vm986_vm9, %v1806_v15 }
 0xf1f   :  { %v2048_v16 = vpop.f32.mrf.mxu2 }
 0xf20   :  { %5068 = vmatpush.xpose.msk.msrb.mxu0 %vm986_vm9, %v2048_v16 }
 0xf24   :  { %5069 = vmatpush.xpose.msk.msrb.mxu0 %vm986_vm9, %v2045_v14  ;;  %5065 = vmatmul.msk.f32.vlgmr.msrb.gmra.mxu3 %vm701_vm12, %v7118_v54 }
 0xf28   :  { %5070 = vmatpush.xpose.msk.msrb.mxu0 %vm986_vm9, %v2042_v11 }
 0xf2c   :  { %5066 = vmatmul.msk.f32.gmra.mxu3 %vm701_vm12, %v1768_v60 }
 0xf34   :  { %5067 = vmatmul.msk.f32.gmra.mxu3 %vm701_vm12, %v1769_v0 }
 0xf8f   :  { %v1906_v18 = vpop.f32.mrf.mxu3 }
 0xf90   :  { %v1915_v19 = vmul.f32 0.20412415, %v1906_v18 }
 0xf92   :  { %v1918_v20 = vsel %vm1034_vm11, %v1915_v19, -inf }
 0xf93   :  { %1919 = vmax.xlane.f32.xlu0 %v1918_v20 }
 0xf97   :  { %v1909_v21 = vpop.f32.mrf.mxu3 }
 0xf98   :  { %v1916_v22 = vmul.f32 0.20412415, %v1909_v21 }
 0xf9a   :  { %v1921_v23 = vsel %vm1034_vm11, %v1916_v22, -inf }
 0xf9b   :  { %1922 = vmax.xlane.f32.xlu1 %v1921_v23 }
 0xf9f   :  { %v1912_v24 = vpop.f32.mrf.mxu3 }
 0xfa0   :  { %v1917_v25 = vmul.f32 0.20412415, %v1912_v24 }
 0xfa2   :  { %v1924_v27 = vsel %vm1041_vm14, %v1917_v25, -inf }
 0xfa3   :  { %1925 = vmax.xlane.f32.xlu2 %v1924_v27 }
 0xfa7   :  { %v2073_v29 = vpop.f32.mrf.mxu3 }
 0xfaf   :  { %v2076_v30 = vpop.f32.mrf.mxu3 }
 0xfb7   :  { %v2079_v31 = vpop.f32.mrf.mxu3 }
 0xfb8   :  { %5074 = vmatpush.msk.msra.mxu1 %vm1078_vm10, %v2079_v31 }
 0xfba   :  { %2188 = vmatpush.msra.mxu1 %v2076_v30 }
 0xfbc   :  { %2189 = vmatpush.msra.mxu1 %v2073_v29 }
0x1006   :  { %v1920_v32 = vpop.xlane.xlu0 %1919 }
0x1007   :  { %v1927_v33 = vsub.f32 %v1915_v19, %v1920_v32 }
0x1009   :  { %v1930_v35 = vmul.f32 1.442695, %v1927_v33 }
0x100b   :  { %5568 = vpow2.f32 %v1930_v35 }
0x100e   :  { %v1923_v36 = vpop.xlane.xlu1 %1922 }
0x100f   :  { %v1928_v37 = vsub.f32 %v1916_v22, %v1923_v36 }
0x1011   :  { %v5569_v39 = vpop.eup %5568  ;;  %v1932_v40 = vmul.f32 1.442695, %v1928_v37 }
0x1012   :  { %v1936_v41 = vsel %vm1034_vm11, %v5569_v39, 0.0 }
0x1013   :  { %5570 = vpow2.f32 %v1932_v40  ;;  %1937 = vadd.xlane.f32.xlu0 %v1936_v41 }
0x1016   :  { %v1926_v42 = vpop.xlane.xlu2 %1925 }
0x1017   :  { %v1929_v44 = vsub.f32 %v1917_v25, %v1926_v42 }
0x1019   :  { %v5571_v45 = vpop.eup %5570  ;;  %v1934_v46 = vmul.f32 1.442695, %v1929_v44 }
0x101a   :  { %v1939_v47 = vsel %vm1034_vm11, %v5571_v45, 0.0 }
0x101b   :  { %5572 = vpow2.f32 %v1934_v46  ;;  %1940 = vadd.xlane.f32.xlu1 %v1939_v47 }
0x1021   :  { %v5573_v49 = vpop.eup %5572 }
0x1022   :  { %v1942_v50 = vsel %vm1041_vm14, %v5573_v49, 0.0 }
0x1023   :  { %1943 = vadd.xlane.f32.xlu2 %v1942_v50 }
0x1086   :  { %v1938_v52 = vpop.xlane.xlu0 %1937 }
0x1087   :  { %5574 = vrcp.f32 %v1938_v52 }
0x108d   :  { %v5575_v43 = vpop.eup %5574 }
0x108e   :  { %v1948_v53 = vmul.f32 %v5575_v43, %v5569_v39  ;;  %v1941_v54 = vpop.xlane.xlu1 %1940 }
0x108f   :  { %5576 = vrcp.f32 %v1941_v54 }
0x1090   :  { %5044 = vmatmul.msk.f32.vlgmr.msra.gmra.mxu0 %vm1034_vm11, %v1948_v53 }
0x1095   :  { %v5577_v48 = vpop.eup %5576 }
0x1096   :  { %v1944_v38 = vpop.xlane.xlu2 %1943  ;;  %v1949_v56 = vmul.f32 %v5577_v48, %v5571_v45 }
0x1097   :  { %5578 = vrcp.f32 %v1944_v38 }
0x1098   :  { %5045 = vmatmul.msk.f32.gmra.mxu0 %vm1034_vm11, %v1949_v56 }
0x109d   :  { %v5579_v57 = vpop.eup %5578 }
0x109e   :  { %v1950_v55 = vmul.f32 %v5579_v57, %v5573_v49 }
0x10a0   :  { %5046 = vmatmul.msk.f32.gmra.mxu0 %vm1034_vm11, %v1950_v55 }
0x10a8   :  { %5071 = vmatmul.msk.f32.vlgmr.msrb.gmra.mxu0 %vm986_vm9, %v2011_v26 }
0x10b0   :  { %5072 = vmatmul.msk.f32.gmra.mxu0 %vm986_vm9, %v2014_v51 }
0x10b8   :  { %5073 = vmatmul.msk.f32.gmra.mxu0 %vm986_vm9, %v2017_v59 }
0x110d   :  { %v7173_v60 = vpop.f32.mrf.mxu0 }
0x110e   :  { %v2200_v20 = vsel %vm986_vm9, %v7173_v60, 0.0 }
0x1115   :  { %v7175_v61 = vpop.f32.mrf.mxu0 }
0x1116   :  { %v2203_v24 = vsel %vm986_vm9, %v7175_v61, 0.0 }
0x111d   :  { %v7177_v62 = vpop.f32.mrf.mxu0 }
0x111e   :  { %v2207_v41 = vsel %vm2206_vm4, %v7177_v62, 0.0 }
0x1125   :  { %v2117_v34 = vpop.f32.mrf.mxu0 }
0x1126   :  { %v2126_v63 = vmul.f32 0.20412415, %v2117_v34 }
0x1128   :  { %v2129_v0 = vsel %vm1034_vm11, %v2126_v63, -inf }
0x1129   :  { %2130 = vmax.xlane.f32.xlu0 %v2129_v0 }
0x112d   :  { %v2120_v58 = vpop.f32.mrf.mxu0 }
0x112e   :  { %v2127_v17 = vmul.f32 0.20412415, %v2120_v58 }
0x1130   :  { %v2132_v2 = vsel %vm1034_vm11, %v2127_v17, -inf }
0x1131   :  { %2133 = vmax.xlane.f32.xlu1 %v2132_v2 }
0x1135   :  { %v2123_v3 = vpop.f32.mrf.mxu0 }
0x1136   :  { %v2128_v4 = vmul.f32 0.20412415, %v2123_v3 }
0x1138   :  { %v2135_v5 = vsel %vm1041_vm14, %v2128_v4, -inf }
0x1139   :  { %2136 = vmax.xlane.f32.xlu2 %v2135_v5 }
0x119c   :  { %v2131_v6 = vpop.xlane.xlu0 %2130 }
0x119d   :  { %v2138_v7 = vsub.f32 %v2126_v63, %v2131_v6 }
0x119f   :  { %v2141_v8 = vmul.f32 1.442695, %v2138_v7 }
0x11a1   :  { %5580 = vpow2.f32 %v2141_v8 }
0x11a4   :  { %v2134_v9 = vpop.xlane.xlu1 %2133 }
0x11a5   :  { %v2139_v10 = vsub.f32 %v2127_v17, %v2134_v9  ;;  %v2320_v9 = vld [vmem:[#allocation36 + $0x10] sm:$0xff] }
0x11a6   :  { %2343 = vmatpush.msra.mxu2 %v2320_v9 }
0x11a7   :  { %v5581_v11 = vpop.eup %5580  ;;  %v2143_v13 = vmul.f32 1.442695, %v2139_v10  ;;  %v2384_v10 = vld [vmem:[#allocation36 + $0x28] sm:$0xff] }
0x11a8   :  { %v2147_v14 = vsel %vm1034_vm11, %v5581_v11, 0.0  ;;  %2407 = vmatpush.msra.mxu3 %v2384_v10 }
0x11a9   :  { %5582 = vpow2.f32 %v2143_v13  ;;  %2148 = vadd.xlane.f32.xlu0 %v2147_v14  ;;  %v2383_v13 = vld [vmem:[#allocation36 + $0x20] sm:$0xff]  ;;  %v2382_v14 = vld [vmem:[#allocation36 + $0x18] sm:$0xff] }
0x11aa   :  { %2408 = vmatpush.msra.mxu3 %v2383_v13 }
0x11ac   :  { %v2137_v15 = vpop.xlane.xlu2 %2136  ;;  %2409 = vmatpush.msra.mxu3 %v2382_v14  ;;  %v2457_v14 = vld [vmem:[%s7845_s23 + $0x38] sm:$0xff] }
0x11ad   :  { %v2140_v16 = vsub.f32 %v2128_v4, %v2137_v15  ;;  %2479 = vmatpush.msra.mxu0 %v2457_v14 }
0x11af   :  { %v5583_v18 = vpop.eup %5582  ;;  %v2145_v19 = vmul.f32 1.442695, %v2140_v16 }
0x11b0   :  { %v2150_v21 = vsel %vm1034_vm11, %v5583_v18, 0.0 }
0x11b1   :  { %5584 = vpow2.f32 %v2145_v19  ;;  %2201 = vadd.xlane.f32.xlu0 %v2200_v20  ;;  %2151 = vadd.xlane.f32.xlu1 %v2150_v21 }
0x11b7   :  { %v5585_v22 = vpop.eup %5584 }
0x11b8   :  { %v2153_v23 = vsel %vm1041_vm14, %v5585_v22, 0.0 }
0x11b9   :  { %2154 = vadd.xlane.f32.xlu2 %v2153_v23 }
0x11c1   :  { %2204 = vadd.xlane.f32.xlu2 %v2203_v24 }
0x121c   :  { %v2149_v25 = vpop.xlane.xlu0 %2148 }
0x121d   :  { %5586 = vrcp.f32 %v2149_v25 }
0x1223   :  { %v5587_v27 = vpop.eup %5586 }
0x1224   :  { %v2159_v29 = vmul.f32 %v5587_v27, %v5581_v11  ;;  %v2152_v30 = vpop.xlane.xlu1 %2151  ;;  %v2202_v46 = vpop.xlane.xlu0 %2201  ;;  %v2319_v11 = vld [vmem:[#allocation36 + $0x8] sm:$0xff] }
0x1225   :  { %5588 = vrcp.f32 %v2152_v30  ;;  %2344 = vmatpush.msra.mxu2 %v2319_v11 }
0x1226   :  { %5075 = vmatmul.msk.f32.vlgmr.msra.gmra.mxu1 %vm1034_vm11, %v2159_v29 }
0x122b   :  { %v5589_v31 = vpop.eup %5588 }
0x122c   :  { %v2155_v32 = vpop.xlane.xlu2 %2154  ;;  %v2160_v33 = vmul.f32 %v5589_v31, %v5583_v18 }
0x122d   :  { %5590 = vrcp.f32 %v2155_v32 }
0x122e   :  { %5076 = vmatmul.msk.f32.gmra.mxu1 %vm1034_vm11, %v2160_v33 }
0x1233   :  { %v5591_v35 = vpop.eup %5590 }
0x1234   :  { %v2161_v36 = vmul.f32 %v5591_v35, %v5585_v22  ;;  %v2205_v48 = vpop.xlane.xlu2 %2204 }
0x1236   :  { %5077 = vmatmul.msk.f32.gmra.mxu1 %vm1034_vm11, %v2161_v36 }
0x12a3   :  { %v2191_v37 = vpop.f32.mrf.mxu1 }
0x12a4   :  { %v2213_v39 = vsel %vm986_vm9, %v2191_v37, 0.0 }
0x12a5   :  { %2214 = vadd.xlane.f32.xlu1 %v2213_v39 }
0x12ab   :  { %v2194_v40 = vpop.f32.mrf.mxu1 }
0x12ac   :  { %v2216_v42 = vsel %vm986_vm9, %v2194_v40, 0.0 }
0x12ad   :  { %2208 = vadd.xlane.f32.xlu1 %v2207_v41  ;;  %2217 = vadd.xlane.f32.xlu0 %v2216_v42 }
0x12b3   :  { %v2197_v44 = vpop.f32.mrf.mxu1 }
0x12b4   :  { %v2219_v45 = vsel %vm2206_vm4, %v2197_v44, 0.0 }
0x12b5   :  { %2220 = vadd.xlane.f32.xlu2 %v2219_v45  ;;  %v5467_v45 = vld [vmem:[#allocation33 + $0x1] ss:$0 sm:$0xff] }
0x1318   :  { %v2215_v47 = vpop.xlane.xlu1 %2214 }
0x1319   :  { %v2222_v49 = vadd.f32 %v2215_v47, %v2202_v46 }
0x131b   :  { %v2225_v50 = vmul.f32 %v2222_v49, %v6836_v12 }
0x131d   :  { %v7198_v52 = vsub.f32 %v2191_v37, %v2225_v50  ;;  %v7201_v43 = vsub.f32 %v7173_v60, %v2225_v50 }
0x131f   :  { %v2249_v53 = vmul.f32 %v7198_v52, %v7198_v52  ;;  %v2234_v54 = vmul.f32 %v7201_v43, %v7201_v43 }
0x1320   :  { %v2218_v38 = vpop.xlane.xlu0 %2217  ;;  %v2209_v63 = vpop.xlane.xlu1 %2208 }
0x1321   :  { %v2223_v56 = vadd.f32 %v2218_v38, %v2205_v48  ;;  %v2252_v57 = vsel %vm986_vm9, %v2249_v53, 0.0  ;;  %v2237_v55 = vsel %vm986_vm9, %v2234_v54, 0.0  ;;  %v5468_v53 = vld [vmem:[#allocation34] ss:$0 sm:$0xff]  ;;  %v5469_v54 = vld [vmem:[#allocation34 + $0x1] ss:$0 sm:$0xff] }
0x1322   :  { %2253 = vadd.xlane.f32.xlu1 %v2252_v57  ;;  %2238 = vadd.xlane.f32.xlu0 %v2237_v55 }
0x1323   :  { %v2226_v26 = vmul.f32 %v2223_v56, %v6836_v12 }
0x1325   :  { %v7210_v51 = vsub.f32 %v2194_v40, %v2226_v26  ;;  %v7213_v59 = vsub.f32 %v7175_v61, %v2226_v26 }
0x1327   :  { %v2250_v60 = vmul.f32 %v7210_v51, %v7210_v51  ;;  %v2235_v34 = vmul.f32 %v7213_v59, %v7213_v59 }
0x1328   :  { %v2221_v0 = vpop.xlane.xlu2 %2220 }
0x1329   :  { %v2224_v58 = vadd.f32 %v2221_v0, %v2209_v63  ;;  %v2255_v17 = vsel %vm986_vm9, %v2250_v60, 0.0  ;;  %v2240_v2 = vsel %vm986_vm9, %v2235_v34, 0.0 }
0x132a   :  { %2256 = vadd.xlane.f32.xlu0 %v2255_v17  ;;  %2241 = vadd.xlane.f32.xlu2 %v2240_v2 }
0x132b   :  { %v2227_v3 = vmul.f32 %v2224_v58, %v6836_v12 }
0x132d   :  { %v7222_v4 = vsub.f32 %v2197_v44, %v2227_v3  ;;  %v7225_v61 = vsub.f32 %v7177_v62, %v2227_v3  ;;  %v2318_v62 = vld [vmem:[#allocation36] sm:$0xff]  ;;  %v5466_v44 = vld [vmem:[#allocation33] ss:$0 sm:$0xff] }
0x132e   :  { %2345 = vmatpush.msra.mxu2 %v2318_v62 }
0x132f   :  { %v2251_v5 = vmul.f32 %v7222_v4, %v7222_v4  ;;  %v2236_v6 = vmul.f32 %v7225_v61, %v7225_v61 }
0x1331   :  { %v2258_v7 = vsel %vm2206_vm4, %v2251_v5, 0.0  ;;  %v2243_v8 = vsel %vm2206_vm4, %v2236_v6, 0.0 }
0x1332   :  { %2259 = vadd.xlane.f32.xlu2 %v2258_v7  ;;  %2244 = vadd.xlane.f32.xlu1 %v2243_v8 }
0x1395   :  { %v2239_v15 = vpop.xlane.xlu0 %2238  ;;  %v2254_v16 = vpop.xlane.xlu1 %2253 }
0x1396   :  { %v2261_v18 = vadd.f32 %v2254_v16, %v2239_v15  ;;  %v2456_v15 = vld [vmem:[%s7845_s23 + $0x30] sm:$0xff]  ;;  %v2455_v16 = vld [vmem:[%s7845_s23 + $0x28] sm:$0xff] }
0x1397   :  { %2480 = vmatpush.msra.mxu0 %v2456_v15  ;;  %v5145_v15 = vld [vmem:[%s7840_s29 + $0x28] sm:$0x1] }
0x1398   :  { %v2264_v19 = vmul.f32 %v2261_v18, %v6836_v12  ;;  %v2452_v18 = vld [vmem:[%s7845_s23 + $0x10] sm:$0xff] }
0x1399   :  { %2481 = vmatpush.msra.mxu0 %v2455_v16  ;;  %v2761_v16 = vsel %vm7809_vm1, %v5145_v15, 0.0 }
0x139a   :  { %v2267_v20 = vadd.f32 1e-05, %v2264_v19  ;;  %v2451_v19 = vld [vmem:[%s7845_s23 + $0x8] sm:$0xff] }
0x139c   :  { %5592 = vrsqrt.f32 %v2267_v20  ;;  %vm2276_vm7 = vweird.f32 %v2267_v20 }
0x139d   :  { %v2257_v21 = vpop.xlane.xlu0 %2256  ;;  %v2242_v22 = vpop.xlane.xlu2 %2241 }
0x139e   :  { %v2262_v23 = vadd.f32 %v2257_v21, %v2242_v22  ;;  %v5470_v21 = vld [vmem:[#allocation37] ss:$0 sm:$0xff] }
0x13a0   :  { %v2265_v24 = vmul.f32 %v2262_v23, %v6836_v12 }
0x13a2   :  { %v5593_v25 = vpop.eup %5592  ;;  %v2268_v27 = vadd.f32 1e-05, %v2265_v24 }
0x13a3   :  { %v2271_v29 = vmul.f32 %v5593_v25, %v2267_v20  ;;  %vm2277_vm6 = vweird.f32 %v5593_v25  ;;  %v2450_v20 = vld [vmem:[%s7845_s23] sm:$0xff] }
0x13a4   :  { %5594 = vrsqrt.f32 %v2268_v27  ;;  %vm2278_vm8 = vmor %vm2276_vm7, %vm2277_vm6  ;;  %vm2286_vm2 = vweird.f32 %v2268_v27 }
0x13a5   :  { %v2272_v30 = vmul.f32 %v5593_v25, %v2271_v29  ;;  %v2245_v31 = vpop.xlane.xlu1 %2244  ;;  %v2260_v32 = vpop.xlane.xlu2 %2259 }
0x13a6   :  { %v2263_v33 = vadd.f32 %v2260_v32, %v2245_v31 }
0x13a7   :  { %v2273_v35 = vmul.f32 0.5, %v2272_v30 }
0x13a8   :  { %v2266_v36 = vmul.f32 %v2263_v33, %v6836_v12 }
0x13a9   :  { %v2274_v37 = vsub.f32 1.5, %v2273_v35 }
0x13aa   :  { %v5595_v39 = vpop.eup %5594  ;;  %v2269_v40 = vadd.f32 1e-05, %v2266_v36 }
0x13ab   :  { %v2275_v41 = vmul.f32 %v5593_v25, %v2274_v37  ;;  %v2281_v42 = vmul.f32 %v5595_v39, %v2268_v27  ;;  %vm2287_vm15 = vweird.f32 %v5595_v39 }
0x13ac   :  { %5596 = vrsqrt.f32 %v2269_v40  ;;  %vm2288_vm6 = vmor %vm2286_vm2, %vm2287_vm15 }
0x13ad   :  { %v2279_v46 = vsel %vm2278_vm8, %v5593_v25, %v2275_v41  ;;  %v2282_v47 = vmul.f32 %v5595_v39, %v2281_v42  ;;  %vm2296_vm8 = vweird.f32 %v2269_v40 }
0x13ae   :  { %v2301_v49 = vmul.f32 %v2279_v46, %v7201_v43  ;;  %v2362_v50 = vmul.f32 %v2279_v46, %v7198_v52 }
0x13af   :  { %v2283_v48 = vmul.f32 0.5, %v2282_v47 }
0x13b0   :  { %v2308_v38 = vmul.f32 %v5466_v44, %v2301_v49  ;;  %v2370_v56 = vmul.f32 %v5467_v45, %v2362_v50 }
0x13b1   :  { %v2284_v57 = vsub.f32 1.5, %v2283_v48 }
0x13b2   :  { %v5597_v55 = vpop.eup %5596  ;;  %v2315_v26 = vadd.f32 %v5468_v53, %v2308_v38  ;;  %v2378_v60 = vadd.f32 %v5469_v54, %v2370_v56 }
0x13b3   :  { %v2285_v34 = vmul.f32 %v5595_v39, %v2284_v57  ;;  %v2291_v63 = vmul.f32 %v5597_v55, %v2269_v40  ;;  %vm2297_vm7 = vweird.f32 %v5597_v55 }
0x13b4   :  { %5078 = vmatmul.msk.f32.vlgmr.msra.gmra.mxu2 %vm986_vm9, %v2315_v26  ;;  %5081 = vmatmul.msk.f32.vlgmr.msra.gmra.mxu3 %vm986_vm9, %v2378_v60  ;;  %vm2298_vm15 = vmor %vm2296_vm8, %vm2297_vm7 }
0x13b5   :  { %v2292_v43 = vmul.f32 %v5597_v55, %v2291_v63  ;;  %v2289_v52 = vsel %vm2288_vm6, %v5595_v39, %v2285_v34 }
0x13b6   :  { %v2302_v0 = vmul.f32 %v2289_v52, %v7213_v59  ;;  %v2363_v58 = vmul.f32 %v2289_v52, %v7210_v51 }
0x13b7   :  { %v2293_v17 = vmul.f32 0.5, %v2292_v43 }
0x13b8   :  { %v2309_v2 = vmul.f32 %v5466_v44, %v2302_v0  ;;  %v2371_v3 = vmul.f32 %v5467_v45, %v2363_v58 }
0x13b9   :  { %v2294_v5 = vsub.f32 1.5, %v2293_v17 }
0x13ba   :  { %v2316_v6 = vadd.f32 %v5468_v53, %v2309_v2  ;;  %v2379_v7 = vadd.f32 %v5469_v54, %v2371_v3  ;;  %v5471_v2 = vld [vmem:[#allocation39] ss:$0 sm:$0xff] }
0x13bb   :  { %v2295_v8 = vmul.f32 %v5597_v55, %v2294_v5 }
0x13bc   :  { %5079 = vmatmul.msk.f32.gmra.mxu2 %vm986_vm9, %v2316_v6  ;;  %5082 = vmatmul.msk.f32.gmra.mxu3 %vm986_vm9, %v2379_v7  ;;  %v5143_v7 = vld [vmem:[%s7840_s29 + $0x18] sm:$0xff] }
0x13bd   :  { %v2299_v59 = vsel %vm2298_vm15, %v5597_v55, %v2295_v8 }
0x13be   :  { %v2303_v51 = vmul.f32 %v2299_v59, %v7225_v61  ;;  %v2364_v9 = vmul.f32 %v2299_v59, %v7222_v4  ;;  %v2454_v61 = vld [vmem:[%s7845_s23 + $0x20] sm:$0xff]  ;;  %v2453_v4 = vld [vmem:[%s7845_s23 + $0x18] sm:$0xff] }
0x13bf   :  { %2482 = vmatpush.msra.mxu0 %v2454_v61 }
0x13c0   :  { %v2310_v10 = vmul.f32 %v5466_v44, %v2303_v51  ;;  %v2372_v11 = vmul.f32 %v5467_v45, %v2364_v9  ;;  %v2755_v51 = vsel %vm567_vm0, %v5143_v7, 0.0 }
0x13c1   :  { %2483 = vmatpush.msra.mxu0 %v2453_v4 }
0x13c2   :  { %v2317_v13 = vadd.f32 %v5468_v53, %v2310_v10  ;;  %v2380_v62 = vadd.f32 %v5469_v54, %v2372_v11  ;;  %v5144_v10 = vld [vmem:[%s7840_s29 + $0x20] sm:$0xff] }
0x13c3   :  { %2484 = vmatpush.msra.mxu0 %v2452_v18 }
0x13c4   :  { %5080 = vmatmul.msk.f32.gmra.mxu2 %vm986_vm9, %v2317_v13  ;;  %5083 = vmatmul.msk.f32.gmra.mxu3 %vm986_vm9, %v2380_v62  ;;  %v2758_v62 = vsel %vm567_vm0, %v5144_v10, 0.0 }
0x13c5   :  { %2485 = vmatpush.msra.mxu0 %v2451_v19 }
0x13c7   :  { %2486 = vmatpush.msra.mxu0 %v2450_v20 }
0x1437   :  { %v2347_v22 = vpop.f32.mrf.mxu2  ;;  %v2411_v23 = vpop.f32.mrf.mxu3 }
0x1438   :  { %v2359_v24 = vadd.f32 %v5470_v21, %v2347_v22 }
0x143a   :  { %v2420_v25 = vadd.f32 %v2411_v23, %v2359_v24 }
0x143c   :  { %v2426_v27 = vmul.f32 0.044715, %v2420_v25  ;;  %v2423_v54 = vmul.f32 0.5, %v2420_v25 }
0x143e   :  { %v2429_v29 = vmul.f32 %v2426_v27, %v2420_v25 }
0x143f   :  { %v2350_v30 = vpop.f32.mrf.mxu2  ;;  %v2414_v31 = vpop.f32.mrf.mxu3 }
0x1440   :  { %v2432_v32 = vmul.f32 %v2429_v29, %v2420_v25  ;;  %v2360_v33 = vadd.f32 %v5470_v21, %v2350_v30 }
0x1442   :  { %v2435_v35 = vadd.f32 %v2432_v32, %v2420_v25  ;;  %v2421_v36 = vadd.f32 %v2414_v31, %v2360_v33 }
0x1444   :  { %v2438_v37 = vmul.f32 0.7978845, %v2435_v35  ;;  %v2427_v39 = vmul.f32 0.044715, %v2421_v36  ;;  %v2424_v34 = vmul.f32 0.5, %v2421_v36 }
0x1446   :  { %5598 = vtanh.f32 %v2438_v37  ;;  %v2430_v40 = vmul.f32 %v2427_v39, %v2421_v36 }
0x1447   :  { %v2353_v41 = vpop.f32.mrf.mxu2  ;;  %v2417_v45 = vpop.f32.mrf.mxu3 }
0x1448   :  { %v2361_v42 = vadd.f32 %v5470_v21, %v2353_v41  ;;  %v2433_v44 = vmul.f32 %v2430_v40, %v2421_v36 }
0x144a   :  { %v2422_v46 = vadd.f32 %v2417_v45, %v2361_v42  ;;  %v2436_v47 = vadd.f32 %v2433_v44, %v2421_v36 }
0x144c   :  { %v5599_v49 = vpop.eup %5598  ;;  %v2428_v50 = vmul.f32 0.044715, %v2422_v46  ;;  %v2439_v53 = vmul.f32 0.7978845, %v2436_v47  ;;  %v2425_v0 = vmul.f32 0.5, %v2422_v46 }
0x144d   :  { %v2444_v48 = vadd.f32 1.0, %v5599_v49 }
0x144e   :  { %5600 = vtanh.f32 %v2439_v53  ;;  %v2431_v38 = vmul.f32 %v2428_v50, %v2422_v46 }
0x144f   :  { %v2447_v56 = vmul.f32 %v2444_v48, %v2423_v54  ;;  %v5121_v54 = vld [vmem:[#allocation43 + $0x40] sm:$0xf]  ;;  %v5364_v48 = vld [vmem:[#allocation43 + $0x4c] sm:$0xf0] }
0x1450   :  { %v2434_v57 = vmul.f32 %v2431_v38, %v2422_v46  ;;  %v5362_v38 = vld [vmem:[#allocation43 + $0x44] sm:$0xf] }
0x1451   :  { %5084 = vmatmul.msk.f32.vlgmr.msra.gmra.mxu0 %vm1571_vm3, %v2447_v56  ;;  %v5122_v56 = vor.u32 %v5364_v48, %v5121_v54 }
0x1452   :  { %v2437_v55 = vadd.f32 %v2434_v57, %v2422_v46  ;;  %v5123_v57 = vld [vmem:[#allocation43 + $0x50] sm:$0xf0] }
0x1453   :  { %2672 = vmatpush.bf16.msrb.mxu1 %v5122_v56 }
0x1454   :  { %v5601_v26 = vpop.eup %5600  ;;  %v2440_v60 = vmul.f32 0.7978845, %v2437_v55  ;;  %v5129_v55 = vld [vmem:[#allocation43 + $0x48] sm:$0xf] }
0x1455   :  { %v2445_v63 = vadd.f32 1.0, %v5601_v26  ;;  %v5365_v26 = vld [vmem:[#allocation43 + $0x54] sm:$0xf0] }
0x1456   :  { %5602 = vtanh.f32 %v2440_v60  ;;  %v5126_v60 = vor.u32 %v5362_v38, %v5123_v57  ;;  %v2839_v57 = vld [vmem:[%s7841_s8 + $0x20] sm:$0xff] }
0x1457   :  { %v2448_v43 = vmul.f32 %v2445_v63, %v2424_v34  ;;  %v5130_v34 = vor.u32 %v5365_v26, %v5129_v55  ;;  %v5363_v63 = vld [vmem:[#allocation43 + $0x4c] sm:$0xf]  ;;  %v2838_v55 = vld [vmem:[%s7841_s8 + $0x18] sm:$0xff] }
0x1458   :  { %2690 = vmatpush.bf16.msrb.mxu2 %v5126_v60 }
0x1459   :  { %5085 = vmatmul.msk.f32.gmra.mxu0 %vm1571_vm3, %v2448_v43  ;;  %v5131_v43 = vld [vmem:[#allocation43 + $0x58] sm:$0xf0]  ;;  %2708 = vmatpush.bf16.msrb.mxu3 %v5130_v34 }
0x145c   :  { %v5603_v52 = vpop.eup %5602 }
0x145d   :  { %v2446_v58 = vadd.f32 1.0, %v5603_v52  ;;  %v5134_v52 = vor.u32 %v5363_v63, %v5131_v43  ;;  %v2837_v63 = vld [vmem:[%s7841_s8 + $0x10] sm:$0xff]  ;;  %v5472_v43 = vld [vmem:[#allocation40] ss:$0 sm:$0xff] }
0x145f   :  { %v2449_v17 = vmul.f32 %v2446_v58, %v2425_v0  ;;  %v5105_v0 = vld [vmem:[#allocation43 + $0x20] sm:$0xf]  ;;  %v5360_v58 = vld [vmem:[#allocation43 + $0x2c] sm:$0xf0]  ;;  %2726 = vmatpush.bf16.msrb.mxu0 %v5134_v52 }
0x1461   :  { %5086 = vmatmul.msk.f32.gmra.mxu0 %vm1571_vm3, %v2449_v17  ;;  %v5358_v17 = vld [vmem:[#allocation43 + $0x24] sm:$0xf] }
0x14ce   :  { %v2488_v3 = vpop.f32.mrf.mxu0 }
0x14cf   :  { %v2489_v5 = vadd.f32 %v5471_v2, %v2488_v3  ;;  %v5106_v3 = vor.u32 %v5360_v58, %v5105_v0  ;;  %v2836_v58 = vld [vmem:[%s7841_s8 + $0x8] sm:$0xff] }
0x14d1   :  { %v2497_v6 = vsel %vm567_vm0, %v2489_v5, 0.0  ;;  %2673 = vmatpush.bf16.msrb.mxu1 %v5106_v3 }
0x14d2   :  { %2498 = vadd.xlane.f32.xlu0 %v2497_v6  ;;  %v5113_v6 = vld [vmem:[#allocation43 + $0x28] sm:$0xf] }
0x14d6   :  { %v2491_v8 = vpop.f32.mrf.mxu0 }
0x14d7   :  { %v2492_v59 = vadd.f32 %v5471_v2, %v2491_v8 }
0x14d9   :  { %v2500_v9 = vsel %vm567_vm0, %v2492_v59, 0.0 }
0x14da   :  { %2501 = vadd.xlane.f32.xlu1 %v2500_v9  ;;  %2756 = vadd.xlane.f32.xlu0 %v2755_v51  ;;  %v5359_v9 = vld [vmem:[#allocation43 + $0x2c] sm:$0xf] }
0x14de   :  { %v2494_v11 = vpop.f32.mrf.mxu0 }
0x14df   :  { %v2495_v13 = vadd.f32 %v5471_v2, %v2494_v11 }
0x14e1   :  { %v2503_v14 = vsel %vm7809_vm1, %v2495_v13, 0.0 }
0x14e2   :  { %2759 = vadd.xlane.f32.xlu1 %v2758_v62  ;;  %2504 = vadd.xlane.f32.xlu2 %v2503_v14  ;;  %v5089_v62 = vld [vmem:[#allocation43] sm:$0xf]  ;;  %v5356_v14 = vld [vmem:[#allocation43 + $0xc] sm:$0xf0] }
0x14ea   :  { %2762 = vadd.xlane.f32.xlu1 %v2761_v16  ;;  %v5090_v16 = vor.u32 %v5356_v14, %v5089_v62 }
0x14ec   :  { %2674 = vmatpush.bf16.msrb.mxu1 %v5090_v16 }
0x1545   :  { %v2499_v61 = vpop.xlane.xlu0 %2498 }
0x1546   :  { %v2506_v4 = vmul.f32 %v2499_v61, %v6836_v12  ;;  %v5091_v61 = vld [vmem:[#allocation43 + $0x10] sm:$0xf0] }
0x1548   :  { %v7269_v18 = vsub.f32 %v2489_v5, %v2506_v4  ;;  %v5107_v5 = vld [vmem:[#allocation43 + $0x30] sm:$0xf0]  ;;  %v5097_v4 = vld [vmem:[#allocation43 + $0x8] sm:$0xf] }
0x154a   :  { %v2512_v19 = vmul.f32 %v7269_v18, %v7269_v18 }
0x154c   :  { %v2515_v20 = vsel %vm567_vm0, %v2512_v19, 0.0  ;;  %v5357_v19 = vld [vmem:[#allocation43 + $0x14] sm:$0xf0] }
0x154d   :  { %v2502_v21 = vpop.xlane.xlu1 %2501  ;;  %2516 = vadd.xlane.f32.xlu2 %v2515_v20  ;;  %v2757_v22 = vpop.xlane.xlu0 %2756 }
0x154e   :  { %v2507_v23 = vmul.f32 %v2502_v21, %v6836_v12  ;;  %v2764_v24 = vmul.f32 %v2757_v22, %v6836_v12  ;;  %v5098_v21 = vor.u32 %v5357_v19, %v5097_v4  ;;  %v5355_v22 = vld [vmem:[#allocation43 + $0xc] sm:$0xf] }
0x1550   :  { %v7276_v25 = vsub.f32 %v2492_v59, %v2507_v23  ;;  %v7278_v27 = vsub.f32 %v5143_v7, %v2764_v24  ;;  %v5361_v7 = vld [vmem:[#allocation43 + $0x34] sm:$0xf0]  ;;  %v5110_v59 = vor.u32 %v5358_v17, %v5107_v5  ;;  %v5099_v23 = vld [vmem:[#allocation43 + $0x18] sm:$0xf0] }
0x1551   :  { %v5114_v51 = vor.u32 %v5361_v7, %v5113_v6  ;;  %v5102_v24 = vor.u32 %v5355_v22, %v5099_v23  ;;  %v2835_v6 = vld [vmem:[%s7841_s8] sm:$0xff] }
0x1552   :  { %v2513_v29 = vmul.f32 %v7276_v25, %v7276_v25  ;;  %v2770_v36 = vmul.f32 %v7278_v27, %v7278_v27  ;;  %2691 = vmatpush.bf16.msrb.mxu2 %v5110_v59  ;;  %v5473_v7 = vld [vmem:[#allocation42] ss:$0 sm:$0xff] }
0x1553   :  { %2709 = vmatpush.bf16.msrb.mxu3 %v5114_v51 }
0x1554   :  { %v2518_v30 = vsel %vm567_vm0, %v2513_v29, 0.0  ;;  %v2773_v40 = vsel %vm567_vm0, %v2770_v36, 0.0 }
0x1555   :  { %2519 = vadd.xlane.f32.xlu0 %v2518_v30  ;;  %v2760_v31 = vpop.xlane.xlu1 %2759  ;;  %v2505_v32 = vpop.xlane.xlu2 %2504 }
0x1556   :  { %v2765_v33 = vmul.f32 %v2760_v31, %v6836_v12  ;;  %v2508_v35 = vmul.f32 %v2505_v32, %v6836_v12 }
0x1557   :  { %2710 = vmatpush.bf16.msrb.mxu3 %v5098_v21 }
0x1558   :  { %v7287_v37 = vsub.f32 %v5144_v10, %v2765_v33  ;;  %v7289_v39 = vsub.f32 %v2495_v13, %v2508_v35  ;;  %v5115_v10 = vld [vmem:[#allocation43 + $0x38] sm:$0xf0] }
0x1559   :  { %v5118_v11 = vor.u32 %v5359_v9, %v5115_v10 }
0x155a   :  { %v2771_v41 = vmul.f32 %v7287_v37, %v7287_v37  ;;  %v2514_v42 = vmul.f32 %v7289_v39, %v7289_v39 }
0x155b   :  { %2727 = vmatpush.bf16.msrb.mxu0 %v5118_v11 }
0x155c   :  { %v2776_v44 = vsel %vm567_vm0, %v2771_v41, 0.0  ;;  %v2521_v45 = vsel %vm7809_vm1, %v2514_v42, 0.0  ;;  %v2840_v41 = vld [vmem:[%s7841_s8 + $0x28] sm:$0xff] }
0x155d   :  { %2774 = vadd.xlane.f32.xlu0 %v2773_v40  ;;  %2777 = vadd.xlane.f32.xlu1 %v2776_v44  ;;  %v2763_v46 = vpop.xlane.xlu1 %2762 }
0x155e   :  { %v2766_v47 = vmul.f32 %v2763_v46, %v6836_v12  ;;  %2522 = vadd.xlane.f32.xlu2 %v2521_v45  ;;  %2864 = vmatpush.msra.mxu1 %v2840_v41 }
0x155f   :  { %2728 = vmatpush.bf16.msrb.mxu0 %v5102_v24 }
0x1560   :  { %v7299_v49 = vsub.f32 %v5145_v15, %v2766_v47  ;;  %v5354_v15 = vld [vmem:[#allocation43 + $0x4] sm:$0xf]  ;;  %2865 = vmatpush.msra.mxu1 %v2839_v57 }
0x1561   :  { %v5094_v20 = vor.u32 %v5354_v15, %v5091_v61 }
0x1562   :  { %v2772_v50 = vmul.f32 %v7299_v49, %v7299_v49  ;;  %2866 = vmatpush.msra.mxu1 %v2838_v55 }
0x1563   :  { %2692 = vmatpush.bf16.msrb.mxu2 %v5094_v20 }
0x1564   :  { %v2779_v53 = vsel %vm7809_vm1, %v2772_v50, 0.0  ;;  %2867 = vmatpush.msra.mxu1 %v2837_v63 }
0x1566   :  { %2780 = vadd.xlane.f32.xlu2 %v2779_v53  ;;  %2868 = vmatpush.msra.mxu1 %v2836_v58 }
0x1568   :  { %2869 = vmatpush.msra.mxu1 %v2835_v6 }
0x15c0   :  { %v2517_v2 = vpop.xlane.xlu2 %2516 }
0x15c1   :  { %v2524_v8 = vmul.f32 %v2517_v2, %v6836_v12 }
0x15c3   :  { %v2527_v13 = vadd.f32 1e-05, %v2524_v8 }
0x15c5   :  { %5604 = vrsqrt.f32 %v2527_v13  ;;  %vm2536_vm6 = vweird.f32 %v2527_v13 }
0x15c8   :  { %v2520_v29 = vpop.xlane.xlu0 %2519 }
0x15c9   :  { %v2525_v30 = vmul.f32 %v2520_v29, %v6836_v12 }
0x15cb   :  { %v5605_v31 = vpop.eup %5604  ;;  %v2528_v32 = vadd.f32 1e-05, %v2525_v30 }
0x15cc   :  { %v2531_v33 = vmul.f32 %v5605_v31, %v2527_v13  ;;  %vm2537_vm2 = vweird.f32 %v5605_v31 }
0x15cd   :  { %5606 = vrsqrt.f32 %v2528_v32  ;;  %vm2538_vm7 = vmor %vm2536_vm6, %vm2537_vm2  ;;  %vm2546_vm15 = vweird.f32 %v2528_v32 }
0x15ce   :  { %v2532_v35 = vmul.f32 %v5605_v31, %v2531_v33 }
0x15d0   :  { %v2533_v36 = vmul.f32 0.5, %v2532_v35  ;;  %v2775_v44 = vpop.xlane.xlu0 %2774  ;;  %v2778_v34 = vpop.xlane.xlu1 %2777 }
0x15d1   :  { %v2523_v40 = vpop.xlane.xlu2 %2522  ;;  %v2782_v54 = vmul.f32 %v2775_v44, %v6836_v12  ;;  %v2783_v2 = vmul.f32 %v2778_v34, %v6836_v12 }
0x15d2   :  { %v2534_v42 = vsub.f32 1.5, %v2533_v36  ;;  %v2526_v45 = vmul.f32 %v2523_v40, %v6836_v12 }
0x15d3   :  { %v5607_v46 = vpop.eup %5606  ;;  %v7311_v26 = vadd.f32 1e-05, %v2782_v54  ;;  %v2786_v9 = vadd.f32 1e-05, %v2783_v2  ;;  %v5475_v54 = vld [vmem:[#allocation4] ss:$0 sm:$0xff] }
0x15d4   :  { %v2535_v47 = vmul.f32 %v5605_v31, %v2534_v42  ;;  %v2541_v50 = vmul.f32 %v5607_v46, %v2528_v32  ;;  %v2529_v53 = vadd.f32 1e-05, %v2526_v45  ;;  %vm2547_vm8 = vweird.f32 %v5607_v46 }
0x15d5   :  { %vm2548_vm2 = vmor %vm2546_vm15, %vm2547_vm8  ;;  %vm2794_vm15 = vweird.f32 %v7311_v26 }
0x15d6   :  { %v2542_v48 = vmul.f32 %v5607_v46, %v2541_v50  ;;  %5608 = vrsqrt.f32 %v2529_v53  ;;  %v2539_v38 = vsel %vm2538_vm7, %v5605_v31, %v2535_v47  ;;  %vm2556_vm7 = vweird.f32 %v2529_v53 }
0x15d7   :  { %v2560_v52 = vmul.f32 %v2539_v38, %v7269_v18  ;;  %5610 = vrsqrt.f32 %v7311_v26 }
0x15d8   :  { %v2543_v56 = vmul.f32 0.5, %v2542_v48  ;;  %5612 = vrsqrt.f32 %v2786_v9 }
0x15d9   :  { %v2567_v8 = vmul.f32 %v5472_v43, %v2560_v52  ;;  %v2781_v11 = vpop.xlane.xlu2 %2780 }
0x15da   :  { %v2544_v60 = vsub.f32 1.5, %v2543_v56  ;;  %v2784_v16 = vmul.f32 %v2781_v11, %v6836_v12 }
0x15db   :  { %v2574_v62 = vadd.f32 %v5473_v7, %v2567_v8 }
0x15dc   :  { %v2545_v0 = vmul.f32 %v5607_v46, %v2544_v60  ;;  %v5609_v17 = vpop.eup %5608  ;;  %v2787_v21 = vadd.f32 1e-05, %v2784_v16 }
0x15dd   :  { %v2551_v5 = vmul.f32 %v5609_v17, %v2529_v53  ;;  %v5611_v13 = vpop.eup %5610  ;;  %vm2557_vm6 = vweird.f32 %v5609_v17 }
0x15de   :  { %v2549_v3 = vsel %vm2548_vm2, %v5607_v46, %v2545_v0  ;;  %v2789_v4 = vmul.f32 %v5611_v13, %v7311_v26  ;;  %vm2558_vm8 = vmor %vm2556_vm7, %vm2557_vm6  ;;  %v5613_v23 = vpop.eup %5612  ;;  %5614 = vrsqrt.f32 %v2787_v21  ;;  %vm2795_vm2 = vweird.f32 %v5611_v13  ;;  %v5474_v46 = vld [vmem:[#allocation2] ss:$0 sm:$0xff]  ;;  %v2591_v0 = vld [vmem:[#allocation45] sm:$0xf] }
0x15df   :  { %v2561_v59 = vmul.f32 %v2549_v3, %v7276_v25  ;;  %v2552_v18 = vmul.f32 %v5609_v17, %v2551_v5  ;;  %v2799_v30 = vmul.f32 %v5613_v23, %v2786_v9  ;;  %vm2796_vm6 = vmor %vm2794_vm15, %vm2795_vm2  ;;  %vm2804_vm7 = vweird.f32 %v2786_v9 }
0x15e0   :  { %v2790_v22 = vmul.f32 %v5611_v13, %v2789_v4  ;;  %vm2814_vm15 = vweird.f32 %v2787_v21  ;;  %v2596_v58 = vperm.slane %v2591_v0, 3  ;;  %v2595_v6 = vperm.slane %v2591_v0, 2 }
0x15e1   :  { %v2568_v51 = vmul.f32 %v5472_v43, %v2561_v59  ;;  %v2553_v10 = vmul.f32 0.5, %v2552_v18  ;;  %v2800_v33 = vmul.f32 %v5613_v23, %v2799_v30 }
0x15e2   :  { %v2791_v29 = vmul.f32 0.5, %v2790_v22 }
0x15e3   :  { %v2575_v14 = vadd.f32 %v5473_v7, %v2568_v51  ;;  %v2554_v15 = vsub.f32 1.5, %v2553_v10  ;;  %v2801_v41 = vmul.f32 0.5, %v2800_v33 }
0x15e4   :  { %v2792_v32 = vsub.f32 1.5, %v2791_v29  ;;  %v5615_v35 = vpop.eup %5614  ;;  %v5476_v29 = vld [vmem:[#allocation6] ss:$0 sm:$0xff] }
0x15e5   :  { %v2577_v61 = vpack.c.bf16 %v2575_v14, %v2574_v62  ;;  %v2555_v19 = vmul.f32 %v5609_v17, %v2554_v15  ;;  %v2809_v42 = vmul.f32 %v5615_v35, %v2787_v21  ;;  %v2802_v44 = vsub.f32 1.5, %v2801_v41 }
0x15e6   :  { %v2793_v40 = vmul.f32 %v5611_v13, %v2792_v32  ;;  %vm2815_vm2 = vweird.f32 %v5615_v35 }
0x15e7   :  { %5135 = vmatmul.msk.bf16.vlgmr.msrb.gmra.mxu1 %vm567_vm0, %v2577_v61  ;;  %5137 = vmatmul.msk.bf16.vlgmr.msrb.gmra.mxu2 %vm567_vm0, %v2577_v61  ;;  %v2559_v25 = vsel %vm2558_vm8, %v5609_v17, %v2555_v19  ;;  %v2810_v45 = vmul.f32 %v5615_v35, %v2809_v42  ;;  %vm2805_vm8 = vweird.f32 %v5613_v23  ;;  %v2803_v50 = vmul.f32 %v5613_v23, %v2802_v44 }
0x15e8   :  { %5139 = vmatmul.msk.bf16.vlgmr.msrb.gmra.mxu3 %vm567_vm0, %v2577_v61  ;;  %5141 = vmatmul.msk.bf16.vlgmr.msrb.gmra.mxu0 %vm567_vm0, %v2577_v61  ;;  %v2562_v20 = vmul.f32 %v2559_v25, %v7289_v39  ;;  %v2797_v39 = vsel %vm2796_vm6, %v5611_v13, %v2793_v40  ;;  %vm2806_vm1 = vmor %vm2804_vm7, %vm2805_vm8 }
0x15e9   :  { %v2818_v47 = vmul.f32 %v2797_v39, %v7278_v27  ;;  %v2811_v53 = vmul.f32 0.5, %v2810_v45  ;;  %v2807_v38 = vsel %vm2806_vm1, %v5613_v23, %v2803_v50  ;;  %vm2816_vm6 = vmor %vm2814_vm15, %vm2815_vm2 }
0x15ea   :  { %v2569_v24 = vmul.f32 %v5472_v43, %v2562_v20  ;;  %v2819_v55 = vmul.f32 %v2807_v38, %v7287_v37  ;;  %v2593_v37 = vperm.slane %v2591_v0, 0 }
0x15eb   :  { %v2825_v48 = vmul.f32 %v5474_v46, %v2818_v47  ;;  %v2812_v56 = vsub.f32 1.5, %v2811_v53 }
0x15ec   :  { %v2576_v31 = vadd.f32 %v5473_v7, %v2569_v24  ;;  %v2826_v60 = vmul.f32 %v5474_v46, %v2819_v55 }
0x15ed   :  { %v2832_v57 = vadd.f32 %v5475_v54, %v2825_v48  ;;  %v2813_v26 = vmul.f32 %v5615_v35, %v2812_v56 }
0x15ee   :  { %v2578_v36 = vpack.c.bf16 %v2576_v31, %v2576_v31  ;;  %v2833_v63 = vadd.f32 %v5475_v54, %v2826_v60 }
0x15ef   :  { %v2817_v34 = vsel %vm2816_vm6, %v5615_v35, %v2813_v26 }
0x15f0   :  { %v2820_v27 = vmul.f32 %v2817_v34, %v7299_v49  ;;  %v2594_v49 = vperm.slane %v2591_v0, 1 }
0x15f2   :  { %v2827_v43 = vmul.f32 %v5474_v46, %v2820_v27 }
0x15f4   :  { %v2834_v52 = vadd.f32 %v5475_v54, %v2827_v43 }
0x15f7   :  { %5136 = vmatmul.msk.bf16.gmra.mxu1 %vm567_vm0, %v2578_v36  ;;  %5138 = vmatmul.msk.bf16.gmra.mxu2 %vm567_vm0, %v2578_v36 }
0x15f8   :  { %5140 = vmatmul.msk.bf16.gmra.mxu3 %vm567_vm0, %v2578_v36  ;;  %5142 = vmatmul.msk.bf16.gmra.mxu0 %vm567_vm0, %v2578_v36 }
0x1607   :  { %5146 = vmatmul.msk.f32.vlgmr.msra.gmra.mxu1 %vm567_vm0, %v2832_v57 }
0x160f   :  { %5147 = vmatmul.msk.f32.gmra.mxu1 %vm567_vm0, %v2833_v63 }
0x1617   :  { %5148 = vmatmul.msk.f32.gmra.mxu1 %vm567_vm0, %v2834_v52 }
0x1664   :  { %v2676_v17 = vpop.f32.mrf.mxu1 }
0x1665   :  { %v2677_v2 = vadd.f32 %v2676_v17, %v2593_v37  ;;  %v2730_v3 = vpop.f32.mrf.mxu0 }
0x1666   :  { %v2731_v5 = vadd.f32 %v2730_v3, %v2596_v58 }
0x1667   :  { %2739 = vst [vmem:[%s6702_s21] sm:$0xff] %v2677_v2 }
0x1668   :  { %2742 = vst [vmem:[%s6702_s21 + $0x18] sm:$0xff] %v2731_v5 }
0x166a   :  { %v2694_v7 = vpop.f32.mrf.mxu2 }
0x166b   :  { %v2695_v8 = vadd.f32 %v2694_v7, %v2594_v49  ;;  %v2712_v59 = vpop.f32.mrf.mxu3 }
0x166c   :  { %v2713_v18 = vadd.f32 %v2712_v59, %v2595_v6  ;;  %v2678_v51 = vpop.f32.mrf.mxu1 }
0x166d   :  { %2740 = vst [vmem:[%s6702_s21 + $0x8] sm:$0xff] %v2695_v8  ;;  %v2679_v9 = vadd.f32 %v2678_v51, %v2593_v37  ;;  %v2732_v10 = vpop.f32.mrf.mxu0 }
0x166e   :  { %2741 = vst [vmem:[%s6702_s21 + $0x10] sm:$0xff] %v2713_v18  ;;  %v2733_v11 = vadd.f32 %v2732_v10, %v2596_v58 }
0x166f   :  { %2743 = vst [vmem:[%s6702_s21 + $0x20] sm:$0xff] %v2679_v9  ;;  %v5477_v9 = vld [vmem:[#allocation7] ss:$0 sm:$0xff] }
0x1670   :  { %2746 = vst [vmem:[%s6702_s21 + $0x38] sm:$0xff] %v2733_v11 }
0x1672   :  { %v2696_v13 = vpop.f32.mrf.mxu2 }
0x1673   :  { %v2697_v62 = vadd.f32 %v2696_v13, %v2594_v49  ;;  %v2714_v14 = vpop.f32.mrf.mxu3 }
0x1674   :  { %v2715_v15 = vadd.f32 %v2714_v14, %v2595_v6  ;;  %v2681_v16 = vpop.f32.mrf.mxu1 }
0x1675   :  { %2744 = vst [vmem:[%s6702_s21 + $0x28] sm:$0xff] %v2697_v62  ;;  %v2682_v61 = vadd.f32 %v2681_v16, %v2593_v37  ;;  %v2735_v4 = vpop.f32.mrf.mxu0  ;;  %v5478_v62 = vld [vmem:[#allocation9] ss:$0 sm:$0xff] }
0x1676   :  { %2745 = vst [vmem:[%s6702_s21 + $0x30] sm:$0xff] %v2715_v15  ;;  %v2736_v19 = vadd.f32 %v2735_v4, %v2596_v58 }
0x1677   :  { %2747 = vst [vmem:[%s6702_s21 + $0x40] sm:$0x1] %v2682_v61 }
0x1678   :  { %2750 = vst [vmem:[%s6702_s21 + $0x58] sm:$0x1] %v2736_v19 }
0x167a   :  { %v2699_v25 = vpop.f32.mrf.mxu2 }
0x167b   :  { %v2700_v20 = vadd.f32 %v2699_v25, %v2594_v49  ;;  %v2717_v21 = vpop.f32.mrf.mxu3 }
0x167c   :  { %v2718_v22 = vadd.f32 %v2717_v21, %v2595_v6  ;;  %v2683_v23 = vpop.f32.mrf.mxu1 }
0x167d   :  { %2748 = vst [vmem:[%s6702_s21 + $0x48] sm:$0x1] %v2700_v20  ;;  %v2737_v24 = vpop.f32.mrf.mxu0  ;;  %v5718_v20 = vld [vmem:[#allocation10] ss:$0 sm:$0xff] }
0x167e   :  { %2749 = vst [vmem:[%s6702_s21 + $0x50] sm:$0x1] %v2718_v22  ;;  %v5719_v24 = vld [vmem:[#allocation12] sm:$0xff] }
0x1682   :  { %v2701_v30 = vpop.f32.mrf.mxu2 }
0x1683   :  { %v2719_v31 = vpop.f32.mrf.mxu3 }
0x1684   :  { %v2871_v32 = vpop.f32.mrf.mxu1 }
0x1685   :  { %v2872_v33 = vadd.f32 %v5476_v29, %v2871_v32 }
0x1687   :  { %v2880_v35 = vsel %vm701_vm12, %v2872_v33, 0.0 }
0x1688   :  { %2881 = vadd.xlane.f32.xlu0 %v2880_v35 }
0x168c   :  { %v2874_v36 = vpop.f32.mrf.mxu1 }
0x168d   :  { %v2875_v40 = vadd.f32 %v5476_v29, %v2874_v36 }
0x168f   :  { %v2883_v41 = vsel %vm701_vm12, %v2875_v40, 0.0 }
0x1690   :  { %2884 = vadd.xlane.f32.xlu1 %v2883_v41 }
0x1694   :  { %v2877_v42 = vpop.f32.mrf.mxu1 }
0x1695   :  { %v2878_v39 = vadd.f32 %v5476_v29, %v2877_v42 }
0x1697   :  { %v2886_v44 = vsel %vm708_vm13, %v2878_v39, 0.0 }
0x1698   :  { %2887 = vadd.xlane.f32.xlu2 %v2886_v44 }
0x16fb   :  { %v2882_v45 = vpop.xlane.xlu0 %2881 }
0x16fc   :  { %v2889_v46 = vmul.f32 %v2882_v45, %v6864_v28 }
0x16fe   :  { %v2892_v47 = vsub.f32 %v2872_v33, %v2889_v46 }
0x1700   :  { %v2895_v50 = vmul.f32 %v2892_v47, %v2892_v47 }
0x1702   :  { %v2898_v53 = vsel %vm701_vm12, %v2895_v50, 0.0 }
0x1703   :  { %v2885_v54 = vpop.xlane.xlu1 %2884  ;;  %2899 = vadd.xlane.f32.xlu0 %v2898_v53 }
0x1704   :  { %v2890_v48 = vmul.f32 %v2885_v54, %v6864_v28 }
0x1706   :  { %v2893_v38 = vsub.f32 %v2875_v40, %v2890_v48 }
0x1708   :  { %v2896_v56 = vmul.f32 %v2893_v38, %v2893_v38 }
0x170a   :  { %v2901_v57 = vsel %vm701_vm12, %v2896_v56, 0.0 }
0x170b   :  { %2902 = vadd.xlane.f32.xlu1 %v2901_v57  ;;  %v2888_v55 = vpop.xlane.xlu2 %2887 }
0x170c   :  { %v2891_v26 = vmul.f32 %v2888_v55, %v6864_v28 }
0x170e   :  { %v7358_v60 = vsub.f32 %v2878_v39, %v2891_v26 }
0x1710   :  { %v2897_v34 = vmul.f32 %v7358_v60, %v7358_v60 }
0x1712   :  { %v2904_v27 = vsel %vm708_vm13, %v2897_v34, 0.0 }
0x1713   :  { %2905 = vadd.xlane.f32.xlu2 %v2904_v27 }
0x1776   :  { %v2900_v63 = vpop.xlane.xlu0 %2899 }
0x1777   :  { %v2907_v43 = vmul.f32 %v2900_v63, %v6864_v28 }
0x1779   :  { %v2910_v52 = vadd.f32 1e-05, %v2907_v43 }
0x177b   :  { %5616 = vrsqrt.f32 %v2910_v52  ;;  %vm2919_vm7 = vweird.f32 %v2910_v52 }
0x177e   :  { %v2903_v0 = vpop.xlane.xlu1 %2902 }
0x177f   :  { %v2908_v37 = vmul.f32 %v2903_v0, %v6864_v28 }
0x1781   :  { %v5617_v58 = vpop.eup %5616  ;;  %v2911_v17 = vadd.f32 1e-05, %v2908_v37 }
0x1782   :  { %v2914_v2 = vmul.f32 %v5617_v58, %v2910_v52  ;;  %vm2920_vm1 = vweird.f32 %v5617_v58 }
0x1783   :  { %5618 = vrsqrt.f32 %v2911_v17  ;;  %vm2921_vm8 = vmor %vm2919_vm7, %vm2920_vm1  ;;  %vm2929_vm2 = vweird.f32 %v2911_v17 }
0x1784   :  { %v2915_v3 = vmul.f32 %v5617_v58, %v2914_v2  ;;  %v5162_v2 = vld [vmem:[%s7842_s18 + $0x98] sm:$0xff] }
0x1785   :  { %3131 = vmatpush.msra.mxu0 %v5162_v2 }
0x1786   :  { %v2916_v5 = vmul.f32 0.5, %v2915_v3  ;;  %v2906_v49 = vpop.xlane.xlu2 %2905  ;;  %v5154_v3 = vld [vmem:[%s7842_s18 + $0x50] sm:$0xff] }
0x1787   :  { %v2909_v6 = vmul.f32 %v2906_v49, %v6864_v28  ;;  %v5161_v49 = vld [vmem:[%s7842_s18 + $0x90] sm:$0xff] }
0x1788   :  { %v2917_v7 = vsub.f32 1.5, %v2916_v5  ;;  %v3048_v5 = vld [vmem:[%s7842_s18 + $0x10] sm:$0xff]  ;;  %3132 = vmatpush.msra.mxu0 %v5161_v49 }
0x1789   :  { %v5619_v8 = vpop.eup %5618  ;;  %v2912_v59 = vadd.f32 1e-05, %v2909_v6  ;;  %v3047_v6 = vld [vmem:[%s7842_s18 + $0x8] sm:$0xff] }
0x178a   :  { %v2918_v18 = vmul.f32 %v5617_v58, %v2917_v7  ;;  %v2924_v51 = vmul.f32 %v5619_v8, %v2911_v17  ;;  %vm2930_vm15 = vweird.f32 %v5619_v8  ;;  %v3049_v17 = vld [vmem:[%s7842_s18 + $0x18] sm:$0xff]  ;;  %v5153_v7 = vld [vmem:[%s7842_s18 + $0x48] sm:$0xff] }
0x178b   :  { %5620 = vrsqrt.f32 %v2912_v59  ;;  %vm2931_vm6 = vmor %vm2929_vm2, %vm2930_vm15  ;;  %vm2939_vm7 = vweird.f32 %v2912_v59  ;;  %3071 = vmatpush.msra.mxu2 %v3049_v17 }
0x178c   :  { %v2922_v10 = vsel %vm2921_vm8, %v5617_v58, %v2918_v18  ;;  %v2925_v11 = vmul.f32 %v5619_v8, %v2924_v51  ;;  %v5155_v58 = vld [vmem:[%s7842_s18 + $0x58] sm:$0xff]  ;;  %v5152_v18 = vld [vmem:[%s7842_s18 + $0x40] sm:$0xff] }
0x178d   :  { %v2943_v13 = vmul.f32 %v2922_v10, %v2892_v47  ;;  %v5721_v47 = vld [vmem:[#allocation12 + $0x10] sm:$0x1]  ;;  %3101 = vmatpush.msra.mxu3 %v5155_v58  ;;  %3072 = vmatpush.msra.mxu2 %v3048_v5  ;;  %v5159_v51 = vld [vmem:[%s7842_s18 + $0x80] sm:$0xff] }
0x178e   :  { %v2926_v14 = vmul.f32 0.5, %v2925_v11 }
0x178f   :  { %v2950_v15 = vmul.f32 %v5477_v9, %v2943_v13  ;;  %3102 = vmatpush.msra.mxu3 %v5154_v3  ;;  %3073 = vmatpush.msra.mxu2 %v3047_v6 }
0x1790   :  { %v2927_v16 = vsub.f32 1.5, %v2926_v14 }
0x1791   :  { %v5621_v61 = vpop.eup %5620  ;;  %v2957_v4 = vadd.f32 %v5478_v62, %v2950_v15  ;;  %3103 = vmatpush.msra.mxu3 %v5153_v7 }
0x1792   :  { %v2928_v19 = vmul.f32 %v5619_v8, %v2927_v16  ;;  %v2934_v25 = vmul.f32 %v5621_v61, %v2912_v59  ;;  %vm2940_vm1 = vweird.f32 %v5621_v61  ;;  %v3046_v59 = vld [vmem:[%s7842_s18] sm:$0xff] }
0x1793   :  { %v2960_v21 = vsel %vm561_vm5, %v5718_v20, %v2957_v4  ;;  %vm2941_vm8 = vmor %vm2939_vm7, %vm2940_vm1  ;;  %3074 = vmatpush.msra.mxu2 %v3046_v59  ;;  %3104 = vmatpush.msra.mxu3 %v5152_v18  ;;  %v5179_v4 = vld [vmem:[%s7842_s18 + $0x38] sm:$0xff] }
0x1794   :  { %v2932_v22 = vsel %vm2931_vm6, %v5619_v8, %v2928_v19  ;;  %v2935_v23 = vmul.f32 %v5621_v61, %v2934_v25  ;;  %v7368_v29 = vadd.f32 %v5719_v24, %v2960_v21  ;;  %v5160_v8 = vld [vmem:[%s7842_s18 + $0x88] sm:$0xff]  ;;  %v5186_v19 = vld [vmem:[%s7842_s18 + $0x78] sm:$0xff]  ;;  %v5178_v25 = vld [vmem:[%s7842_s18 + $0x30] sm:$0xff] }
0x1795   :  { %v2944_v30 = vmul.f32 %v2932_v22, %v2893_v38  ;;  %3133 = vmatpush.msra.mxu0 %v5160_v8  ;;  %3279 = vmatpush.msrb.mxu3 %v5179_v4  ;;  %v5185_v21 = vld [vmem:[%s7842_s18 + $0x70] sm:$0xff]  ;;  %v5177_v24 = vld [vmem:[%s7842_s18 + $0x28] sm:$0xff]  ;;  %v5193_v18 = vld [vmem:[%s7842_s18 + $0xb8] sm:$0xff] }
0x1796   :  { %v2936_v31 = vmul.f32 0.5, %v2935_v23  ;;  %v2966_v32 = vsel %vm701_vm12, %v7368_v29, 0.0 }
0x1797   :  { %2967 = vadd.xlane.f32.xlu0 %v2966_v32  ;;  %v2951_v33 = vmul.f32 %v5477_v9, %v2944_v30  ;;  %3134 = vmatpush.msra.mxu0 %v5159_v51  ;;  %v5184_v30 = vld [vmem:[%s7842_s18 + $0x68] sm:$0xff]  ;;  %v5192_v51 = vld [vmem:[%s7842_s18 + $0xb0] sm:$0xff] }
0x1798   :  { %v2937_v35 = vsub.f32 1.5, %v2936_v31  ;;  %3280 = vmatpush.msrb.mxu3 %v5178_v25 }
0x1799   :  { %v2958_v36 = vadd.f32 %v5478_v62, %v2951_v33  ;;  %3309 = vmatpush.msrb.mxu0 %v5186_v19 }
0x179a   :  { %v2938_v40 = vmul.f32 %v5621_v61, %v2937_v35  ;;  %v5176_v35 = vld [vmem:[%s7842_s18 + $0x20] sm:$0xff]  ;;  %3281 = vmatpush.msrb.mxu3 %v5177_v24 }
0x179b   :  { %v7372_v41 = vadd.f32 %v5720_v1, %v2958_v36  ;;  %3310 = vmatpush.msrb.mxu0 %v5185_v21  ;;  %v5183_v36 = vld [vmem:[%s7842_s18 + $0x60] sm:$0xff] }
0x179c   :  { %v2942_v42 = vsel %vm2941_vm8, %v5621_v61, %v2938_v40  ;;  %3282 = vmatpush.msrb.mxu3 %v5176_v35 }
0x179d   :  { %v2945_v39 = vmul.f32 %v2942_v42, %v7358_v60  ;;  %v2969_v44 = vsel %vm701_vm12, %v7372_v41, 0.0  ;;  %3311 = vmatpush.msrb.mxu0 %v5184_v30  ;;  %v5479_v42 = vld [vmem:[#allocation13] ss:$0 sm:$0xff] }
0x179e   :  { %2970 = vadd.xlane.f32.xlu1 %v2969_v44 }
0x179f   :  { %v2952_v45 = vmul.f32 %v5477_v9, %v2945_v39  ;;  %3312 = vmatpush.msrb.mxu0 %v5183_v36 }
0x17a1   :  { %v2959_v46 = vadd.f32 %v5478_v62, %v2952_v45  ;;  %v5480_v45 = vld [vmem:[#allocation15] ss:$0 sm:$0xff] }
0x17a3   :  { %v7377_v50 = vadd.f32 %v5721_v47, %v2959_v46 }
0x17a5   :  { %v2972_v53 = vsel %vm708_vm13, %v7377_v50, 0.0 }
0x17a6   :  { %2973 = vadd.xlane.f32.xlu2 %v2972_v53 }
0x180a   :  { %v2968_v54 = vpop.xlane.xlu0 %2967 }
0x180b   :  { %v2975_v48 = vmul.f32 %v2968_v54, %v6864_v28 }
0x180d   :  { %v7383_v38 = vsub.f32 %v7368_v29, %v2975_v48 }
0x180f   :  { %v2981_v56 = vmul.f32 %v7383_v38, %v7383_v38 }
0x1811   :  { %v2971_v57 = vpop.xlane.xlu1 %2970  ;;  %v2984_v55 = vsel %vm701_vm12, %v2981_v56, 0.0 }
0x1812   :  { %v2976_v26 = vmul.f32 %v2971_v57, %v6864_v28  ;;  %2985 = vadd.xlane.f32.xlu0 %v2984_v55 }
0x1814   :  { %v7390_v60 = vsub.f32 %v7372_v41, %v2976_v26 }
0x1816   :  { %v2982_v34 = vmul.f32 %v7390_v60, %v7390_v60 }
0x1818   :  { %v2987_v27 = vsel %vm701_vm12, %v2982_v34, 0.0 }
0x1819   :  { %2988 = vadd.xlane.f32.xlu1 %v2987_v27  ;;  %v2974_v63 = vpop.xlane.xlu2 %2973 }
0x181a   :  { %v2977_v43 = vmul.f32 %v2974_v63, %v6864_v28 }
0x181c   :  { %v7397_v52 = vsub.f32 %v7377_v50, %v2977_v43 }
0x181e   :  { %v2983_v0 = vmul.f32 %v7397_v52, %v7397_v52 }
0x1820   :  { %v2990_v37 = vsel %vm708_vm13, %v2983_v0, 0.0 }
0x1821   :  { %2991 = vadd.xlane.f32.xlu2 %v2990_v37 }
0x1885   :  { %v2986_v9 = vpop.xlane.xlu0 %2985 }
0x1886   :  { %v2993_v10 = vmul.f32 %v2986_v9, %v6864_v28 }
0x1888   :  { %v2996_v11 = vadd.f32 1e-05, %v2993_v10  ;;  %v5191_v10 = vld [vmem:[%s7842_s18 + $0xa8] sm:$0xff] }
0x188a   :  { %5622 = vrsqrt.f32 %v2996_v11  ;;  %vm3005_vm15 = vweird.f32 %v2996_v11 }
0x188c   :  { %v2989_v13 = vpop.xlane.xlu1 %2988 }
0x188d   :  { %v2994_v62 = vmul.f32 %v2989_v13, %v6864_v28 }
0x188f   :  { %v2997_v14 = vadd.f32 1e-05, %v2994_v62 }
0x1890   :  { %v5623_v15 = vpop.eup %5622 }
0x1891   :  { %v3000_v16 = vmul.f32 %v5623_v15, %v2996_v11  ;;  %5624 = vrsqrt.f32 %v2997_v14  ;;  %vm3006_vm5 = vweird.f32 %v5623_v15  ;;  %vm3015_vm1 = vweird.f32 %v2997_v14  ;;  %v5190_v11 = vld [vmem:[%s7842_s18 + $0xa0] sm:$0xff] }
0x1892   :  { %vm3007_vm2 = vmor %vm3005_vm15, %vm3006_vm5 }
0x1893   :  { %v3001_v61 = vmul.f32 %v5623_v15, %v3000_v16 }
0x1894   :  { %v2992_v20 = vpop.xlane.xlu2 %2991 }
0x1895   :  { %v3002_v22 = vmul.f32 0.5, %v3001_v61  ;;  %v2995_v23 = vmul.f32 %v2992_v20, %v6864_v28 }
0x1897   :  { %v5625_v31 = vpop.eup %5624  ;;  %v3003_v32 = vsub.f32 1.5, %v3002_v22  ;;  %v2998_v33 = vadd.f32 1e-05, %v2995_v23 }
0x1898   :  { %v3010_v40 = vmul.f32 %v5625_v31, %v2997_v14  ;;  %vm3016_vm6 = vweird.f32 %v5625_v31 }
0x1899   :  { %v3004_v1 = vmul.f32 %v5623_v15, %v3003_v32  ;;  %5626 = vrsqrt.f32 %v2998_v33  ;;  %vm3017_vm7 = vmor %vm3015_vm1, %vm3016_vm6  ;;  %vm3025_vm5 = vweird.f32 %v2998_v33 }
0x189a   :  { %v3011_v39 = vmul.f32 %v5625_v31, %v3010_v40 }
0x189b   :  { %v3008_v44 = vsel %vm3007_vm2, %v5623_v15, %v3004_v1 }
0x189c   :  { %v3029_v46 = vmul.f32 %v3008_v44, %v7383_v38  ;;  %v3012_v47 = vmul.f32 0.5, %v3011_v39 }
0x189e   :  { %v3036_v53 = vmul.f32 %v5479_v42, %v3029_v46  ;;  %v3013_v54 = vsub.f32 1.5, %v3012_v47 }
0x189f   :  { %v5627_v48 = vpop.eup %5626 }
0x18a0   :  { %v7426_v56 = vadd.f32 %v5480_v45, %v3036_v53  ;;  %v3014_v57 = vmul.f32 %v5625_v31, %v3013_v54  ;;  %v3020_v55 = vmul.f32 %v5627_v48, %v2998_v33  ;;  %vm3026_vm8 = vweird.f32 %v5627_v48 }
0x18a1   :  { %vm3027_vm15 = vmor %vm3025_vm5, %vm3026_vm8 }
0x18a2   :  { %v3018_v26 = vsel %vm3017_vm7, %v5625_v31, %v3014_v57  ;;  %v3021_v34 = vmul.f32 %v5627_v48, %v3020_v55  ;;  %5149 = vmatmul.msk.f32.vlgmr.msra.gmra.mxu2 %vm701_vm12, %v7426_v56  ;;  %5156 = vmatmul.msk.f32.vlgmr.msra.gmra.mxu3 %vm701_vm12, %v7426_v56 }
0x18a3   :  { %v3030_v38 = vmul.f32 %v3018_v26, %v7390_v60  ;;  %5163 = vmatmul.msk.f32.vlgmr.msra.gmra.mxu0 %vm701_vm12, %v7426_v56 }
0x18a4   :  { %v3022_v27 = vmul.f32 0.5, %v3021_v34 }
0x18a5   :  { %v3037_v63 = vmul.f32 %v5479_v42, %v3030_v38 }
0x18a6   :  { %v3023_v43 = vsub.f32 1.5, %v3022_v27  ;;  %v3474_v27 = vld [vmem:[#allocation16 + $0x10] sm:$0xff] }
0x18a7   :  { %v3044_v0 = vadd.f32 %v5480_v45, %v3037_v63  ;;  %v3473_v63 = vld [vmem:[#allocation16 + $0x8] sm:$0xff]  ;;  %3497 = vmatpush.msra.mxu0 %v3474_v27 }
0x18a8   :  { %v3024_v37 = vmul.f32 %v5627_v48, %v3023_v43 }
0x18a9   :  { %3498 = vmatpush.msra.mxu0 %v3473_v63 }
0x18aa   :  { %v3028_v58 = vsel %vm3027_vm15, %v5627_v48, %v3024_v37  ;;  %5150 = vmatmul.msk.f32.gmra.mxu2 %vm701_vm12, %v3044_v0  ;;  %5157 = vmatmul.msk.f32.gmra.mxu3 %vm701_vm12, %v3044_v0 }
0x18ab   :  { %v3031_v17 = vmul.f32 %v3028_v58, %v7397_v52  ;;  %5164 = vmatmul.msk.f32.gmra.mxu0 %vm701_vm12, %v3044_v0 }
0x18ad   :  { %v3038_v60 = vmul.f32 %v5479_v42, %v3031_v17 }
0x18af   :  { %v3045_v2 = vadd.f32 %v5480_v45, %v3038_v60  ;;  %v3472_v60 = vld [vmem:[#allocation16] sm:$0xff] }
0x18b0   :  { %3499 = vmatpush.msra.mxu0 %v3472_v60 }
0x18b2   :  { %5151 = vmatmul.msk.f32.gmra.mxu2 %vm701_vm12, %v3045_v2  ;;  %5158 = vmatmul.msk.f32.gmra.mxu3 %vm701_vm12, %v3045_v2 }
0x18b3   :  { %5165 = vmatmul.msk.f32.gmra.mxu0 %vm701_vm12, %v3045_v2 }
0x18ba   :  { %5180 = vmatmul.msk.f32.vlgmr.msrb.gmra.mxu3 %vm701_vm12, %v7426_v56 }
0x18bb   :  { %5187 = vmatmul.msk.f32.vlgmr.msrb.gmra.mxu0 %vm701_vm12, %v7426_v56 }
0x18c2   :  { %5181 = vmatmul.msk.f32.gmra.mxu3 %vm701_vm12, %v3044_v0 }
0x18c3   :  { %5188 = vmatmul.msk.f32.gmra.mxu0 %vm701_vm12, %v3044_v0 }
0x18ca   :  { %5182 = vmatmul.msk.f32.gmra.mxu3 %vm701_vm12, %v3045_v2 }
0x18cb   :  { %5189 = vmatmul.msk.f32.gmra.mxu0 %vm701_vm12, %v3045_v2 }
0x1920   :  { %v3136_v52 = vpop.f32.mrf.mxu0 }
0x1925   :  { %v3106_v3 = vpop.f32.mrf.mxu3  ;;  %v3076_v59 = vpop.f32.mrf.mxu2 }
0x1928   :  { %v3139_v5 = vpop.f32.mrf.mxu0 }
0x192d   :  { %v3109_v49 = vpop.f32.mrf.mxu3  ;;  %v3079_v13 = vpop.f32.mrf.mxu2 }
0x1930   :  { %v3142_v6 = vpop.f32.mrf.mxu0 }
0x1931   :  { %5172 = vmatpush.msk.msrb.mxu2 %vm1078_vm10, %v3142_v6 }
0x1933   :  { %3251 = vmatpush.msrb.mxu2 %v3139_v5 }
0x1935   :  { %3252 = vmatpush.msrb.mxu2 %v3136_v52  ;;  %v3112_v7 = vpop.f32.mrf.mxu3  ;;  %v3082_v14 = vpop.f32.mrf.mxu2 }
0x1936   :  { %5166 = vmatpush.xpose.msk.msrb.mxu1 %vm986_vm9, %v3112_v7 }
0x1938   :  { %v3314_v8 = vpop.f32.mrf.mxu0 }
0x193a   :  { %5167 = vmatpush.xpose.msk.msrb.mxu1 %vm986_vm9, %v3109_v49 }
0x193d   :  { %v3284_v37 = vpop.f32.mrf.mxu3 }
0x193e   :  { %5168 = vmatpush.xpose.msk.msrb.mxu1 %vm986_vm9, %v3106_v3 }
0x1940   :  { %v3317_v9 = vpop.f32.mrf.mxu0 }
0x1941   :  { %5169 = vmatmul.msk.f32.vlgmr.msrb.gmra.mxu1 %vm986_vm9, %v3076_v59 }
0x1942   :  { %3339 = vmatpush.msra.mxu1 %v5193_v18 }
0x1944   :  { %3340 = vmatpush.msra.mxu1 %v5192_v51 }
0x1945   :  { %v3287_v58 = vpop.f32.mrf.mxu3 }
0x1946   :  { %3341 = vmatpush.msra.mxu1 %v5191_v10 }
0x1948   :  { %3342 = vmatpush.msra.mxu1 %v5190_v11  ;;  %v3320_v62 = vpop.f32.mrf.mxu0 }
0x1949   :  { %5197 = vmatpush.xpose.msk.msra.mxu2 %vm986_vm9, %v3320_v62  ;;  %5170 = vmatmul.msk.f32.gmra.mxu1 %vm986_vm9, %v3079_v13 }
0x194d   :  { %5198 = vmatpush.xpose.msk.msra.mxu2 %vm986_vm9, %v3317_v9  ;;  %v3290_v17 = vpop.f32.mrf.mxu3 }
0x1951   :  { %5199 = vmatpush.xpose.msk.msra.mxu2 %vm986_vm9, %v3314_v8  ;;  %5171 = vmatmul.msk.f32.gmra.mxu1 %vm986_vm9, %v3082_v14 }
0x1959   :  { %5194 = vmatmul.msk.f32.vlgmr.msra.gmra.mxu1 %vm701_vm12, %v7426_v56 }
0x1961   :  { %5195 = vmatmul.msk.f32.gmra.mxu1 %vm701_vm12, %v3044_v0 }
0x1969   :  { %5196 = vmatmul.msk.f32.gmra.mxu1 %vm701_vm12, %v3045_v2 }
0x19be   :  { %v3180_v15 = vpop.f32.mrf.mxu1 }
0x19bf   :  { %v3189_v16 = vmul.f32 0.20412415, %v3180_v15 }
0x19c1   :  { %v3192_v61 = vsel %vm1034_vm11, %v3189_v16, -inf }
0x19c2   :  { %3193 = vmax.xlane.f32.xlu0 %v3192_v61 }
0x19c6   :  { %v3183_v4 = vpop.f32.mrf.mxu1 }
0x19c7   :  { %v3190_v19 = vmul.f32 0.20412415, %v3183_v4 }
0x19c9   :  { %v3195_v25 = vsel %vm1034_vm11, %v3190_v19, -inf }
0x19ca   :  { %3196 = vmax.xlane.f32.xlu1 %v3195_v25 }
0x19ce   :  { %v3186_v20 = vpop.f32.mrf.mxu1 }
0x19cf   :  { %v3191_v21 = vmul.f32 0.20412415, %v3186_v20 }
0x19d1   :  { %v3198_v22 = vsel %vm1041_vm14, %v3191_v21, -inf }
0x19d2   :  { %3199 = vmax.xlane.f32.xlu2 %v3198_v22 }
0x19d6   :  { %v3344_v23 = vpop.f32.mrf.mxu1 }
0x19de   :  { %v3347_v24 = vpop.f32.mrf.mxu1 }
0x19e6   :  { %v3350_v30 = vpop.f32.mrf.mxu1 }
0x19e7   :  { %5203 = vmatpush.msk.msra.mxu3 %vm1078_vm10, %v3350_v30  ;;  %v3517_v30 = vld [vmem:[#allocation16 + $0x20] sm:$0xff] }
0x19e9   :  { %3459 = vmatpush.msra.mxu3 %v3347_v24  ;;  %v3518_v24 = vld [vmem:[#allocation16 + $0x28] sm:$0xff] }
0x19ea   :  { %3541 = vmatpush.msrb.mxu1 %v3518_v24 }
0x19eb   :  { %3460 = vmatpush.msra.mxu3 %v3344_v23 }
0x19ec   :  { %3542 = vmatpush.msrb.mxu1 %v3517_v30 }
0x1a35   :  { %v3194_v31 = vpop.xlane.xlu0 %3193 }
0x1a36   :  { %v3201_v32 = vsub.f32 %v3189_v16, %v3194_v31 }
0x1a38   :  { %v3204_v33 = vmul.f32 1.442695, %v3201_v32 }
0x1a3a   :  { %5628 = vpow2.f32 %v3204_v33 }
0x1a3d   :  { %v3197_v35 = vpop.xlane.xlu1 %3196 }
0x1a3e   :  { %v3202_v36 = vsub.f32 %v3190_v19, %v3197_v35 }
0x1a40   :  { %v5629_v40 = vpop.eup %5628  ;;  %v3206_v1 = vmul.f32 1.442695, %v3202_v36 }
0x1a41   :  { %v3210_v42 = vsel %vm1034_vm11, %v5629_v40, 0.0 }
0x1a42   :  { %5630 = vpow2.f32 %v3206_v1  ;;  %3211 = vadd.xlane.f32.xlu0 %v3210_v42 }
0x1a45   :  { %v3200_v39 = vpop.xlane.xlu2 %3199 }
0x1a46   :  { %v3203_v44 = vsub.f32 %v3191_v21, %v3200_v39 }
0x1a48   :  { %v5631_v45 = vpop.eup %5630  ;;  %v3208_v46 = vmul.f32 1.442695, %v3203_v44  ;;  %v3516_v44 = vld [vmem:[#allocation16 + $0x18] sm:$0xff] }
0x1a49   :  { %v3213_v47 = vsel %vm1034_vm11, %v5631_v45, 0.0  ;;  %3543 = vmatpush.msrb.mxu1 %v3516_v44  ;;  %v5483_v44 = vld [vmem:[#allocation21] ss:$0 sm:$0xff] }
0x1a4a   :  { %5632 = vpow2.f32 %v3208_v46  ;;  %3214 = vadd.xlane.f32.xlu1 %v3213_v47 }
0x1a50   :  { %v5633_v53 = vpop.eup %5632 }
0x1a51   :  { %v3216_v54 = vsel %vm1041_vm14, %v5633_v53, 0.0 }
0x1a52   :  { %3217 = vadd.xlane.f32.xlu2 %v3216_v54  ;;  %v5481_v54 = vld [vmem:[#allocation18] ss:$0 sm:$0xff] }
0x1ab5   :  { %v3212_v48 = vpop.xlane.xlu0 %3211 }
0x1ab6   :  { %5634 = vrcp.f32 %v3212_v48 }
0x1abc   :  { %v5635_v56 = vpop.eup %5634 }
0x1abd   :  { %v3222_v57 = vmul.f32 %v5635_v56, %v5629_v40  ;;  %v3215_v55 = vpop.xlane.xlu1 %3214 }
0x1abe   :  { %5636 = vrcp.f32 %v3215_v55 }
0x1abf   :  { %5173 = vmatmul.msk.f32.vlgmr.msrb.gmra.mxu2 %vm1034_vm11, %v3222_v57 }
0x1ac4   :  { %v5637_v26 = vpop.eup %5636 }
0x1ac5   :  { %v3218_v34 = vpop.xlane.xlu2 %3217  ;;  %v3223_v38 = vmul.f32 %v5637_v26, %v5631_v45 }
0x1ac6   :  { %5638 = vrcp.f32 %v3218_v34 }
0x1ac7   :  { %5174 = vmatmul.msk.f32.gmra.mxu2 %vm1034_vm11, %v3223_v38 }
0x1acc   :  { %v5639_v43 = vpop.eup %5638 }
0x1acd   :  { %v3224_v0 = vmul.f32 %v5639_v43, %v5633_v53 }
0x1acf   :  { %5175 = vmatmul.msk.f32.gmra.mxu2 %vm1034_vm11, %v3224_v0 }
0x1ad7   :  { %5200 = vmatmul.msk.f32.vlgmr.msra.gmra.mxu2 %vm986_vm9, %v3284_v37 }
0x1adf   :  { %5201 = vmatmul.msk.f32.gmra.mxu2 %vm986_vm9, %v3287_v58 }
0x1ae7   :  { %5202 = vmatmul.msk.f32.gmra.mxu2 %vm986_vm9, %v3290_v17 }
0x1b42   :  { %v3254_v2 = vpop.f32.mrf.mxu2 }
0x1b43   :  { %5207 = vmatmul.msk.f32.vlgmr.msra.gmra.mxu0 %vm986_vm9, %v3254_v2 }
0x1b4a   :  { %v3257_v52 = vpop.f32.mrf.mxu2 }
0x1b4b   :  { %5208 = vmatmul.msk.f32.gmra.mxu0 %vm986_vm9, %v3257_v52 }
0x1b52   :  { %v3260_v3 = vpop.f32.mrf.mxu2 }
0x1b53   :  { %5209 = vmatmul.msk.f32.gmra.mxu0 %vm986_vm9, %v3260_v3 }
0x1b5a   :  { %v3388_v5 = vpop.f32.mrf.mxu2 }
0x1b5b   :  { %v3397_v49 = vmul.f32 0.20412415, %v3388_v5 }
0x1b5d   :  { %v3400_v6 = vsel %vm1034_vm11, %v3397_v49, -inf }
0x1b5e   :  { %3401 = vmax.xlane.f32.xlu0 %v3400_v6 }
0x1b62   :  { %v3391_v7 = vpop.f32.mrf.mxu2 }
0x1b63   :  { %v3398_v8 = vmul.f32 0.20412415, %v3391_v7 }
0x1b65   :  { %v3403_v59 = vsel %vm1034_vm11, %v3398_v8, -inf }
0x1b66   :  { %3404 = vmax.xlane.f32.xlu1 %v3403_v59 }
0x1b6a   :  { %v3394_v18 = vpop.f32.mrf.mxu2 }
0x1b6b   :  { %v3399_v51 = vmul.f32 0.20412415, %v3394_v18 }
0x1b6d   :  { %v3406_v9 = vsel %vm1041_vm14, %v3399_v51, -inf }
0x1b6e   :  { %3407 = vmax.xlane.f32.xlu2 %v3406_v9 }
0x1bc0   :  { %v3501_v53 = vpop.f32.mrf.mxu0 }
0x1bc1   :  { %v3513_v48 = vadd.f32 %v5481_v54, %v3501_v53 }
0x1bc8   :  { %v3504_v55 = vpop.f32.mrf.mxu0 }
0x1bc9   :  { %v3514_v38 = vadd.f32 %v5481_v54, %v3504_v55 }
0x1bd0   :  { %v3507_v0 = vpop.f32.mrf.mxu0 }
0x1bd1   :  { %v3402_v10 = vpop.xlane.xlu0 %3401  ;;  %v3515_v58 = vadd.f32 %v5481_v54, %v3507_v0 }
0x1bd2   :  { %v3409_v11 = vsub.f32 %v3397_v49, %v3402_v10 }
0x1bd4   :  { %v3412_v13 = vmul.f32 1.442695, %v3409_v11 }
0x1bd6   :  { %5640 = vpow2.f32 %v3412_v13  ;;  %v3643_v13 = vld [vmem:[#allocation22 + $0x18] sm:$0xff] }
0x1bd7   :  { %3669 = vmatpush.msrb.mxu2 %v3643_v13 }
0x1bd9   :  { %v3405_v62 = vpop.xlane.xlu1 %3404 }
0x1bda   :  { %v3410_v14 = vsub.f32 %v3398_v8, %v3405_v62  ;;  %v3642_v62 = vld [vmem:[#allocation22 + $0x10] sm:$0xff] }
0x1bdb   :  { %3670 = vmatpush.msrb.mxu2 %v3642_v62 }
0x1bdc   :  { %v5641_v15 = vpop.eup %5640  ;;  %v3414_v16 = vmul.f32 1.442695, %v3410_v14  ;;  %v3641_v14 = vld [vmem:[#allocation22 + $0x8] sm:$0xff] }
0x1bdd   :  { %v3418_v61 = vsel %vm1034_vm11, %v5641_v15, 0.0  ;;  %3671 = vmatpush.msrb.mxu2 %v3641_v14 }
0x1bde   :  { %5642 = vpow2.f32 %v3414_v16  ;;  %3419 = vadd.xlane.f32.xlu0 %v3418_v61 }
0x1be1   :  { %v3408_v4 = vpop.xlane.xlu2 %3407 }
0x1be2   :  { %v3411_v19 = vsub.f32 %v3399_v51, %v3408_v4 }
0x1be4   :  { %v5643_v25 = vpop.eup %5642  ;;  %v3416_v20 = vmul.f32 1.442695, %v3411_v19 }
0x1be5   :  { %v3421_v21 = vsel %vm1034_vm11, %v5643_v25, 0.0 }
0x1be6   :  { %5644 = vpow2.f32 %v3416_v20  ;;  %3422 = vadd.xlane.f32.xlu1 %v3421_v21 }
0x1bec   :  { %v5645_v22 = vpop.eup %5644 }
0x1bed   :  { %v3424_v23 = vsel %vm1041_vm14, %v5645_v22, 0.0 }
0x1bee   :  { %3425 = vadd.xlane.f32.xlu2 %v3424_v23 }
0x1c51   :  { %v3420_v31 = vpop.xlane.xlu0 %3419 }
0x1c52   :  { %5646 = vrcp.f32 %v3420_v31 }
0x1c58   :  { %v5647_v32 = vpop.eup %5646 }
0x1c59   :  { %v3430_v33 = vmul.f32 %v5647_v32, %v5641_v15  ;;  %v3423_v35 = vpop.xlane.xlu1 %3422  ;;  %v3640_v15 = vld [vmem:[#allocation22] sm:$0xff] }
0x1c5a   :  { %5648 = vrcp.f32 %v3423_v35  ;;  %3672 = vmatpush.msrb.mxu2 %v3640_v15 }
0x1c5b   :  { %5204 = vmatmul.msk.f32.vlgmr.msra.gmra.mxu3 %vm1034_vm11, %v3430_v33 }
0x1c60   :  { %v5649_v36 = vpop.eup %5648 }
0x1c61   :  { %v3426_v40 = vpop.xlane.xlu2 %3425  ;;  %v3431_v1 = vmul.f32 %v5649_v36, %v5643_v25 }
0x1c62   :  { %5650 = vrcp.f32 %v3426_v40 }
0x1c63   :  { %5205 = vmatmul.msk.f32.gmra.mxu3 %vm1034_vm11, %v3431_v1  ;;  %v5482_v1 = vld [vmem:[#allocation19] ss:$0 sm:$0xff] }
0x1c68   :  { %v5651_v42 = vpop.eup %5650 }
0x1c69   :  { %v3432_v39 = vmul.f32 %v5651_v42, %v5645_v22 }
0x1c6b   :  { %5206 = vmatmul.msk.f32.gmra.mxu3 %vm1034_vm11, %v3432_v39 }
0x1cde   :  { %v3462_v45 = vpop.f32.mrf.mxu3 }
0x1cdf   :  { %5210 = vmatmul.msk.f32.vlgmr.msrb.gmra.mxu1 %vm986_vm9, %v3462_v45 }
0x1ce6   :  { %v3465_v46 = vpop.f32.mrf.mxu3 }
0x1ce7   :  { %5211 = vmatmul.msk.f32.gmra.mxu1 %vm986_vm9, %v3465_v46 }
0x1cee   :  { %v3468_v47 = vpop.f32.mrf.mxu3 }
0x1cef   :  { %5212 = vmatmul.msk.f32.gmra.mxu1 %vm986_vm9, %v3468_v47 }
0x1d5c   :  { %v3545_v56 = vpop.f32.mrf.mxu1 }
0x1d5d   :  { %v3554_v57 = vadd.f32 %v3545_v56, %v3513_v48 }
0x1d5f   :  { %v7497_v26 = vadd.f32 %v3554_v57, %v7368_v29 }
0x1d61   :  { %v3560_v34 = vsel %vm701_vm12, %v7497_v26, 0.0 }
0x1d62   :  { %3561 = vadd.xlane.f32.xlu0 %v3560_v34 }
0x1d64   :  { %v3548_v27 = vpop.f32.mrf.mxu1 }
0x1d65   :  { %v3555_v63 = vadd.f32 %v3548_v27, %v3514_v38 }
0x1d67   :  { %v7502_v43 = vadd.f32 %v3555_v63, %v7372_v41 }
0x1d69   :  { %v3563_v37 = vsel %vm701_vm12, %v7502_v43, 0.0 }
0x1d6a   :  { %3564 = vadd.xlane.f32.xlu1 %v3563_v37 }
0x1d6c   :  { %v3551_v17 = vpop.f32.mrf.mxu1 }
0x1d6d   :  { %v3556_v60 = vadd.f32 %v3551_v17, %v3515_v58 }
0x1d6f   :  { %v7507_v29 = vadd.f32 %v3556_v60, %v7377_v50 }
0x1d71   :  { %v3566_v2 = vsel %vm708_vm13, %v7507_v29, 0.0 }
0x1d72   :  { %3567 = vadd.xlane.f32.xlu2 %v3566_v2 }
0x1dd5   :  { %v3562_v52 = vpop.xlane.xlu0 %3561 }
0x1dd6   :  { %v3569_v3 = vmul.f32 %v3562_v52, %v6864_v28 }
0x1dd8   :  { %v3572_v41 = vsub.f32 %v7497_v26, %v3569_v3  ;;  %v3717_v3 = vld [vmem:[%s7843_s20 + $0x38] sm:$0xff] }
0x1dd9   :  { %3739 = vmatpush.msrb.mxu3 %v3717_v3 }
0x1dda   :  { %v3575_v5 = vmul.f32 %v3572_v41, %v3572_v41 }
0x1ddc   :  { %v3578_v49 = vsel %vm701_vm12, %v3575_v5, 0.0  ;;  %v3715_v5 = vld [vmem:[%s7843_s20 + $0x28] sm:$0xff] }
0x1ddd   :  { %3579 = vadd.xlane.f32.xlu0 %v3578_v49  ;;  %v3565_v6 = vpop.xlane.xlu1 %3564  ;;  %v3714_v49 = vld [vmem:[%s7843_s20 + $0x20] sm:$0xff] }
0x1dde   :  { %v3570_v7 = vmul.f32 %v3565_v6, %v6864_v28  ;;  %v3713_v6 = vld [vmem:[%s7843_s20 + $0x18] sm:$0xff] }
0x1de0   :  { %v3573_v8 = vsub.f32 %v7502_v43, %v3570_v7  ;;  %v3712_v7 = vld [vmem:[%s7843_s20 + $0x10] sm:$0xff] }
0x1de2   :  { %v3576_v50 = vmul.f32 %v3573_v8, %v3573_v8 }
0x1de4   :  { %v3581_v59 = vsel %vm701_vm12, %v3576_v50, 0.0  ;;  %v3710_v50 = vld [vmem:[%s7843_s20] sm:$0xff] }
0x1de5   :  { %3582 = vadd.xlane.f32.xlu1 %v3581_v59  ;;  %v3568_v18 = vpop.xlane.xlu2 %3567  ;;  %v5484_v59 = vld [vmem:[#allocation24] ss:$0 sm:$0xff] }
0x1de6   :  { %v3571_v51 = vmul.f32 %v3568_v18, %v6864_v28 }
0x1de8   :  { %v7519_v9 = vsub.f32 %v7507_v29, %v3571_v51 }
0x1dea   :  { %v3577_v10 = vmul.f32 %v7519_v9, %v7519_v9 }
0x1dec   :  { %v3584_v11 = vsel %vm708_vm13, %v3577_v10, 0.0 }
0x1ded   :  { %3585 = vadd.xlane.f32.xlu2 %v3584_v11 }
0x1e50   :  { %v3580_v16 = vpop.xlane.xlu0 %3579 }
0x1e51   :  { %v3587_v61 = vmul.f32 %v3580_v16, %v6864_v28 }
0x1e53   :  { %v3590_v4 = vadd.f32 1e-05, %v3587_v61 }
0x1e55   :  { %5652 = vrsqrt.f32 %v3590_v4  ;;  %vm3599_vm6 = vweird.f32 %v3590_v4 }
0x1e58   :  { %v3583_v19 = vpop.xlane.xlu1 %3582 }
0x1e59   :  { %v3588_v25 = vmul.f32 %v3583_v19, %v6864_v28 }
0x1e5b   :  { %v5653_v20 = vpop.eup %5652  ;;  %v3591_v21 = vadd.f32 1e-05, %v3588_v25 }
0x1e5c   :  { %v3594_v22 = vmul.f32 %v5653_v20, %v3590_v4  ;;  %vm3600_vm2 = vweird.f32 %v5653_v20 }
0x1e5d   :  { %5654 = vrsqrt.f32 %v3591_v21  ;;  %vm3601_vm1 = vmor %vm3599_vm6, %vm3600_vm2  ;;  %vm3609_vm8 = vweird.f32 %v3591_v21 }
0x1e5e   :  { %v3595_v23 = vmul.f32 %v5653_v20, %v3594_v22 }
0x1e60   :  { %v3596_v24 = vmul.f32 0.5, %v3595_v23  ;;  %v3586_v30 = vpop.xlane.xlu2 %3585 }
0x1e61   :  { %v3589_v31 = vmul.f32 %v3586_v30, %v6864_v28 }
0x1e62   :  { %v3597_v32 = vsub.f32 1.5, %v3596_v24 }
0x1e63   :  { %v5655_v33 = vpop.eup %5654  ;;  %v3592_v35 = vadd.f32 1e-05, %v3589_v31 }
0x1e64   :  { %v3598_v36 = vmul.f32 %v5653_v20, %v3597_v32  ;;  %v3604_v40 = vmul.f32 %v5655_v33, %v3591_v21  ;;  %vm3610_vm7 = vweird.f32 %v5655_v33 }
0x1e65   :  { %5656 = vrsqrt.f32 %v3592_v35  ;;  %vm3611_vm5 = vmor %vm3609_vm8, %vm3610_vm7  ;;  %vm3619_vm2 = vweird.f32 %v3592_v35 }
0x1e66   :  { %v3602_v42 = vsel %vm3601_vm1, %v5653_v20, %v3598_v36  ;;  %v3605_v39 = vmul.f32 %v5655_v33, %v3604_v40 }
0x1e67   :  { %v3623_v45 = vmul.f32 %v3602_v42, %v3572_v41  ;;  %v3716_v41 = vld [vmem:[%s7843_s20 + $0x30] sm:$0xff] }
0x1e68   :  { %v3606_v46 = vmul.f32 0.5, %v3605_v39  ;;  %3740 = vmatpush.msrb.mxu3 %v3716_v41 }
0x1e69   :  { %v3630_v47 = vmul.f32 %v5482_v1, %v3623_v45 }
0x1e6a   :  { %v3607_v53 = vsub.f32 1.5, %v3606_v46  ;;  %3741 = vmatpush.msrb.mxu3 %v3715_v5 }
0x1e6b   :  { %v5657_v54 = vpop.eup %5656  ;;  %v3637_v48 = vadd.f32 %v5483_v44, %v3630_v47 }
0x1e6c   :  { %v3608_v56 = vmul.f32 %v5655_v33, %v3607_v53  ;;  %v3614_v57 = vmul.f32 %v5657_v54, %v3592_v35  ;;  %vm3620_vm15 = vweird.f32 %v5657_v54  ;;  %3742 = vmatpush.msrb.mxu3 %v3714_v49  ;;  %v5485_v53 = vld [vmem:[#allocation25] ss:$0 sm:$0xff] }
0x1e6d   :  { %5213 = vmatmul.msk.f32.vlgmr.msrb.gmra.mxu2 %vm701_vm12, %v3637_v48  ;;  %vm3621_vm6 = vmor %vm3619_vm2, %vm3620_vm15 }
0x1e6e   :  { %v3612_v55 = vsel %vm3611_vm5, %v5655_v33, %v3608_v56  ;;  %v3615_v34 = vmul.f32 %v5657_v54, %v3614_v57  ;;  %3743 = vmatpush.msrb.mxu3 %v3713_v6 }
0x1e6f   :  { %v3624_v38 = vmul.f32 %v3612_v55, %v3573_v8  ;;  %v3711_v8 = vld [vmem:[%s7843_s20 + $0x8] sm:$0xff] }
0x1e70   :  { %v3616_v27 = vmul.f32 0.5, %v3615_v34  ;;  %3744 = vmatpush.msrb.mxu3 %v3712_v7 }
0x1e71   :  { %v3631_v63 = vmul.f32 %v5482_v1, %v3624_v38 }
0x1e72   :  { %v3617_v0 = vsub.f32 1.5, %v3616_v27  ;;  %3745 = vmatpush.msrb.mxu3 %v3711_v8 }
0x1e73   :  { %v3638_v37 = vadd.f32 %v5483_v44, %v3631_v63 }
0x1e74   :  { %v3618_v58 = vmul.f32 %v5657_v54, %v3617_v0  ;;  %3746 = vmatpush.msrb.mxu3 %v3710_v50 }
0x1e75   :  { %5214 = vmatmul.msk.f32.gmra.mxu2 %vm701_vm12, %v3638_v37 }
0x1e76   :  { %v3622_v17 = vsel %vm3621_vm6, %v5657_v54, %v3618_v58 }
0x1e77   :  { %v3625_v60 = vmul.f32 %v3622_v17, %v7519_v9 }
0x1e79   :  { %v3632_v2 = vmul.f32 %v5482_v1, %v3625_v60 }
0x1e7b   :  { %v3639_v52 = vadd.f32 %v5483_v44, %v3632_v2 }
0x1e7d   :  { %5215 = vmatmul.msk.f32.gmra.mxu2 %vm701_vm12, %v3639_v52 }
0x1ef0   :  { %v3674_v18 = vpop.f32.mrf.mxu2 }
0x1ef1   :  { %v3675_v51 = vadd.f32 %v5484_v59, %v3674_v18 }
0x1ef3   :  { %v3686_v9 = vmul.f32 0.044715, %v3675_v51  ;;  %v3683_v24 = vmul.f32 0.5, %v3675_v51 }
0x1ef5   :  { %v3689_v10 = vmul.f32 %v3686_v9, %v3675_v51 }
0x1ef7   :  { %v3692_v11 = vmul.f32 %v3689_v10, %v3675_v51 }
0x1ef8   :  { %v3677_v13 = vpop.f32.mrf.mxu2 }
0x1ef9   :  { %v3695_v62 = vadd.f32 %v3692_v11, %v3675_v51  ;;  %v3678_v14 = vadd.f32 %v5484_v59, %v3677_v13 }
0x1efb   :  { %v3698_v15 = vmul.f32 0.7978845, %v3695_v62  ;;  %v3687_v16 = vmul.f32 0.044715, %v3678_v14  ;;  %v3684_v1 = vmul.f32 0.5, %v3678_v14 }
0x1efd   :  { %5658 = vtanh.f32 %v3698_v15  ;;  %v3690_v61 = vmul.f32 %v3687_v16, %v3678_v14 }
0x1eff   :  { %v3693_v4 = vmul.f32 %v3690_v61, %v3678_v14 }
0x1f00   :  { %v3680_v19 = vpop.f32.mrf.mxu2 }
0x1f01   :  { %v3681_v25 = vadd.f32 %v5484_v59, %v3680_v19  ;;  %v3696_v20 = vadd.f32 %v3693_v4, %v3678_v14 }
0x1f03   :  { %v5659_v21 = vpop.eup %5658  ;;  %v3688_v22 = vmul.f32 0.044715, %v3681_v25  ;;  %v3699_v23 = vmul.f32 0.7978845, %v3696_v20  ;;  %v3685_v45 = vmul.f32 0.5, %v3681_v25 }
0x1f04   :  { %v3704_v30 = vadd.f32 1.0, %v5659_v21 }
0x1f05   :  { %v3691_v31 = vmul.f32 %v3688_v22, %v3681_v25  ;;  %5660 = vtanh.f32 %v3699_v23  ;;  %v5486_v22 = vld [vmem:[#allocation27] ss:$0 sm:$0xff] }
0x1f06   :  { %v3707_v32 = vmul.f32 %v3704_v30, %v3683_v24 }
0x1f07   :  { %v3694_v33 = vmul.f32 %v3691_v31, %v3681_v25  ;;  %v5487_v31 = vld [vmem:[#allocation28] ss:$0 sm:$0xff] }
0x1f08   :  { %5216 = vmatmul.msk.f32.vlgmr.msrb.gmra.mxu3 %vm1571_vm3, %v3707_v32 }
0x1f09   :  { %v3697_v35 = vadd.f32 %v3694_v33, %v3681_v25 }
0x1f0b   :  { %v5661_v36 = vpop.eup %5660  ;;  %v3700_v40 = vmul.f32 0.7978845, %v3697_v35 }
0x1f0c   :  { %v3705_v42 = vadd.f32 1.0, %v5661_v36 }
0x1f0d   :  { %5662 = vtanh.f32 %v3700_v40 }
0x1f0e   :  { %v3708_v39 = vmul.f32 %v3705_v42, %v3684_v1 }
0x1f10   :  { %5217 = vmatmul.msk.f32.gmra.mxu3 %vm1571_vm3, %v3708_v39 }
0x1f13   :  { %v5663_v44 = vpop.eup %5662 }
0x1f14   :  { %v3706_v46 = vadd.f32 1.0, %v5663_v44 }
0x1f16   :  { %v3709_v47 = vmul.f32 %v3706_v46, %v3685_v45 }
0x1f18   :  { %5218 = vmatmul.msk.f32.gmra.mxu3 %vm1571_vm3, %v3709_v47 }
0x1f8b   :  { %v3748_v54 = vpop.f32.mrf.mxu3 }
0x1f8c   :  { %v3749_v48 = vadd.f32 %v5485_v53, %v3748_v54 }
0x1f8e   :  { %v3757_v56 = vadd.f32 %v3749_v48, %v7497_v26 }
0x1f90   :  { %v3760_v57 = vsel %vm701_vm12, %v3757_v56, 0.0 }
0x1f91   :  { %3761 = vadd.xlane.f32.xlu0 %v3760_v57 }
0x1f93   :  { %v3751_v55 = vpop.f32.mrf.mxu3 }
0x1f94   :  { %v3752_v34 = vadd.f32 %v5485_v53, %v3751_v55 }
0x1f96   :  { %v3758_v38 = vadd.f32 %v3752_v34, %v7502_v43 }
0x1f98   :  { %v3763_v27 = vsel %vm701_vm12, %v3758_v38, 0.0 }
0x1f99   :  { %3764 = vadd.xlane.f32.xlu1 %v3763_v27 }
0x1f9b   :  { %v3754_v63 = vpop.f32.mrf.mxu3 }
0x1f9c   :  { %v3755_v0 = vadd.f32 %v5485_v53, %v3754_v63 }
0x1f9e   :  { %v3759_v37 = vadd.f32 %v3755_v0, %v7507_v29 }
0x1fa0   :  { %v3766_v58 = vsel %vm708_vm13, %v3759_v37, 0.0 }
0x1fa1   :  { %3767 = vadd.xlane.f32.xlu2 %v3766_v58 }
0x2004   :  { %v3762_v17 = vpop.xlane.xlu0 %3761 }
0x2005   :  { %v3769_v26 = vmul.f32 %v3762_v17, %v6864_v28 }
0x2007   :  { %v3772_v60 = vsub.f32 %v3757_v56, %v3769_v26 }
0x2009   :  { %v3775_v2 = vmul.f32 %v3772_v60, %v3772_v60 }
0x200b   :  { %v3778_v52 = vsel %vm701_vm12, %v3775_v2, 0.0 }
0x200c   :  { %v3765_v3 = vpop.xlane.xlu1 %3764  ;;  %3779 = vadd.xlane.f32.xlu0 %v3778_v52 }
0x200d   :  { %v3770_v43 = vmul.f32 %v3765_v3, %v6864_v28 }
0x200f   :  { %v3773_v41 = vsub.f32 %v3758_v38, %v3770_v43 }
0x2011   :  { %v3776_v5 = vmul.f32 %v3773_v41, %v3773_v41 }
0x2013   :  { %v3781_v49 = vsel %vm701_vm12, %v3776_v5, 0.0 }
0x2014   :  { %3782 = vadd.xlane.f32.xlu1 %v3781_v49  ;;  %v3768_v29 = vpop.xlane.xlu2 %3767 }
0x2015   :  { %v3771_v6 = vmul.f32 %v3768_v29, %v6864_v28 }
0x2017   :  { %v3774_v7 = vsub.f32 %v3759_v37, %v3771_v6 }
0x2019   :  { %v3777_v8 = vmul.f32 %v3774_v7, %v3774_v7 }
0x201b   :  { %v3784_v50 = vsel %vm708_vm13, %v3777_v8, 0.0  ;;  %v3923_v8 = vld [vmem:[%s7844_s14 + $0x18] sm:$0xff] }
0x201c   :  { %3785 = vadd.xlane.f32.xlu2 %v3784_v50  ;;  %v5232_v50 = vld [vmem:[%s7844_s14 + $0x98] sm:$0xff]  ;;  %3945 = vmatpush.msrb.mxu0 %v3923_v8 }
0x201d   :  { %4005 = vmatpush.msra.mxu2 %v5232_v50 }
0x207f   :  { %v3780_v59 = vpop.xlane.xlu0 %3779 }
0x2080   :  { %v3787_v18 = vmul.f32 %v3780_v59, %v6864_v28  ;;  %v3922_v59 = vld [vmem:[%s7844_s14 + $0x10] sm:$0xff] }
0x2081   :  { %3946 = vmatpush.msrb.mxu0 %v3922_v59 }
0x2082   :  { %v3790_v51 = vadd.f32 1e-05, %v3787_v18  ;;  %v5224_v18 = vld [vmem:[%s7844_s14 + $0x50] sm:$0xff] }
0x2084   :  { %5664 = vrsqrt.f32 %v3790_v51  ;;  %vm3799_vm7 = vweird.f32 %v3790_v51 }
0x2087   :  { %v3783_v9 = vpop.xlane.xlu1 %3782 }
0x2088   :  { %v3788_v10 = vmul.f32 %v3783_v9, %v6864_v28  ;;  %v3921_v9 = vld [vmem:[%s7844_s14 + $0x8] sm:$0xff] }
0x2089   :  { %3947 = vmatpush.msrb.mxu0 %v3921_v9  ;;  %v5262_v9 = vld [vmem:[%s7844_s14 + $0xb0] sm:$0xff] }
0x208a   :  { %v5665_v11 = vpop.eup %5664  ;;  %v3791_v13 = vadd.f32 1e-05, %v3788_v10  ;;  %v5223_v10 = vld [vmem:[%s7844_s14 + $0x48] sm:$0xff] }
0x208b   :  { %v3794_v62 = vmul.f32 %v5665_v11, %v3790_v51  ;;  %vm3800_vm1 = vweird.f32 %v5665_v11  ;;  %v5231_v51 = vld [vmem:[%s7844_s14 + $0x90] sm:$0xff] }
0x208c   :  { %5666 = vrsqrt.f32 %v3791_v13  ;;  %vm3801_vm8 = vmor %vm3799_vm7, %vm3800_vm1  ;;  %vm3809_vm15 = vweird.f32 %v3791_v13  ;;  %4006 = vmatpush.msra.mxu2 %v5231_v51  ;;  %v5263_v51 = vld [vmem:[%s7844_s14 + $0xb8] sm:$0xff] }
0x208d   :  { %v3795_v14 = vmul.f32 %v5665_v11, %v3794_v62  ;;  %v5222_v62 = vld [vmem:[%s7844_s14 + $0x40] sm:$0xff] }
0x208f   :  { %v3796_v15 = vmul.f32 0.5, %v3795_v14  ;;  %v3786_v16 = vpop.xlane.xlu2 %3785  ;;  %v5229_v14 = vld [vmem:[%s7844_s14 + $0x80] sm:$0xff] }
0x2090   :  { %v3789_v61 = vmul.f32 %v3786_v16, %v6864_v28 }
0x2091   :  { %v3797_v4 = vsub.f32 1.5, %v3796_v15 }
0x2092   :  { %v5667_v19 = vpop.eup %5666  ;;  %v3792_v25 = vadd.f32 1e-05, %v3789_v61 }
0x2093   :  { %v3798_v20 = vmul.f32 %v5665_v11, %v3797_v4  ;;  %v3804_v21 = vmul.f32 %v5667_v19, %v3791_v13  ;;  %vm3810_vm5 = vweird.f32 %v5667_v19  ;;  %v3920_v13 = vld [vmem:[%s7844_s14] sm:$0xff] }
0x2094   :  { %5668 = vrsqrt.f32 %v3792_v25  ;;  %vm3811_vm2 = vmor %vm3809_vm15, %vm3810_vm5  ;;  %vm3819_vm1 = vweird.f32 %v3792_v25  ;;  %3948 = vmatpush.msrb.mxu0 %v3920_v13 }
0x2095   :  { %v3805_v23 = vmul.f32 %v5667_v19, %v3804_v21  ;;  %v3802_v24 = vsel %vm3801_vm8, %v5665_v11, %v3798_v20  ;;  %v5230_v11 = vld [vmem:[%s7844_s14 + $0x88] sm:$0xff] }
0x2096   :  { %v3823_v30 = vmul.f32 %v3802_v24, %v3772_v60  ;;  %4007 = vmatpush.msra.mxu2 %v5230_v11  ;;  %v5256_v24 = vld [vmem:[%s7844_s14 + $0x78] sm:$0xff]  ;;  %v5260_v11 = vld [vmem:[%s7844_s14 + $0xa0] sm:$0xff] }
0x2097   :  { %v3806_v32 = vmul.f32 0.5, %v3805_v23  ;;  %v5249_v23 = vld [vmem:[%s7844_s14 + $0x38] sm:$0xff] }
0x2098   :  { %v3830_v33 = vmul.f32 %v5486_v22, %v3823_v30  ;;  %4008 = vmatpush.msra.mxu2 %v5229_v14  ;;  %v5248_v30 = vld [vmem:[%s7844_s14 + $0x30] sm:$0xff] }
0x2099   :  { %v3807_v35 = vsub.f32 1.5, %v3806_v32 }
0x209a   :  { %v5669_v36 = vpop.eup %5668  ;;  %v3837_v40 = vadd.f32 %v5487_v31, %v3830_v33  ;;  %4183 = vmatpush.msrb.mxu2 %v5256_v24 }
0x209b   :  { %v3808_v1 = vmul.f32 %v5667_v19, %v3807_v35  ;;  %v3814_v42 = vmul.f32 %v5669_v36, %v3792_v25  ;;  %vm3820_vm6 = vweird.f32 %v5669_v36  ;;  %v5247_v35 = vld [vmem:[%s7844_s14 + $0x28] sm:$0xff] }
0x209c   :  { %v3840_v39 = vsel %vm701_vm12, %v3837_v40, 0.0  ;;  %vm3821_vm7 = vmor %vm3819_vm1, %vm3820_vm6 }
0x209d   :  { %v3815_v44 = vmul.f32 %v5669_v36, %v3814_v42  ;;  %3841 = vadd.xlane.f32.xlu0 %v3840_v39  ;;  %v3812_v45 = vsel %vm3811_vm2, %v5667_v19, %v3808_v1  ;;  %v5246_v42 = vld [vmem:[%s7844_s14 + $0x20] sm:$0xff] }
0x209e   :  { %v3824_v46 = vmul.f32 %v3812_v45, %v3773_v41  ;;  %v5253_v39 = vld [vmem:[%s7844_s14 + $0x60] sm:$0xff] }
0x209f   :  { %v3816_v47 = vmul.f32 0.5, %v3815_v44 }
0x20a0   :  { %v3831_v53 = vmul.f32 %v5486_v22, %v3824_v46 }
0x20a1   :  { %v3817_v54 = vsub.f32 1.5, %v3816_v47 }
0x20a2   :  { %v3838_v48 = vadd.f32 %v5487_v31, %v3831_v53  ;;  %v5488_v53 = vld [vmem:[#allocation30] ss:$0 sm:$0xff] }
0x20a3   :  { %v3818_v56 = vmul.f32 %v5669_v36, %v3817_v54 }
0x20a4   :  { %v3843_v57 = vsel %vm701_vm12, %v3838_v48, 0.0 }
0x20a5   :  { %3844 = vadd.xlane.f32.xlu1 %v3843_v57  ;;  %v3822_v55 = vsel %vm3821_vm7, %v5669_v36, %v3818_v56  ;;  %v5254_v36 = vld [vmem:[%s7844_s14 + $0x68] sm:$0xff] }
0x20a6   :  { %v3825_v34 = vmul.f32 %v3822_v55, %v3774_v7  ;;  %v5225_v7 = vld [vmem:[%s7844_s14 + $0x58] sm:$0xff] }
0x20a7   :  { %3975 = vmatpush.msra.mxu1 %v5225_v7 }
0x20a8   :  { %v3832_v38 = vmul.f32 %v5486_v22, %v3825_v34 }
0x20a9   :  { %3976 = vmatpush.msra.mxu1 %v5224_v18 }
0x20aa   :  { %v3839_v27 = vadd.f32 %v5487_v31, %v3832_v38  ;;  %v5255_v31 = vld [vmem:[%s7844_s14 + $0x70] sm:$0xff] }
0x20ab   :  { %3977 = vmatpush.msra.mxu1 %v5223_v10  ;;  %4184 = vmatpush.msrb.mxu2 %v5255_v31  ;;  %v5261_v10 = vld [vmem:[%s7844_s14 + $0xa8] sm:$0xff] }
0x20ac   :  { %v3846_v63 = vsel %vm708_vm13, %v3839_v27, 0.0 }
0x20ad   :  { %3847 = vadd.xlane.f32.xlu2 %v3846_v63  ;;  %3978 = vmatpush.msra.mxu1 %v5222_v62 }
0x20ae   :  { %4185 = vmatpush.msrb.mxu2 %v5254_v36 }
0x20af   :  { %4153 = vmatpush.msrb.mxu1 %v5249_v23 }
0x20b0   :  { %4186 = vmatpush.msrb.mxu2 %v5253_v39 }
0x20b1   :  { %4154 = vmatpush.msrb.mxu1 %v5248_v30 }
0x20b3   :  { %4155 = vmatpush.msrb.mxu1 %v5247_v35 }
0x20b5   :  { %4156 = vmatpush.msrb.mxu1 %v5246_v42 }
0x2110   :  { %v3842_v0 = vpop.xlane.xlu0 %3841 }
0x2111   :  { %v3849_v37 = vmul.f32 %v3842_v0, %v6864_v28 }
0x2113   :  { %v7561_v58 = vsub.f32 %v3837_v40, %v3849_v37 }
0x2115   :  { %v3855_v17 = vmul.f32 %v7561_v58, %v7561_v58 }
0x2117   :  { %v3858_v26 = vsel %vm701_vm12, %v3855_v17, 0.0 }
0x2118   :  { %v3845_v60 = vpop.xlane.xlu1 %3844  ;;  %3859 = vadd.xlane.f32.xlu0 %v3858_v26 }
0x2119   :  { %v3850_v2 = vmul.f32 %v3845_v60, %v6864_v28 }
0x211b   :  { %v7567_v52 = vsub.f32 %v3838_v48, %v3850_v2  ;;  %v5489_v48 = vld [vmem:[#allocation31] ss:$0 sm:$0xff] }
0x211d   :  { %v3856_v3 = vmul.f32 %v7567_v52, %v7567_v52 }
0x211f   :  { %v3861_v43 = vsel %vm701_vm12, %v3856_v3, 0.0 }
0x2120   :  { %3862 = vadd.xlane.f32.xlu1 %v3861_v43  ;;  %v3848_v41 = vpop.xlane.xlu2 %3847 }
0x2121   :  { %v3851_v5 = vmul.f32 %v3848_v41, %v6864_v28 }
0x2123   :  { %v7573_v49 = vsub.f32 %v3839_v27, %v3851_v5 }
0x2125   :  { %v3857_v29 = vmul.f32 %v7573_v49, %v7573_v49 }
0x2127   :  { %v3864_v6 = vsel %vm708_vm13, %v3857_v29, 0.0 }
0x2128   :  { %3865 = vadd.xlane.f32.xlu2 %v3864_v6 }
0x218b   :  { %v3860_v15 = vpop.xlane.xlu0 %3859 }
0x218c   :  { %v3867_v16 = vmul.f32 %v3860_v15, %v6864_v28 }
0x218e   :  { %v3870_v61 = vadd.f32 1e-05, %v3867_v16 }
0x2190   :  { %5670 = vrsqrt.f32 %v3870_v61  ;;  %vm3879_vm8 = vweird.f32 %v3870_v61 }
0x2193   :  { %v3863_v4 = vpop.xlane.xlu1 %3862 }
0x2194   :  { %v3868_v19 = vmul.f32 %v3863_v4, %v6864_v28 }
0x2196   :  { %v5671_v25 = vpop.eup %5670  ;;  %v3871_v20 = vadd.f32 1e-05, %v3868_v19 }
0x2197   :  { %v3874_v21 = vmul.f32 %v5671_v25, %v3870_v61  ;;  %vm3880_vm13 = vweird.f32 %v5671_v25 }
0x2198   :  { %5672 = vrsqrt.f32 %v3871_v20  ;;  %vm3881_vm5 = vmor %vm3879_vm8, %vm3880_vm13  ;;  %vm3889_vm2 = vweird.f32 %v3871_v20 }
0x2199   :  { %v3875_v22 = vmul.f32 %v5671_v25, %v3874_v21 }
0x219b   :  { %v3876_v32 = vmul.f32 0.5, %v3875_v22  ;;  %v3866_v33 = vpop.xlane.xlu2 %3865 }
0x219c   :  { %v3869_v40 = vmul.f32 %v3866_v33, %v6864_v28 }
0x219d   :  { %v3877_v1 = vsub.f32 1.5, %v3876_v32 }
0x219e   :  { %v5673_v44 = vpop.eup %5672  ;;  %v3872_v45 = vadd.f32 1e-05, %v3869_v40 }
0x219f   :  { %v3878_v46 = vmul.f32 %v5671_v25, %v3877_v1  ;;  %v3884_v47 = vmul.f32 %v5673_v44, %v3871_v20  ;;  %vm3890_vm15 = vweird.f32 %v5673_v44 }
0x21a0   :  { %5674 = vrsqrt.f32 %v3872_v45  ;;  %vm3891_vm6 = vmor %vm3889_vm2, %vm3890_vm15  ;;  %vm3899_vm7 = vweird.f32 %v3872_v45 }
0x21a1   :  { %v3882_v54 = vsel %vm3881_vm5, %v5671_v25, %v3878_v46  ;;  %v3885_v28 = vmul.f32 %v5673_v44, %v3884_v47 }
0x21a2   :  { %v3903_v56 = vmul.f32 %v3882_v54, %v7561_v58 }
0x21a3   :  { %v3886_v57 = vmul.f32 0.5, %v3885_v28 }
0x21a4   :  { %v3910_v55 = vmul.f32 %v5488_v53, %v3903_v56 }
0x21a5   :  { %v3887_v34 = vsub.f32 1.5, %v3886_v57 }
0x21a6   :  { %v5675_v38 = vpop.eup %5674  ;;  %v7602_v27 = vadd.f32 %v5489_v48, %v3910_v55 }
0x21a7   :  { %v3888_v63 = vmul.f32 %v5673_v44, %v3887_v34  ;;  %v3894_v0 = vmul.f32 %v5675_v38, %v3872_v45  ;;  %vm3900_vm1 = vweird.f32 %v5675_v38 }
0x21a8   :  { %5219 = vmatmul.msk.f32.vlgmr.msrb.gmra.mxu0 %vm701_vm12, %v7602_v27  ;;  %5226 = vmatmul.msk.f32.vlgmr.msra.gmra.mxu1 %vm701_vm12, %v7602_v27  ;;  %vm3901_vm13 = vmor %vm3899_vm7, %vm3900_vm1 }
0x21a9   :  { %v3892_v37 = vsel %vm3891_vm6, %v5673_v44, %v3888_v63  ;;  %v3895_v17 = vmul.f32 %v5675_v38, %v3894_v0  ;;  %5233 = vmatmul.msk.f32.vlgmr.msra.gmra.mxu2 %vm701_vm12, %v7602_v27 }
0x21aa   :  { %v3904_v58 = vmul.f32 %v3892_v37, %v7567_v52 }
0x21ab   :  { %v3896_v26 = vmul.f32 0.5, %v3895_v17 }
0x21ac   :  { %v3911_v60 = vmul.f32 %v5488_v53, %v3904_v58 }
0x21ad   :  { %v3897_v2 = vsub.f32 1.5, %v3896_v26 }
0x21ae   :  { %v3918_v3 = vadd.f32 %v5489_v48, %v3911_v60 }
0x21af   :  { %v3898_v43 = vmul.f32 %v5675_v38, %v3897_v2 }
0x21b0   :  { %5220 = vmatmul.msk.f32.gmra.mxu0 %vm701_vm12, %v3918_v3  ;;  %5227 = vmatmul.msk.f32.gmra.mxu1 %vm701_vm12, %v3918_v3 }
0x21b1   :  { %v3902_v41 = vsel %vm3901_vm13, %v5675_v38, %v3898_v43  ;;  %5234 = vmatmul.msk.f32.gmra.mxu2 %vm701_vm12, %v3918_v3 }
0x21b2   :  { %v3905_v5 = vmul.f32 %v3902_v41, %v7573_v49 }
0x21b4   :  { %v3912_v29 = vmul.f32 %v5488_v53, %v3905_v5 }
0x21b6   :  { %v3919_v6 = vadd.f32 %v5489_v48, %v3912_v29 }
0x21b8   :  { %5221 = vmatmul.msk.f32.gmra.mxu0 %vm701_vm12, %v3919_v6  ;;  %5228 = vmatmul.msk.f32.gmra.mxu1 %vm701_vm12, %v3919_v6 }
0x21b9   :  { %5235 = vmatmul.msk.f32.gmra.mxu2 %vm701_vm12, %v3919_v6 }
0x21c0   :  { %5250 = vmatmul.msk.f32.vlgmr.msrb.gmra.mxu1 %vm701_vm12, %v7602_v27 }
0x21c1   :  { %5257 = vmatmul.msk.f32.vlgmr.msrb.gmra.mxu2 %vm701_vm12, %v7602_v27 }
0x21c8   :  { %5251 = vmatmul.msk.f32.gmra.mxu1 %vm701_vm12, %v3918_v3 }
0x21c9   :  { %5258 = vmatmul.msk.f32.gmra.mxu2 %vm701_vm12, %v3918_v3 }
0x21d0   :  { %5252 = vmatmul.msk.f32.gmra.mxu1 %vm701_vm12, %v3919_v6 }
0x21d1   :  { %5259 = vmatmul.msk.f32.gmra.mxu2 %vm701_vm12, %v3919_v6 }
0x2225   :  { %v3980_v52 = vpop.f32.mrf.mxu1  ;;  %v3950_v59 = vpop.f32.mrf.mxu0 }
0x222c   :  { %v4010_v49 = vpop.f32.mrf.mxu2 }
0x222d   :  { %v3983_v7 = vpop.f32.mrf.mxu1  ;;  %v3953_v62 = vpop.f32.mrf.mxu0 }
0x2234   :  { %v4013_v8 = vpop.f32.mrf.mxu2 }
0x2235   :  { %v3986_v50 = vpop.f32.mrf.mxu1  ;;  %v3956_v15 = vpop.f32.mrf.mxu0 }
0x2236   :  { %5236 = vmatpush.xpose.msk.msra.mxu3 %vm986_vm9, %v3986_v50 }
0x223a   :  { %5237 = vmatpush.xpose.msk.msra.mxu3 %vm986_vm9, %v3983_v7 }
0x223c   :  { %v4016_v18 = vpop.f32.mrf.mxu2 }
0x223d   :  { %5242 = vmatpush.msk.msra.mxu0 %vm1078_vm10, %v4016_v18  ;;  %v4158_v17 = vpop.f32.mrf.mxu1 }
0x223e   :  { %5238 = vmatpush.xpose.msk.msra.mxu3 %vm986_vm9, %v3980_v52 }
0x223f   :  { %4125 = vmatpush.msra.mxu0 %v4013_v8 }
0x2241   :  { %4126 = vmatpush.msra.mxu0 %v4010_v49  ;;  %5239 = vmatmul.msk.f32.vlgmr.msra.gmra.mxu3 %vm986_vm9, %v3950_v59 }
0x2242   :  { %4213 = vmatpush.msrb.mxu3 %v5263_v51 }
0x2244   :  { %4214 = vmatpush.msrb.mxu3 %v5262_v9  ;;  %v4188_v13 = vpop.f32.mrf.mxu2 }
0x2245   :  { %v4161_v58 = vpop.f32.mrf.mxu1 }
0x2246   :  { %4215 = vmatpush.msrb.mxu3 %v5261_v10 }
0x2248   :  { %4216 = vmatpush.msrb.mxu3 %v5260_v11 }
0x2249   :  { %5240 = vmatmul.msk.f32.gmra.mxu3 %vm986_vm9, %v3953_v62 }
0x224c   :  { %v4191_v14 = vpop.f32.mrf.mxu2 }
0x224d   :  { %v4164_v26 = vpop.f32.mrf.mxu1 }
0x2251   :  { %5241 = vmatmul.msk.f32.gmra.mxu3 %vm986_vm9, %v3956_v15 }
0x2254   :  { %v4194_v16 = vpop.f32.mrf.mxu2 }
0x2255   :  { %5267 = vmatpush.xpose.msk.msrb.mxu0 %vm986_vm9, %v4194_v16 }
0x2259   :  { %5268 = vmatpush.xpose.msk.msrb.mxu0 %vm986_vm9, %v4191_v14  ;;  %5264 = vmatmul.msk.f32.vlgmr.msrb.gmra.mxu3 %vm701_vm12, %v7602_v27 }
0x225d   :  { %5269 = vmatpush.xpose.msk.msrb.mxu0 %vm986_vm9, %v4188_v13 }
0x2261   :  { %5265 = vmatmul.msk.f32.gmra.mxu3 %vm701_vm12, %v3918_v3 }
0x2269   :  { %5266 = vmatmul.msk.f32.gmra.mxu3 %vm701_vm12, %v3919_v6 }
0x22c4   :  { %v4054_v61 = vpop.f32.mrf.mxu3 }
0x22c5   :  { %v4063_v4 = vmul.f32 0.20412415, %v4054_v61 }
0x22c7   :  { %v4066_v19 = vsel %vm1034_vm11, %v4063_v4, -inf }
0x22c8   :  { %4067 = vmax.xlane.f32.xlu0 %v4066_v19 }
0x22cc   :  { %v4057_v25 = vpop.f32.mrf.mxu3 }
0x22cd   :  { %v4064_v20 = vmul.f32 0.20412415, %v4057_v25 }
0x22cf   :  { %v4069_v21 = vsel %vm1034_vm11, %v4064_v20, -inf }
0x22d0   :  { %4070 = vmax.xlane.f32.xlu1 %v4069_v21 }
0x22d4   :  { %v4060_v22 = vpop.f32.mrf.mxu3 }
0x22d5   :  { %v4065_v23 = vmul.f32 0.20412415, %v4060_v22 }
0x22d7   :  { %v4072_v24 = vsel %vm1041_vm14, %v4065_v23, -inf }
0x22d8   :  { %4073 = vmax.xlane.f32.xlu2 %v4072_v24 }
0x22dc   :  { %v4218_v30 = vpop.f32.mrf.mxu3 }
0x22e4   :  { %v4221_v31 = vpop.f32.mrf.mxu3 }
0x22ec   :  { %v4224_v32 = vpop.f32.mrf.mxu3 }
0x22ed   :  { %5273 = vmatpush.msk.msra.mxu1 %vm1078_vm10, %v4224_v32 }
0x22ef   :  { %4333 = vmatpush.msra.mxu1 %v4221_v31 }
0x22f1   :  { %4334 = vmatpush.msra.mxu1 %v4218_v30 }
0x233b   :  { %v4068_v33 = vpop.xlane.xlu0 %4067 }
0x233c   :  { %v4075_v35 = vsub.f32 %v4063_v4, %v4068_v33 }
0x233e   :  { %v4078_v36 = vmul.f32 1.442695, %v4075_v35 }
0x2340   :  { %5676 = vpow2.f32 %v4078_v36 }
0x2343   :  { %v4071_v40 = vpop.xlane.xlu1 %4070 }
0x2344   :  { %v4076_v1 = vsub.f32 %v4064_v20, %v4071_v40 }
0x2346   :  { %v5677_v42 = vpop.eup %5676  ;;  %v4080_v39 = vmul.f32 1.442695, %v4076_v1 }
0x2347   :  { %v4084_v44 = vsel %vm1034_vm11, %v5677_v42, 0.0 }
0x2348   :  { %5678 = vpow2.f32 %v4080_v39  ;;  %4085 = vadd.xlane.f32.xlu0 %v4084_v44 }
0x234b   :  { %v4074_v45 = vpop.xlane.xlu2 %4073 }
0x234c   :  { %v4077_v46 = vsub.f32 %v4065_v23, %v4074_v45 }
0x234e   :  { %v5679_v47 = vpop.eup %5678  ;;  %v4082_v53 = vmul.f32 1.442695, %v4077_v46 }
0x234f   :  { %v4087_v54 = vsel %vm1034_vm11, %v5679_v47, 0.0 }
0x2350   :  { %5680 = vpow2.f32 %v4082_v53  ;;  %4088 = vadd.xlane.f32.xlu1 %v4087_v54 }
0x2356   :  { %v5681_v28 = vpop.eup %5680 }
0x2357   :  { %v4090_v48 = vsel %vm1041_vm14, %v5681_v28, 0.0 }
0x2358   :  { %4091 = vadd.xlane.f32.xlu2 %v4090_v48 }
0x23bb   :  { %v4086_v56 = vpop.xlane.xlu0 %4085 }
0x23bc   :  { %5682 = vrcp.f32 %v4086_v56 }
0x23c2   :  { %v5683_v57 = vpop.eup %5682 }
0x23c3   :  { %v4096_v55 = vmul.f32 %v5683_v57, %v5677_v42  ;;  %v4089_v34 = vpop.xlane.xlu1 %4088 }
0x23c4   :  { %5684 = vrcp.f32 %v4089_v34 }
0x23c5   :  { %5243 = vmatmul.msk.f32.vlgmr.msra.gmra.mxu0 %vm1034_vm11, %v4096_v55 }
0x23ca   :  { %v5685_v38 = vpop.eup %5684 }
0x23cb   :  { %v4092_v27 = vpop.xlane.xlu2 %4091  ;;  %v4097_v63 = vmul.f32 %v5685_v38, %v5679_v47 }
0x23cc   :  { %5686 = vrcp.f32 %v4092_v27 }
0x23cd   :  { %5244 = vmatmul.msk.f32.gmra.mxu0 %vm1034_vm11, %v4097_v63 }
0x23d2   :  { %v5687_v0 = vpop.eup %5686 }
0x23d3   :  { %v4098_v37 = vmul.f32 %v5687_v0, %v5681_v28 }
0x23d5   :  { %5245 = vmatmul.msk.f32.gmra.mxu0 %vm1034_vm11, %v4098_v37 }
0x23dd   :  { %5270 = vmatmul.msk.f32.vlgmr.msrb.gmra.mxu0 %vm986_vm9, %v4158_v17 }
0x23e5   :  { %5271 = vmatmul.msk.f32.gmra.mxu0 %vm986_vm9, %v4161_v58 }
0x23ed   :  { %5272 = vmatmul.msk.f32.gmra.mxu0 %vm986_vm9, %v4164_v26 }
0x2442   :  { %v7657_v60 = vpop.f32.mrf.mxu0 }
0x2443   :  { %v4345_v61 = vsel %vm986_vm9, %v7657_v60, 0.0 }
0x244a   :  { %v7659_v2 = vpop.f32.mrf.mxu0 }
0x244b   :  { %v4348_v20 = vsel %vm986_vm9, %v7659_v2, 0.0 }
0x2452   :  { %v7661_v3 = vpop.f32.mrf.mxu0 }
0x2453   :  { %v4351_v42 = vsel %vm2206_vm4, %v7661_v3, 0.0 }
0x245a   :  { %v4262_v43 = vpop.f32.mrf.mxu0 }
0x245b   :  { %v4271_v41 = vmul.f32 0.20412415, %v4262_v43 }
0x245d   :  { %v4274_v5 = vsel %vm1034_vm11, %v4271_v41, -inf }
0x245e   :  { %4275 = vmax.xlane.f32.xlu0 %v4274_v5 }
0x2462   :  { %v4265_v29 = vpop.f32.mrf.mxu0 }
0x2463   :  { %v4272_v6 = vmul.f32 0.20412415, %v4265_v29 }
0x2465   :  { %v4277_v52 = vsel %vm1034_vm11, %v4272_v6, -inf }
0x2466   :  { %4278 = vmax.xlane.f32.xlu1 %v4277_v52 }
0x246a   :  { %v4268_v49 = vpop.f32.mrf.mxu0 }
0x246b   :  { %v4273_v7 = vmul.f32 0.20412415, %v4268_v49 }
0x246d   :  { %v4280_v8 = vsel %vm1041_vm14, %v4273_v7, -inf }
0x246e   :  { %4281 = vmax.xlane.f32.xlu2 %v4280_v8 }
0x24d1   :  { %v4276_v50 = vpop.xlane.xlu0 %4275 }
0x24d2   :  { %v4283_v59 = vsub.f32 %v4271_v41, %v4276_v50 }
0x24d4   :  { %v4286_v18 = vmul.f32 1.442695, %v4283_v59  ;;  %v4464_v59 = vld [vmem:[#allocation36 + $0x10] sm:$0xff] }
0x24d5   :  { %4487 = vmatpush.msra.mxu2 %v4464_v59 }
0x24d6   :  { %5688 = vpow2.f32 %v4286_v18  ;;  %v4525_v18 = vld [vmem:[#allocation36 + $0x28] sm:$0xff] }
0x24d7   :  { %4548 = vmatpush.msra.mxu3 %v4525_v18 }
0x24d9   :  { %v4279_v51 = vpop.xlane.xlu1 %4278 }
0x24da   :  { %v4284_v9 = vsub.f32 %v4272_v6, %v4279_v51  ;;  %v4524_v51 = vld [vmem:[#allocation36 + $0x20] sm:$0xff] }
0x24db   :  { %4549 = vmatpush.msra.mxu3 %v4524_v51  ;;  %v4598_v51 = vld [vmem:[%s7845_s23 + $0x38] sm:$0xff] }
0x24dc   :  { %v5689_v10 = vpop.eup %5688  ;;  %v4288_v11 = vmul.f32 1.442695, %v4284_v9  ;;  %v4462_v9 = vld [vmem:[#allocation36] sm:$0xff]  ;;  %4620 = vmatpush.msra.mxu0 %v4598_v51 }
0x24dd   :  { %v4292_v13 = vsel %vm1034_vm11, %v5689_v10, 0.0 }
0x24de   :  { %5690 = vpow2.f32 %v4288_v11  ;;  %4293 = vadd.xlane.f32.xlu0 %v4292_v13 }
0x24e1   :  { %v4282_v62 = vpop.xlane.xlu2 %4281 }
0x24e2   :  { %v4285_v14 = vsub.f32 %v4273_v7, %v4282_v62 }
0x24e4   :  { %v5691_v15 = vpop.eup %5690  ;;  %v4290_v16 = vmul.f32 1.442695, %v4285_v14 }
0x24e5   :  { %v4295_v4 = vsel %vm1034_vm11, %v5691_v15, 0.0 }
0x24e6   :  { %5692 = vpow2.f32 %v4290_v16  ;;  %4346 = vadd.xlane.f32.xlu0 %v4345_v61  ;;  %4296 = vadd.xlane.f32.xlu1 %v4295_v4 }
0x24ec   :  { %v5693_v19 = vpop.eup %5692 }
0x24ed   :  { %v4298_v25 = vsel %vm1041_vm14, %v5693_v19, 0.0 }
0x24ee   :  { %4299 = vadd.xlane.f32.xlu2 %v4298_v25 }
0x24f6   :  { %4349 = vadd.xlane.f32.xlu2 %v4348_v20 }
0x2551   :  { %v4294_v21 = vpop.xlane.xlu0 %4293 }
0x2552   :  { %5694 = vrcp.f32 %v4294_v21 }
0x2558   :  { %v5695_v22 = vpop.eup %5694 }
0x2559   :  { %v4304_v23 = vmul.f32 %v5695_v22, %v5689_v10  ;;  %v4297_v24 = vpop.xlane.xlu1 %4296  ;;  %v4347_v46 = vpop.xlane.xlu0 %4346  ;;  %v4523_v10 = vld [vmem:[#allocation36 + $0x18] sm:$0xff] }
0x255a   :  { %5696 = vrcp.f32 %v4297_v24  ;;  %4550 = vmatpush.msra.mxu3 %v4523_v10  ;;  %v4596_v10 = vld [vmem:[%s7845_s23 + $0x28] sm:$0xff] }
0x255b   :  { %5274 = vmatmul.msk.f32.vlgmr.msra.gmra.mxu1 %vm1034_vm11, %v4304_v23 }
0x2560   :  { %v5697_v30 = vpop.eup %5696 }
0x2561   :  { %v4300_v31 = vpop.xlane.xlu2 %4299  ;;  %v4305_v32 = vmul.f32 %v5697_v30, %v5691_v15 }
0x2562   :  { %5698 = vrcp.f32 %v4300_v31 }
0x2563   :  { %5275 = vmatmul.msk.f32.gmra.mxu1 %vm1034_vm11, %v4305_v32 }
0x2568   :  { %v5699_v33 = vpop.eup %5698 }
0x2569   :  { %v4306_v35 = vmul.f32 %v5699_v33, %v5693_v19  ;;  %v4350_v55 = vpop.xlane.xlu2 %4349 }
0x256b   :  { %5276 = vmatmul.msk.f32.gmra.mxu1 %vm1034_vm11, %v4306_v35 }
0x25d8   :  { %v4336_v36 = vpop.f32.mrf.mxu1 }
0x25d9   :  { %v4357_v40 = vsel %vm986_vm9, %v4336_v36, 0.0 }
0x25da   :  { %4358 = vadd.xlane.f32.xlu1 %v4357_v40 }
0x25e0   :  { %v4339_v1 = vpop.f32.mrf.mxu1 }
0x25e1   :  { %v4360_v39 = vsel %vm986_vm9, %v4339_v1, 0.0 }
0x25e2   :  { %4352 = vadd.xlane.f32.xlu1 %v4351_v42  ;;  %4361 = vadd.xlane.f32.xlu0 %v4360_v39  ;;  %v5490_v42 = vld [vmem:[#allocation33] ss:$0 sm:$0xff]  ;;  %v5492_v39 = vld [vmem:[#allocation33 + $0x1] ss:$0 sm:$0xff] }
0x25e8   :  { %v4342_v44 = vpop.f32.mrf.mxu1 }
0x25e9   :  { %v4363_v45 = vsel %vm2206_vm4, %v4342_v44, 0.0 }
0x25ea   :  { %4364 = vadd.xlane.f32.xlu2 %v4363_v45 }
0x264d   :  { %v4359_v47 = vpop.xlane.xlu1 %4358 }
0x264e   :  { %v4366_v53 = vadd.f32 %v4359_v47, %v4347_v46  ;;  %v5491_v46 = vld [vmem:[#allocation34] ss:$0 sm:$0xff]  ;;  %v5493_v47 = vld [vmem:[#allocation34 + $0x1] ss:$0 sm:$0xff] }
0x2650   :  { %v4369_v54 = vmul.f32 %v4366_v53, %v6836_v12 }
0x2652   :  { %v7682_v28 = vsub.f32 %v4336_v36, %v4369_v54  ;;  %v7685_v48 = vsub.f32 %v7657_v60, %v4369_v54 }
0x2654   :  { %v4393_v56 = vmul.f32 %v7682_v28, %v7682_v28  ;;  %v4378_v57 = vmul.f32 %v7685_v48, %v7685_v48 }
0x2655   :  { %v4362_v34 = vpop.xlane.xlu0 %4361  ;;  %v4353_v60 = vpop.xlane.xlu1 %4352 }
0x2656   :  { %v4367_v38 = vadd.f32 %v4362_v34, %v4350_v55  ;;  %v4396_v27 = vsel %vm986_vm9, %v4393_v56, 0.0  ;;  %v4381_v63 = vsel %vm986_vm9, %v4378_v57, 0.0 }
0x2657   :  { %4397 = vadd.xlane.f32.xlu1 %v4396_v27  ;;  %4382 = vadd.xlane.f32.xlu0 %v4381_v63 }
0x2658   :  { %v4370_v0 = vmul.f32 %v4367_v38, %v6836_v12 }
0x265a   :  { %v7694_v37 = vsub.f32 %v4339_v1, %v4370_v0  ;;  %v7697_v17 = vsub.f32 %v7659_v2, %v4370_v0 }
0x265c   :  { %v4394_v58 = vmul.f32 %v7694_v37, %v7694_v37  ;;  %v4379_v26 = vmul.f32 %v7697_v17, %v7697_v17 }
0x265d   :  { %v4365_v43 = vpop.xlane.xlu2 %4364 }
0x265e   :  { %v4368_v41 = vadd.f32 %v4365_v43, %v4353_v60  ;;  %v4399_v5 = vsel %vm986_vm9, %v4394_v58, 0.0  ;;  %v4384_v29 = vsel %vm986_vm9, %v4379_v26, 0.0 }
0x265f   :  { %4400 = vadd.xlane.f32.xlu0 %v4399_v5  ;;  %4385 = vadd.xlane.f32.xlu2 %v4384_v29 }
0x2660   :  { %v4371_v6 = vmul.f32 %v4368_v41, %v6836_v12 }
0x2662   :  { %v7707_v2 = vsub.f32 %v7661_v3, %v4371_v6  ;;  %v7709_v52 = vsub.f32 %v4342_v44, %v4371_v6  ;;  %v4463_v3 = vld [vmem:[#allocation36 + $0x8] sm:$0xff] }
0x2663   :  { %4488 = vmatpush.msra.mxu2 %v4463_v3 }
0x2664   :  { %v4395_v49 = vmul.f32 %v7709_v52, %v7709_v52  ;;  %v4380_v7 = vmul.f32 %v7707_v2, %v7707_v2 }
0x2665   :  { %4489 = vmatpush.msra.mxu2 %v4462_v9  ;;  %v4597_v9 = vld [vmem:[%s7845_s23 + $0x30] sm:$0xff] }
0x2666   :  { %v4402_v8 = vsel %vm2206_vm4, %v4395_v49, 0.0  ;;  %v4387_v50 = vsel %vm2206_vm4, %v4380_v7, 0.0  ;;  %4621 = vmatpush.msra.mxu0 %v4597_v9 }
0x2667   :  { %4403 = vadd.xlane.f32.xlu2 %v4402_v8  ;;  %4388 = vadd.xlane.f32.xlu1 %v4387_v50 }
0x2668   :  { %4622 = vmatpush.msra.mxu0 %v4596_v10 }
0x26ca   :  { %v4383_v11 = vpop.xlane.xlu0 %4382  ;;  %v4398_v13 = vpop.xlane.xlu1 %4397 }
0x26cb   :  { %v4405_v62 = vadd.f32 %v4398_v13, %v4383_v11  ;;  %v4593_v11 = vld [vmem:[%s7845_s23 + $0x10] sm:$0xff]  ;;  %v4592_v13 = vld [vmem:[%s7845_s23 + $0x8] sm:$0xff] }
0x26cd   :  { %v4408_v14 = vmul.f32 %v4405_v62, %v6836_v12  ;;  %v4591_v62 = vld [vmem:[%s7845_s23] sm:$0xff] }
0x26cf   :  { %v4411_v15 = vadd.f32 1e-05, %v4408_v14  ;;  %v5494_v14 = vld [vmem:[#allocation37] ss:$0 sm:$0xff] }
0x26d1   :  { %5700 = vrsqrt.f32 %v4411_v15  ;;  %vm4420_vm10 = vweird.f32 %v4411_v15 }
0x26d2   :  { %v4401_v16 = vpop.xlane.xlu0 %4400  ;;  %v4386_v61 = vpop.xlane.xlu2 %4385 }
0x26d3   :  { %v4406_v4 = vadd.f32 %v4401_v16, %v4386_v61 }
0x26d5   :  { %v4409_v19 = vmul.f32 %v4406_v4, %v6836_v12 }
0x26d7   :  { %v5701_v25 = vpop.eup %5700  ;;  %v4412_v20 = vadd.f32 1e-05, %v4409_v19 }
0x26d8   :  { %v4415_v21 = vmul.f32 %v5701_v25, %v4411_v15  ;;  %vm4421_vm12 = vweird.f32 %v5701_v25 }
0x26d9   :  { %5702 = vrsqrt.f32 %v4412_v20  ;;  %vm4422_vm11 = vmor %vm4420_vm10, %vm4421_vm12  ;;  %vm4430_vm4 = vweird.f32 %v4412_v20 }
0x26da   :  { %v4416_v22 = vmul.f32 %v5701_v25, %v4415_v21  ;;  %v4389_v23 = vpop.xlane.xlu1 %4388  ;;  %v4404_v24 = vpop.xlane.xlu2 %4403 }
0x26db   :  { %v4407_v30 = vadd.f32 %v4404_v24, %v4389_v23 }
0x26dc   :  { %v4417_v31 = vmul.f32 0.5, %v4416_v22 }
0x26dd   :  { %v4410_v32 = vmul.f32 %v4407_v30, %v6836_v12 }
0x26de   :  { %v4418_v33 = vsub.f32 1.5, %v4417_v31 }
0x26df   :  { %v5703_v35 = vpop.eup %5702  ;;  %v4413_v36 = vadd.f32 1e-05, %v4410_v32 }
0x26e0   :  { %v4419_v40 = vmul.f32 %v5701_v25, %v4418_v33  ;;  %v4425_v1 = vmul.f32 %v5703_v35, %v4412_v20  ;;  %vm4431_vm14 = vweird.f32 %v5703_v35 }
0x26e1   :  { %5704 = vrsqrt.f32 %v4413_v36  ;;  %vm4432_vm8 = vmor %vm4430_vm4, %vm4431_vm14  ;;  %vm4440_vm15 = vweird.f32 %v4413_v36 }
0x26e2   :  { %v4423_v44 = vsel %vm4422_vm11, %v5701_v25, %v4419_v40  ;;  %v4426_v45 = vmul.f32 %v5703_v35, %v4425_v1 }
0x26e3   :  { %v4445_v53 = vmul.f32 %v4423_v44, %v7685_v48  ;;  %v4506_v54 = vmul.f32 %v4423_v44, %v7682_v28 }
0x26e4   :  { %v4427_v56 = vmul.f32 0.5, %v4426_v45 }
0x26e5   :  { %v4452_v57 = vmul.f32 %v5490_v42, %v4445_v53  ;;  %v4513_v55 = vmul.f32 %v5492_v39, %v4506_v54 }
0x26e6   :  { %v4428_v34 = vsub.f32 1.5, %v4427_v56 }
0x26e7   :  { %v5705_v38 = vpop.eup %5704  ;;  %v4459_v27 = vadd.f32 %v5491_v46, %v4452_v57  ;;  %v4520_v63 = vadd.f32 %v5493_v47, %v4513_v55 }
0x26e8   :  { %v4429_v0 = vmul.f32 %v5703_v35, %v4428_v34  ;;  %v4435_v58 = vmul.f32 %v5705_v38, %v4413_v36  ;;  %vm4441_vm5 = vweird.f32 %v5705_v38 }
0x26e9   :  { %5277 = vmatmul.msk.f32.vlgmr.msra.gmra.mxu2 %vm986_vm9, %v4459_v27  ;;  %5280 = vmatmul.msk.f32.vlgmr.msra.gmra.mxu3 %vm986_vm9, %v4520_v63  ;;  %vm4442_vm2 = vmor %vm4440_vm15, %vm4441_vm5 }
0x26ea   :  { %v4433_v26 = vsel %vm4432_vm8, %v5703_v35, %v4429_v0  ;;  %v4436_v48 = vmul.f32 %v5705_v38, %v4435_v58 }
0x26eb   :  { %v4446_v28 = vmul.f32 %v4433_v26, %v7697_v17  ;;  %v4507_v60 = vmul.f32 %v4433_v26, %v7694_v37 }
0x26ec   :  { %v4437_v43 = vmul.f32 0.5, %v4436_v48 }
0x26ed   :  { %v4453_v41 = vmul.f32 %v5490_v42, %v4446_v28  ;;  %v4514_v5 = vmul.f32 %v5492_v39, %v4507_v60  ;;  %v5495_v60 = vld [vmem:[#allocation39] ss:$0 sm:$0xff] }
0x26ee   :  { %v4438_v29 = vsub.f32 1.5, %v4437_v43 }
0x26ef   :  { %v4460_v6 = vadd.f32 %v5491_v46, %v4453_v41  ;;  %v4521_v49 = vadd.f32 %v5493_v47, %v4514_v5 }
0x26f0   :  { %v4439_v7 = vmul.f32 %v5705_v38, %v4438_v29 }
0x26f1   :  { %5278 = vmatmul.msk.f32.gmra.mxu2 %vm986_vm9, %v4460_v6  ;;  %5281 = vmatmul.msk.f32.gmra.mxu3 %vm986_vm9, %v4521_v49 }
0x26f2   :  { %v4443_v17 = vsel %vm4442_vm2, %v5705_v38, %v4439_v7 }
0x26f3   :  { %v4447_v37 = vmul.f32 %v4443_v17, %v7707_v2  ;;  %v4508_v8 = vmul.f32 %v4443_v17, %v7709_v52  ;;  %v4595_v2 = vld [vmem:[%s7845_s23 + $0x20] sm:$0xff]  ;;  %v4594_v52 = vld [vmem:[%s7845_s23 + $0x18] sm:$0xff] }
0x26f4   :  { %4623 = vmatpush.msra.mxu0 %v4595_v2 }
0x26f5   :  { %v4454_v50 = vmul.f32 %v5490_v42, %v4447_v37  ;;  %v4515_v59 = vmul.f32 %v5492_v39, %v4508_v8 }
0x26f6   :  { %4624 = vmatpush.msra.mxu0 %v4594_v52 }
0x26f7   :  { %v4461_v18 = vadd.f32 %v5491_v46, %v4454_v50  ;;  %v4522_v3 = vadd.f32 %v5493_v47, %v4515_v59 }
0x26f8   :  { %4625 = vmatpush.msra.mxu0 %v4593_v11 }
0x26f9   :  { %5279 = vmatmul.msk.f32.gmra.mxu2 %vm986_vm9, %v4461_v18  ;;  %5282 = vmatmul.msk.f32.gmra.mxu3 %vm986_vm9, %v4522_v3  ;;  %vm7846_vm9 = vcmask 385024  }
0x26fa   :  { %4626 = vmatpush.msra.mxu0 %v4592_v13 }
0x26fc   :  { %4627 = vmatpush.msra.mxu0 %v4591_v62 }
0x276c   :  { %v4491_v15 = vpop.f32.mrf.mxu2  ;;  %v4552_v16 = vpop.f32.mrf.mxu3 }
0x276d   :  { %v4503_v61 = vadd.f32 %v5494_v14, %v4491_v15 }
0x276f   :  { %v4561_v4 = vadd.f32 %v4552_v16, %v4503_v61  ;;  %v5320_v16 = vld [vmem:[#allocation43 + $0x40] sm:$0xf]  ;;  %v5376_v61 = vld [vmem:[#allocation43 + $0x4c] sm:$0xf0] }
0x2771   :  { %v4567_v19 = vmul.f32 0.044715, %v4561_v4  ;;  %v4564_v47 = vmul.f32 0.5, %v4561_v4 }
0x2773   :  { %v4570_v25 = vmul.f32 %v4567_v19, %v4561_v4  ;;  %v5321_v19 = vor.u32 %v5376_v61, %v5320_v16 }
0x2774   :  { %v4494_v20 = vpop.f32.mrf.mxu2  ;;  %v4555_v21 = vpop.f32.mrf.mxu3 }
0x2775   :  { %v4573_v22 = vmul.f32 %v4570_v25, %v4561_v4  ;;  %v4504_v23 = vadd.f32 %v5494_v14, %v4494_v20  ;;  %v5322_v25 = vld [vmem:[#allocation43 + $0x50] sm:$0xf0]  ;;  %v5328_v20 = vld [vmem:[#allocation43 + $0x48] sm:$0xf]  ;;  %4813 = vmatpush.bf16.msrb.mxu1 %v5321_v19  ;;  %v5497_v19 = vld [vmem:[#allocation42] ss:$0 sm:$0xff] }
0x2777   :  { %v4576_v24 = vadd.f32 %v4573_v22, %v4561_v4  ;;  %v4562_v30 = vadd.f32 %v4555_v21, %v4504_v23  ;;  %v5374_v4 = vld [vmem:[#allocation43 + $0x44] sm:$0xf]  ;;  %v5377_v21 = vld [vmem:[#allocation43 + $0x54] sm:$0xf0] }
0x2778   :  { %v5325_v22 = vor.u32 %v5374_v4, %v5322_v25  ;;  %v5329_v23 = vor.u32 %v5377_v21, %v5328_v20 }
0x2779   :  { %v4579_v31 = vmul.f32 0.7978845, %v4576_v24  ;;  %v4568_v32 = vmul.f32 0.044715, %v4562_v30  ;;  %v4565_v27 = vmul.f32 0.5, %v4562_v30 }
0x277a   :  { %v5375_v24 = vld [vmem:[#allocation43 + $0x4c] sm:$0xf]  ;;  %4831 = vmatpush.bf16.msrb.mxu2 %v5325_v22  ;;  %4849 = vmatpush.bf16.msrb.mxu3 %v5329_v23 }
0x277b   :  { %5706 = vtanh.f32 %v4579_v31  ;;  %v4571_v33 = vmul.f32 %v4568_v32, %v4562_v30  ;;  %v5304_v32 = vld [vmem:[#allocation43 + $0x20] sm:$0xf] }
0x277c   :  { %v4497_v35 = vpop.f32.mrf.mxu2  ;;  %v4558_v1 = vpop.f32.mrf.mxu3 }
0x277d   :  { %v4574_v36 = vmul.f32 %v4571_v33, %v4562_v30  ;;  %v4505_v40 = vadd.f32 %v5494_v14, %v4497_v35  ;;  %v5372_v33 = vld [vmem:[#allocation43 + $0x2c] sm:$0xf0]  ;;  %v5370_v35 = vld [vmem:[#allocation43 + $0x24] sm:$0xf] }
0x277f   :  { %v4563_v42 = vadd.f32 %v4558_v1, %v4505_v40  ;;  %v4577_v39 = vadd.f32 %v4574_v36, %v4562_v30  ;;  %v5330_v30 = vld [vmem:[#allocation43 + $0x58] sm:$0xf0]  ;;  %v5305_v40 = vor.u32 %v5372_v33, %v5304_v32  ;;  %v5306_v1 = vld [vmem:[#allocation43 + $0x30] sm:$0xf0] }
0x2780   :  { %v5333_v31 = vor.u32 %v5375_v24, %v5330_v30 }
0x2781   :  { %v5707_v44 = vpop.eup %5706  ;;  %v4569_v45 = vmul.f32 0.044715, %v4563_v42  ;;  %v4580_v46 = vmul.f32 0.7978845, %v4577_v39  ;;  %v4566_v26 = vmul.f32 0.5, %v4563_v42  ;;  %4814 = vmatpush.bf16.msrb.mxu1 %v5305_v40 }
0x2782   :  { %v4585_v53 = vadd.f32 1.0, %v5707_v44  ;;  %4867 = vmatpush.bf16.msrb.mxu0 %v5333_v31  ;;  %v5373_v39 = vld [vmem:[#allocation43 + $0x34] sm:$0xf0]  ;;  %v4732_v40 = vld [vmem:[#allocation45] sm:$0xf] }
0x2783   :  { %v4572_v54 = vmul.f32 %v4569_v45, %v4563_v42  ;;  %5708 = vtanh.f32 %v4580_v46  ;;  %v5309_v45 = vor.u32 %v5370_v35, %v5306_v1  ;;  %v4734_v1 = vperm.slane %v4732_v40, 0 }
0x2784   :  { %v4588_v56 = vmul.f32 %v4585_v53, %v4564_v47  ;;  %v5371_v47 = vld [vmem:[#allocation43 + $0x2c] sm:$0xf]  ;;  %v5314_v53 = vld [vmem:[#allocation43 + $0x38] sm:$0xf0] }
0x2785   :  { %v4575_v57 = vmul.f32 %v4572_v54, %v4563_v42  ;;  %v5317_v54 = vor.u32 %v5371_v47, %v5314_v53  ;;  %4832 = vmatpush.bf16.msrb.mxu2 %v5309_v45  ;;  %v4736_v47 = vperm.slane %v4732_v40, 2 }
0x2786   :  { %5283 = vmatmul.msk.f32.vlgmr.msra.gmra.mxu0 %vm1571_vm3, %v4588_v56 }
0x2787   :  { %v4578_v55 = vadd.f32 %v4575_v57, %v4563_v42  ;;  %v5312_v42 = vld [vmem:[#allocation43 + $0x28] sm:$0xf]  ;;  %v5288_v57 = vld [vmem:[#allocation43] sm:$0xf]  ;;  %4868 = vmatpush.bf16.msrb.mxu0 %v5317_v54 }
0x2788   :  { %v5313_v46 = vor.u32 %v5373_v39, %v5312_v42  ;;  %v4737_v42 = vperm.slane %v4732_v40, 3 }
0x2789   :  { %v5709_v34 = vpop.eup %5708  ;;  %v4581_v38 = vmul.f32 0.7978845, %v4578_v55  ;;  %v5368_v55 = vld [vmem:[#allocation43 + $0xc] sm:$0xf0] }
0x278a   :  { %v4586_v63 = vadd.f32 1.0, %v5709_v34  ;;  %4850 = vmatpush.bf16.msrb.mxu3 %v5313_v46  ;;  %v5289_v34 = vor.u32 %v5368_v55, %v5288_v57  ;;  %v4735_v46 = vperm.slane %v4732_v40, 1 }
0x278b   :  { %5710 = vtanh.f32 %v4581_v38  ;;  %v5366_v38 = vld [vmem:[#allocation43 + $0x4] sm:$0xf] }
0x278c   :  { %v4589_v0 = vmul.f32 %v4586_v63, %v4565_v27  ;;  %v5290_v27 = vld [vmem:[#allocation43 + $0x10] sm:$0xf0]  ;;  %v5296_v63 = vld [vmem:[#allocation43 + $0x8] sm:$0xf]  ;;  %4815 = vmatpush.bf16.msrb.mxu1 %v5289_v34 }
0x278e   :  { %5284 = vmatmul.msk.f32.gmra.mxu0 %vm1571_vm3, %v4589_v0  ;;  %v5293_v0 = vor.u32 %v5366_v38, %v5290_v27 }
0x2790   :  { %4833 = vmatpush.bf16.msrb.mxu2 %v5293_v0 }
0x2791   :  { %v5711_v58 = vpop.eup %5710 }
0x2792   :  { %v4587_v48 = vadd.f32 1.0, %v5711_v58  ;;  %v5369_v58 = vld [vmem:[#allocation43 + $0x14] sm:$0xf0] }
0x2794   :  { %v4590_v28 = vmul.f32 %v4587_v48, %v4566_v26  ;;  %v5367_v26 = vld [vmem:[#allocation43 + $0xc] sm:$0xf]  ;;  %v5298_v48 = vld [vmem:[#allocation43 + $0x18] sm:$0xf0] }
0x2796   :  { %5285 = vmatmul.msk.f32.gmra.mxu0 %vm1571_vm3, %v4590_v28  ;;  %vm7847_vm3 = vmmov %vm7846_vm9  ;;  %v5297_v28 = vor.u32 %v5369_v58, %v5296_v63 }
0x2798   :  { %4851 = vmatpush.bf16.msrb.mxu3 %v5297_v28 }
0x2803   :  { %v4629_v43 = vpop.f32.mrf.mxu0 }
0x2804   :  { %v4630_v41 = vadd.f32 %v5495_v60, %v4629_v43 }
0x2806   :  { %v4638_v5 = vsel %vm567_vm0, %v4630_v41, 0.0 }
0x2807   :  { %4639 = vadd.xlane.f32.xlu0 %v4638_v5 }
0x280b   :  { %v4632_v29 = vpop.f32.mrf.mxu0 }
0x280c   :  { %v4633_v6 = vadd.f32 %v5495_v60, %v4632_v29 }
0x280e   :  { %v4641_v49 = vsel %vm567_vm0, %v4633_v6, 0.0 }
0x280f   :  { %4642 = vadd.xlane.f32.xlu1 %v4641_v49 }
0x2813   :  { %v4635_v7 = vpop.f32.mrf.mxu0 }
0x2814   :  { %v4636_v17 = vadd.f32 %v5495_v60, %v4635_v7  ;;  %v5301_v60 = vor.u32 %v5367_v26, %v5298_v48 }
0x2816   :  { %v4644_v37 = vsel %vm7846_vm9, %v4636_v17, 0.0  ;;  %4869 = vmatpush.bf16.msrb.mxu0 %v5301_v60 }
0x2817   :  { %4645 = vadd.xlane.f32.xlu2 %v4644_v37 }
0x287a   :  { %v4640_v8 = vpop.xlane.xlu0 %4639 }
0x287b   :  { %v4647_v50 = vmul.f32 %v4640_v8, %v6836_v12 }
0x287d   :  { %v7747_v59 = vsub.f32 %v4630_v41, %v4647_v50 }
0x287f   :  { %v4653_v18 = vmul.f32 %v7747_v59, %v7747_v59 }
0x2881   :  { %v4656_v3 = vsel %vm567_vm0, %v4653_v18, 0.0 }
0x2882   :  { %4657 = vadd.xlane.f32.xlu0 %v4656_v3  ;;  %v4643_v51 = vpop.xlane.xlu1 %4642 }
0x2883   :  { %v4648_v9 = vmul.f32 %v4643_v51, %v6836_v12 }
0x2885   :  { %v7753_v10 = vsub.f32 %v4633_v6, %v4648_v9 }
0x2887   :  { %v4654_v2 = vmul.f32 %v7753_v10, %v7753_v10 }
0x2889   :  { %v4659_v52 = vsel %vm567_vm0, %v4654_v2, 0.0 }
0x288a   :  { %4660 = vadd.xlane.f32.xlu1 %v4659_v52  ;;  %v4646_v11 = vpop.xlane.xlu2 %4645 }
0x288b   :  { %v4649_v13 = vmul.f32 %v4646_v11, %v6836_v12 }
0x288d   :  { %v7759_v62 = vsub.f32 %v4636_v17, %v4649_v13 }
0x288f   :  { %v4655_v14 = vmul.f32 %v7759_v62, %v7759_v62 }
0x2891   :  { %v4662_v15 = vsel %vm7847_vm3, %v4655_v14, 0.0  ;;  %v5496_v14 = vld [vmem:[#allocation40] ss:$0 sm:$0xff] }
0x2892   :  { %4663 = vadd.xlane.f32.xlu2 %v4662_v15 }
0x28f5   :  { %v4658_v36 = vpop.xlane.xlu0 %4657 }
0x28f6   :  { %v4665_v44 = vmul.f32 %v4658_v36, %v6836_v12 }
0x28f8   :  { %v4668_v56 = vadd.f32 1e-05, %v4665_v44 }
0x28fa   :  { %5712 = vrsqrt.f32 %v4668_v56  ;;  %vm4677_vm1 = vweird.f32 %v4668_v56 }
0x28fd   :  { %v4661_v43 = vpop.xlane.xlu1 %4660 }
0x28fe   :  { %v4666_v41 = vmul.f32 %v4661_v43, %v6836_v12 }
0x2900   :  { %v5713_v5 = vpop.eup %5712  ;;  %v4669_v29 = vadd.f32 1e-05, %v4666_v41 }
0x2901   :  { %v4672_v6 = vmul.f32 %v5713_v5, %v4668_v56  ;;  %vm4678_vm6 = vweird.f32 %v5713_v5 }
0x2902   :  { %5714 = vrsqrt.f32 %v4669_v29  ;;  %vm4679_vm7 = vmor %vm4677_vm1, %vm4678_vm6  ;;  %vm4687_vm12 = vweird.f32 %v4669_v29 }
0x2903   :  { %v4673_v49 = vmul.f32 %v5713_v5, %v4672_v6 }
0x2905   :  { %v4674_v7 = vmul.f32 0.5, %v4673_v49  ;;  %v4664_v17 = vpop.xlane.xlu2 %4663 }
0x2906   :  { %v4667_v37 = vmul.f32 %v4664_v17, %v6836_v12 }
0x2907   :  { %v4675_v8 = vsub.f32 1.5, %v4674_v7 }
0x2908   :  { %v5715_v50 = vpop.eup %5714  ;;  %v4670_v18 = vadd.f32 1e-05, %v4667_v37 }
0x2909   :  { %v4676_v3 = vmul.f32 %v5713_v5, %v4675_v8  ;;  %v4682_v51 = vmul.f32 %v5715_v50, %v4669_v29  ;;  %vm4688_vm13 = vweird.f32 %v5715_v50 }
0x290a   :  { %5716 = vrsqrt.f32 %v4670_v18  ;;  %vm4689_vm10 = vmor %vm4687_vm12, %vm4688_vm13  ;;  %vm4697_vm14 = vweird.f32 %v4670_v18 }
0x290b   :  { %v4683_v9 = vmul.f32 %v5715_v50, %v4682_v51  ;;  %v4680_v2 = vsel %vm4679_vm7, %v5713_v5, %v4676_v3 }
0x290c   :  { %v4701_v15 = vmul.f32 %v4680_v2, %v7747_v59 }
0x290d   :  { %v4684_v52 = vmul.f32 0.5, %v4683_v9 }
0x290e   :  { %v4708_v25 = vmul.f32 %v5496_v14, %v4701_v15 }
0x290f   :  { %v4685_v11 = vsub.f32 1.5, %v4684_v52 }
0x2910   :  { %v5717_v13 = vpop.eup %5716  ;;  %v4715_v24 = vadd.f32 %v5497_v19, %v4708_v25 }
0x2911   :  { %v4686_v16 = vmul.f32 %v5715_v50, %v4685_v11  ;;  %v4692_v12 = vmul.f32 %v5717_v13, %v4670_v18  ;;  %vm4698_vm11 = vweird.f32 %v5717_v13 }
0x2912   :  { %vm4699_vm4 = vmor %vm4697_vm14, %vm4698_vm11 }
0x2913   :  { %v4690_v61 = vsel %vm4689_vm10, %v5715_v50, %v4686_v16  ;;  %v4693_v4 = vmul.f32 %v5717_v13, %v4692_v12 }
0x2914   :  { %v4702_v20 = vmul.f32 %v4690_v61, %v7753_v10 }
0x2915   :  { %v4694_v21 = vmul.f32 0.5, %v4693_v4 }
0x2916   :  { %v4709_v22 = vmul.f32 %v5496_v14, %v4702_v20 }
0x2917   :  { %v4695_v23 = vsub.f32 1.5, %v4694_v21 }
0x2918   :  { %v4716_v30 = vadd.f32 %v5497_v19, %v4709_v22 }
0x2919   :  { %v4696_v31 = vmul.f32 %v5717_v13, %v4695_v23 }
0x291a   :  { %v4718_v32 = vpack.c.bf16 %v4716_v30, %v4715_v24 }
0x291b   :  { %v4700_v59 = vsel %vm4699_vm4, %v5717_v13, %v4696_v31 }
0x291c   :  { %5334 = vmatmul.msk.bf16.vlgmr.msrb.gmra.mxu1 %vm567_vm0, %v4718_v32  ;;  %5336 = vmatmul.msk.bf16.vlgmr.msrb.gmra.mxu2 %vm567_vm0, %v4718_v32  ;;  %v4703_v10 = vmul.f32 %v4700_v59, %v7759_v62 }
0x291d   :  { %5338 = vmatmul.msk.bf16.vlgmr.msrb.gmra.mxu3 %vm567_vm0, %v4718_v32  ;;  %5340 = vmatmul.msk.bf16.vlgmr.msrb.gmra.mxu0 %vm567_vm0, %v4718_v32 }
0x291e   :  { %v4710_v33 = vmul.f32 %v5496_v14, %v4703_v10 }
0x2920   :  { %v4717_v35 = vadd.f32 %v5497_v19, %v4710_v33 }
0x2922   :  { %v4719_v36 = vpack.c.bf16 %v4717_v35, %v4717_v35 }
0x292c   :  { %5335 = vmatmul.msk.bf16.gmra.mxu1 %vm567_vm0, %v4719_v36  ;;  %5337 = vmatmul.msk.bf16.gmra.mxu2 %vm567_vm0, %v4719_v36 }
0x292d   :  { %5339 = vmatmul.msk.bf16.gmra.mxu3 %vm567_vm0, %v4719_v36  ;;  %5341 = vmatmul.msk.bf16.gmra.mxu0 %vm567_vm0, %v4719_v36 }
0x2999   :  { %v4817_v39 = vpop.f32.mrf.mxu1 }
0x299a   :  { %v4818_v44 = vadd.f32 %v4817_v39, %v4734_v1  ;;  %v4871_v62 = vpop.f32.mrf.mxu0 }
0x299b   :  { %v4872_v45 = vadd.f32 %v4871_v62, %v4737_v42 }
0x299c   :  { %5342 = vst [vmem:[%s6702_s21 + $0x60] sm:$0xff] %v4818_v44 }
0x299d   :  { %5345 = vst [vmem:[%s6702_s21 + $0x78] sm:$0xff] %v4872_v45 }
0x299f   :  { %v4835_v53 = vpop.f32.mrf.mxu2 }
0x29a0   :  { %v4836_v54 = vadd.f32 %v4835_v53, %v4735_v46  ;;  %v4853_v56 = vpop.f32.mrf.mxu3 }
0x29a1   :  { %v4854_v57 = vadd.f32 %v4853_v56, %v4736_v47  ;;  %v4819_v55 = vpop.f32.mrf.mxu1 }
0x29a2   :  { %5343 = vst [vmem:[%s6702_s21 + $0x68] sm:$0xff] %v4836_v54  ;;  %v4820_v34 = vadd.f32 %v4819_v55, %v4734_v1  ;;  %v4873_v38 = vpop.f32.mrf.mxu0 }
0x29a3   :  { %5344 = vst [vmem:[%s6702_s21 + $0x70] sm:$0xff] %v4854_v57  ;;  %v4874_v27 = vadd.f32 %v4873_v38, %v4737_v42 }
0x29a4   :  { %5346 = vst [vmem:[%s6702_s21 + $0x80] sm:$0xff] %v4820_v34 }
0x29a5   :  { %5349 = vst [vmem:[%s6702_s21 + $0x98] sm:$0xff] %v4874_v27 }
0x29a7   :  { %v4837_v63 = vpop.f32.mrf.mxu2 }
0x29a8   :  { %v4838_v0 = vadd.f32 %v4837_v63, %v4735_v46  ;;  %v4855_v58 = vpop.f32.mrf.mxu3 }
0x29a9   :  { %v4856_v26 = vadd.f32 %v4855_v58, %v4736_v47  ;;  %v4822_v48 = vpop.f32.mrf.mxu1 }
0x29aa   :  { %5347 = vst [vmem:[%s6702_s21 + $0x88] sm:$0xff] %v4838_v0  ;;  %v4823_v28 = vadd.f32 %v4822_v48, %v4734_v1  ;;  %v4876_v60 = vpop.f32.mrf.mxu0 }
0x29ab   :  { %5348 = vst [vmem:[%s6702_s21 + $0x90] sm:$0xff] %v4856_v26  ;;  %v4877_v43 = vadd.f32 %v4876_v60, %v4737_v42 }
0x29ac   :  { %5350 = vst [vmem:[%s6702_s21 + $0xa0] sm:$0x1] %v4823_v28 }
0x29ad   :  { %5353 = vst [vmem:[%s6702_s21 + $0xb8] sm:$0x1] %v4877_v43 }
0x29af   :  { %v4840_v41 = vpop.f32.mrf.mxu2 }
0x29b0   :  { %v4841_v5 = vadd.f32 %v4840_v41, %v4735_v46  ;;  %v4858_v29 = vpop.f32.mrf.mxu3 }
0x29b1   :  { %v4859_v6 = vadd.f32 %v4858_v29, %v4736_v47  ;;  %v4824_v49 = vpop.f32.mrf.mxu1 }
0x29b2   :  { %5351 = vst [vmem:[%s6702_s21 + $0xa8] sm:$0x1] %v4841_v5  ;;  %v4878_v7 = vpop.f32.mrf.mxu0 }
0x29b3   :  { %5352 = vst [vmem:[%s6702_s21 + $0xb0] sm:$0x1] %v4859_v6 }
0x29b7   :  { %v4842_v17 = vpop.f32.mrf.mxu2 }
0x29b8   :  { %v4860_v37 = vpop.f32.mrf.mxu3 }
0x29b9   :  { %4897 = vsyncpa [#allocation3], 1 }
0x29ba   :  { %4898 = vsyncpa [#allocation5], 1 }
0x29bb   :  { %4899 = vsyncpa [#allocation8], 1 }
0x29bc   :  { %4900 = vsyncpa [#allocation11], 1 }
0x29bd   :  { %4901 = vsyncpa [#allocation14], 1 }
0x29be   :  { %4902 = vsyncpa [#allocation17], 1 }
0x29bf   :  { %4903 = vsyncpa [#allocation20], 1 }
0x29c0   :  { %4904 = vsyncpa [#allocation23], 1 }
0x29c1   :  { %4905 = vsyncpa [#allocation26], 1 }
0x29c2   :  { %4906 = vsyncpa [#allocation29], 1 }
0x29c3   :  { %4907 = vsyncpa [#allocation32], 1 }
0x29c4   :  { %4908 = vsyncpa [#allocation35], 1 }
0x29c5   :  { %4909 = vsyncpa [#allocation38], 1 }
0x29c6   :  { %4910 = vsyncpa [#allocation41], 1 }
0x29c7   :  { %4911 = vsyncpa [#allocation44], 1 }

</bundles_post_ra>
